<compile_context>
chip_gen: v7x
topology: tpu7x:2x2x1
jax: 0.10.0
libtpu: 0.0.40
codegen_flags: <defaults>
</compile_context>

<pallas_src>
import numpy as np
import jax
import jax.numpy as jnp
from jax import lax
from jax.experimental import pallas as pl
from jax.experimental.pallas import tpu as pltpu

C1_OUT = 32     # conv1 output channels
C2_OUT = 64     # conv2 output channels
FC1_OUT = 128   # fc1 width
NCLASS = 10     # fc2 width (true)
LANE = 128      # fc2 width padded for a lane-dense store


# ------------------------------ fused kernel -------------------------------

def _make_fused_kernel(resolution):
    R = resolution
    P1 = R // 2          # spatial after pool1
    P2 = R // 4          # spatial after pool2
    PH = (R + 2) // 2    # extent of one parity phase of the padded input

    def kernel(xph_ref, w1_ref, b1_ref, w2_ref, b2_ref,
               wfc1_ref, bfc1_ref, wfc2_ref, bfc2_ref,
               o_ref, h1p_ref):
        f32 = jnp.float32

        # -------- conv1 (shifted VPU FMAs) + 2x2 max-pool -----------------
        # xph_ref: [4, PH, PH, 2]; phase f = 2*(h%2)+(w%2) of the padded input.
        # w1_ref : [18, 32], rows ordered (ky, kx, cin).
        w1 = w1_ref[...]
        a1 = None                                   # running max over pool positions
        for a in range(2):
            for b in range(2):
                acc = jnp.zeros((P1 * P1, C1_OUT), f32)
                for ky in range(3):
                    for kx in range(3):
                        fh, oh = (a + ky) % 2, (a + ky) // 2
                        fw, ow = (b + kx) % 2, (b + kx) // 2
                        slab = xph_ref[2 * fh + fw,
                                       pl.ds(oh, P1), pl.ds(ow, P1), :]  # [P1,P1,2]
                        slab = slab.reshape(P1 * P1, 2)                  # layout no-op
                        t = (ky * 3 + kx) * 2
                        acc = (acc
                               + slab[:, 0:1] * w1[t:t + 1, :]
                               + slab[:, 1:2] * w1[t + 1:t + 2, :])
                a1 = acc if a1 is None else jnp.maximum(a1, acc)
        a1 = jnp.maximum(a1 + b1_ref[...], 0.0)      # bias + ReLU after max, [P1*P1,32]

        # -------- pad conv1 activation into VMEM scratch (padding=1) ------
        h1p_ref[...] = jnp.zeros_like(h1p_ref)
        h1p_ref[pl.ds(1, P1), pl.ds(1, P1), :] = a1.reshape(P1, P1, C1_OUT)

        # -------- conv2 on the MXU: K-split accumulation over the 9 taps --
        acc2 = jnp.zeros((P1 * P1, C2_OUT), f32)
        for ky in range(3):
            for kx in range(3):
                slab = h1p_ref[pl.ds(ky, P1), pl.ds(kx, P1), :]   # [P1,P1,32]
                slab = slab.reshape(P1 * P1, C1_OUT)              # layout no-op
                acc2 = acc2 + jnp.dot(slab, w2_ref[ky * 3 + kx],
                                      preferred_element_type=f32)

        # -------- 2x2 max-pool2 + NHWC flatten + fc1 + ReLU + fc2 ---------
        y = acc2.reshape(P2, 2, P1, C2_OUT)          # rows (h,w) -> (m, h-parity, w)
        yh = jnp.max(y, axis=1)                      # [P2, P1, 64]
        b2v = b2_ref[...]                            # [1, 64]

        h1 = bfc1_ref[...]                           # [1, 128]  (start from fc1 bias)
        for n in range(P2):
            cell_col = jnp.maximum(yh[:, 2 * n:2 * n + 1, :],
                                   yh[:, 2 * n + 1:2 * n + 2, :])  # [P2,1,64]
            cell_col = jnp.maximum(cell_col + b2v, 0.0)            # conv2 bias + ReLU
            for m in range(P2):
                cell = cell_col[m:m + 1, :, :].reshape(1, C2_OUT)  # [1,64]
                h1 = h1 + jnp.dot(cell, wfc1_ref[m * P2 + n],
                                  preferred_element_type=f32)
        h1 = jnp.maximum(h1, 0.0)
        out = jnp.dot(h1, wfc2_ref[...], preferred_element_type=f32) + bfc2_ref[...]
        o_ref[...] = out.reshape(1, 1, LANE).astype(o_ref.dtype)

    return kernel


# ------------------------------ host wrappers -------------------------------

def prepare_params(params, resolution=16):
    """One-time re-layout of the torch-style parameters for the fused kernel."""
    w1, b1, w2, b2, wfc1, bfc1, wfc2, bfc2 = params
    P2 = resolution // 4
    w1r = w1.reshape(18, C1_OUT)                      # rows ordered (ky, kx, cin)
    b1r = b1.reshape(1, C1_OUT)
    w2r = w2.reshape(9, C1_OUT, C2_OUT)               # [tap, cin, cout]
    b2r = b2.reshape(1, C2_OUT)
    # fc1 consumes cells in NHWC order -> pre-permute (folds the NCHW flatten).
    wfc1b = (wfc1.reshape(FC1_OUT, C2_OUT, P2, P2)
                 .transpose(2, 3, 1, 0)
                 .reshape(P2 * P2, C2_OUT, FC1_OUT))  # [(m,n), cin, fc1]
    bfc1r = bfc1.reshape(1, FC1_OUT)
    wfc2p = jnp.zeros((FC1_OUT, LANE), jnp.float32).at[:, :NCLASS].set(wfc2.T)
    bfc2p = jnp.zeros((1, LANE), jnp.float32).at[:, :NCLASS].set(
        bfc2.reshape(1, NCLASS))
    return (w1r, b1r, w2r, b2r, wfc1b, bfc1r, wfc2p, bfc2p)


def sparse_cnn_forward(x_nchw, prepared, resolution=16):
    """Fused Pallas implementation of SparseCNN.forward.  x_nchw: [N,2,R,R] f32."""
    w1r, b1r, w2r, b2r, wfc1b, bfc1r, wfc2p, bfc2p = prepared
    n = x_nchw.shape[0]
    R = resolution
    P1, P2, PH = R // 2, R // 4, (R + 2) // 2

    # Host layout glue only (no data expansion): NCHW->NHWC, zero-pad (pad=1),
    # split into the 4 (h%2, w%2) parity phases so every in-kernel conv tap is
    # a contiguous static slice.
    x = jnp.transpose(x_nchw, (0, 2, 3, 1))
    xpad = jnp.pad(x, ((0, 0), (1, 1), (1, 1), (0, 0)))
    xph = jnp.stack([xpad[:, a::2, b::2, :] for a in range(2) for b in range(2)],
                    axis=1)                                     # [N,4,PH,PH,2]
    xph = xph.reshape(n * 4, PH, PH, 2)

    kernel = _make_fused_kernel(R)
    flops = n * (R * R * C1_OUT * 18 * 2
                 + P1 * P1 * C2_OUT * 9 * C1_OUT * 2
                 + P2 * P2 * C2_OUT * FC1_OUT * 2
                 + FC1_OUT * LANE * 2)
    bytes_accessed = ((w1r.size + w2r.size + wfc1b.size + wfc2p.size) * 4
                      + n * (4 * PH * PH * 2 + LANE) * 4)

    out = pl.pallas_call(
        kernel,
        out_shape=jax.ShapeDtypeStruct((n, 1, LANE), jnp.float32),
        grid=(n,),
        in_specs=[
            pl.BlockSpec((4, PH, PH, 2), lambda i: (i, 0, 0, 0)),       # per-sample phases
            pl.BlockSpec((18, C1_OUT), lambda i: (0, 0)),               # conv1 w (resident)
            pl.BlockSpec((1, C1_OUT), lambda i: (0, 0)),                # conv1 b
            pl.BlockSpec((9, C1_OUT, C2_OUT), lambda i: (0, 0, 0)),     # conv2 w
            pl.BlockSpec((1, C2_OUT), lambda i: (0, 0)),                # conv2 b
            pl.BlockSpec((P2 * P2, C2_OUT, FC1_OUT), lambda i: (0, 0, 0)),  # fc1 w blocks
            pl.BlockSpec((1, FC1_OUT), lambda i: (0, 0)),               # fc1 b
            pl.BlockSpec((FC1_OUT, LANE), lambda i: (0, 0)),            # fc2 w (padded)
            pl.BlockSpec((1, LANE), lambda i: (0, 0)),                  # fc2 b (padded)
        ],
        out_specs=pl.BlockSpec((1, 1, LANE), lambda i: (i, 0, 0)),
        scratch_shapes=[pltpu.VMEM((P1 + 2, P1 + 2, C1_OUT), jnp.float32)],
        compiler_params=pltpu.CompilerParams(
            dimension_semantics=("parallel",),
            vmem_limit_bytes=32 * 1024 * 1024),
        cost_estimate=pl.CostEstimate(flops=flops, transcendentals=0,
                                      bytes_accessed=bytes_accessed),
    )(xph, w1r, b1r, w2r, b2r, wfc1b, bfc1r, wfc2p, bfc2p)

    return out.reshape(n, LANE)[:, :NCLASS]


# ------------------------------ params & ref --------------------------------

def init_params(key, resolution=16):
    ks = jax.random.split(key, 8)
    f = lambda k, shape, s: (s * jax.random.normal(k, shape)).astype(jnp.float32)
    w1 = f(ks[0], (3, 3, 2, 32), 0.10)     # conv1 weight, HWIO
    b1 = f(ks[1], (32,), 0.10)
    w2 = f(ks[2], (3, 3, 32, 64), 0.05)    # conv2 weight, HWIO
    b2 = f(ks[3], (64,), 0.05)
    flat = 64 * (resolution // 4) ** 2     # 1024 for resolution=16
    wfc1 = f(ks[4], (128, flat), 0.02)     # torch Linear layout [out, in]
    bfc1 = f(ks[5], (128,), 0.02)
    wfc2 = f(ks[6], (10, 128), 0.05)
    bfc2 = f(ks[7], (10,), 0.05)
    return (w1, b1, w2, b2, wfc1, bfc1, wfc2, bfc2)


def reference_forward(x_nchw, params):
    """Pure-JAX reference mirroring the PyTorch module."""
    w1, b1, w2, b2, wfc1, bfc1, wfc2, bfc2 = params
    n = x_nchw.shape[0]
    dn = ('NHWC', 'HWIO', 'NHWC')
    y = jnp.transpose(x_nchw, (0, 2, 3, 1))
    y = lax.conv_general_dilated(y, w1, (1, 1), 'SAME', dimension_numbers=dn) + b1
    y = jnp.maximum(y, 0.0)
    y = lax.reduce_window(y, -jnp.inf, lax.max, (1, 2, 2, 1), (1, 2, 2, 1), 'VALID')
    y = lax.conv_general_dilated(y, w2, (1, 1), 'SAME', dimension_numbers=dn) + b2
    y = jnp.maximum(y, 0.0)
    y = lax.reduce_window(y, -jnp.inf, lax.max, (1, 2, 2, 1), (1, 2, 2, 1), 'VALID')
    y = jnp.transpose(y, (0, 3, 1, 2)).reshape(n, -1)
    y = jnp.maximum(y @ wfc1.T + bfc1, 0.0)
    return y @ wfc2.T + bfc2


# ----------------------------------- main -----------------------------------

if __name__ == "__main__":
    key = jax.random.PRNGKey(0)
    k_mask, k_val, k_param = jax.random.split(key, 3)

    batch, resolution = 2, 16
    # Channel 0: binary reveal mask; channel 1: revealed pixel values.
    mask = jax.random.bernoulli(
        k_mask, 0.3, (batch, 1, resolution, resolution)).astype(jnp.float32)
    vals = jax.random.uniform(
        k_val, (batch, 1, resolution, resolution), dtype=jnp.float32)
    x = jnp.concatenate([mask, mask * vals], axis=1)            # [2, 2, 16, 16]

    params = init_params(k_param, resolution)
    prepared = prepare_params(params, resolution)

    out = jax.block_until_ready(sparse_cnn_forward(x, prepared, resolution))  # [2, 10]
    ref = jax.block_until_ready(reference_forward(x, params))

    assert out.shape == (batch, 10) and out.dtype == jnp.float32
    np.testing.assert_allclose(np.asarray(out), np.asarray(ref), rtol=1e-4, atol=1e-4)
    print("KERNEL_OK")
</pallas_src>

<mosaic_0001>
module attributes {stable_mosaic.version = 11 : i64} {
  func.func @kernel(%arg0: i32, %arg1: memref<4x9x9x2xf32, #tpu.memory_space<vmem>>, %arg2: memref<18x32xf32, #tpu.memory_space<vmem>>, %arg3: memref<1x32xf32, #tpu.memory_space<vmem>>, %arg4: memref<9x32x64xf32, #tpu.memory_space<vmem>>, %arg5: memref<1x64xf32, #tpu.memory_space<vmem>>, %arg6: memref<16x64x128xf32, #tpu.memory_space<vmem>>, %arg7: memref<1x128xf32, #tpu.memory_space<vmem>>, %arg8: memref<128x128xf32, #tpu.memory_space<vmem>>, %arg9: memref<1x128xf32, #tpu.memory_space<vmem>>, %arg10: memref<1x1x128xf32, #tpu.memory_space<vmem>>, %arg11: memref<10x10x32xf32, #tpu.memory_space<vmem>>) attributes {dimension_semantics = [#tpu.dimension_semantics<parallel>], iteration_bounds = array<i64: 2>, scalar_prefetch = 0 : i64, scratch_operands = 1 : i64, tpu.core_type = #tpu.core_type<tc>, window_params = [{transform_indices = @transform_0, window_bounds = array<i64: 4, 9, 9, 2>}, {pipeline_mode = #tpu.pipeline_mode<synchronous>, transform_indices = @transform_1, window_bounds = array<i64: 18, 32>}, {pipeline_mode = #tpu.pipeline_mode<synchronous>, transform_indices = @transform_2, window_bounds = array<i64: 1, 32>}, {pipeline_mode = #tpu.pipeline_mode<synchronous>, transform_indices = @transform_3, window_bounds = array<i64: 9, 32, 64>}, {pipeline_mode = #tpu.pipeline_mode<synchronous>, transform_indices = @transform_4, window_bounds = array<i64: 1, 64>}, {pipeline_mode = #tpu.pipeline_mode<synchronous>, transform_indices = @transform_5, window_bounds = array<i64: 16, 64, 128>}, {pipeline_mode = #tpu.pipeline_mode<synchronous>, transform_indices = @transform_6, window_bounds = array<i64: 1, 128>}, {pipeline_mode = #tpu.pipeline_mode<synchronous>, transform_indices = @transform_7, window_bounds = array<i64: 128, 128>}, {pipeline_mode = #tpu.pipeline_mode<synchronous>, transform_indices = @transform_8, window_bounds = array<i64: 1, 128>}, {transform_indices = @transform_9, window_bounds = array<i64: 1, 1, 128>}]} {
    %c0 = arith.constant 0 : index
    %c0_0 = arith.constant 0 : index
    %0 = vector.load %arg2[%c0, %c0_0] : memref<18x32xf32, #tpu.memory_space<vmem>>, vector<18x32xf32>
    %cst = arith.constant 0.000000e+00 : f32
    %1 = vector.broadcast %cst : f32 to vector<64x32xf32>
    %c0_1 = arith.constant 0 : index
    %c0_2 = arith.constant 0 : index
    %c0_3 = arith.constant 0 : index
    %c0_4 = arith.constant 0 : index
    %2 = vector.load %arg1[%c0_1, %c0_2, %c0_3, %c0_4] : memref<4x9x9x2xf32, #tpu.memory_space<vmem>>, vector<1x8x8x2xf32>
    %3 = vector.shape_cast %2 : vector<1x8x8x2xf32> to vector<8x8x2xf32>
    %4 = vector.shape_cast %3 : vector<8x8x2xf32> to vector<64x2xf32>
    %5 = vector.extract_strided_slice %4 {offsets = [0, 0], sizes = [64, 1], strides = [1, 1]} : vector<64x2xf32> to vector<64x1xf32>
    %6 = vector.extract_strided_slice %0 {offsets = [0, 0], sizes = [1, 32], strides = [1, 1]} : vector<18x32xf32> to vector<1x32xf32>
    %7 = vector.broadcast %5 : vector<64x1xf32> to vector<64x32xf32>
    %8 = vector.broadcast %6 : vector<1x32xf32> to vector<64x32xf32>
    %9 = arith.mulf %7, %8 : vector<64x32xf32>
    %10 = arith.addf %1, %9 : vector<64x32xf32>
    %11 = vector.extract_strided_slice %4 {offsets = [0, 1], sizes = [64, 1], strides = [1, 1]} : vector<64x2xf32> to vector<64x1xf32>
    %12 = vector.extract_strided_slice %0 {offsets = [1, 0], sizes = [1, 32], strides = [1, 1]} : vector<18x32xf32> to vector<1x32xf32>
    %13 = vector.broadcast %11 : vector<64x1xf32> to vector<64x32xf32>
    %14 = vector.broadcast %12 : vector<1x32xf32> to vector<64x32xf32>
    %15 = arith.mulf %13, %14 : vector<64x32xf32>
    %16 = arith.addf %10, %15 : vector<64x32xf32>
    %c1 = arith.constant 1 : index
    %c0_5 = arith.constant 0 : index
    %c0_6 = arith.constant 0 : index
    %c0_7 = arith.constant 0 : index
    %17 = vector.load %arg1[%c1, %c0_5, %c0_6, %c0_7] : memref<4x9x9x2xf32, #tpu.memory_space<vmem>>, vector<1x8x8x2xf32>
    %18 = vector.shape_cast %17 : vector<1x8x8x2xf32> to vector<8x8x2xf32>
    %19 = vector.shape_cast %18 : vector<8x8x2xf32> to vector<64x2xf32>
    %20 = vector.extract_strided_slice %19 {offsets = [0, 0], sizes = [64, 1], strides = [1, 1]} : vector<64x2xf32> to vector<64x1xf32>
    %21 = vector.extract_strided_slice %0 {offsets = [2, 0], sizes = [1, 32], strides = [1, 1]} : vector<18x32xf32> to vector<1x32xf32>
    %22 = vector.broadcast %20 : vector<64x1xf32> to vector<64x32xf32>
    %23 = vector.broadcast %21 : vector<1x32xf32> to vector<64x32xf32>
    %24 = arith.mulf %22, %23 : vector<64x32xf32>
    %25 = arith.addf %16, %24 : vector<64x32xf32>
    %26 = vector.extract_strided_slice %19 {offsets = [0, 1], sizes = [64, 1], strides = [1, 1]} : vector<64x2xf32> to vector<64x1xf32>
    %27 = vector.extract_strided_slice %0 {offsets = [3, 0], sizes = [1, 32], strides = [1, 1]} : vector<18x32xf32> to vector<1x32xf32>
    %28 = vector.broadcast %26 : vector<64x1xf32> to vector<64x32xf32>
    %29 = vector.broadcast %27 : vector<1x32xf32> to vector<64x32xf32>
    %30 = arith.mulf %28, %29 : vector<64x32xf32>
    %31 = arith.addf %25, %30 : vector<64x32xf32>
    %c0_8 = arith.constant 0 : index
    %c0_9 = arith.constant 0 : index
    %c1_10 = arith.constant 1 : index
    %c0_11 = arith.constant 0 : index
    %32 = vector.load %arg1[%c0_8, %c0_9, %c1_10, %c0_11] : memref<4x9x9x2xf32, #tpu.memory_space<vmem>>, vector<1x8x8x2xf32>
    %33 = vector.shape_cast %32 : vector<1x8x8x2xf32> to vector<8x8x2xf32>
    %34 = vector.shape_cast %33 : vector<8x8x2xf32> to vector<64x2xf32>
    %35 = vector.extract_strided_slice %34 {offsets = [0, 0], sizes = [64, 1], strides = [1, 1]} : vector<64x2xf32> to vector<64x1xf32>
    %36 = vector.extract_strided_slice %0 {offsets = [4, 0], sizes = [1, 32], strides = [1, 1]} : vector<18x32xf32> to vector<1x32xf32>
    %37 = vector.broadcast %35 : vector<64x1xf32> to vector<64x32xf32>
    %38 = vector.broadcast %36 : vector<1x32xf32> to vector<64x32xf32>
    %39 = arith.mulf %37, %38 : vector<64x32xf32>
    %40 = arith.addf %31, %39 : vector<64x32xf32>
    %41 = vector.extract_strided_slice %34 {offsets = [0, 1], sizes = [64, 1], strides = [1, 1]} : vector<64x2xf32> to vector<64x1xf32>
    %42 = vector.extract_strided_slice %0 {offsets = [5, 0], sizes = [1, 32], strides = [1, 1]} : vector<18x32xf32> to vector<1x32xf32>
    %43 = vector.broadcast %41 : vector<64x1xf32> to vector<64x32xf32>
    %44 = vector.broadcast %42 : vector<1x32xf32> to vector<64x32xf32>
    %45 = arith.mulf %43, %44 : vector<64x32xf32>
    %46 = arith.addf %40, %45 : vector<64x32xf32>
    %c2 = arith.constant 2 : index
    %c0_12 = arith.constant 0 : index
    %c0_13 = arith.constant 0 : index
    %c0_14 = arith.constant 0 : index
    %47 = vector.load %arg1[%c2, %c0_12, %c0_13, %c0_14] : memref<4x9x9x2xf32, #tpu.memory_space<vmem>>, vector<1x8x8x2xf32>
    %48 = vector.shape_cast %47 : vector<1x8x8x2xf32> to vector<8x8x2xf32>
    %49 = vector.shape_cast %48 : vector<8x8x2xf32> to vector<64x2xf32>
    %50 = vector.extract_strided_slice %49 {offsets = [0, 0], sizes = [64, 1], strides = [1, 1]} : vector<64x2xf32> to vector<64x1xf32>
    %51 = vector.extract_strided_slice %0 {offsets = [6, 0], sizes = [1, 32], strides = [1, 1]} : vector<18x32xf32> to vector<1x32xf32>
    %52 = vector.broadcast %50 : vector<64x1xf32> to vector<64x32xf32>
    %53 = vector.broadcast %51 : vector<1x32xf32> to vector<64x32xf32>
    %54 = arith.mulf %52, %53 : vector<64x32xf32>
    %55 = arith.addf %46, %54 : vector<64x32xf32>
    %56 = vector.extract_strided_slice %49 {offsets = [0, 1], sizes = [64, 1], strides = [1, 1]} : vector<64x2xf32> to vector<64x1xf32>
    %57 = vector.extract_strided_slice %0 {offsets = [7, 0], sizes = [1, 32], strides = [1, 1]} : vector<18x32xf32> to vector<1x32xf32>
    %58 = vector.broadcast %56 : vector<64x1xf32> to vector<64x32xf32>
    %59 = vector.broadcast %57 : vector<1x32xf32> to vector<64x32xf32>
    %60 = arith.mulf %58, %59 : vector<64x32xf32>
    %61 = arith.addf %55, %60 : vector<64x32xf32>
    %c3 = arith.constant 3 : index
    %c0_15 = arith.constant 0 : index
    %c0_16 = arith.constant 0 : index
    %c0_17 = arith.constant 0 : index
    %62 = vector.load %arg1[%c3, %c0_15, %c0_16, %c0_17] : memref<4x9x9x2xf32, #tpu.memory_space<vmem>>, vector<1x8x8x2xf32>
    %63 = vector.shape_cast %62 : vector<1x8x8x2xf32> to vector<8x8x2xf32>
    %64 = vector.shape_cast %63 : vector<8x8x2xf32> to vector<64x2xf32>
    %65 = vector.extract_strided_slice %64 {offsets = [0, 0], sizes = [64, 1], strides = [1, 1]} : vector<64x2xf32> to vector<64x1xf32>
    %66 = vector.extract_strided_slice %0 {offsets = [8, 0], sizes = [1, 32], strides = [1, 1]} : vector<18x32xf32> to vector<1x32xf32>
    %67 = vector.broadcast %65 : vector<64x1xf32> to vector<64x32xf32>
    %68 = vector.broadcast %66 : vector<1x32xf32> to vector<64x32xf32>
    %69 = arith.mulf %67, %68 : vector<64x32xf32>
    %70 = arith.addf %61, %69 : vector<64x32xf32>
    %71 = vector.extract_strided_slice %64 {offsets = [0, 1], sizes = [64, 1], strides = [1, 1]} : vector<64x2xf32> to vector<64x1xf32>
    %72 = vector.extract_strided_slice %0 {offsets = [9, 0], sizes = [1, 32], strides = [1, 1]} : vector<18x32xf32> to vector<1x32xf32>
    %73 = vector.broadcast %71 : vector<64x1xf32> to vector<64x32xf32>
    %74 = vector.broadcast %72 : vector<1x32xf32> to vector<64x32xf32>
    %75 = arith.mulf %73, %74 : vector<64x32xf32>
    %76 = arith.addf %70, %75 : vector<64x32xf32>
    %c2_18 = arith.constant 2 : index
    %c0_19 = arith.constant 0 : index
    %c1_20 = arith.constant 1 : index
    %c0_21 = arith.constant 0 : index
    %77 = vector.load %arg1[%c2_18, %c0_19, %c1_20, %c0_21] : memref<4x9x9x2xf32, #tpu.memory_space<vmem>>, vector<1x8x8x2xf32>
    %78 = vector.shape_cast %77 : vector<1x8x8x2xf32> to vector<8x8x2xf32>
    %79 = vector.shape_cast %78 : vector<8x8x2xf32> to vector<64x2xf32>
    %80 = vector.extract_strided_slice %79 {offsets = [0, 0], sizes = [64, 1], strides = [1, 1]} : vector<64x2xf32> to vector<64x1xf32>
    %81 = vector.extract_strided_slice %0 {offsets = [10, 0], sizes = [1, 32], strides = [1, 1]} : vector<18x32xf32> to vector<1x32xf32>
    %82 = vector.broadcast %80 : vector<64x1xf32> to vector<64x32xf32>
    %83 = vector.broadcast %81 : vector<1x32xf32> to vector<64x32xf32>
    %84 = arith.mulf %82, %83 : vector<64x32xf32>
    %85 = arith.addf %76, %84 : vector<64x32xf32>
    %86 = vector.extract_strided_slice %79 {offsets = [0, 1], sizes = [64, 1], strides = [1, 1]} : vector<64x2xf32> to vector<64x1xf32>
    %87 = vector.extract_strided_slice %0 {offsets = [11, 0], sizes = [1, 32], strides = [1, 1]} : vector<18x32xf32> to vector<1x32xf32>
    %88 = vector.broadcast %86 : vector<64x1xf32> to vector<64x32xf32>
    %89 = vector.broadcast %87 : vector<1x32xf32> to vector<64x32xf32>
    %90 = arith.mulf %88, %89 : vector<64x32xf32>
    %91 = arith.addf %85, %90 : vector<64x32xf32>
    %c0_22 = arith.constant 0 : index
    %c1_23 = arith.constant 1 : index
    %c0_24 = arith.constant 0 : index
    %c0_25 = arith.constant 0 : index
    %92 = vector.load %arg1[%c0_22, %c1_23, %c0_24, %c0_25] : memref<4x9x9x2xf32, #tpu.memory_space<vmem>>, vector<1x8x8x2xf32>
    %93 = vector.shape_cast %92 : vector<1x8x8x2xf32> to vector<8x8x2xf32>
    %94 = vector.shape_cast %93 : vector<8x8x2xf32> to vector<64x2xf32>
    %95 = vector.extract_strided_slice %94 {offsets = [0, 0], sizes = [64, 1], strides = [1, 1]} : vector<64x2xf32> to vector<64x1xf32>
    %96 = vector.extract_strided_slice %0 {offsets = [12, 0], sizes = [1, 32], strides = [1, 1]} : vector<18x32xf32> to vector<1x32xf32>
    %97 = vector.broadcast %95 : vector<64x1xf32> to vector<64x32xf32>
    %98 = vector.broadcast %96 : vector<1x32xf32> to vector<64x32xf32>
    %99 = arith.mulf %97, %98 : vector<64x32xf32>
    %100 = arith.addf %91, %99 : vector<64x32xf32>
    %101 = vector.extract_strided_slice %94 {offsets = [0, 1], sizes = [64, 1], strides = [1, 1]} : vector<64x2xf32> to vector<64x1xf32>
    %102 = vector.extract_strided_slice %0 {offsets = [13, 0], sizes = [1, 32], strides = [1, 1]} : vector<18x32xf32> to vector<1x32xf32>
    %103 = vector.broadcast %101 : vector<64x1xf32> to vector<64x32xf32>
    %104 = vector.broadcast %102 : vector<1x32xf32> to vector<64x32xf32>
    %105 = arith.mulf %103, %104 : vector<64x32xf32>
    %106 = arith.addf %100, %105 : vector<64x32xf32>
    %c1_26 = arith.constant 1 : index
    %c1_27 = arith.constant 1 : index
    %c0_28 = arith.constant 0 : index
    %c0_29 = arith.constant 0 : index
    %107 = vector.load %arg1[%c1_26, %c1_27, %c0_28, %c0_29] : memref<4x9x9x2xf32, #tpu.memory_space<vmem>>, vector<1x8x8x2xf32>
    %108 = vector.shape_cast %107 : vector<1x8x8x2xf32> to vector<8x8x2xf32>
    %109 = vector.shape_cast %108 : vector<8x8x2xf32> to vector<64x2xf32>
    %110 = vector.extract_strided_slice %109 {offsets = [0, 0], sizes = [64, 1], strides = [1, 1]} : vector<64x2xf32> to vector<64x1xf32>
    %111 = vector.extract_strided_slice %0 {offsets = [14, 0], sizes = [1, 32], strides = [1, 1]} : vector<18x32xf32> to vector<1x32xf32>
    %112 = vector.broadcast %110 : vector<64x1xf32> to vector<64x32xf32>
    %113 = vector.broadcast %111 : vector<1x32xf32> to vector<64x32xf32>
    %114 = arith.mulf %112, %113 : vector<64x32xf32>
    %115 = arith.addf %106, %114 : vector<64x32xf32>
    %116 = vector.extract_strided_slice %109 {offsets = [0, 1], sizes = [64, 1], strides = [1, 1]} : vector<64x2xf32> to vector<64x1xf32>
    %117 = vector.extract_strided_slice %0 {offsets = [15, 0], sizes = [1, 32], strides = [1, 1]} : vector<18x32xf32> to vector<1x32xf32>
    %118 = vector.broadcast %116 : vector<64x1xf32> to vector<64x32xf32>
    %119 = vector.broadcast %117 : vector<1x32xf32> to vector<64x32xf32>
    %120 = arith.mulf %118, %119 : vector<64x32xf32>
    %121 = arith.addf %115, %120 : vector<64x32xf32>
    %c0_30 = arith.constant 0 : index
    %c1_31 = arith.constant 1 : index
    %c1_32 = arith.constant 1 : index
    %c0_33 = arith.constant 0 : index
    %122 = vector.load %arg1[%c0_30, %c1_31, %c1_32, %c0_33] : memref<4x9x9x2xf32, #tpu.memory_space<vmem>>, vector<1x8x8x2xf32>
    %123 = vector.shape_cast %122 : vector<1x8x8x2xf32> to vector<8x8x2xf32>
    %124 = vector.shape_cast %123 : vector<8x8x2xf32> to vector<64x2xf32>
    %125 = vector.extract_strided_slice %124 {offsets = [0, 0], sizes = [64, 1], strides = [1, 1]} : vector<64x2xf32> to vector<64x1xf32>
    %126 = vector.extract_strided_slice %0 {offsets = [16, 0], sizes = [1, 32], strides = [1, 1]} : vector<18x32xf32> to vector<1x32xf32>
    %127 = vector.broadcast %125 : vector<64x1xf32> to vector<64x32xf32>
    %128 = vector.broadcast %126 : vector<1x32xf32> to vector<64x32xf32>
    %129 = arith.mulf %127, %128 : vector<64x32xf32>
    %130 = arith.addf %121, %129 : vector<64x32xf32>
    %131 = vector.extract_strided_slice %124 {offsets = [0, 1], sizes = [64, 1], strides = [1, 1]} : vector<64x2xf32> to vector<64x1xf32>
    %132 = vector.extract_strided_slice %0 {offsets = [17, 0], sizes = [1, 32], strides = [1, 1]} : vector<18x32xf32> to vector<1x32xf32>
    %133 = vector.broadcast %131 : vector<64x1xf32> to vector<64x32xf32>
    %134 = vector.broadcast %132 : vector<1x32xf32> to vector<64x32xf32>
    %135 = arith.mulf %133, %134 : vector<64x32xf32>
    %136 = arith.addf %130, %135 : vector<64x32xf32>
    %cst_34 = arith.constant 0.000000e+00 : f32
    %137 = vector.broadcast %cst_34 : f32 to vector<64x32xf32>
    %c1_35 = arith.constant 1 : index
    %c0_36 = arith.constant 0 : index
    %c0_37 = arith.constant 0 : index
    %c0_38 = arith.constant 0 : index
    %138 = vector.load %arg1[%c1_35, %c0_36, %c0_37, %c0_38] : memref<4x9x9x2xf32, #tpu.memory_space<vmem>>, vector<1x8x8x2xf32>
    %139 = vector.shape_cast %138 : vector<1x8x8x2xf32> to vector<8x8x2xf32>
    %140 = vector.shape_cast %139 : vector<8x8x2xf32> to vector<64x2xf32>
    %141 = vector.extract_strided_slice %140 {offsets = [0, 0], sizes = [64, 1], strides = [1, 1]} : vector<64x2xf32> to vector<64x1xf32>
    %142 = vector.extract_strided_slice %0 {offsets = [0, 0], sizes = [1, 32], strides = [1, 1]} : vector<18x32xf32> to vector<1x32xf32>
    %143 = vector.broadcast %141 : vector<64x1xf32> to vector<64x32xf32>
    %144 = vector.broadcast %142 : vector<1x32xf32> to vector<64x32xf32>
    %145 = arith.mulf %143, %144 : vector<64x32xf32>
    %146 = arith.addf %137, %145 : vector<64x32xf32>
    %147 = vector.extract_strided_slice %140 {offsets = [0, 1], sizes = [64, 1], strides = [1, 1]} : vector<64x2xf32> to vector<64x1xf32>
    %148 = vector.extract_strided_slice %0 {offsets = [1, 0], sizes = [1, 32], strides = [1, 1]} : vector<18x32xf32> to vector<1x32xf32>
    %149 = vector.broadcast %147 : vector<64x1xf32> to vector<64x32xf32>
    %150 = vector.broadcast %148 : vector<1x32xf32> to vector<64x32xf32>
    %151 = arith.mulf %149, %150 : vector<64x32xf32>
    %152 = arith.addf %146, %151 : vector<64x32xf32>
    %c0_39 = arith.constant 0 : index
    %c0_40 = arith.constant 0 : index
    %c1_41 = arith.constant 1 : index
    %c0_42 = arith.constant 0 : index
    %153 = vector.load %arg1[%c0_39, %c0_40, %c1_41, %c0_42] : memref<4x9x9x2xf32, #tpu.memory_space<vmem>>, vector<1x8x8x2xf32>
    %154 = vector.shape_cast %153 : vector<1x8x8x2xf32> to vector<8x8x2xf32>
    %155 = vector.shape_cast %154 : vector<8x8x2xf32> to vector<64x2xf32>
    %156 = vector.extract_strided_slice %155 {offsets = [0, 0], sizes = [64, 1], strides = [1, 1]} : vector<64x2xf32> to vector<64x1xf32>
    %157 = vector.extract_strided_slice %0 {offsets = [2, 0], sizes = [1, 32], strides = [1, 1]} : vector<18x32xf32> to vector<1x32xf32>
    %158 = vector.broadcast %156 : vector<64x1xf32> to vector<64x32xf32>
    %159 = vector.broadcast %157 : vector<1x32xf32> to vector<64x32xf32>
    %160 = arith.mulf %158, %159 : vector<64x32xf32>
    %161 = arith.addf %152, %160 : vector<64x32xf32>
    %162 = vector.extract_strided_slice %155 {offsets = [0, 1], sizes = [64, 1], strides = [1, 1]} : vector<64x2xf32> to vector<64x1xf32>
    %163 = vector.extract_strided_slice %0 {offsets = [3, 0], sizes = [1, 32], strides = [1, 1]} : vector<18x32xf32> to vector<1x32xf32>
    %164 = vector.broadcast %162 : vector<64x1xf32> to vector<64x32xf32>
    %165 = vector.broadcast %163 : vector<1x32xf32> to vector<64x32xf32>
    %166 = arith.mulf %164, %165 : vector<64x32xf32>
    %167 = arith.addf %161, %166 : vector<64x32xf32>
    %c1_43 = arith.constant 1 : index
    %c0_44 = arith.constant 0 : index
    %c1_45 = arith.constant 1 : index
    %c0_46 = arith.constant 0 : index
    %168 = vector.load %arg1[%c1_43, %c0_44, %c1_45, %c0_46] : memref<4x9x9x2xf32, #tpu.memory_space<vmem>>, vector<1x8x8x2xf32>
    %169 = vector.shape_cast %168 : vector<1x8x8x2xf32> to vector<8x8x2xf32>
    %170 = vector.shape_cast %169 : vector<8x8x2xf32> to vector<64x2xf32>
    %171 = vector.extract_strided_slice %170 {offsets = [0, 0], sizes = [64, 1], strides = [1, 1]} : vector<64x2xf32> to vector<64x1xf32>
    %172 = vector.extract_strided_slice %0 {offsets = [4, 0], sizes = [1, 32], strides = [1, 1]} : vector<18x32xf32> to vector<1x32xf32>
    %173 = vector.broadcast %171 : vector<64x1xf32> to vector<64x32xf32>
    %174 = vector.broadcast %172 : vector<1x32xf32> to vector<64x32xf32>
    %175 = arith.mulf %173, %174 : vector<64x32xf32>
    %176 = arith.addf %167, %175 : vector<64x32xf32>
    %177 = vector.extract_strided_slice %170 {offsets = [0, 1], sizes = [64, 1], strides = [1, 1]} : vector<64x2xf32> to vector<64x1xf32>
    %178 = vector.extract_strided_slice %0 {offsets = [5, 0], sizes = [1, 32], strides = [1, 1]} : vector<18x32xf32> to vector<1x32xf32>
    %179 = vector.broadcast %177 : vector<64x1xf32> to vector<64x32xf32>
    %180 = vector.broadcast %178 : vector<1x32xf32> to vector<64x32xf32>
    %181 = arith.mulf %179, %180 : vector<64x32xf32>
    %182 = arith.addf %176, %181 : vector<64x32xf32>
    %c3_47 = arith.constant 3 : index
    %c0_48 = arith.constant 0 : index
    %c0_49 = arith.constant 0 : index
    %c0_50 = arith.constant 0 : index
    %183 = vector.load %arg1[%c3_47, %c0_48, %c0_49, %c0_50] : memref<4x9x9x2xf32, #tpu.memory_space<vmem>>, vector<1x8x8x2xf32>
    %184 = vector.shape_cast %183 : vector<1x8x8x2xf32> to vector<8x8x2xf32>
    %185 = vector.shape_cast %184 : vector<8x8x2xf32> to vector<64x2xf32>
    %186 = vector.extract_strided_slice %185 {offsets = [0, 0], sizes = [64, 1], strides = [1, 1]} : vector<64x2xf32> to vector<64x1xf32>
    %187 = vector.extract_strided_slice %0 {offsets = [6, 0], sizes = [1, 32], strides = [1, 1]} : vector<18x32xf32> to vector<1x32xf32>
    %188 = vector.broadcast %186 : vector<64x1xf32> to vector<64x32xf32>
    %189 = vector.broadcast %187 : vector<1x32xf32> to vector<64x32xf32>
    %190 = arith.mulf %188, %189 : vector<64x32xf32>
    %191 = arith.addf %182, %190 : vector<64x32xf32>
    %192 = vector.extract_strided_slice %185 {offsets = [0, 1], sizes = [64, 1], strides = [1, 1]} : vector<64x2xf32> to vector<64x1xf32>
    %193 = vector.extract_strided_slice %0 {offsets = [7, 0], sizes = [1, 32], strides = [1, 1]} : vector<18x32xf32> to vector<1x32xf32>
    %194 = vector.broadcast %192 : vector<64x1xf32> to vector<64x32xf32>
    %195 = vector.broadcast %193 : vector<1x32xf32> to vector<64x32xf32>
    %196 = arith.mulf %194, %195 : vector<64x32xf32>
    %197 = arith.addf %191, %196 : vector<64x32xf32>
    %c2_51 = arith.constant 2 : index
    %c0_52 = arith.constant 0 : index
    %c1_53 = arith.constant 1 : index
    %c0_54 = arith.constant 0 : index
    %198 = vector.load %arg1[%c2_51, %c0_52, %c1_53, %c0_54] : memref<4x9x9x2xf32, #tpu.memory_space<vmem>>, vector<1x8x8x2xf32>
    %199 = vector.shape_cast %198 : vector<1x8x8x2xf32> to vector<8x8x2xf32>
    %200 = vector.shape_cast %199 : vector<8x8x2xf32> to vector<64x2xf32>
    %201 = vector.extract_strided_slice %200 {offsets = [0, 0], sizes = [64, 1], strides = [1, 1]} : vector<64x2xf32> to vector<64x1xf32>
    %202 = vector.extract_strided_slice %0 {offsets = [8, 0], sizes = [1, 32], strides = [1, 1]} : vector<18x32xf32> to vector<1x32xf32>
    %203 = vector.broadcast %201 : vector<64x1xf32> to vector<64x32xf32>
    %204 = vector.broadcast %202 : vector<1x32xf32> to vector<64x32xf32>
    %205 = arith.mulf %203, %204 : vector<64x32xf32>
    %206 = arith.addf %197, %205 : vector<64x32xf32>
    %207 = vector.extract_strided_slice %200 {offsets = [0, 1], sizes = [64, 1], strides = [1, 1]} : vector<64x2xf32> to vector<64x1xf32>
    %208 = vector.extract_strided_slice %0 {offsets = [9, 0], sizes = [1, 32], strides = [1, 1]} : vector<18x32xf32> to vector<1x32xf32>
    %209 = vector.broadcast %207 : vector<64x1xf32> to vector<64x32xf32>
    %210 = vector.broadcast %208 : vector<1x32xf32> to vector<64x32xf32>
    %211 = arith.mulf %209, %210 : vector<64x32xf32>
    %212 = arith.addf %206, %211 : vector<64x32xf32>
    %c3_55 = arith.constant 3 : index
    %c0_56 = arith.constant 0 : index
    %c1_57 = arith.constant 1 : index
    %c0_58 = arith.constant 0 : index
    %213 = vector.load %arg1[%c3_55, %c0_56, %c1_57, %c0_58] : memref<4x9x9x2xf32, #tpu.memory_space<vmem>>, vector<1x8x8x2xf32>
    %214 = vector.shape_cast %213 : vector<1x8x8x2xf32> to vector<8x8x2xf32>
    %215 = vector.shape_cast %214 : vector<8x8x2xf32> to vector<64x2xf32>
    %216 = vector.extract_strided_slice %215 {offsets = [0, 0], sizes = [64, 1], strides = [1, 1]} : vector<64x2xf32> to vector<64x1xf32>
    %217 = vector.extract_strided_slice %0 {offsets = [10, 0], sizes = [1, 32], strides = [1, 1]} : vector<18x32xf32> to vector<1x32xf32>
    %218 = vector.broadcast %216 : vector<64x1xf32> to vector<64x32xf32>
    %219 = vector.broadcast %217 : vector<1x32xf32> to vector<64x32xf32>
    %220 = arith.mulf %218, %219 : vector<64x32xf32>
    %221 = arith.addf %212, %220 : vector<64x32xf32>
    %222 = vector.extract_strided_slice %215 {offsets = [0, 1], sizes = [64, 1], strides = [1, 1]} : vector<64x2xf32> to vector<64x1xf32>
    %223 = vector.extract_strided_slice %0 {offsets = [11, 0], sizes = [1, 32], strides = [1, 1]} : vector<18x32xf32> to vector<1x32xf32>
    %224 = vector.broadcast %222 : vector<64x1xf32> to vector<64x32xf32>
    %225 = vector.broadcast %223 : vector<1x32xf32> to vector<64x32xf32>
    %226 = arith.mulf %224, %225 : vector<64x32xf32>
    %227 = arith.addf %221, %226 : vector<64x32xf32>
    %c1_59 = arith.constant 1 : index
    %c1_60 = arith.constant 1 : index
    %c0_61 = arith.constant 0 : index
    %c0_62 = arith.constant 0 : index
    %228 = vector.load %arg1[%c1_59, %c1_60, %c0_61, %c0_62] : memref<4x9x9x2xf32, #tpu.memory_space<vmem>>, vector<1x8x8x2xf32>
    %229 = vector.shape_cast %228 : vector<1x8x8x2xf32> to vector<8x8x2xf32>
    %230 = vector.shape_cast %229 : vector<8x8x2xf32> to vector<64x2xf32>
    %231 = vector.extract_strided_slice %230 {offsets = [0, 0], sizes = [64, 1], strides = [1, 1]} : vector<64x2xf32> to vector<64x1xf32>
    %232 = vector.extract_strided_slice %0 {offsets = [12, 0], sizes = [1, 32], strides = [1, 1]} : vector<18x32xf32> to vector<1x32xf32>
    %233 = vector.broadcast %231 : vector<64x1xf32> to vector<64x32xf32>
    %234 = vector.broadcast %232 : vector<1x32xf32> to vector<64x32xf32>
    %235 = arith.mulf %233, %234 : vector<64x32xf32>
    %236 = arith.addf %227, %235 : vector<64x32xf32>
    %237 = vector.extract_strided_slice %230 {offsets = [0, 1], sizes = [64, 1], strides = [1, 1]} : vector<64x2xf32> to vector<64x1xf32>
    %238 = vector.extract_strided_slice %0 {offsets = [13, 0], sizes = [1, 32], strides = [1, 1]} : vector<18x32xf32> to vector<1x32xf32>
    %239 = vector.broadcast %237 : vector<64x1xf32> to vector<64x32xf32>
    %240 = vector.broadcast %238 : vector<1x32xf32> to vector<64x32xf32>
    %241 = arith.mulf %239, %240 : vector<64x32xf32>
    %242 = arith.addf %236, %241 : vector<64x32xf32>
    %c0_63 = arith.constant 0 : index
    %c1_64 = arith.constant 1 : index
    %c1_65 = arith.constant 1 : index
    %c0_66 = arith.constant 0 : index
    %243 = vector.load %arg1[%c0_63, %c1_64, %c1_65, %c0_66] : memref<4x9x9x2xf32, #tpu.memory_space<vmem>>, vector<1x8x8x2xf32>
    %244 = vector.shape_cast %243 : vector<1x8x8x2xf32> to vector<8x8x2xf32>
    %245 = vector.shape_cast %244 : vector<8x8x2xf32> to vector<64x2xf32>
    %246 = vector.extract_strided_slice %245 {offsets = [0, 0], sizes = [64, 1], strides = [1, 1]} : vector<64x2xf32> to vector<64x1xf32>
    %247 = vector.extract_strided_slice %0 {offsets = [14, 0], sizes = [1, 32], strides = [1, 1]} : vector<18x32xf32> to vector<1x32xf32>
    %248 = vector.broadcast %246 : vector<64x1xf32> to vector<64x32xf32>
    %249 = vector.broadcast %247 : vector<1x32xf32> to vector<64x32xf32>
    %250 = arith.mulf %248, %249 : vector<64x32xf32>
    %251 = arith.addf %242, %250 : vector<64x32xf32>
    %252 = vector.extract_strided_slice %245 {offsets = [0, 1], sizes = [64, 1], strides = [1, 1]} : vector<64x2xf32> to vector<64x1xf32>
    %253 = vector.extract_strided_slice %0 {offsets = [15, 0], sizes = [1, 32], strides = [1, 1]} : vector<18x32xf32> to vector<1x32xf32>
    %254 = vector.broadcast %252 : vector<64x1xf32> to vector<64x32xf32>
    %255 = vector.broadcast %253 : vector<1x32xf32> to vector<64x32xf32>
    %256 = arith.mulf %254, %255 : vector<64x32xf32>
    %257 = arith.addf %251, %256 : vector<64x32xf32>
    %c1_67 = arith.constant 1 : index
    %c1_68 = arith.constant 1 : index
    %c1_69 = arith.constant 1 : index
    %c0_70 = arith.constant 0 : index
    %258 = vector.load %arg1[%c1_67, %c1_68, %c1_69, %c0_70] : memref<4x9x9x2xf32, #tpu.memory_space<vmem>>, vector<1x8x8x2xf32>
    %259 = vector.shape_cast %258 : vector<1x8x8x2xf32> to vector<8x8x2xf32>
    %260 = vector.shape_cast %259 : vector<8x8x2xf32> to vector<64x2xf32>
    %261 = vector.extract_strided_slice %260 {offsets = [0, 0], sizes = [64, 1], strides = [1, 1]} : vector<64x2xf32> to vector<64x1xf32>
    %262 = vector.extract_strided_slice %0 {offsets = [16, 0], sizes = [1, 32], strides = [1, 1]} : vector<18x32xf32> to vector<1x32xf32>
    %263 = vector.broadcast %261 : vector<64x1xf32> to vector<64x32xf32>
    %264 = vector.broadcast %262 : vector<1x32xf32> to vector<64x32xf32>
    %265 = arith.mulf %263, %264 : vector<64x32xf32>
    %266 = arith.addf %257, %265 : vector<64x32xf32>
    %267 = vector.extract_strided_slice %260 {offsets = [0, 1], sizes = [64, 1], strides = [1, 1]} : vector<64x2xf32> to vector<64x1xf32>
    %268 = vector.extract_strided_slice %0 {offsets = [17, 0], sizes = [1, 32], strides = [1, 1]} : vector<18x32xf32> to vector<1x32xf32>
    %269 = vector.broadcast %267 : vector<64x1xf32> to vector<64x32xf32>
    %270 = vector.broadcast %268 : vector<1x32xf32> to vector<64x32xf32>
    %271 = arith.mulf %269, %270 : vector<64x32xf32>
    %272 = arith.addf %266, %271 : vector<64x32xf32>
    %273 = arith.maximumf %136, %272 : vector<64x32xf32>
    %cst_71 = arith.constant 0.000000e+00 : f32
    %274 = vector.broadcast %cst_71 : f32 to vector<64x32xf32>
    %c2_72 = arith.constant 2 : index
    %c0_73 = arith.constant 0 : index
    %c0_74 = arith.constant 0 : index
    %c0_75 = arith.constant 0 : index
    %275 = vector.load %arg1[%c2_72, %c0_73, %c0_74, %c0_75] : memref<4x9x9x2xf32, #tpu.memory_space<vmem>>, vector<1x8x8x2xf32>
    %276 = vector.shape_cast %275 : vector<1x8x8x2xf32> to vector<8x8x2xf32>
    %277 = vector.shape_cast %276 : vector<8x8x2xf32> to vector<64x2xf32>
    %278 = vector.extract_strided_slice %277 {offsets = [0, 0], sizes = [64, 1], strides = [1, 1]} : vector<64x2xf32> to vector<64x1xf32>
    %279 = vector.extract_strided_slice %0 {offsets = [0, 0], sizes = [1, 32], strides = [1, 1]} : vector<18x32xf32> to vector<1x32xf32>
    %280 = vector.broadcast %278 : vector<64x1xf32> to vector<64x32xf32>
    %281 = vector.broadcast %279 : vector<1x32xf32> to vector<64x32xf32>
    %282 = arith.mulf %280, %281 : vector<64x32xf32>
    %283 = arith.addf %274, %282 : vector<64x32xf32>
    %284 = vector.extract_strided_slice %277 {offsets = [0, 1], sizes = [64, 1], strides = [1, 1]} : vector<64x2xf32> to vector<64x1xf32>
    %285 = vector.extract_strided_slice %0 {offsets = [1, 0], sizes = [1, 32], strides = [1, 1]} : vector<18x32xf32> to vector<1x32xf32>
    %286 = vector.broadcast %284 : vector<64x1xf32> to vector<64x32xf32>
    %287 = vector.broadcast %285 : vector<1x32xf32> to vector<64x32xf32>
    %288 = arith.mulf %286, %287 : vector<64x32xf32>
    %289 = arith.addf %283, %288 : vector<64x32xf32>
    %c3_76 = arith.constant 3 : index
    %c0_77 = arith.constant 0 : index
    %c0_78 = arith.constant 0 : index
    %c0_79 = arith.constant 0 : index
    %290 = vector.load %arg1[%c3_76, %c0_77, %c0_78, %c0_79] : memref<4x9x9x2xf32, #tpu.memory_space<vmem>>, vector<1x8x8x2xf32>
    %291 = vector.shape_cast %290 : vector<1x8x8x2xf32> to vector<8x8x2xf32>
    %292 = vector.shape_cast %291 : vector<8x8x2xf32> to vector<64x2xf32>
    %293 = vector.extract_strided_slice %292 {offsets = [0, 0], sizes = [64, 1], strides = [1, 1]} : vector<64x2xf32> to vector<64x1xf32>
    %294 = vector.extract_strided_slice %0 {offsets = [2, 0], sizes = [1, 32], strides = [1, 1]} : vector<18x32xf32> to vector<1x32xf32>
    %295 = vector.broadcast %293 : vector<64x1xf32> to vector<64x32xf32>
    %296 = vector.broadcast %294 : vector<1x32xf32> to vector<64x32xf32>
    %297 = arith.mulf %295, %296 : vector<64x32xf32>
    %298 = arith.addf %289, %297 : vector<64x32xf32>
    %299 = vector.extract_strided_slice %292 {offsets = [0, 1], sizes = [64, 1], strides = [1, 1]} : vector<64x2xf32> to vector<64x1xf32>
    %300 = vector.extract_strided_slice %0 {offsets = [3, 0], sizes = [1, 32], strides = [1, 1]} : vector<18x32xf32> to vector<1x32xf32>
    %301 = vector.broadcast %299 : vector<64x1xf32> to vector<64x32xf32>
    %302 = vector.broadcast %300 : vector<1x32xf32> to vector<64x32xf32>
    %303 = arith.mulf %301, %302 : vector<64x32xf32>
    %304 = arith.addf %298, %303 : vector<64x32xf32>
    %c2_80 = arith.constant 2 : index
    %c0_81 = arith.constant 0 : index
    %c1_82 = arith.constant 1 : index
    %c0_83 = arith.constant 0 : index
    %305 = vector.load %arg1[%c2_80, %c0_81, %c1_82, %c0_83] : memref<4x9x9x2xf32, #tpu.memory_space<vmem>>, vector<1x8x8x2xf32>
    %306 = vector.shape_cast %305 : vector<1x8x8x2xf32> to vector<8x8x2xf32>
    %307 = vector.shape_cast %306 : vector<8x8x2xf32> to vector<64x2xf32>
    %308 = vector.extract_strided_slice %307 {offsets = [0, 0], sizes = [64, 1], strides = [1, 1]} : vector<64x2xf32> to vector<64x1xf32>
    %309 = vector.extract_strided_slice %0 {offsets = [4, 0], sizes = [1, 32], strides = [1, 1]} : vector<18x32xf32> to vector<1x32xf32>
    %310 = vector.broadcast %308 : vector<64x1xf32> to vector<64x32xf32>
    %311 = vector.broadcast %309 : vector<1x32xf32> to vector<64x32xf32>
    %312 = arith.mulf %310, %311 : vector<64x32xf32>
    %313 = arith.addf %304, %312 : vector<64x32xf32>
    %314 = vector.extract_strided_slice %307 {offsets = [0, 1], sizes = [64, 1], strides = [1, 1]} : vector<64x2xf32> to vector<64x1xf32>
    %315 = vector.extract_strided_slice %0 {offsets = [5, 0], sizes = [1, 32], strides = [1, 1]} : vector<18x32xf32> to vector<1x32xf32>
    %316 = vector.broadcast %314 : vector<64x1xf32> to vector<64x32xf32>
    %317 = vector.broadcast %315 : vector<1x32xf32> to vector<64x32xf32>
    %318 = arith.mulf %316, %317 : vector<64x32xf32>
    %319 = arith.addf %313, %318 : vector<64x32xf32>
    %c0_84 = arith.constant 0 : index
    %c1_85 = arith.constant 1 : index
    %c0_86 = arith.constant 0 : index
    %c0_87 = arith.constant 0 : index
    %320 = vector.load %arg1[%c0_84, %c1_85, %c0_86, %c0_87] : memref<4x9x9x2xf32, #tpu.memory_space<vmem>>, vector<1x8x8x2xf32>
    %321 = vector.shape_cast %320 : vector<1x8x8x2xf32> to vector<8x8x2xf32>
    %322 = vector.shape_cast %321 : vector<8x8x2xf32> to vector<64x2xf32>
    %323 = vector.extract_strided_slice %322 {offsets = [0, 0], sizes = [64, 1], strides = [1, 1]} : vector<64x2xf32> to vector<64x1xf32>
    %324 = vector.extract_strided_slice %0 {offsets = [6, 0], sizes = [1, 32], strides = [1, 1]} : vector<18x32xf32> to vector<1x32xf32>
    %325 = vector.broadcast %323 : vector<64x1xf32> to vector<64x32xf32>
    %326 = vector.broadcast %324 : vector<1x32xf32> to vector<64x32xf32>
    %327 = arith.mulf %325, %326 : vector<64x32xf32>
    %328 = arith.addf %319, %327 : vector<64x32xf32>
    %329 = vector.extract_strided_slice %322 {offsets = [0, 1], sizes = [64, 1], strides = [1, 1]} : vector<64x2xf32> to vector<64x1xf32>
    %330 = vector.extract_strided_slice %0 {offsets = [7, 0], sizes = [1, 32], strides = [1, 1]} : vector<18x32xf32> to vector<1x32xf32>
    %331 = vector.broadcast %329 : vector<64x1xf32> to vector<64x32xf32>
    %332 = vector.broadcast %330 : vector<1x32xf32> to vector<64x32xf32>
    %333 = arith.mulf %331, %332 : vector<64x32xf32>
    %334 = arith.addf %328, %333 : vector<64x32xf32>
    %c1_88 = arith.constant 1 : index
    %c1_89 = arith.constant 1 : index
    %c0_90 = arith.constant 0 : index
    %c0_91 = arith.constant 0 : index
    %335 = vector.load %arg1[%c1_88, %c1_89, %c0_90, %c0_91] : memref<4x9x9x2xf32, #tpu.memory_space<vmem>>, vector<1x8x8x2xf32>
    %336 = vector.shape_cast %335 : vector<1x8x8x2xf32> to vector<8x8x2xf32>
    %337 = vector.shape_cast %336 : vector<8x8x2xf32> to vector<64x2xf32>
    %338 = vector.extract_strided_slice %337 {offsets = [0, 0], sizes = [64, 1], strides = [1, 1]} : vector<64x2xf32> to vector<64x1xf32>
    %339 = vector.extract_strided_slice %0 {offsets = [8, 0], sizes = [1, 32], strides = [1, 1]} : vector<18x32xf32> to vector<1x32xf32>
    %340 = vector.broadcast %338 : vector<64x1xf32> to vector<64x32xf32>
    %341 = vector.broadcast %339 : vector<1x32xf32> to vector<64x32xf32>
    %342 = arith.mulf %340, %341 : vector<64x32xf32>
    %343 = arith.addf %334, %342 : vector<64x32xf32>
    %344 = vector.extract_strided_slice %337 {offsets = [0, 1], sizes = [64, 1], strides = [1, 1]} : vector<64x2xf32> to vector<64x1xf32>
    %345 = vector.extract_strided_slice %0 {offsets = [9, 0], sizes = [1, 32], strides = [1, 1]} : vector<18x32xf32> to vector<1x32xf32>
    %346 = vector.broadcast %344 : vector<64x1xf32> to vector<64x32xf32>
    %347 = vector.broadcast %345 : vector<1x32xf32> to vector<64x32xf32>
    %348 = arith.mulf %346, %347 : vector<64x32xf32>
    %349 = arith.addf %343, %348 : vector<64x32xf32>
    %c0_92 = arith.constant 0 : index
    %c1_93 = arith.constant 1 : index
    %c1_94 = arith.constant 1 : index
    %c0_95 = arith.constant 0 : index
    %350 = vector.load %arg1[%c0_92, %c1_93, %c1_94, %c0_95] : memref<4x9x9x2xf32, #tpu.memory_space<vmem>>, vector<1x8x8x2xf32>
    %351 = vector.shape_cast %350 : vector<1x8x8x2xf32> to vector<8x8x2xf32>
    %352 = vector.shape_cast %351 : vector<8x8x2xf32> to vector<64x2xf32>
    %353 = vector.extract_strided_slice %352 {offsets = [0, 0], sizes = [64, 1], strides = [1, 1]} : vector<64x2xf32> to vector<64x1xf32>
    %354 = vector.extract_strided_slice %0 {offsets = [10, 0], sizes = [1, 32], strides = [1, 1]} : vector<18x32xf32> to vector<1x32xf32>
    %355 = vector.broadcast %353 : vector<64x1xf32> to vector<64x32xf32>
    %356 = vector.broadcast %354 : vector<1x32xf32> to vector<64x32xf32>
    %357 = arith.mulf %355, %356 : vector<64x32xf32>
    %358 = arith.addf %349, %357 : vector<64x32xf32>
    %359 = vector.extract_strided_slice %352 {offsets = [0, 1], sizes = [64, 1], strides = [1, 1]} : vector<64x2xf32> to vector<64x1xf32>
    %360 = vector.extract_strided_slice %0 {offsets = [11, 0], sizes = [1, 32], strides = [1, 1]} : vector<18x32xf32> to vector<1x32xf32>
    %361 = vector.broadcast %359 : vector<64x1xf32> to vector<64x32xf32>
    %362 = vector.broadcast %360 : vector<1x32xf32> to vector<64x32xf32>
    %363 = arith.mulf %361, %362 : vector<64x32xf32>
    %364 = arith.addf %358, %363 : vector<64x32xf32>
    %c2_96 = arith.constant 2 : index
    %c1_97 = arith.constant 1 : index
    %c0_98 = arith.constant 0 : index
    %c0_99 = arith.constant 0 : index
    %365 = vector.load %arg1[%c2_96, %c1_97, %c0_98, %c0_99] : memref<4x9x9x2xf32, #tpu.memory_space<vmem>>, vector<1x8x8x2xf32>
    %366 = vector.shape_cast %365 : vector<1x8x8x2xf32> to vector<8x8x2xf32>
    %367 = vector.shape_cast %366 : vector<8x8x2xf32> to vector<64x2xf32>
    %368 = vector.extract_strided_slice %367 {offsets = [0, 0], sizes = [64, 1], strides = [1, 1]} : vector<64x2xf32> to vector<64x1xf32>
    %369 = vector.extract_strided_slice %0 {offsets = [12, 0], sizes = [1, 32], strides = [1, 1]} : vector<18x32xf32> to vector<1x32xf32>
    %370 = vector.broadcast %368 : vector<64x1xf32> to vector<64x32xf32>
    %371 = vector.broadcast %369 : vector<1x32xf32> to vector<64x32xf32>
    %372 = arith.mulf %370, %371 : vector<64x32xf32>
    %373 = arith.addf %364, %372 : vector<64x32xf32>
    %374 = vector.extract_strided_slice %367 {offsets = [0, 1], sizes = [64, 1], strides = [1, 1]} : vector<64x2xf32> to vector<64x1xf32>
    %375 = vector.extract_strided_slice %0 {offsets = [13, 0], sizes = [1, 32], strides = [1, 1]} : vector<18x32xf32> to vector<1x32xf32>
    %376 = vector.broadcast %374 : vector<64x1xf32> to vector<64x32xf32>
    %377 = vector.broadcast %375 : vector<1x32xf32> to vector<64x32xf32>
    %378 = arith.mulf %376, %377 : vector<64x32xf32>
    %379 = arith.addf %373, %378 : vector<64x32xf32>
    %c3_100 = arith.constant 3 : index
    %c1_101 = arith.constant 1 : index
    %c0_102 = arith.constant 0 : index
    %c0_103 = arith.constant 0 : index
    %380 = vector.load %arg1[%c3_100, %c1_101, %c0_102, %c0_103] : memref<4x9x9x2xf32, #tpu.memory_space<vmem>>, vector<1x8x8x2xf32>
    %381 = vector.shape_cast %380 : vector<1x8x8x2xf32> to vector<8x8x2xf32>
    %382 = vector.shape_cast %381 : vector<8x8x2xf32> to vector<64x2xf32>
    %383 = vector.extract_strided_slice %382 {offsets = [0, 0], sizes = [64, 1], strides = [1, 1]} : vector<64x2xf32> to vector<64x1xf32>
    %384 = vector.extract_strided_slice %0 {offsets = [14, 0], sizes = [1, 32], strides = [1, 1]} : vector<18x32xf32> to vector<1x32xf32>
    %385 = vector.broadcast %383 : vector<64x1xf32> to vector<64x32xf32>
    %386 = vector.broadcast %384 : vector<1x32xf32> to vector<64x32xf32>
    %387 = arith.mulf %385, %386 : vector<64x32xf32>
    %388 = arith.addf %379, %387 : vector<64x32xf32>
    %389 = vector.extract_strided_slice %382 {offsets = [0, 1], sizes = [64, 1], strides = [1, 1]} : vector<64x2xf32> to vector<64x1xf32>
    %390 = vector.extract_strided_slice %0 {offsets = [15, 0], sizes = [1, 32], strides = [1, 1]} : vector<18x32xf32> to vector<1x32xf32>
    %391 = vector.broadcast %389 : vector<64x1xf32> to vector<64x32xf32>
    %392 = vector.broadcast %390 : vector<1x32xf32> to vector<64x32xf32>
    %393 = arith.mulf %391, %392 : vector<64x32xf32>
    %394 = arith.addf %388, %393 : vector<64x32xf32>
    %c2_104 = arith.constant 2 : index
    %c1_105 = arith.constant 1 : index
    %c1_106 = arith.constant 1 : index
    %c0_107 = arith.constant 0 : index
    %395 = vector.load %arg1[%c2_104, %c1_105, %c1_106, %c0_107] : memref<4x9x9x2xf32, #tpu.memory_space<vmem>>, vector<1x8x8x2xf32>
    %396 = vector.shape_cast %395 : vector<1x8x8x2xf32> to vector<8x8x2xf32>
    %397 = vector.shape_cast %396 : vector<8x8x2xf32> to vector<64x2xf32>
    %398 = vector.extract_strided_slice %397 {offsets = [0, 0], sizes = [64, 1], strides = [1, 1]} : vector<64x2xf32> to vector<64x1xf32>
    %399 = vector.extract_strided_slice %0 {offsets = [16, 0], sizes = [1, 32], strides = [1, 1]} : vector<18x32xf32> to vector<1x32xf32>
    %400 = vector.broadcast %398 : vector<64x1xf32> to vector<64x32xf32>
    %401 = vector.broadcast %399 : vector<1x32xf32> to vector<64x32xf32>
    %402 = arith.mulf %400, %401 : vector<64x32xf32>
    %403 = arith.addf %394, %402 : vector<64x32xf32>
    %404 = vector.extract_strided_slice %397 {offsets = [0, 1], sizes = [64, 1], strides = [1, 1]} : vector<64x2xf32> to vector<64x1xf32>
    %405 = vector.extract_strided_slice %0 {offsets = [17, 0], sizes = [1, 32], strides = [1, 1]} : vector<18x32xf32> to vector<1x32xf32>
    %406 = vector.broadcast %404 : vector<64x1xf32> to vector<64x32xf32>
    %407 = vector.broadcast %405 : vector<1x32xf32> to vector<64x32xf32>
    %408 = arith.mulf %406, %407 : vector<64x32xf32>
    %409 = arith.addf %403, %408 : vector<64x32xf32>
    %410 = arith.maximumf %273, %409 : vector<64x32xf32>
    %cst_108 = arith.constant 0.000000e+00 : f32
    %411 = vector.broadcast %cst_108 : f32 to vector<64x32xf32>
    %c3_109 = arith.constant 3 : index
    %c0_110 = arith.constant 0 : index
    %c0_111 = arith.constant 0 : index
    %c0_112 = arith.constant 0 : index
    %412 = vector.load %arg1[%c3_109, %c0_110, %c0_111, %c0_112] : memref<4x9x9x2xf32, #tpu.memory_space<vmem>>, vector<1x8x8x2xf32>
    %413 = vector.shape_cast %412 : vector<1x8x8x2xf32> to vector<8x8x2xf32>
    %414 = vector.shape_cast %413 : vector<8x8x2xf32> to vector<64x2xf32>
    %415 = vector.extract_strided_slice %414 {offsets = [0, 0], sizes = [64, 1], strides = [1, 1]} : vector<64x2xf32> to vector<64x1xf32>
    %416 = vector.extract_strided_slice %0 {offsets = [0, 0], sizes = [1, 32], strides = [1, 1]} : vector<18x32xf32> to vector<1x32xf32>
    %417 = vector.broadcast %415 : vector<64x1xf32> to vector<64x32xf32>
    %418 = vector.broadcast %416 : vector<1x32xf32> to vector<64x32xf32>
    %419 = arith.mulf %417, %418 : vector<64x32xf32>
    %420 = arith.addf %411, %419 : vector<64x32xf32>
    %421 = vector.extract_strided_slice %414 {offsets = [0, 1], sizes = [64, 1], strides = [1, 1]} : vector<64x2xf32> to vector<64x1xf32>
    %422 = vector.extract_strided_slice %0 {offsets = [1, 0], sizes = [1, 32], strides = [1, 1]} : vector<18x32xf32> to vector<1x32xf32>
    %423 = vector.broadcast %421 : vector<64x1xf32> to vector<64x32xf32>
    %424 = vector.broadcast %422 : vector<1x32xf32> to vector<64x32xf32>
    %425 = arith.mulf %423, %424 : vector<64x32xf32>
    %426 = arith.addf %420, %425 : vector<64x32xf32>
    %c2_113 = arith.constant 2 : index
    %c0_114 = arith.constant 0 : index
    %c1_115 = arith.constant 1 : index
    %c0_116 = arith.constant 0 : index
    %427 = vector.load %arg1[%c2_113, %c0_114, %c1_115, %c0_116] : memref<4x9x9x2xf32, #tpu.memory_space<vmem>>, vector<1x8x8x2xf32>
    %428 = vector.shape_cast %427 : vector<1x8x8x2xf32> to vector<8x8x2xf32>
    %429 = vector.shape_cast %428 : vector<8x8x2xf32> to vector<64x2xf32>
    %430 = vector.extract_strided_slice %429 {offsets = [0, 0], sizes = [64, 1], strides = [1, 1]} : vector<64x2xf32> to vector<64x1xf32>
    %431 = vector.extract_strided_slice %0 {offsets = [2, 0], sizes = [1, 32], strides = [1, 1]} : vector<18x32xf32> to vector<1x32xf32>
    %432 = vector.broadcast %430 : vector<64x1xf32> to vector<64x32xf32>
    %433 = vector.broadcast %431 : vector<1x32xf32> to vector<64x32xf32>
    %434 = arith.mulf %432, %433 : vector<64x32xf32>
    %435 = arith.addf %426, %434 : vector<64x32xf32>
    %436 = vector.extract_strided_slice %429 {offsets = [0, 1], sizes = [64, 1], strides = [1, 1]} : vector<64x2xf32> to vector<64x1xf32>
    %437 = vector.extract_strided_slice %0 {offsets = [3, 0], sizes = [1, 32], strides = [1, 1]} : vector<18x32xf32> to vector<1x32xf32>
    %438 = vector.broadcast %436 : vector<64x1xf32> to vector<64x32xf32>
    %439 = vector.broadcast %437 : vector<1x32xf32> to vector<64x32xf32>
    %440 = arith.mulf %438, %439 : vector<64x32xf32>
    %441 = arith.addf %435, %440 : vector<64x32xf32>
    %c3_117 = arith.constant 3 : index
    %c0_118 = arith.constant 0 : index
    %c1_119 = arith.constant 1 : index
    %c0_120 = arith.constant 0 : index
    %442 = vector.load %arg1[%c3_117, %c0_118, %c1_119, %c0_120] : memref<4x9x9x2xf32, #tpu.memory_space<vmem>>, vector<1x8x8x2xf32>
    %443 = vector.shape_cast %442 : vector<1x8x8x2xf32> to vector<8x8x2xf32>
    %444 = vector.shape_cast %443 : vector<8x8x2xf32> to vector<64x2xf32>
    %445 = vector.extract_strided_slice %444 {offsets = [0, 0], sizes = [64, 1], strides = [1, 1]} : vector<64x2xf32> to vector<64x1xf32>
    %446 = vector.extract_strided_slice %0 {offsets = [4, 0], sizes = [1, 32], strides = [1, 1]} : vector<18x32xf32> to vector<1x32xf32>
    %447 = vector.broadcast %445 : vector<64x1xf32> to vector<64x32xf32>
    %448 = vector.broadcast %446 : vector<1x32xf32> to vector<64x32xf32>
    %449 = arith.mulf %447, %448 : vector<64x32xf32>
    %450 = arith.addf %441, %449 : vector<64x32xf32>
    %451 = vector.extract_strided_slice %444 {offsets = [0, 1], sizes = [64, 1], strides = [1, 1]} : vector<64x2xf32> to vector<64x1xf32>
    %452 = vector.extract_strided_slice %0 {offsets = [5, 0], sizes = [1, 32], strides = [1, 1]} : vector<18x32xf32> to vector<1x32xf32>
    %453 = vector.broadcast %451 : vector<64x1xf32> to vector<64x32xf32>
    %454 = vector.broadcast %452 : vector<1x32xf32> to vector<64x32xf32>
    %455 = arith.mulf %453, %454 : vector<64x32xf32>
    %456 = arith.addf %450, %455 : vector<64x32xf32>
    %c1_121 = arith.constant 1 : index
    %c1_122 = arith.constant 1 : index
    %c0_123 = arith.constant 0 : index
    %c0_124 = arith.constant 0 : index
    %457 = vector.load %arg1[%c1_121, %c1_122, %c0_123, %c0_124] : memref<4x9x9x2xf32, #tpu.memory_space<vmem>>, vector<1x8x8x2xf32>
    %458 = vector.shape_cast %457 : vector<1x8x8x2xf32> to vector<8x8x2xf32>
    %459 = vector.shape_cast %458 : vector<8x8x2xf32> to vector<64x2xf32>
    %460 = vector.extract_strided_slice %459 {offsets = [0, 0], sizes = [64, 1], strides = [1, 1]} : vector<64x2xf32> to vector<64x1xf32>
    %461 = vector.extract_strided_slice %0 {offsets = [6, 0], sizes = [1, 32], strides = [1, 1]} : vector<18x32xf32> to vector<1x32xf32>
    %462 = vector.broadcast %460 : vector<64x1xf32> to vector<64x32xf32>
    %463 = vector.broadcast %461 : vector<1x32xf32> to vector<64x32xf32>
    %464 = arith.mulf %462, %463 : vector<64x32xf32>
    %465 = arith.addf %456, %464 : vector<64x32xf32>
    %466 = vector.extract_strided_slice %459 {offsets = [0, 1], sizes = [64, 1], strides = [1, 1]} : vector<64x2xf32> to vector<64x1xf32>
    %467 = vector.extract_strided_slice %0 {offsets = [7, 0], sizes = [1, 32], strides = [1, 1]} : vector<18x32xf32> to vector<1x32xf32>
    %468 = vector.broadcast %466 : vector<64x1xf32> to vector<64x32xf32>
    %469 = vector.broadcast %467 : vector<1x32xf32> to vector<64x32xf32>
    %470 = arith.mulf %468, %469 : vector<64x32xf32>
    %471 = arith.addf %465, %470 : vector<64x32xf32>
    %c0_125 = arith.constant 0 : index
    %c1_126 = arith.constant 1 : index
    %c1_127 = arith.constant 1 : index
    %c0_128 = arith.constant 0 : index
    %472 = vector.load %arg1[%c0_125, %c1_126, %c1_127, %c0_128] : memref<4x9x9x2xf32, #tpu.memory_space<vmem>>, vector<1x8x8x2xf32>
    %473 = vector.shape_cast %472 : vector<1x8x8x2xf32> to vector<8x8x2xf32>
    %474 = vector.shape_cast %473 : vector<8x8x2xf32> to vector<64x2xf32>
    %475 = vector.extract_strided_slice %474 {offsets = [0, 0], sizes = [64, 1], strides = [1, 1]} : vector<64x2xf32> to vector<64x1xf32>
    %476 = vector.extract_strided_slice %0 {offsets = [8, 0], sizes = [1, 32], strides = [1, 1]} : vector<18x32xf32> to vector<1x32xf32>
    %477 = vector.broadcast %475 : vector<64x1xf32> to vector<64x32xf32>
    %478 = vector.broadcast %476 : vector<1x32xf32> to vector<64x32xf32>
    %479 = arith.mulf %477, %478 : vector<64x32xf32>
    %480 = arith.addf %471, %479 : vector<64x32xf32>
    %481 = vector.extract_strided_slice %474 {offsets = [0, 1], sizes = [64, 1], strides = [1, 1]} : vector<64x2xf32> to vector<64x1xf32>
    %482 = vector.extract_strided_slice %0 {offsets = [9, 0], sizes = [1, 32], strides = [1, 1]} : vector<18x32xf32> to vector<1x32xf32>
    %483 = vector.broadcast %481 : vector<64x1xf32> to vector<64x32xf32>
    %484 = vector.broadcast %482 : vector<1x32xf32> to vector<64x32xf32>
    %485 = arith.mulf %483, %484 : vector<64x32xf32>
    %486 = arith.addf %480, %485 : vector<64x32xf32>
    %c1_129 = arith.constant 1 : index
    %c1_130 = arith.constant 1 : index
    %c1_131 = arith.constant 1 : index
    %c0_132 = arith.constant 0 : index
    %487 = vector.load %arg1[%c1_129, %c1_130, %c1_131, %c0_132] : memref<4x9x9x2xf32, #tpu.memory_space<vmem>>, vector<1x8x8x2xf32>
    %488 = vector.shape_cast %487 : vector<1x8x8x2xf32> to vector<8x8x2xf32>
    %489 = vector.shape_cast %488 : vector<8x8x2xf32> to vector<64x2xf32>
    %490 = vector.extract_strided_slice %489 {offsets = [0, 0], sizes = [64, 1], strides = [1, 1]} : vector<64x2xf32> to vector<64x1xf32>
    %491 = vector.extract_strided_slice %0 {offsets = [10, 0], sizes = [1, 32], strides = [1, 1]} : vector<18x32xf32> to vector<1x32xf32>
    %492 = vector.broadcast %490 : vector<64x1xf32> to vector<64x32xf32>
    %493 = vector.broadcast %491 : vector<1x32xf32> to vector<64x32xf32>
    %494 = arith.mulf %492, %493 : vector<64x32xf32>
    %495 = arith.addf %486, %494 : vector<64x32xf32>
    %496 = vector.extract_strided_slice %489 {offsets = [0, 1], sizes = [64, 1], strides = [1, 1]} : vector<64x2xf32> to vector<64x1xf32>
    %497 = vector.extract_strided_slice %0 {offsets = [11, 0], sizes = [1, 32], strides = [1, 1]} : vector<18x32xf32> to vector<1x32xf32>
    %498 = vector.broadcast %496 : vector<64x1xf32> to vector<64x32xf32>
    %499 = vector.broadcast %497 : vector<1x32xf32> to vector<64x32xf32>
    %500 = arith.mulf %498, %499 : vector<64x32xf32>
    %501 = arith.addf %495, %500 : vector<64x32xf32>
    %c3_133 = arith.constant 3 : index
    %c1_134 = arith.constant 1 : index
    %c0_135 = arith.constant 0 : index
    %c0_136 = arith.constant 0 : index
    %502 = vector.load %arg1[%c3_133, %c1_134, %c0_135, %c0_136] : memref<4x9x9x2xf32, #tpu.memory_space<vmem>>, vector<1x8x8x2xf32>
    %503 = vector.shape_cast %502 : vector<1x8x8x2xf32> to vector<8x8x2xf32>
    %504 = vector.shape_cast %503 : vector<8x8x2xf32> to vector<64x2xf32>
    %505 = vector.extract_strided_slice %504 {offsets = [0, 0], sizes = [64, 1], strides = [1, 1]} : vector<64x2xf32> to vector<64x1xf32>
    %506 = vector.extract_strided_slice %0 {offsets = [12, 0], sizes = [1, 32], strides = [1, 1]} : vector<18x32xf32> to vector<1x32xf32>
    %507 = vector.broadcast %505 : vector<64x1xf32> to vector<64x32xf32>
    %508 = vector.broadcast %506 : vector<1x32xf32> to vector<64x32xf32>
    %509 = arith.mulf %507, %508 : vector<64x32xf32>
    %510 = arith.addf %501, %509 : vector<64x32xf32>
    %511 = vector.extract_strided_slice %504 {offsets = [0, 1], sizes = [64, 1], strides = [1, 1]} : vector<64x2xf32> to vector<64x1xf32>
    %512 = vector.extract_strided_slice %0 {offsets = [13, 0], sizes = [1, 32], strides = [1, 1]} : vector<18x32xf32> to vector<1x32xf32>
    %513 = vector.broadcast %511 : vector<64x1xf32> to vector<64x32xf32>
    %514 = vector.broadcast %512 : vector<1x32xf32> to vector<64x32xf32>
    %515 = arith.mulf %513, %514 : vector<64x32xf32>
    %516 = arith.addf %510, %515 : vector<64x32xf32>
    %c2_137 = arith.constant 2 : index
    %c1_138 = arith.constant 1 : index
    %c1_139 = arith.constant 1 : index
    %c0_140 = arith.constant 0 : index
    %517 = vector.load %arg1[%c2_137, %c1_138, %c1_139, %c0_140] : memref<4x9x9x2xf32, #tpu.memory_space<vmem>>, vector<1x8x8x2xf32>
    %518 = vector.shape_cast %517 : vector<1x8x8x2xf32> to vector<8x8x2xf32>
    %519 = vector.shape_cast %518 : vector<8x8x2xf32> to vector<64x2xf32>
    %520 = vector.extract_strided_slice %519 {offsets = [0, 0], sizes = [64, 1], strides = [1, 1]} : vector<64x2xf32> to vector<64x1xf32>
    %521 = vector.extract_strided_slice %0 {offsets = [14, 0], sizes = [1, 32], strides = [1, 1]} : vector<18x32xf32> to vector<1x32xf32>
    %522 = vector.broadcast %520 : vector<64x1xf32> to vector<64x32xf32>
    %523 = vector.broadcast %521 : vector<1x32xf32> to vector<64x32xf32>
    %524 = arith.mulf %522, %523 : vector<64x32xf32>
    %525 = arith.addf %516, %524 : vector<64x32xf32>
    %526 = vector.extract_strided_slice %519 {offsets = [0, 1], sizes = [64, 1], strides = [1, 1]} : vector<64x2xf32> to vector<64x1xf32>
    %527 = vector.extract_strided_slice %0 {offsets = [15, 0], sizes = [1, 32], strides = [1, 1]} : vector<18x32xf32> to vector<1x32xf32>
    %528 = vector.broadcast %526 : vector<64x1xf32> to vector<64x32xf32>
    %529 = vector.broadcast %527 : vector<1x32xf32> to vector<64x32xf32>
    %530 = arith.mulf %528, %529 : vector<64x32xf32>
    %531 = arith.addf %525, %530 : vector<64x32xf32>
    %c3_141 = arith.constant 3 : index
    %c1_142 = arith.constant 1 : index
    %c1_143 = arith.constant 1 : index
    %c0_144 = arith.constant 0 : index
    %532 = vector.load %arg1[%c3_141, %c1_142, %c1_143, %c0_144] : memref<4x9x9x2xf32, #tpu.memory_space<vmem>>, vector<1x8x8x2xf32>
    %533 = vector.shape_cast %532 : vector<1x8x8x2xf32> to vector<8x8x2xf32>
    %534 = vector.shape_cast %533 : vector<8x8x2xf32> to vector<64x2xf32>
    %535 = vector.extract_strided_slice %534 {offsets = [0, 0], sizes = [64, 1], strides = [1, 1]} : vector<64x2xf32> to vector<64x1xf32>
    %536 = vector.extract_strided_slice %0 {offsets = [16, 0], sizes = [1, 32], strides = [1, 1]} : vector<18x32xf32> to vector<1x32xf32>
    %537 = vector.broadcast %535 : vector<64x1xf32> to vector<64x32xf32>
    %538 = vector.broadcast %536 : vector<1x32xf32> to vector<64x32xf32>
    %539 = arith.mulf %537, %538 : vector<64x32xf32>
    %540 = arith.addf %531, %539 : vector<64x32xf32>
    %541 = vector.extract_strided_slice %534 {offsets = [0, 1], sizes = [64, 1], strides = [1, 1]} : vector<64x2xf32> to vector<64x1xf32>
    %542 = vector.extract_strided_slice %0 {offsets = [17, 0], sizes = [1, 32], strides = [1, 1]} : vector<18x32xf32> to vector<1x32xf32>
    %543 = vector.broadcast %541 : vector<64x1xf32> to vector<64x32xf32>
    %544 = vector.broadcast %542 : vector<1x32xf32> to vector<64x32xf32>
    %545 = arith.mulf %543, %544 : vector<64x32xf32>
    %546 = arith.addf %540, %545 : vector<64x32xf32>
    %547 = arith.maximumf %410, %546 : vector<64x32xf32>
    %c0_145 = arith.constant 0 : index
    %c0_146 = arith.constant 0 : index
    %548 = vector.load %arg3[%c0_145, %c0_146] : memref<1x32xf32, #tpu.memory_space<vmem>>, vector<1x32xf32>
    %549 = vector.broadcast %548 : vector<1x32xf32> to vector<64x32xf32>
    %550 = arith.addf %547, %549 : vector<64x32xf32>
    %cst_147 = arith.constant 0.000000e+00 : f32
    %551 = vector.broadcast %cst_147 : f32 to vector<64x32xf32>
    %552 = arith.maximumf %550, %551 : vector<64x32xf32>
    %cst_148 = arith.constant 0.000000e+00 : f32
    %553 = vector.broadcast %cst_148 : f32 to vector<10x10x32xf32>
    %c0_149 = arith.constant 0 : index
    %c0_150 = arith.constant 0 : index
    %c0_151 = arith.constant 0 : index
    %554 = vector.load %arg11[%c0_149, %c0_150, %c0_151] : memref<10x10x32xf32, #tpu.memory_space<vmem>>, vector<10x10x32xf32>
    tpu.vector_store %arg11[%c0_149, %c0_150, %c0_151], %553 {strides = array<i32>} : memref<10x10x32xf32, #tpu.memory_space<vmem>>, vector<10x10x32xf32>,
    %555 = vector.shape_cast %552 : vector<64x32xf32> to vector<8x8x32xf32>
    %c1_152 = arith.constant 1 : index
    %c1_153 = arith.constant 1 : index
    %c0_154 = arith.constant 0 : index
    %556 = vector.load %arg11[%c1_152, %c1_153, %c0_154] : memref<10x10x32xf32, #tpu.memory_space<vmem>>, vector<8x8x32xf32>
    tpu.vector_store %arg11[%c1_152, %c1_153, %c0_154], %555 {strides = array<i32>} : memref<10x10x32xf32, #tpu.memory_space<vmem>>, vector<8x8x32xf32>,
    %cst_155 = arith.constant 0.000000e+00 : f32
    %557 = vector.broadcast %cst_155 : f32 to vector<64x64xf32>
    %c0_156 = arith.constant 0 : index
    %c0_157 = arith.constant 0 : index
    %c0_158 = arith.constant 0 : index
    %558 = vector.load %arg11[%c0_156, %c0_157, %c0_158] : memref<10x10x32xf32, #tpu.memory_space<vmem>>, vector<8x8x32xf32>
    %559 = vector.shape_cast %558 : vector<8x8x32xf32> to vector<64x32xf32>
    %c0_159 = arith.constant 0 : index
    %c0_160 = arith.constant 0 : index
    %c0_161 = arith.constant 0 : index
    %560 = vector.load %arg4[%c0_159, %c0_160, %c0_161] : memref<9x32x64xf32, #tpu.memory_space<vmem>>, vector<1x32x64xf32>
    %561 = vector.shape_cast %560 : vector<1x32x64xf32> to vector<32x64xf32>
    %cst_162 = arith.constant dense<0.000000e+00> : vector<64x64xf32>
    %562 = tpu.matmul %559, %561, %cst_162 {dimension_numbers = #tpu.dot_dimension_numbers<[1], [0], [0], [1], [0, 0, 1, 1], [], []>} : vector<64x32xf32>, vector<32x64xf32>, vector<64x64xf32> -> vector<64x64xf32>
    %563 = arith.addf %557, %562 : vector<64x64xf32>
    %c0_163 = arith.constant 0 : index
    %c1_164 = arith.constant 1 : index
    %c0_165 = arith.constant 0 : index
    %564 = vector.load %arg11[%c0_163, %c1_164, %c0_165] : memref<10x10x32xf32, #tpu.memory_space<vmem>>, vector<8x8x32xf32>
    %565 = vector.shape_cast %564 : vector<8x8x32xf32> to vector<64x32xf32>
    %c1_166 = arith.constant 1 : index
    %c0_167 = arith.constant 0 : index
    %c0_168 = arith.constant 0 : index
    %566 = vector.load %arg4[%c1_166, %c0_167, %c0_168] : memref<9x32x64xf32, #tpu.memory_space<vmem>>, vector<1x32x64xf32>
    %567 = vector.shape_cast %566 : vector<1x32x64xf32> to vector<32x64xf32>
    %cst_169 = arith.constant dense<0.000000e+00> : vector<64x64xf32>
    %568 = tpu.matmul %565, %567, %cst_169 {dimension_numbers = #tpu.dot_dimension_numbers<[1], [0], [0], [1], [0, 0, 1, 1], [], []>} : vector<64x32xf32>, vector<32x64xf32>, vector<64x64xf32> -> vector<64x64xf32>
    %569 = arith.addf %563, %568 : vector<64x64xf32>
    %c0_170 = arith.constant 0 : index
    %c2_171 = arith.constant 2 : index
    %c0_172 = arith.constant 0 : index
    %570 = vector.load %arg11[%c0_170, %c2_171, %c0_172] : memref<10x10x32xf32, #tpu.memory_space<vmem>>, vector<8x8x32xf32>
    %571 = vector.shape_cast %570 : vector<8x8x32xf32> to vector<64x32xf32>
    %c2_173 = arith.constant 2 : index
    %c0_174 = arith.constant 0 : index
    %c0_175 = arith.constant 0 : index
    %572 = vector.load %arg4[%c2_173, %c0_174, %c0_175] : memref<9x32x64xf32, #tpu.memory_space<vmem>>, vector<1x32x64xf32>
    %573 = vector.shape_cast %572 : vector<1x32x64xf32> to vector<32x64xf32>
    %cst_176 = arith.constant dense<0.000000e+00> : vector<64x64xf32>
    %574 = tpu.matmul %571, %573, %cst_176 {dimension_numbers = #tpu.dot_dimension_numbers<[1], [0], [0], [1], [0, 0, 1, 1], [], []>} : vector<64x32xf32>, vector<32x64xf32>, vector<64x64xf32> -> vector<64x64xf32>
    %575 = arith.addf %569, %574 : vector<64x64xf32>
    %c1_177 = arith.constant 1 : index
    %c0_178 = arith.constant 0 : index
    %c0_179 = arith.constant 0 : index
    %576 = vector.load %arg11[%c1_177, %c0_178, %c0_179] : memref<10x10x32xf32, #tpu.memory_space<vmem>>, vector<8x8x32xf32>
    %577 = vector.shape_cast %576 : vector<8x8x32xf32> to vector<64x32xf32>
    %c3_180 = arith.constant 3 : index
    %c0_181 = arith.constant 0 : index
    %c0_182 = arith.constant 0 : index
    %578 = vector.load %arg4[%c3_180, %c0_181, %c0_182] : memref<9x32x64xf32, #tpu.memory_space<vmem>>, vector<1x32x64xf32>
    %579 = vector.shape_cast %578 : vector<1x32x64xf32> to vector<32x64xf32>
    %cst_183 = arith.constant dense<0.000000e+00> : vector<64x64xf32>
    %580 = tpu.matmul %577, %579, %cst_183 {dimension_numbers = #tpu.dot_dimension_numbers<[1], [0], [0], [1], [0, 0, 1, 1], [], []>} : vector<64x32xf32>, vector<32x64xf32>, vector<64x64xf32> -> vector<64x64xf32>
    %581 = arith.addf %575, %580 : vector<64x64xf32>
    %c1_184 = arith.constant 1 : index
    %c1_185 = arith.constant 1 : index
    %c0_186 = arith.constant 0 : index
    %582 = vector.load %arg11[%c1_184, %c1_185, %c0_186] : memref<10x10x32xf32, #tpu.memory_space<vmem>>, vector<8x8x32xf32>
    %583 = vector.shape_cast %582 : vector<8x8x32xf32> to vector<64x32xf32>
    %c4 = arith.constant 4 : index
    %c0_187 = arith.constant 0 : index
    %c0_188 = arith.constant 0 : index
    %584 = vector.load %arg4[%c4, %c0_187, %c0_188] : memref<9x32x64xf32, #tpu.memory_space<vmem>>, vector<1x32x64xf32>
    %585 = vector.shape_cast %584 : vector<1x32x64xf32> to vector<32x64xf32>
    %cst_189 = arith.constant dense<0.000000e+00> : vector<64x64xf32>
    %586 = tpu.matmul %583, %585, %cst_189 {dimension_numbers = #tpu.dot_dimension_numbers<[1], [0], [0], [1], [0, 0, 1, 1], [], []>} : vector<64x32xf32>, vector<32x64xf32>, vector<64x64xf32> -> vector<64x64xf32>
    %587 = arith.addf %581, %586 : vector<64x64xf32>
    %c1_190 = arith.constant 1 : index
    %c2_191 = arith.constant 2 : index
    %c0_192 = arith.constant 0 : index
    %588 = vector.load %arg11[%c1_190, %c2_191, %c0_192] : memref<10x10x32xf32, #tpu.memory_space<vmem>>, vector<8x8x32xf32>
    %589 = vector.shape_cast %588 : vector<8x8x32xf32> to vector<64x32xf32>
    %c5 = arith.constant 5 : index
    %c0_193 = arith.constant 0 : index
    %c0_194 = arith.constant 0 : index
    %590 = vector.load %arg4[%c5, %c0_193, %c0_194] : memref<9x32x64xf32, #tpu.memory_space<vmem>>, vector<1x32x64xf32>
    %591 = vector.shape_cast %590 : vector<1x32x64xf32> to vector<32x64xf32>
    %cst_195 = arith.constant dense<0.000000e+00> : vector<64x64xf32>
    %592 = tpu.matmul %589, %591, %cst_195 {dimension_numbers = #tpu.dot_dimension_numbers<[1], [0], [0], [1], [0, 0, 1, 1], [], []>} : vector<64x32xf32>, vector<32x64xf32>, vector<64x64xf32> -> vector<64x64xf32>
    %593 = arith.addf %587, %592 : vector<64x64xf32>
    %c2_196 = arith.constant 2 : index
    %c0_197 = arith.constant 0 : index
    %c0_198 = arith.constant 0 : index
    %594 = vector.load %arg11[%c2_196, %c0_197, %c0_198] : memref<10x10x32xf32, #tpu.memory_space<vmem>>, vector<8x8x32xf32>
    %595 = vector.shape_cast %594 : vector<8x8x32xf32> to vector<64x32xf32>
    %c6 = arith.constant 6 : index
    %c0_199 = arith.constant 0 : index
    %c0_200 = arith.constant 0 : index
    %596 = vector.load %arg4[%c6, %c0_199, %c0_200] : memref<9x32x64xf32, #tpu.memory_space<vmem>>, vector<1x32x64xf32>
    %597 = vector.shape_cast %596 : vector<1x32x64xf32> to vector<32x64xf32>
    %cst_201 = arith.constant dense<0.000000e+00> : vector<64x64xf32>
    %598 = tpu.matmul %595, %597, %cst_201 {dimension_numbers = #tpu.dot_dimension_numbers<[1], [0], [0], [1], [0, 0, 1, 1], [], []>} : vector<64x32xf32>, vector<32x64xf32>, vector<64x64xf32> -> vector<64x64xf32>
    %599 = arith.addf %593, %598 : vector<64x64xf32>
    %c2_202 = arith.constant 2 : index
    %c1_203 = arith.constant 1 : index
    %c0_204 = arith.constant 0 : index
    %600 = vector.load %arg11[%c2_202, %c1_203, %c0_204] : memref<10x10x32xf32, #tpu.memory_space<vmem>>, vector<8x8x32xf32>
    %601 = vector.shape_cast %600 : vector<8x8x32xf32> to vector<64x32xf32>
    %c7 = arith.constant 7 : index
    %c0_205 = arith.constant 0 : index
    %c0_206 = arith.constant 0 : index
    %602 = vector.load %arg4[%c7, %c0_205, %c0_206] : memref<9x32x64xf32, #tpu.memory_space<vmem>>, vector<1x32x64xf32>
    %603 = vector.shape_cast %602 : vector<1x32x64xf32> to vector<32x64xf32>
    %cst_207 = arith.constant dense<0.000000e+00> : vector<64x64xf32>
    %604 = tpu.matmul %601, %603, %cst_207 {dimension_numbers = #tpu.dot_dimension_numbers<[1], [0], [0], [1], [0, 0, 1, 1], [], []>} : vector<64x32xf32>, vector<32x64xf32>, vector<64x64xf32> -> vector<64x64xf32>
    %605 = arith.addf %599, %604 : vector<64x64xf32>
    %c2_208 = arith.constant 2 : index
    %c2_209 = arith.constant 2 : index
    %c0_210 = arith.constant 0 : index
    %606 = vector.load %arg11[%c2_208, %c2_209, %c0_210] : memref<10x10x32xf32, #tpu.memory_space<vmem>>, vector<8x8x32xf32>
    %607 = vector.shape_cast %606 : vector<8x8x32xf32> to vector<64x32xf32>
    %c8 = arith.constant 8 : index
    %c0_211 = arith.constant 0 : index
    %c0_212 = arith.constant 0 : index
    %608 = vector.load %arg4[%c8, %c0_211, %c0_212] : memref<9x32x64xf32, #tpu.memory_space<vmem>>, vector<1x32x64xf32>
    %609 = vector.shape_cast %608 : vector<1x32x64xf32> to vector<32x64xf32>
    %cst_213 = arith.constant dense<0.000000e+00> : vector<64x64xf32>
    %610 = tpu.matmul %607, %609, %cst_213 {dimension_numbers = #tpu.dot_dimension_numbers<[1], [0], [0], [1], [0, 0, 1, 1], [], []>} : vector<64x32xf32>, vector<32x64xf32>, vector<64x64xf32> -> vector<64x64xf32>
    %611 = arith.addf %605, %610 : vector<64x64xf32>
    %612 = vector.shape_cast %611 : vector<64x64xf32> to vector<4x2x8x64xf32>
    %cst_214 = arith.constant dense<0xFF800000> : vector<4x8x64xf32>
    %613 = vector.multi_reduction <maximumf>, %612, %cst_214 [1] : vector<4x2x8x64xf32> to vector<4x8x64xf32>
    %c0_215 = arith.constant 0 : index
    %c0_216 = arith.constant 0 : index
    %614 = vector.load %arg5[%c0_215, %c0_216] : memref<1x64xf32, #tpu.memory_space<vmem>>, vector<1x64xf32>
    %c0_217 = arith.constant 0 : index
    %c0_218 = arith.constant 0 : index
    %615 = vector.load %arg7[%c0_217, %c0_218] : memref<1x128xf32, #tpu.memory_space<vmem>>, vector<1x128xf32>
    %616 = vector.extract_strided_slice %613 {offsets = [0, 0, 0], sizes = [4, 1, 64], strides = [1, 1, 1]} : vector<4x8x64xf32> to vector<4x1x64xf32>
    %617 = vector.extract_strided_slice %613 {offsets = [0, 1, 0], sizes = [4, 1, 64], strides = [1, 1, 1]} : vector<4x8x64xf32> to vector<4x1x64xf32>
    %618 = arith.maximumf %616, %617 : vector<4x1x64xf32>
    %619 = vector.shape_cast %614 : vector<1x64xf32> to vector<1x1x64xf32>
    %620 = vector.broadcast %619 : vector<1x1x64xf32> to vector<4x1x64xf32>
    %621 = arith.addf %618, %620 : vector<4x1x64xf32>
    %cst_219 = arith.constant 0.000000e+00 : f32
    %622 = vector.broadcast %cst_219 : f32 to vector<4x1x64xf32>
    %623 = arith.maximumf %621, %622 : vector<4x1x64xf32>
    %624 = vector.extract_strided_slice %623 {offsets = [0, 0, 0], sizes = [1, 1, 64], strides = [1, 1, 1]} : vector<4x1x64xf32> to vector<1x1x64xf32>
    %625 = vector.shape_cast %624 : vector<1x1x64xf32> to vector<1x64xf32>
    %c0_220 = arith.constant 0 : index
    %c0_221 = arith.constant 0 : index
    %c0_222 = arith.constant 0 : index
    %626 = vector.load %arg6[%c0_220, %c0_221, %c0_222] : memref<16x64x128xf32, #tpu.memory_space<vmem>>, vector<1x64x128xf32>
    %627 = vector.shape_cast %626 : vector<1x64x128xf32> to vector<64x128xf32>
    %cst_223 = arith.constant dense<0.000000e+00> : vector<1x128xf32>
    %628 = tpu.matmul %625, %627, %cst_223 {dimension_numbers = #tpu.dot_dimension_numbers<[1], [0], [0], [1], [0, 0, 1, 1], [], []>} : vector<1x64xf32>, vector<64x128xf32>, vector<1x128xf32> -> vector<1x128xf32>
    %629 = arith.addf %615, %628 : vector<1x128xf32>
    %630 = vector.extract_strided_slice %623 {offsets = [1, 0, 0], sizes = [1, 1, 64], strides = [1, 1, 1]} : vector<4x1x64xf32> to vector<1x1x64xf32>
    %631 = vector.shape_cast %630 : vector<1x1x64xf32> to vector<1x64xf32>
    %c4_224 = arith.constant 4 : index
    %c0_225 = arith.constant 0 : index
    %c0_226 = arith.constant 0 : index
    %632 = vector.load %arg6[%c4_224, %c0_225, %c0_226] : memref<16x64x128xf32, #tpu.memory_space<vmem>>, vector<1x64x128xf32>
    %633 = vector.shape_cast %632 : vector<1x64x128xf32> to vector<64x128xf32>
    %cst_227 = arith.constant dense<0.000000e+00> : vector<1x128xf32>
    %634 = tpu.matmul %631, %633, %cst_227 {dimension_numbers = #tpu.dot_dimension_numbers<[1], [0], [0], [1], [0, 0, 1, 1], [], []>} : vector<1x64xf32>, vector<64x128xf32>, vector<1x128xf32> -> vector<1x128xf32>
    %635 = arith.addf %629, %634 : vector<1x128xf32>
    %636 = vector.extract_strided_slice %623 {offsets = [2, 0, 0], sizes = [1, 1, 64], strides = [1, 1, 1]} : vector<4x1x64xf32> to vector<1x1x64xf32>
    %637 = vector.shape_cast %636 : vector<1x1x64xf32> to vector<1x64xf32>
    %c8_228 = arith.constant 8 : index
    %c0_229 = arith.constant 0 : index
    %c0_230 = arith.constant 0 : index
    %638 = vector.load %arg6[%c8_228, %c0_229, %c0_230] : memref<16x64x128xf32, #tpu.memory_space<vmem>>, vector<1x64x128xf32>
    %639 = vector.shape_cast %638 : vector<1x64x128xf32> to vector<64x128xf32>
    %cst_231 = arith.constant dense<0.000000e+00> : vector<1x128xf32>
    %640 = tpu.matmul %637, %639, %cst_231 {dimension_numbers = #tpu.dot_dimension_numbers<[1], [0], [0], [1], [0, 0, 1, 1], [], []>} : vector<1x64xf32>, vector<64x128xf32>, vector<1x128xf32> -> vector<1x128xf32>
    %641 = arith.addf %635, %640 : vector<1x128xf32>
    %642 = vector.extract_strided_slice %623 {offsets = [3, 0, 0], sizes = [1, 1, 64], strides = [1, 1, 1]} : vector<4x1x64xf32> to vector<1x1x64xf32>
    %643 = vector.shape_cast %642 : vector<1x1x64xf32> to vector<1x64xf32>
    %c12 = arith.constant 12 : index
    %c0_232 = arith.constant 0 : index
    %c0_233 = arith.constant 0 : index
    %644 = vector.load %arg6[%c12, %c0_232, %c0_233] : memref<16x64x128xf32, #tpu.memory_space<vmem>>, vector<1x64x128xf32>
    %645 = vector.shape_cast %644 : vector<1x64x128xf32> to vector<64x128xf32>
    %cst_234 = arith.constant dense<0.000000e+00> : vector<1x128xf32>
    %646 = tpu.matmul %643, %645, %cst_234 {dimension_numbers = #tpu.dot_dimension_numbers<[1], [0], [0], [1], [0, 0, 1, 1], [], []>} : vector<1x64xf32>, vector<64x128xf32>, vector<1x128xf32> -> vector<1x128xf32>
    %647 = arith.addf %641, %646 : vector<1x128xf32>
    %648 = vector.extract_strided_slice %613 {offsets = [0, 2, 0], sizes = [4, 1, 64], strides = [1, 1, 1]} : vector<4x8x64xf32> to vector<4x1x64xf32>
    %649 = vector.extract_strided_slice %613 {offsets = [0, 3, 0], sizes = [4, 1, 64], strides = [1, 1, 1]} : vector<4x8x64xf32> to vector<4x1x64xf32>
    %650 = arith.maximumf %648, %649 : vector<4x1x64xf32>
    %651 = vector.shape_cast %614 : vector<1x64xf32> to vector<1x1x64xf32>
    %652 = vector.broadcast %651 : vector<1x1x64xf32> to vector<4x1x64xf32>
    %653 = arith.addf %650, %652 : vector<4x1x64xf32>
    %cst_235 = arith.constant 0.000000e+00 : f32
    %654 = vector.broadcast %cst_235 : f32 to vector<4x1x64xf32>
    %655 = arith.maximumf %653, %654 : vector<4x1x64xf32>
    %656 = vector.extract_strided_slice %655 {offsets = [0, 0, 0], sizes = [1, 1, 64], strides = [1, 1, 1]} : vector<4x1x64xf32> to vector<1x1x64xf32>
    %657 = vector.shape_cast %656 : vector<1x1x64xf32> to vector<1x64xf32>
    %c1_236 = arith.constant 1 : index
    %c0_237 = arith.constant 0 : index
    %c0_238 = arith.constant 0 : index
    %658 = vector.load %arg6[%c1_236, %c0_237, %c0_238] : memref<16x64x128xf32, #tpu.memory_space<vmem>>, vector<1x64x128xf32>
    %659 = vector.shape_cast %658 : vector<1x64x128xf32> to vector<64x128xf32>
    %cst_239 = arith.constant dense<0.000000e+00> : vector<1x128xf32>
    %660 = tpu.matmul %657, %659, %cst_239 {dimension_numbers = #tpu.dot_dimension_numbers<[1], [0], [0], [1], [0, 0, 1, 1], [], []>} : vector<1x64xf32>, vector<64x128xf32>, vector<1x128xf32> -> vector<1x128xf32>
    %661 = arith.addf %647, %660 : vector<1x128xf32>
    %662 = vector.extract_strided_slice %655 {offsets = [1, 0, 0], sizes = [1, 1, 64], strides = [1, 1, 1]} : vector<4x1x64xf32> to vector<1x1x64xf32>
    %663 = vector.shape_cast %662 : vector<1x1x64xf32> to vector<1x64xf32>
    %c5_240 = arith.constant 5 : index
    %c0_241 = arith.constant 0 : index
    %c0_242 = arith.constant 0 : index
    %664 = vector.load %arg6[%c5_240, %c0_241, %c0_242] : memref<16x64x128xf32, #tpu.memory_space<vmem>>, vector<1x64x128xf32>
    %665 = vector.shape_cast %664 : vector<1x64x128xf32> to vector<64x128xf32>
    %cst_243 = arith.constant dense<0.000000e+00> : vector<1x128xf32>
    %666 = tpu.matmul %663, %665, %cst_243 {dimension_numbers = #tpu.dot_dimension_numbers<[1], [0], [0], [1], [0, 0, 1, 1], [], []>} : vector<1x64xf32>, vector<64x128xf32>, vector<1x128xf32> -> vector<1x128xf32>
    %667 = arith.addf %661, %666 : vector<1x128xf32>
    %668 = vector.extract_strided_slice %655 {offsets = [2, 0, 0], sizes = [1, 1, 64], strides = [1, 1, 1]} : vector<4x1x64xf32> to vector<1x1x64xf32>
    %669 = vector.shape_cast %668 : vector<1x1x64xf32> to vector<1x64xf32>
    %c9 = arith.constant 9 : index
    %c0_244 = arith.constant 0 : index
    %c0_245 = arith.constant 0 : index
    %670 = vector.load %arg6[%c9, %c0_244, %c0_245] : memref<16x64x128xf32, #tpu.memory_space<vmem>>, vector<1x64x128xf32>
    %671 = vector.shape_cast %670 : vector<1x64x128xf32> to vector<64x128xf32>
    %cst_246 = arith.constant dense<0.000000e+00> : vector<1x128xf32>
    %672 = tpu.matmul %669, %671, %cst_246 {dimension_numbers = #tpu.dot_dimension_numbers<[1], [0], [0], [1], [0, 0, 1, 1], [], []>} : vector<1x64xf32>, vector<64x128xf32>, vector<1x128xf32> -> vector<1x128xf32>
    %673 = arith.addf %667, %672 : vector<1x128xf32>
    %674 = vector.extract_strided_slice %655 {offsets = [3, 0, 0], sizes = [1, 1, 64], strides = [1, 1, 1]} : vector<4x1x64xf32> to vector<1x1x64xf32>
    %675 = vector.shape_cast %674 : vector<1x1x64xf32> to vector<1x64xf32>
    %c13 = arith.constant 13 : index
    %c0_247 = arith.constant 0 : index
    %c0_248 = arith.constant 0 : index
    %676 = vector.load %arg6[%c13, %c0_247, %c0_248] : memref<16x64x128xf32, #tpu.memory_space<vmem>>, vector<1x64x128xf32>
    %677 = vector.shape_cast %676 : vector<1x64x128xf32> to vector<64x128xf32>
    %cst_249 = arith.constant dense<0.000000e+00> : vector<1x128xf32>
    %678 = tpu.matmul %675, %677, %cst_249 {dimension_numbers = #tpu.dot_dimension_numbers<[1], [0], [0], [1], [0, 0, 1, 1], [], []>} : vector<1x64xf32>, vector<64x128xf32>, vector<1x128xf32> -> vector<1x128xf32>
    %679 = arith.addf %673, %678 : vector<1x128xf32>
    %680 = vector.extract_strided_slice %613 {offsets = [0, 4, 0], sizes = [4, 1, 64], strides = [1, 1, 1]} : vector<4x8x64xf32> to vector<4x1x64xf32>
    %681 = vector.extract_strided_slice %613 {offsets = [0, 5, 0], sizes = [4, 1, 64], strides = [1, 1, 1]} : vector<4x8x64xf32> to vector<4x1x64xf32>
    %682 = arith.maximumf %680, %681 : vector<4x1x64xf32>
    %683 = vector.shape_cast %614 : vector<1x64xf32> to vector<1x1x64xf32>
    %684 = vector.broadcast %683 : vector<1x1x64xf32> to vector<4x1x64xf32>
    %685 = arith.addf %682, %684 : vector<4x1x64xf32>
    %cst_250 = arith.constant 0.000000e+00 : f32
    %686 = vector.broadcast %cst_250 : f32 to vector<4x1x64xf32>
    %687 = arith.maximumf %685, %686 : vector<4x1x64xf32>
    %688 = vector.extract_strided_slice %687 {offsets = [0, 0, 0], sizes = [1, 1, 64], strides = [1, 1, 1]} : vector<4x1x64xf32> to vector<1x1x64xf32>
    %689 = vector.shape_cast %688 : vector<1x1x64xf32> to vector<1x64xf32>
    %c2_251 = arith.constant 2 : index
    %c0_252 = arith.constant 0 : index
    %c0_253 = arith.constant 0 : index
    %690 = vector.load %arg6[%c2_251, %c0_252, %c0_253] : memref<16x64x128xf32, #tpu.memory_space<vmem>>, vector<1x64x128xf32>
    %691 = vector.shape_cast %690 : vector<1x64x128xf32> to vector<64x128xf32>
    %cst_254 = arith.constant dense<0.000000e+00> : vector<1x128xf32>
    %692 = tpu.matmul %689, %691, %cst_254 {dimension_numbers = #tpu.dot_dimension_numbers<[1], [0], [0], [1], [0, 0, 1, 1], [], []>} : vector<1x64xf32>, vector<64x128xf32>, vector<1x128xf32> -> vector<1x128xf32>
    %693 = arith.addf %679, %692 : vector<1x128xf32>
    %694 = vector.extract_strided_slice %687 {offsets = [1, 0, 0], sizes = [1, 1, 64], strides = [1, 1, 1]} : vector<4x1x64xf32> to vector<1x1x64xf32>
    %695 = vector.shape_cast %694 : vector<1x1x64xf32> to vector<1x64xf32>
    %c6_255 = arith.constant 6 : index
    %c0_256 = arith.constant 0 : index
    %c0_257 = arith.constant 0 : index
    %696 = vector.load %arg6[%c6_255, %c0_256, %c0_257] : memref<16x64x128xf32, #tpu.memory_space<vmem>>, vector<1x64x128xf32>
    %697 = vector.shape_cast %696 : vector<1x64x128xf32> to vector<64x128xf32>
    %cst_258 = arith.constant dense<0.000000e+00> : vector<1x128xf32>
    %698 = tpu.matmul %695, %697, %cst_258 {dimension_numbers = #tpu.dot_dimension_numbers<[1], [0], [0], [1], [0, 0, 1, 1], [], []>} : vector<1x64xf32>, vector<64x128xf32>, vector<1x128xf32> -> vector<1x128xf32>
    %699 = arith.addf %693, %698 : vector<1x128xf32>
    %700 = vector.extract_strided_slice %687 {offsets = [2, 0, 0], sizes = [1, 1, 64], strides = [1, 1, 1]} : vector<4x1x64xf32> to vector<1x1x64xf32>
    %701 = vector.shape_cast %700 : vector<1x1x64xf32> to vector<1x64xf32>
    %c10 = arith.constant 10 : index
    %c0_259 = arith.constant 0 : index
    %c0_260 = arith.constant 0 : index
    %702 = vector.load %arg6[%c10, %c0_259, %c0_260] : memref<16x64x128xf32, #tpu.memory_space<vmem>>, vector<1x64x128xf32>
    %703 = vector.shape_cast %702 : vector<1x64x128xf32> to vector<64x128xf32>
    %cst_261 = arith.constant dense<0.000000e+00> : vector<1x128xf32>
    %704 = tpu.matmul %701, %703, %cst_261 {dimension_numbers = #tpu.dot_dimension_numbers<[1], [0], [0], [1], [0, 0, 1, 1], [], []>} : vector<1x64xf32>, vector<64x128xf32>, vector<1x128xf32> -> vector<1x128xf32>
    %705 = arith.addf %699, %704 : vector<1x128xf32>
    %706 = vector.extract_strided_slice %687 {offsets = [3, 0, 0], sizes = [1, 1, 64], strides = [1, 1, 1]} : vector<4x1x64xf32> to vector<1x1x64xf32>
    %707 = vector.shape_cast %706 : vector<1x1x64xf32> to vector<1x64xf32>
    %c14 = arith.constant 14 : index
    %c0_262 = arith.constant 0 : index
    %c0_263 = arith.constant 0 : index
    %708 = vector.load %arg6[%c14, %c0_262, %c0_263] : memref<16x64x128xf32, #tpu.memory_space<vmem>>, vector<1x64x128xf32>
    %709 = vector.shape_cast %708 : vector<1x64x128xf32> to vector<64x128xf32>
    %cst_264 = arith.constant dense<0.000000e+00> : vector<1x128xf32>
    %710 = tpu.matmul %707, %709, %cst_264 {dimension_numbers = #tpu.dot_dimension_numbers<[1], [0], [0], [1], [0, 0, 1, 1], [], []>} : vector<1x64xf32>, vector<64x128xf32>, vector<1x128xf32> -> vector<1x128xf32>
    %711 = arith.addf %705, %710 : vector<1x128xf32>
    %712 = vector.extract_strided_slice %613 {offsets = [0, 6, 0], sizes = [4, 1, 64], strides = [1, 1, 1]} : vector<4x8x64xf32> to vector<4x1x64xf32>
    %713 = vector.extract_strided_slice %613 {offsets = [0, 7, 0], sizes = [4, 1, 64], strides = [1, 1, 1]} : vector<4x8x64xf32> to vector<4x1x64xf32>
    %714 = arith.maximumf %712, %713 : vector<4x1x64xf32>
    %715 = vector.shape_cast %614 : vector<1x64xf32> to vector<1x1x64xf32>
    %716 = vector.broadcast %715 : vector<1x1x64xf32> to vector<4x1x64xf32>
    %717 = arith.addf %714, %716 : vector<4x1x64xf32>
    %cst_265 = arith.constant 0.000000e+00 : f32
    %718 = vector.broadcast %cst_265 : f32 to vector<4x1x64xf32>
    %719 = arith.maximumf %717, %718 : vector<4x1x64xf32>
    %720 = vector.extract_strided_slice %719 {offsets = [0, 0, 0], sizes = [1, 1, 64], strides = [1, 1, 1]} : vector<4x1x64xf32> to vector<1x1x64xf32>
    %721 = vector.shape_cast %720 : vector<1x1x64xf32> to vector<1x64xf32>
    %c3_266 = arith.constant 3 : index
    %c0_267 = arith.constant 0 : index
    %c0_268 = arith.constant 0 : index
    %722 = vector.load %arg6[%c3_266, %c0_267, %c0_268] : memref<16x64x128xf32, #tpu.memory_space<vmem>>, vector<1x64x128xf32>
    %723 = vector.shape_cast %722 : vector<1x64x128xf32> to vector<64x128xf32>
    %cst_269 = arith.constant dense<0.000000e+00> : vector<1x128xf32>
    %724 = tpu.matmul %721, %723, %cst_269 {dimension_numbers = #tpu.dot_dimension_numbers<[1], [0], [0], [1], [0, 0, 1, 1], [], []>} : vector<1x64xf32>, vector<64x128xf32>, vector<1x128xf32> -> vector<1x128xf32>
    %725 = arith.addf %711, %724 : vector<1x128xf32>
    %726 = vector.extract_strided_slice %719 {offsets = [1, 0, 0], sizes = [1, 1, 64], strides = [1, 1, 1]} : vector<4x1x64xf32> to vector<1x1x64xf32>
    %727 = vector.shape_cast %726 : vector<1x1x64xf32> to vector<1x64xf32>
    %c7_270 = arith.constant 7 : index
    %c0_271 = arith.constant 0 : index
    %c0_272 = arith.constant 0 : index
    %728 = vector.load %arg6[%c7_270, %c0_271, %c0_272] : memref<16x64x128xf32, #tpu.memory_space<vmem>>, vector<1x64x128xf32>
    %729 = vector.shape_cast %728 : vector<1x64x128xf32> to vector<64x128xf32>
    %cst_273 = arith.constant dense<0.000000e+00> : vector<1x128xf32>
    %730 = tpu.matmul %727, %729, %cst_273 {dimension_numbers = #tpu.dot_dimension_numbers<[1], [0], [0], [1], [0, 0, 1, 1], [], []>} : vector<1x64xf32>, vector<64x128xf32>, vector<1x128xf32> -> vector<1x128xf32>
    %731 = arith.addf %725, %730 : vector<1x128xf32>
    %732 = vector.extract_strided_slice %719 {offsets = [2, 0, 0], sizes = [1, 1, 64], strides = [1, 1, 1]} : vector<4x1x64xf32> to vector<1x1x64xf32>
    %733 = vector.shape_cast %732 : vector<1x1x64xf32> to vector<1x64xf32>
    %c11 = arith.constant 11 : index
    %c0_274 = arith.constant 0 : index
    %c0_275 = arith.constant 0 : index
    %734 = vector.load %arg6[%c11, %c0_274, %c0_275] : memref<16x64x128xf32, #tpu.memory_space<vmem>>, vector<1x64x128xf32>
    %735 = vector.shape_cast %734 : vector<1x64x128xf32> to vector<64x128xf32>
    %cst_276 = arith.constant dense<0.000000e+00> : vector<1x128xf32>
    %736 = tpu.matmul %733, %735, %cst_276 {dimension_numbers = #tpu.dot_dimension_numbers<[1], [0], [0], [1], [0, 0, 1, 1], [], []>} : vector<1x64xf32>, vector<64x128xf32>, vector<1x128xf32> -> vector<1x128xf32>
    %737 = arith.addf %731, %736 : vector<1x128xf32>
    %738 = vector.extract_strided_slice %719 {offsets = [3, 0, 0], sizes = [1, 1, 64], strides = [1, 1, 1]} : vector<4x1x64xf32> to vector<1x1x64xf32>
    %739 = vector.shape_cast %738 : vector<1x1x64xf32> to vector<1x64xf32>
    %c15 = arith.constant 15 : index
    %c0_277 = arith.constant 0 : index
    %c0_278 = arith.constant 0 : index
    %740 = vector.load %arg6[%c15, %c0_277, %c0_278] : memref<16x64x128xf32, #tpu.memory_space<vmem>>, vector<1x64x128xf32>
    %741 = vector.shape_cast %740 : vector<1x64x128xf32> to vector<64x128xf32>
    %cst_279 = arith.constant dense<0.000000e+00> : vector<1x128xf32>
    %742 = tpu.matmul %739, %741, %cst_279 {dimension_numbers = #tpu.dot_dimension_numbers<[1], [0], [0], [1], [0, 0, 1, 1], [], []>} : vector<1x64xf32>, vector<64x128xf32>, vector<1x128xf32> -> vector<1x128xf32>
    %743 = arith.addf %737, %742 : vector<1x128xf32>
    %cst_280 = arith.constant 0.000000e+00 : f32
    %744 = vector.broadcast %cst_280 : f32 to vector<1x128xf32>
    %745 = arith.maximumf %743, %744 : vector<1x128xf32>
    %c0_281 = arith.constant 0 : index
    %c0_282 = arith.constant 0 : index
    %746 = vector.load %arg8[%c0_281, %c0_282] : memref<128x128xf32, #tpu.memory_space<vmem>>, vector<128x128xf32>
    %cst_283 = arith.constant dense<0.000000e+00> : vector<1x128xf32>
    %747 = tpu.matmul %745, %746, %cst_283 {dimension_numbers = #tpu.dot_dimension_numbers<[1], [0], [0], [1], [0, 0, 1, 1], [], []>} : vector<1x128xf32>, vector<128x128xf32>, vector<1x128xf32> -> vector<1x128xf32>
    %c0_284 = arith.constant 0 : index
    %c0_285 = arith.constant 0 : index
    %748 = vector.load %arg9[%c0_284, %c0_285] : memref<1x128xf32, #tpu.memory_space<vmem>>, vector<1x128xf32>
    %749 = arith.addf %747, %748 : vector<1x128xf32>
    %750 = vector.shape_cast %749 : vector<1x128xf32> to vector<1x1x128xf32>
    %c0_286 = arith.constant 0 : index
    %c0_287 = arith.constant 0 : index
    %c0_288 = arith.constant 0 : index
    %751 = vector.load %arg10[%c0_286, %c0_287, %c0_288] : memref<1x1x128xf32, #tpu.memory_space<vmem>>, vector<1x1x128xf32>
    tpu.vector_store %arg10[%c0_286, %c0_287, %c0_288], %750 {strides = array<i32>} : memref<1x1x128xf32, #tpu.memory_space<vmem>>, vector<1x1x128xf32>,
    return
  }
  func.func @transform_0(%arg0: i32) -> (i32, i32, i32, i32) {
    %c0_i32 = arith.constant 0 : i32
    %c0_i32_0 = arith.constant 0 : i32
    %c0_i32_1 = arith.constant 0 : i32
    %c0_i32_2 = arith.constant 0 : i32
    return %arg0, %c0_i32, %c0_i32_0, %c0_i32_1 : i32, i32, i32, i32
  }
  func.func @transform_1(%arg0: i32) -> (i32, i32) {
    %c0_i32 = arith.constant 0 : i32
    %c0_i32_0 = arith.constant 0 : i32
    %c0_i32_1 = arith.constant 0 : i32
    return %c0_i32, %c0_i32_0 : i32, i32
  }
  func.func @transform_2(%arg0: i32) -> (i32, i32) {
    %c0_i32 = arith.constant 0 : i32
    %c0_i32_0 = arith.constant 0 : i32
    %c0_i32_1 = arith.constant 0 : i32
    return %c0_i32, %c0_i32_0 : i32, i32
  }
  func.func @transform_3(%arg0: i32) -> (i32, i32, i32) {
    %c0_i32 = arith.constant 0 : i32
    %c0_i32_0 = arith.constant 0 : i32
    %c0_i32_1 = arith.constant 0 : i32
    %c0_i32_2 = arith.constant 0 : i32
    return %c0_i32, %c0_i32_0, %c0_i32_1 : i32, i32, i32
  }
  func.func @transform_4(%arg0: i32) -> (i32, i32) {
    %c0_i32 = arith.constant 0 : i32
    %c0_i32_0 = arith.constant 0 : i32
    %c0_i32_1 = arith.constant 0 : i32
    return %c0_i32, %c0_i32_0 : i32, i32
  }
  func.func @transform_5(%arg0: i32) -> (i32, i32, i32) {
    %c0_i32 = arith.constant 0 : i32
    %c0_i32_0 = arith.constant 0 : i32
    %c0_i32_1 = arith.constant 0 : i32
    %c0_i32_2 = arith.constant 0 : i32
    return %c0_i32, %c0_i32_0, %c0_i32_1 : i32, i32, i32
  }
  func.func @transform_6(%arg0: i32) -> (i32, i32) {
    %c0_i32 = arith.constant 0 : i32
    %c0_i32_0 = arith.constant 0 : i32
    %c0_i32_1 = arith.constant 0 : i32
    return %c0_i32, %c0_i32_0 : i32, i32
  }
  func.func @transform_7(%arg0: i32) -> (i32, i32) {
    %c0_i32 = arith.constant 0 : i32
    %c0_i32_0 = arith.constant 0 : i32
    %c0_i32_1 = arith.constant 0 : i32
    return %c0_i32, %c0_i32_0 : i32, i32
  }
  func.func @transform_8(%arg0: i32) -> (i32, i32) {
    %c0_i32 = arith.constant 0 : i32
    %c0_i32_0 = arith.constant 0 : i32
    %c0_i32_1 = arith.constant 0 : i32
    return %c0_i32, %c0_i32_0 : i32, i32
  }
  func.func @transform_9(%arg0: i32) -> (i32, i32, i32) {
    %c0_i32 = arith.constant 0 : i32
    %c0_i32_0 = arith.constant 0 : i32
    %c0_i32_1 = arith.constant 0 : i32
    return %arg0, %c0_i32, %c0_i32_0 : i32, i32, i32
  }
}

</mosaic_0001>

<bundles_post_ra>
// kernel: tpu_custom_call.1
= control target key start
LH: loop header
LB: loop body
LE: loop exit
PB: predicated region body
PF: predicated region fallthrough
CT: control target
= control target key end

     0   :  { %s11276_s0 = inlined_call_operand.vmem [shape: f32[8,9,9,2], index: 0, kind: input, shape index: {}]   ;;  %s11277_s1 = inlined_call_operand.hbm [shape: f32[18,32], index: 1, kind: input, shape index: {}]   ;;  %s11278_s2 = inlined_call_operand.vmem [shape: f32[1,32], index: 2, kind: input, shape index: {}]   ;;  %s11279_s3 = inlined_call_operand.vmem [shape: f32[9,32,64], index: 3, kind: input, shape index: {}]   ;;  %s11280_s4 = inlined_call_operand.vmem [shape: f32[1,64], index: 4, kind: input, shape index: {}]   ;;  %s11281_s5 = inlined_call_operand.vmem [shape: f32[16,64,128], index: 5, kind: input, shape index: {}]   ;;  %s11282_s6 = inlined_call_operand.hbm [shape: f32[1,128], index: 6, kind: input, shape index: {}]   ;;  %s11283_s7 = inlined_call_operand.hbm [shape: f32[128,128], index: 7, kind: input, shape index: {}]   ;;  %s11284_s8 = inlined_call_operand.vmem [shape: f32[1,128], index: 8, kind: input, shape index: {}]   ;;  %s11285_s9 = inlined_call_operand.hbm [shape: f32[2,1,128], index: 9, kind: output, shape index: {}]  }
   0x1   :  { %11444 = sst [smem:[#allocation117_spill]] %s11282_s6 }
   0x2   :  { %14 = vsyncpa [#allocation4], 0 }
   0x3   :  { %15 = vsyncpa [#allocation7], 0 }
   0x4   :  { %16 = vsyncpa [#allocation5], 0 }
   0x5   :  { %18 = vsyncpa [#allocation5 + $0x1], 0  ;;  %s7808_s30 = smov 0   ;;  %s7810_s10 = smov 0  }
   0x6   :  { %s7812_s11 = smov 0   ;;  %s7814_s12 = smov 0  }
   0x7 LB: > { %11445 = sst [smem:[#allocation13_spill]] %s7741_s11  ;;  %s7829_s13 = sadd.s32 4294967295, %s7745_s12   ;;  %s7745_s12 = sphi %s7814_s12, %s11839_s12   ;;  %s7741_s11 = sphi %s7812_s11, %s11841_s11   ;;  %s7737_s10 = sphi %s7810_s10, %s11843_s10   ;;  %s7733_s30 = sphi %s7808_s30, %s11842_s30  }
   0x8   : > { %s5875_s14 = sadd.s32 4294967294, %s7745_s12   ;;  %s7833_s15 = sadd.s32 1, %s7745_s12  }
   0x9   : > { %11446 = sst [smem:[#allocation14_spill]] %s7833_s15  ;;  %s225_s16 = sadd.s32 1, %s7741_s11 }
   0xa   : > { %s222_s17 = ssub.s32 %s7745_s12, %s7833_s15  ;;  %p235_p0 = scmp.ne.s32.totalorder %s7741_s11, %s7737_s10 }
   0xb   : > { %p223_p1 = scmp.eq.s32.totalorder %s222_s17, 0  ;;  %p236_p2 = scmp.eq.s32.totalorder %s7829_s13, 1 }
   0xc   : > { %p241_p3 = scmp.ne.s32.totalorder %s7737_s10, %s7733_s30  ;;  %p242_p4 = scmp.eq.s32.totalorder %s5875_s14, 1 }
   0xd   : > { %s7844_s18 = scalar_select %p223_p1, %s7741_s11, %s225_s16  }
   0xe   : > { %p7846_p5 = por %p236_p2, %p235_p0  ;;  %p7850_p6 = por %p242_p4, %p241_p3 }
   0xf   : > { %11447 = sst [smem:[#allocation15_spill]] %s7844_s18  ;;  %p5876_p7 = scmp.ge.s32.totalorder %s7745_s12, 1 }
  0x10   : > { %s11448_s19 = scalar_select %p7846_p5, 1, 0 }
  0x11   : > { %s11449_s20 = scalar_select %p7850_p6, 1, 0 }
  0x12   : > { %p249_p8 = scmp.lt.s32.totalorder %s7745_s12, 3  ;;  %p11286_p9 = scmp.eq.s32.totalorder %s7829_s13, 0 }
  0x13   : > { %s7747_s22 = smov [#allocation6]   ;;  %s7748_s24 = smov [#allocation3]  }
  0x14   : > { %p7857_p10 = pnand %p5876_p7, %p249_p8  ;;  %s287_s23 = sshll.u32 %s7747_s22, 4  ;;  %s288_s23 = int_to_ptr.vmem [resolvable:$true] %s287_s23 }
  0x15   : > { %s261_s25 = sshll.u32 %s7748_s24, 4  ;;  %s7749_s27 = smov [#allocation8]   ;;  %s7869_s25 = int_to_ptr.vmem [resolvable:$true] %s261_s25 }
  0x16   : > { %s11450_s21 = scalar_select %p7857_p10, 1, 0 }
  0x17   : > { %p7428_p11 = pneg %p7857_p10  ;;  %s7871_s28 = sshll.u32 %s7749_s27, 4  ;;  %s298_s28 = int_to_ptr.vmem [resolvable:$true] %s7871_s28 }
  0x18   : > { %s11452_s6 = sld [smem:[#allocation117_spill]] }
  0x19   : > { %p7865_p12 = pnand %p11286_p9, %p7428_p11 }
  0x1b   : > { %p7881_p0 = pneg %p7865_p12 }
  0x1e   : > { %s7591_s16 = scalar_lea.hbm %s11452_s6, 16 }
  0x1f   : > { %p7592_p13 = scmp.ne.s32.totalorder %s11452_s6, %s7591_s16  ;;  %p7598_p3 = scmp.lt.u32.totalorder %s7591_s16, %s11452_s6 }
  0x21   : > { %p7594_p1 = pnand %p7881_p0, %p7592_p13 }
  0x23   : > { %p7595_p2 = pneg %p7594_p1 }
  0x25   : > { %p7600_p4 = pnand %p7598_p3, %p7595_p2 }
  0x27   : > { %7603 = shalt.err (!%p7600_p4)
}
  0x28   : > { %s7604_s29 = scalar_lea.vmem %s288_s23, 16  ;;  %s7611_s14 = scalar_lea.vmem %s288_s23, 32 }
  0x29   : > { %p7605_p7 = scmp.ne.s32.totalorder %s288_s23, %s7604_s29  ;;  %p7612_p9 = scmp.lt.s32.totalorder %s288_s23, %s288_s23 }
  0x2a   : > { %p7613_p6 = scmp.lt.s32.totalorder %s7611_s14, %s7604_s29 }
  0x2b   : > { %p7607_p8 = pnand %p7605_p7, %p7881_p0 }
  0x2c   : > { %p7614_p5 = por %p7613_p6, %p7612_p9 }
  0x2d   : > { %p7608_p11 = pneg %p7607_p8 }
  0x2f   : > { %p7615_p10 = pnand %p7614_p5, %p7608_p11 }
  0x31   : > { %7618 = shalt.err (!%p7615_p10)
}
  0x32   : > { %7434 = dma.hbm_to_vmem [thread:$0]  (!%p7865_p12), %s11452_s6, 16, %s288_s23, [#allocation7]  }
  0x33   : > { %s7619_s27 = scalar_lea.hbm %s11277_s1, 384 }
  0x34   : > { %p7620_p13 = scmp.ne.s32.totalorder %s11277_s1, %s7619_s27  ;;  %p7626_p5 = scmp.lt.u32.totalorder %s7619_s27, %s11277_s1 }
  0x36   : > { %p7622_p1 = pnand %p7620_p13, %p7881_p0 }
  0x38   : > { %p7623_p6 = pneg %p7622_p1 }
  0x3a   : > { %p7628_p9 = pnand %p7626_p5, %p7623_p6 }
  0x3c   : > { %7631 = shalt.err (!%p7628_p9)
}
  0x3d   : > { %s7632_s23 = scalar_lea.vmem %s7869_s25, 384  ;;  %p7640_p4 = scmp.lt.s32.totalorder %s7869_s25, %s7869_s25 }
  0x3e   : > { %p7633_p10 = scmp.ne.s32.totalorder %s7869_s25, %s7632_s23  ;;  %p7641_p7 = scmp.lt.s32.totalorder %s7632_s23, %s7632_s23 }
  0x40   : > { %p7635_p2 = pnand %p7633_p10, %p7881_p0  ;;  %p7642_p8 = por %p7641_p7, %p7640_p4 }
  0x42   : > { %p7636_p3 = pneg %p7635_p2 }
  0x44   : > { %p7643_p11 = pnand %p7642_p8, %p7636_p3 }
  0x46   : > { %7646 = shalt.err (!%p7643_p11)
}
  0x47   : > { %s7750_s11 = smov 128   ;;  %s7751_s15 = smov 8  }
  0x48   : > { %7431 = dma.hbm_to_vmem [thread:$0]  (!%p7865_p12), %s11277_s1, 384, %s7869_s25, [#allocation4], %s7750_s11, %s7750_s11, %s7751_s15  }
  0x49   : > { %s7647_s27 = scalar_lea.hbm %s11283_s7, 2048 }
  0x4a   : > { %p7648_p13 = scmp.ne.s32.totalorder %s11283_s7, %s7647_s27  ;;  %p7654_p5 = scmp.lt.u32.totalorder %s7647_s27, %s11283_s7 }
  0x4c   : > { %p7650_p1 = pnand %p7648_p13, %p7881_p0 }
  0x4e   : > { %p7651_p6 = pneg %p7650_p1 }
  0x50   : > { %p7656_p9 = pnand %p7654_p5, %p7651_p6 }
  0x52   : > { %7659 = shalt.err (!%p7656_p9)
}
  0x53   : > { %s7660_s17 = scalar_lea.vmem %s298_s28, 2048  ;;  %p7668_p4 = scmp.lt.s32.totalorder %s298_s28, %s298_s28 }
  0x54   : > { %p7661_p10 = scmp.ne.s32.totalorder %s298_s28, %s7660_s17  ;;  %p7669_p7 = scmp.lt.s32.totalorder %s7660_s17, %s7660_s17 }
  0x56   : > { %p7663_p2 = pnand %p7661_p10, %p7881_p0  ;;  %p7670_p8 = por %p7669_p7, %p7668_p4 }
  0x58   : > { %p7664_p3 = pneg %p7663_p2 }
  0x5a   : > { %p7671_p11 = pnand %p7670_p8, %p7664_p3 }
  0x5c   : > { %7674 = shalt.err (!%p7671_p11)
}
  0x5d   : > { %7437 = dma.hbm_to_vmem [thread:$0]  (!%p7865_p12), %s11283_s7, 2048, %s298_s28, [#allocation7], %s7750_s11, %s7750_s11, %s7751_s15  }
  0x5e   : > { %p11454_p13 = scmp.ne.s32.totalorder %s11450_s21, 0 }
  0x60   : > { %326 = sbr.rel (%p11454_p13) target bundleno = 1877 (0x755), region = 56 }
  0x67   : > { %p11455_p1 = scmp.eq.s32.totalorder %s7829_s13, 0 }
  0x69   : > { %7720 = dma.done.wait (%p11455_p1), [#allocation4], 384   ;;  %p11456_p0 = pmov %p11455_p1 }
  0x6b   : > { %7722 = vsyncadd (%p11456_p0), [#allocation4], 4294966912  ;;  %p11457_p6 = pmov %p11456_p0 }
  0x6c   : > { %p11458_p5 = pmov %p11456_p0 }
  0x6d   : > { %7724 = dma.done.wait (%p11457_p6), [#allocation7], 2064  }
  0x6e   : > { %7726 = vsyncadd (%p11458_p5), [#allocation7], 4294965232  ;;  %s5885_s6 = sshll.u32 %s7829_s13, 2  ;;  %v11296_v0 = vmov 1   ;;  %v11292_v1 = vmov 0   ;;  %vm2938_vm0 = vcmask 261120  }
  0x6f   : > { %7491 = vset.pattern.permute.xlu0 %v11296_v0  ;;  %7492 = vset.pattern.permute.xlu1 %v11292_v1  ;;  %p371_p12 = scmp.lt.s32.totalorder %s5885_s6, 7  ;;  %vm2940_vm1 = vcmask 254976   ;;  %vm7756_vm2 = vmmov 0   ;;  %vm4303_vm3 = vcmask 523264   ;;  %s368_s28 = sand.u32 1, %s7737_s10  }
  0x70   : > { %s6240_s18 = sshll.u32 %s7829_s13, 4  ;;  %s369_s16 = scalar_lea.vmem [#allocation9], %s368_s28 }
  0x71   : > { %s11845_s6 = smov (!%p371_p12, %s5885_s6), 7  ;;  %s5789_s27 = sshll.u32 %s369_s16, 4  ;;  %s11236_s27 = int_to_ptr.vmem [resolvable:$true] %s5789_s27 }
  0x72   : > { %s7413_s21 = smul.u32 144, %s11845_s6  ;;  %s5777_s23 = scalar_lea.sflag [#allocation5], %s368_s28 }
  0x73   : > { %s7675_s17 = scalar_lea.vmem %s11236_s27, 16  ;;  %p11837_p10 = scmp.ne.s32.totalorder %s11448_s19, 0 }
  0x74   : > { %s7955_s24 = scalar_lea.vmem %s11276_s0, %s7413_s21  ;;  %p7676_p9 = scmp.ne.s32.totalorder %s11236_s27, %s7675_s17 }
  0x75   : > { %v5887_v2 = vld [vmem:[%s7955_s24 + $0x90] sm:$0xff]  ;;  %v7959_v3 = vld [vmem:[%s7955_s24] sm:$0xff]  ;;  %s7757_s13 = smov [#allocation9]  }
  0x76   : > { %511 = vperm.xlu1 %7492, %v5887_v2   ;;  %449 = vperm.xlu0 %7491, %v7959_v3   ;;  %v7963_v4 = vld [vmem:[%s7955_s24 + $0x10] sm:$0xff]  ;;  %v621_v6 = vld [vmem:[%s7955_s24 + $0x1] sm:$0xff]  ;;  %p7677_p2 = pnand %p7676_p9, %p11837_p10  ;;  %s7679_s25 = sshll.u32 %s7757_s13, 4  ;;  %s7680_s25 = int_to_ptr.vmem [resolvable:$false] %s7679_s25 }
  0x77   : > { %v7968_v5 = vld [vmem:[%s7955_s24 + $0xb0] sm:$0xff]  ;;  %v7975_v8 = vld [vmem:[%s7955_s24 + $0x120] sm:$0xff]  ;;  %s7681_s22 = scalar_lea.vmem %s7680_s25, 32  ;;  %p7682_p4 = scmp.lt.s32.totalorder %s11236_s27, %s7680_s25 }
  0x78   : > { %v5903_v7 = vld [vmem:[%s7955_s24 + $0x1b0] sm:$0xff]  ;;  %v7990_v11 = vld [vmem:[%s7955_s24 + $0xa0] sm:$0xff]  ;;  %p7678_p3 = pneg %p7677_p2  ;;  %p7683_p7 = scmp.lt.s32.totalorder %s7681_s22, %s7675_s17 }
  0x79   : > { %v7978_v9 = vld [vmem:[%s7955_s24 + $0x11] sm:$0xff]  ;;  %v8004_v15 = vld [vmem:[%s7955_s24 + $0x20] sm:$0xff] }
  0x7a   : > { %7493 = vset.pattern.permute.xlu1 %v11296_v0  ;;  %453 = vperm.xlu0 %7491, %v7963_v4   ;;  %v7984_v10 = vld [vmem:[%s7955_s24 + $0xd0] sm:$0xff]  ;;  %v8014_v17 = vld [vmem:[%s7955_s24 + $0x1e0] sm:$0xff]  ;;  %p7684_p8 = por %p7683_p7, %p7682_p4 }
  0x7b   : > { %570 = vperm.xlu1 %7493, %v5887_v2   ;;  %v7993_v12 = vld [vmem:[%s7955_s24 + $0x1d0] sm:$0xff]  ;;  %v8019_v18 = vld [vmem:[%s7955_s24 + $0xa1] sm:$0xff] }
  0x7c   : > { %v5943_v13 = vld [vmem:[%s7955_s24 + $0x91] sm:$0xff]  ;;  %v8024_v19 = vld [vmem:[%s7955_s24 + $0x60] sm:$0xff]  ;;  %p7685_p11 = pnand %p7684_p8, %p7678_p3 }
  0x7d   : > { %v8001_v14 = vld [vmem:[%s7955_s24 + $0x50] sm:$0xff]  ;;  %11459 = vst [vmem:[#allocation16_spill] sm:$0xff] %v8024_v19  ;;  %v623_v24 = vld [vmem:[%s7955_s24 + $0x21] sm:$0xff] }
  0x7e   : > { %578 = vperm.xlu0 %7491, %v7968_v5   ;;  %v8009_v16 = vld [vmem:[%s7955_s24 + $0x31] sm:$0xff]  ;;  %v8053_v26 = vld [vmem:[%s7955_s24 + $0x140] sm:$0xff] }
  0x7f   : > { %7494 = vset.pattern.permute.xlu1 %v11292_v1  ;;  %v8029_v20 = vld [vmem:[%s7955_s24 + $0xf0] sm:$0xff]  ;;  %v8056_v27 = vld [vmem:[%s7955_s24 + $0x1c1] sm:$0xff] }
  0x80   : > { %631 = vperm.xlu1 %7494, %v621_v6   ;;  %v8034_v21 = vld [vmem:[%s7955_s24 + $0x1b1] sm:$0xff]  ;;  %v8073_v30 = vld [vmem:[%s7955_s24 + $0xc0] sm:$0xff] }
  0x81   : > { %v8037_v22 = vld [vmem:[%s7955_s24 + $0x130] sm:$0xff]  ;;  %v8078_v31 = vld [vmem:[%s7955_s24 + $0xe1] sm:$0xff] }
  0x82   : > { %932 = vperm.xlu0 %7491, %v5903_v7   ;;  %v8043_v23 = vld [vmem:[%s7955_s24 + $0x170] sm:$0xff]  ;;  %v8081_v32 = vld [vmem:[%s7955_s24 + $0x1c0] sm:$0xff] }
  0x83   : > { %v8049_v25 = vld [vmem:[%s7955_s24 + $0x151] sm:$0xff]  ;;  %v8094_v34 = vld [vmem:[%s7955_s24 + $0x40] sm:$0xff] }
  0x84   : > { %7495 = vset.pattern.permute.xlu1 %v11296_v0  ;;  %v8062_v28 = vld [vmem:[%s7955_s24 + $0xd1] sm:$0xff]  ;;  %v8107_v36 = vld [vmem:[%s7955_s24 + $0x41] sm:$0xff] }
  0x85   : > { %811 = vperm.xlu1 %7495, %v7975_v8   ;;  %v8067_v29 = vld [vmem:[%s7955_s24 + $0x30] sm:$0xff]  ;;  %v8112_v37 = vld [vmem:[%s7955_s24 + $0x100] sm:$0xff] }
  0x86   : > { %694 = vperm.xlu0 %7491, %v7978_v9   ;;  %v8086_v33 = vld [vmem:[%s7955_s24 + $0xf1] sm:$0xff]  ;;  %v8117_v38 = vld [vmem:[%s7955_s24 + $0x121] sm:$0xff] }
  0x87   : > { %v8099_v35 = vld [vmem:[%s7955_s24 + $0x211] sm:$0xff]  ;;  %v8120_v39 = vld [vmem:[%s7955_s24 + $0xc1] sm:$0xff] }
  0x88   : > { %v8129_v40 = vld [vmem:[%s7955_s24 + $0x150] sm:$0xff]  ;;  %v8135_v41 = vld [vmem:[%s7955_s24 + $0x61] sm:$0xff] }
  0x89   : > { %7496 = vset.pattern.permute.xlu1 %v11292_v1  ;;  %v5912_v44 = vld [vmem:[%s7955_s24 + $0x131] sm:$0xff]  ;;  %v8153_v48 = vld [vmem:[%s7955_s24 + $0x160] sm:$0xff] }
  0x8a   : > { %395 = vperm.xlu1 %7496, %v7963_v4   ;;  %586 = vperm.xlu0 %7491, %v7984_v10   ;;  %v8163_v51 = vld [vmem:[%s7955_s24 + $0xb1] sm:$0xff]  ;;  %v8166_v52 = vld [vmem:[%s7955_s24 + $0x141] sm:$0xff] }
  0x8b   : > { %v8176_v55 = vld [vmem:[%s7955_s24 + $0x200] sm:$0xff]  ;;  %v5973_v61 = vld [vmem:[%s7955_s24 + $0x190] sm:$0xff] }
  0x8c   : > { %v8185_v58 = vld [vmem:[%s7955_s24 + $0xe0] sm:$0xff]  ;;  %v8201_v2 = vld [vmem:[%s7955_s24 + $0x1d1] sm:$0xff] }
  0x8d   : > { %11463 = vst [vmem:[#allocation20_spill] sm:$0xff] %v8185_v58 }
  0x8e   : > { %516 = vperm.xlu1 %7496, %v7990_v11   ;;  %940 = vperm.xlu0 %7491, %v7993_v12  }
  0x92   : > { %7497 = vset.pattern.permute.xlu1 %v11296_v0  ;;  %1594 = vperm.xlu0 %7491, %v5943_v13  }
  0x93   : > { %574 = vperm.xlu1 %7497, %v7990_v11  }
  0x96   : > { %469 = vperm.xlu0 %7491, %v8001_v14  }
  0x97   : > { %457 = vperm.xlu1 %7497, %v8004_v15  }
  0x9a   : > { %702 = vperm.xlu0 %7491, %v8009_v16  }
  0x9b   : > { %7498 = vset.pattern.permute.xlu1 %v11292_v1 }
  0x9c   : > { %521 = vperm.xlu1 %7498, %v7968_v5  }
  0x9e   : > { %944 = vperm.xlu0 %7491, %v8014_v17  }
  0xa0   : > { %7499 = vset.pattern.permute.xlu1 %v11296_v0 }
  0xa1   : > { %690 = vperm.xlu1 %7499, %v621_v6  }
  0xa2   : > { %1598 = vperm.xlu0 %7491, %v8019_v18  }
  0xa5   : > { %7500 = vset.pattern.permute.xlu1 %v11292_v1 }
  0xa6   : > { %873 = vperm.xlu1 %7500, %v5903_v7   ;;  %473 = vperm.xlu0 %7491, %v8024_v19  }
  0xaa   : > { %636 = vperm.xlu1 %7500, %v7978_v9   ;;  %594 = vperm.xlu0 %7491, %v8029_v20  }
  0xae   : > { %7501 = vset.pattern.permute.xlu1 %v11296_v0  ;;  %1770 = vperm.xlu0 %7491, %v8034_v21  }
  0xaf   : > { %815 = vperm.xlu1 %7501, %v8037_v22  }
  0xb2   : > { %831 = vperm.xlu0 %7491, %v8043_v23  }
  0xb3   : > { %7502 = vset.pattern.permute.xlu1 %v11292_v1 }
  0xb4   : > { %641 = vperm.xlu1 %7502, %v623_v24  }
  0xb6   : > { %1064 = vperm.xlu0 %7491, %v8049_v25  }
  0xb8   : > { %7503 = vset.pattern.permute.xlu1 %v11296_v0 }
  0xb9   : > { %819 = vperm.xlu1 %7503, %v8053_v26  }
  0xba   : > { %1774 = vperm.xlu0 %7491, %v8056_v27  }
  0xbd   : > { %7504 = vset.pattern.permute.xlu1 %v11292_v1 }
  0xbe   : > { %1539 = vperm.xlu1 %7504, %v5943_v13   ;;  %1610 = vperm.xlu0 %7491, %v8062_v28  }
  0xc2   : > { %7505 = vset.pattern.permute.xlu1 %v11296_v0  ;;  %1177 = vperm.xlu0 %7491, %v8004_v15  }
  0xc3   : > { %461 = vperm.xlu1 %7505, %v8067_v29  }
  0xc6   : > { %1181 = vperm.xlu0 %7491, %v8067_v29  }
  0xc7   : > { %582 = vperm.xlu1 %7505, %v8073_v30  }
  0xca   : > { %1614 = vperm.xlu0 %7491, %v8078_v31  }
  0xcb   : > { %7506 = vset.pattern.permute.xlu1 %v11292_v1 }
  0xcc   : > { %878 = vperm.xlu1 %7506, %v8081_v32  }
  0xce   : > { %1618 = vperm.xlu0 %7491, %v8086_v33  }
  0xd0   : > { %7507 = vset.pattern.permute.xlu1 %v11296_v0 }
  0xd1   : > { %936 = vperm.xlu1 %7507, %v8081_v32  }
  0xd2   : > { %1189 = vperm.xlu0 %7491, %v8001_v14  }
  0xd5   : > { %465 = vperm.xlu1 %7507, %v8094_v34  }
  0xd6   : > { %1306 = vperm.xlu0 %7491, %v7984_v10  }
  0xd9   : > { %7508 = vset.pattern.permute.xlu1 %v11292_v1 }
  0xda   : > { %531 = vperm.xlu1 %7508, %v7984_v10   ;;  %1794 = vperm.xlu0 %7491, %v8099_v35  }
  0xde   : > { %7509 = vset.pattern.permute.xlu1 %v11296_v0  ;;  %1193 = vperm.xlu0 %7491, %v8024_v19  }
  0xdf   : > { %698 = vperm.xlu1 %7509, %v623_v24   ;;  %v8219_v24 = vld [vmem:[%s7955_s24 + $0x181] sm:$0xff] }
  0xe2   : > { %1426 = vperm.xlu0 %7491, %v8107_v36  }
  0xe3   : > { %7510 = vset.pattern.permute.xlu1 %v11292_v1 }
  0xe4   : > { %883 = vperm.xlu1 %7510, %v7993_v12   ;;  %v8210_v12 = vld [vmem:[%s7955_s24 + $0x1e1] sm:$0xff] }
  0xe6   : > { %1318 = vperm.xlu0 %7491, %v8112_v37  }
  0xe8   : > { %7511 = vset.pattern.permute.xlu1 %v11296_v0 }
  0xe9   : > { %1052 = vperm.xlu1 %7511, %v8117_v38  }
  0xea   : > { %1954 = vperm.xlu0 %7491, %v8120_v39  }
  0xed   : > { %7512 = vset.pattern.permute.xlu1 %v11292_v1 }
  0xee   : > { %646 = vperm.xlu1 %7512, %v8009_v16   ;;  %2372 = vperm.xlu0 %7491, %v8081_v32  }
  0xf2   : > { %7513 = vset.pattern.permute.xlu1 %v11296_v0  ;;  %2267 = vperm.xlu0 %7491, %v8129_v40  }
  0xf3   : > { %823 = vperm.xlu1 %7513, %v8129_v40  }
  0xf5   : > { %v8137_v42 = vpop.permute.xlu1 %511  ;;  %v8139_v43 = vpop.permute.xlu0 %449 }
  0xf6   : > { %1434 = vperm.xlu0 %7491, %v8135_v41  }
  0xf7   : > { %7514 = vset.pattern.permute.xlu1 %v11292_v1 }
  0xf8   : > { %998 = vperm.xlu1 %7514, %v5912_v44  }
  0xf9   : > { %v8144_v45 = vpop.permute.xlu0 %453 }
  0xfa   : > { %11460 = vst [vmem:[#allocation17_spill] sm:$0xff] %v8144_v45  ;;  %v8146_v46 = vpop.permute.xlu1 %570  ;;  %1962 = vperm.xlu0 %7491, %v8078_v31  }
  0xfc   : > { %651 = vperm.xlu1 %7514, %v8107_v36  }
  0xfd   : > { %v8150_v47 = vpop.permute.xlu0 %578 }
  0xfe   : > { %2484 = vperm.xlu0 %7491, %v5912_v44  }
  0xff   : > { %v8155_v49 = vpop.permute.xlu1 %631 }
 0x100   : > { %7515 = vset.pattern.permute.xlu1 %v11296_v0 }
 0x101   : > { %827 = vperm.xlu1 %7515, %v8153_v48   ;;  %v8159_v50 = vpop.permute.xlu0 %932 }
 0x102   : > { %2271 = vperm.xlu0 %7491, %v8153_v48  }
 0x104   : > { %v8168_v53 = vpop.permute.xlu1 %811 }
 0x105   : > { %7516 = vset.pattern.permute.xlu1 %v11292_v1  ;;  %v8171_v54 = vpop.permute.xlu0 %694 }
 0x106   : > { %11461 = vst [vmem:[#allocation18_spill] sm:$0xff] %v8171_v54  ;;  %1549 = vperm.xlu1 %7516, %v8163_v51   ;;  %2488 = vperm.xlu0 %7491, %v8166_v52  }
 0x109   : > { %v8178_v56 = vpop.permute.xlu1 %395  ;;  %v8180_v57 = vpop.permute.xlu0 %586 }
 0x10a   : > { %11462 = vst [vmem:[#allocation19_spill] sm:$0xff] %v8178_v56  ;;  %415 = vperm.xlu1 %7516, %v8001_v14   ;;  %2388 = vperm.xlu0 %7491, %v8176_v55   ;;  %v11474_v56 = vmov 1  }
 0x10d   : > { %v8187_v59 = vpop.permute.xlu1 %516  ;;  %v8189_v60 = vpop.permute.xlu0 %940 }
 0x10e   : > { %11464 = vst [vmem:[#allocation21_spill] sm:$0xff] %v8187_v59  ;;  %11465 = vst [vmem:[#allocation22_spill] sm:$0xff] %v8189_v60  ;;  %536 = vperm.xlu1 %7516, %v8185_v58   ;;  %2860 = vperm.xlu0 %7491, %v8056_v27  }
 0x111   : > { %v8194_v62 = vpop.permute.xlu0 %1594 }
 0x112   : > { %7517 = vset.pattern.permute.xlu1 %v11296_v0  ;;  %v8197_v63 = vpop.permute.xlu1 %574  ;;  %2283 = vperm.xlu0 %7491, %v5973_v61  }
 0x113   : > { %11466 = vst [vmem:[#allocation23_spill] sm:$0xff] %v8197_v63  ;;  %590 = vperm.xlu1 %7517, %v8185_v58  }
 0x115   : > { %v8203_v6 = vpop.permute.xlu0 %469 }
 0x116   : > { %11467 = vst [vmem:[#allocation24_spill] sm:$0xff] %v8203_v6  ;;  %v8205_v7 = vpop.permute.xlu1 %457  ;;  %2864 = vperm.xlu0 %7491, %v8201_v2  }
 0x117   : > { %7518 = vset.pattern.permute.xlu1 %v11292_v1  ;;  %v8226_v1 = vld [vmem:[%s7955_s24 + $0x201] sm:$0xff] }
 0x118   : > { %888 = vperm.xlu1 %7518, %v8014_v17   ;;  %v11470_v17 = vmov 0  }
 0x119   : > { %v8213_v13 = vpop.permute.xlu0 %702 }
 0x11a   : > { %11468 = vst [vmem:[#allocation25_spill] sm:$0xff] %v8213_v13  ;;  %2868 = vperm.xlu0 %7491, %v8210_v12   ;;  %v626_v13 = vld [vmem:[%s7955_s24 + $0x51] sm:$0xff] }
 0x11b   : > { %v8216_v16 = vpop.permute.xlu1 %521 }
 0x11c   : > { %7519 = vset.pattern.permute.xlu1 %v11296_v0 }
 0x11d   : > { %1056 = vperm.xlu1 %7519, %v5912_v44   ;;  %v8222_v61 = vpop.permute.xlu0 %944 }
 0x11e   : > { %11469 = vst [vmem:[#allocation26_spill] sm:$0xff] %v8222_v61  ;;  %2504 = vperm.xlu0 %7491, %v8219_v24  }
 0x120   : > { %v8228_v6 = vpop.permute.xlu1 %690 }
 0x121   : > { %7520 = vset.pattern.permute.xlu1 %v11470_v17  ;;  %v8231_v63 = vpop.permute.xlu0 %1598 }
 0x122   : > { %11471 = vst [vmem:[#allocation27_spill] sm:$0xff] %v8231_v63  ;;  %420 = vperm.xlu1 %7520, %v8024_v19   ;;  %2876 = vperm.xlu0 %7491, %v8226_v1   ;;  %v5907_v63 = vld [vmem:[%s7955_s24 + $0x1f0] sm:$0xff] }
 0x125   : > { %v8235_v59 = vpop.permute.xlu1 %873  ;;  %v8237_v44 = vpop.permute.xlu0 %473 }
 0x126   : > { %541 = vperm.xlu1 %7520, %v8029_v20   ;;  %7554 = vset.pattern.permute.xlu0 %v11470_v17 }
 0x127   : > { %390 = vperm.xlu0 %7554, %v7959_v3  }
 0x129   : > { %v8242_v0 = vpop.permute.xlu1 %636  ;;  %v8244_v54 = vpop.permute.xlu0 %594 }
 0x12a   : > { %11472 = vst [vmem:[#allocation28_spill] sm:$0xff] %v8242_v0  ;;  %11473 = vst [vmem:[#allocation29_spill] sm:$0xff] %v8244_v54  ;;  %7521 = vset.pattern.permute.xlu1 %v11474_v56 }
 0x12b   : > { %706 = vperm.xlu1 %7521, %v8107_v36   ;;  %752 = vperm.xlu0 %7554, %v7975_v8  }
 0x12d   : > { %v8250_v45 = vpop.permute.xlu0 %1770 }
 0x12e   : > { %v8252_v61 = vpop.permute.xlu1 %815 }
 0x12f   : > { %11475 = vst [vmem:[#allocation30_spill] sm:$0xff] %v8252_v61  ;;  %948 = vperm.xlu1 %7521, %v5907_v63   ;;  %400 = vperm.xlu0 %7554, %v8004_v15  }
 0x131   : > { %v8255_v3 = vpop.permute.xlu0 %831 }
 0x132   : > { %11476 = vst [vmem:[#allocation31_spill] sm:$0xff] %v8255_v3 }
 0x133   : > { %1060 = vperm.xlu1 %7521, %v8166_v52   ;;  %v8258_v20 = vpop.permute.xlu1 %641  ;;  %757 = vperm.xlu0 %7554, %v8037_v22  }
 0x135   : > { %v8261_v0 = vpop.permute.xlu0 %1064 }
 0x136   : > { %11477 = vst [vmem:[#allocation32_spill] sm:$0xff] %v8261_v0 }
 0x137   : > { %1602 = vperm.xlu1 %7521, %v8163_v51   ;;  %762 = vperm.xlu0 %7554, %v8053_v26  }
 0x138   : > { %v8265_v8 = vpop.permute.xlu1 %819 }
 0x139   : > { %v8267_v61 = vpop.permute.xlu0 %1774 }
 0x13a   : > { %11478 = vst [vmem:[#allocation33_spill] sm:$0xff] %v8267_v61 }
 0x13b   : > { %7522 = vset.pattern.permute.xlu1 %v11470_v17  ;;  %993 = vperm.xlu0 %7554, %v8117_v38  }
 0x13c   : > { %656 = vperm.xlu1 %7522, %v626_v13  }
 0x13d   : > { %v8272_v3 = vpop.permute.xlu1 %1539  ;;  %v8274_v19 = vpop.permute.xlu0 %1610 }
 0x13f   : > { %405 = vperm.xlu0 %7554, %v8067_v29  }
 0x140   : > { %777 = vperm.xlu1 %7522, %v8043_v23  }
 0x141   : > { %v8278_v22 = vpop.permute.xlu0 %1177 }
 0x142   : > { %11479 = vst [vmem:[#allocation34_spill] sm:$0xff] %v8278_v22  ;;  %v8280_v26 = vpop.permute.xlu1 %461  ;;  %v5901_v22 = vld [vmem:[%s7955_s24 + $0x180] sm:$0xff] }
 0x143   : > { %11480 = vst [vmem:[#allocation35_spill] sm:$0xff] %v8280_v26  ;;  %526 = vperm.xlu0 %7554, %v8073_v30  }
 0x144   : > { %1008 = vperm.xlu1 %7522, %v8049_v25  }
 0x145   : > { %v8284_v51 = vpop.permute.xlu0 %1181 }
 0x146   : > { %11481 = vst [vmem:[#allocation36_spill] sm:$0xff] %v8284_v51  ;;  %v8286_v38 = vpop.permute.xlu1 %582 }
 0x147   : > { %11482 = vst [vmem:[#allocation37_spill] sm:$0xff] %v8286_v38  ;;  %410 = vperm.xlu0 %7554, %v8094_v34  }
 0x148   : > { %1720 = vperm.xlu1 %7522, %v8056_v27  }
 0x149   : > { %v8290_v61 = vpop.permute.xlu0 %1614 }
 0x14a   : > { %11483 = vst [vmem:[#allocation38_spill] sm:$0xff] %v8290_v61 }
 0x14b   : > { %v8292_v0 = vpop.permute.xlu1 %878  ;;  %767 = vperm.xlu0 %7554, %v8129_v40  }
 0x14c   : > { %11484 = vst [vmem:[#allocation39_spill] sm:$0xff] %v8292_v0  ;;  %661 = vperm.xlu1 %7522, %v8135_v41  }
 0x14d   : > { %v8296_v23 = vpop.permute.xlu0 %1618 }
 0x14e   : > { %11485 = vst [vmem:[#allocation40_spill] sm:$0xff] %v8296_v23 }
 0x14f   : > { %1544 = vperm.xlu0 %7554, %v8019_v18  }
 0x150   : > { %v8300_v25 = vpop.permute.xlu1 %936  ;;  %7523 = vset.pattern.permute.xlu1 %v11474_v56 }
 0x151   : > { %11486 = vst [vmem:[#allocation41_spill] sm:$0xff] %v8300_v25  ;;  %v8303_v51 = vpop.permute.xlu0 %1189  ;;  %835 = vperm.xlu1 %7523, %v5901_v22  }
 0x152   : > { %11487 = vst [vmem:[#allocation42_spill] sm:$0xff] %v8303_v51 }
 0x153   : > { %772 = vperm.xlu0 %7554, %v8153_v48  }
 0x154   : > { %v8306_v26 = vpop.permute.xlu1 %465 }
 0x155   : > { %v8308_v0 = vpop.permute.xlu0 %1306  ;;  %1173 = vperm.xlu1 %7523, %v7963_v4  }
 0x156   : > { %11488 = vst [vmem:[#allocation43_spill] sm:$0xff] %v8308_v0 }
 0x157   : > { %1003 = vperm.xlu0 %7554, %v8166_v52  }
 0x159   : > { %v8312_v40 = vpop.permute.xlu1 %531  ;;  %v8314_v18 = vpop.permute.xlu0 %1794  ;;  %7524 = vset.pattern.permute.xlu1 %v11470_v17 }
 0x15a   : > { %11489 = vst [vmem:[#allocation44_spill] sm:$0xff] %v8314_v18  ;;  %1559 = vperm.xlu1 %7524, %v8062_v28  }
 0x15b   : > { %1715 = vperm.xlu0 %7554, %v8034_v21  }
 0x15d   : > { %v8319_v25 = vpop.permute.xlu0 %1193 }
 0x15e   : > { %11490 = vst [vmem:[#allocation45_spill] sm:$0xff] %v8319_v25  ;;  %v8321_v51 = vpop.permute.xlu1 %698  ;;  %7525 = vset.pattern.permute.xlu1 %v11474_v56 }
 0x15f   : > { %710 = vperm.xlu1 %7525, %v626_v13   ;;  %893 = vperm.xlu0 %7554, %v5907_v63  }
 0x161   : > { %v8324_v0 = vpop.permute.xlu0 %1426 }
 0x162   : > { %11491 = vst [vmem:[#allocation46_spill] sm:$0xff] %v8324_v0 }
 0x163   : > { %v8326_v23 = vpop.permute.xlu1 %883  ;;  %952 = vperm.xlu1 %7525, %v8176_v55   ;;  %1114 = vperm.xlu0 %7554, %v7963_v4   ;;  %v5915_v4 = vld [vmem:[%s7955_s24 + $0x161] sm:$0xff] }
 0x164   : > { %11492 = vst [vmem:[#allocation47_spill] sm:$0xff] %v8326_v23 }
 0x165   : > { %v8330_v28 = vpop.permute.xlu0 %1318 }
 0x166   : > { %11493 = vst [vmem:[#allocation48_spill] sm:$0xff] %v8330_v28 }
 0x167   : > { %7526 = vset.pattern.permute.xlu1 %v11470_v17  ;;  %1554 = vperm.xlu0 %7554, %v8120_v39  }
 0x168   : > { %v8334_v21 = vpop.permute.xlu1 %1052  ;;  %1119 = vperm.xlu1 %7526, %v8004_v15   ;;  %v8352_v15 = vld [vmem:[%s7955_s24 + $0x210] sm:$0xff] }
 0x169   : > { %v8337_v63 = vpop.permute.xlu0 %1954 }
 0x16a   : > { %11494 = vst [vmem:[#allocation49_spill] sm:$0xff] %v8337_v63 }
 0x16b   : > { %782 = vperm.xlu0 %7554, %v5901_v22  }
 0x16c   : > { %7527 = vset.pattern.permute.xlu1 %v11474_v56 }
 0x16d   : > { %v8340_v13 = vpop.permute.xlu1 %646  ;;  %v8342_v25 = vpop.permute.xlu0 %2372  ;;  %1606 = vperm.xlu1 %7527, %v8120_v39  }
 0x16e   : > { %11495 = vst [vmem:[#allocation50_spill] sm:$0xff] %v8340_v13  ;;  %11496 = vst [vmem:[#allocation51_spill] sm:$0xff] %v8342_v25  ;;  %v8456_v13 = vld [vmem:[%s7955_s24 + $0x71] sm:$0xff] }
 0x16f   : > { %1013 = vperm.xlu0 %7554, %v5915_v4   ;;  %11527 = vst [vmem:[#allocation82_spill] sm:$0xff] %v8456_v13 }
 0x171   : > { %v8346_v28 = vpop.permute.xlu0 %2267  ;;  %714 = vperm.xlu1 %7527, %v8135_v41  }
 0x172   : > { %11497 = vst [vmem:[#allocation52_spill] sm:$0xff] %v8346_v28  ;;  %v8349_v18 = vpop.permute.xlu1 %823 }
 0x173   : > { %11498 = vst [vmem:[#allocation53_spill] sm:$0xff] %v8349_v18  ;;  %1235 = vperm.xlu0 %7554, %v7990_v11  }
 0x175   : > { %v8355_v22 = vpop.permute.xlu0 %1434  ;;  %956 = vperm.xlu1 %7527, %v8352_v15  }
 0x176   : > { %11499 = vst [vmem:[#allocation54_spill] sm:$0xff] %v8355_v22 }
 0x177   : > { %v8358_v25 = vpop.permute.xlu1 %998  ;;  %1725 = vperm.xlu0 %7554, %v8201_v2  }
 0x178   : > { %11500 = vst [vmem:[#allocation55_spill] sm:$0xff] %v8358_v25  ;;  %v5916_v25 = vld [vmem:[%s7955_s24 + $0x171] sm:$0xff] }
 0x179   : > { %v8361_v63 = vpop.permute.xlu0 %1962  ;;  %1068 = vperm.xlu1 %7527, %v5915_v4  }
 0x17a   : > { %11501 = vst [vmem:[#allocation56_spill] sm:$0xff] %v8361_v63 }
 0x17b   : > { %v8363_v28 = vpop.permute.xlu1 %651  ;;  %898 = vperm.xlu0 %7554, %v8176_v55  }
 0x17d   : > { %v8366_v41 = vpop.permute.xlu0 %2484  ;;  %1294 = vperm.xlu1 %7527, %v7990_v11  }
 0x17e   : > { %11502 = vst [vmem:[#allocation57_spill] sm:$0xff] %v8366_v41 }
 0x17f   : > { %903 = vperm.xlu0 %7554, %v8352_v15  }
 0x180   : > { %v8370_v22 = vpop.permute.xlu1 %827 }
 0x181   : > { %11503 = vst [vmem:[#allocation58_spill] sm:$0xff] %v8370_v22  ;;  %v8372_v0 = vpop.permute.xlu0 %2271  ;;  %1778 = vperm.xlu1 %7527, %v8201_v2  }
 0x182   : > { %11504 = vst [vmem:[#allocation59_spill] sm:$0xff] %v8372_v0 }
 0x183   : > { %1124 = vperm.xlu0 %7554, %v8067_v29  }
 0x185   : > { %v8377_v4 = vpop.permute.xlu1 %1549  ;;  %v8379_v63 = vpop.permute.xlu0 %2488  ;;  %7528 = vset.pattern.permute.xlu1 %v11470_v17 }
 0x186   : > { %11505 = vst [vmem:[#allocation60_spill] sm:$0xff] %v8379_v63  ;;  %1018 = vperm.xlu1 %7528, %v5916_v25  }
 0x187   : > { %1564 = vperm.xlu0 %7554, %v8078_v31  }
 0x189   : > { %v8383_v11 = vpop.permute.xlu1 %415  ;;  %v8385_v41 = vpop.permute.xlu0 %2388 }
 0x18a   : > { %11506 = vst [vmem:[#allocation61_spill] sm:$0xff] %v8383_v11  ;;  %11507 = vst [vmem:[#allocation62_spill] sm:$0xff] %v8385_v41  ;;  %1240 = vperm.xlu1 %7528, %v7968_v5  }
 0x18b   : > { %1569 = vperm.xlu0 %7554, %v8086_v33  }
 0x18d   : > { %v8389_v2 = vpop.permute.xlu1 %536  ;;  %v8391_v29 = vpop.permute.xlu0 %2860 }
 0x18e   : > { %11508 = vst [vmem:[#allocation63_spill] sm:$0xff] %v8389_v2  ;;  %11509 = vst [vmem:[#allocation64_spill] sm:$0xff] %v8391_v29  ;;  %1730 = vperm.xlu1 %7528, %v8210_v12  }
 0x18f   : > { %1129 = vperm.xlu0 %7554, %v8094_v34  }
 0x191   : > { %v8395_v63 = vpop.permute.xlu0 %2283 }
 0x192   : > { %11510 = vst [vmem:[#allocation65_spill] sm:$0xff] %v8395_v63  ;;  %v8397_v31 = vpop.permute.xlu1 %590  ;;  %1023 = vperm.xlu1 %7528, %v8219_v24   ;;  %v8414_v63 = vld [vmem:[%s7955_s24 + $0x1f1] sm:$0xff] }
 0x193   : > { %11511 = vst [vmem:[#allocation66_spill] sm:$0xff] %v8397_v31  ;;  %1134 = vperm.xlu0 %7554, %v8001_v14   ;;  %11516 = vst [vmem:[#allocation71_spill] sm:$0xff] %v8414_v63  ;;  %v8419_v14 = vld [vmem:[%s7955_s24 + $0x70] sm:$0xff] }
 0x194   : > { %11518 = vst [vmem:[#allocation73_spill] sm:$0xff] %v8419_v14 }
 0x195   : > { %v8401_v41 = vpop.permute.xlu0 %2864 }
 0x196   : > { %11512 = vst [vmem:[#allocation67_spill] sm:$0xff] %v8401_v41  ;;  %1245 = vperm.xlu1 %7528, %v8073_v30  }
 0x197   : > { %v8404_v33 = vpop.permute.xlu1 %888  ;;  %1250 = vperm.xlu0 %7554, %v7984_v10  }
 0x198   : > { %11513 = vst [vmem:[#allocation68_spill] sm:$0xff] %v8404_v33 }
 0x199   : > { %v8407_v0 = vpop.permute.xlu0 %2868 }
 0x19a   : > { %11514 = vst [vmem:[#allocation69_spill] sm:$0xff] %v8407_v0  ;;  %1355 = vperm.xlu1 %7528, %v7978_v9  }
 0x19b   : > { %1745 = vperm.xlu0 %7554, %v8099_v35  }
 0x19c   : > { %v8410_v29 = vpop.permute.xlu1 %1056 }
 0x19d   : > { %11515 = vst [vmem:[#allocation70_spill] sm:$0xff] %v8410_v29  ;;  %v8416_v11 = vpop.permute.xlu0 %2504 }
 0x19e   : > { %11517 = vst [vmem:[#allocation72_spill] sm:$0xff] %v8416_v11  ;;  %1735 = vperm.xlu1 %7528, %v8414_v63  }
 0x19f   : > { %1144 = vperm.xlu0 %7554, %v8419_v14  }
 0x1a1   : > { %v8423_v41 = vpop.permute.xlu1 %420  ;;  %v8425_v10 = vpop.permute.xlu0 %2876 }
 0x1a2   : > { %11519 = vst [vmem:[#allocation74_spill] sm:$0xff] %v8425_v10  ;;  %7529 = vset.pattern.permute.xlu1 %v11474_v56 }
 0x1a3   : > { %1072 = vperm.xlu1 %7529, %v5916_v25   ;;  %1370 = vperm.xlu0 %7554, %v8107_v36  }
 0x1a5   : > { %v8429_v35 = vpop.permute.xlu1 %541 }
 0x1a6   : > { %11520 = vst [vmem:[#allocation75_spill] sm:$0xff] %v8429_v35  ;;  %v391_v0 = vpop.permute.xlu0 %390 }
 0x1a7   : > { %1298 = vperm.xlu1 %7529, %v7968_v5   ;;  %1265 = vperm.xlu0 %7554, %v8112_v37   ;;  %v428_v5 = vlaneseq  ;;  %v5962_v37 = vld [vmem:[%s7955_s24 + $0xd1] sm:$0xff] }
 0x1a9   : > { %v8451_v33 = vshrl.u32 %v428_v5, 7 }
 0x1aa   : > { %v8433_v11 = vpop.permute.xlu1 %706  ;;  %v8435_v29 = vpop.permute.xlu0 %752 }
 0x1ab   : > { %11521 = vst [vmem:[#allocation76_spill] sm:$0xff] %v8433_v11  ;;  %1782 = vperm.xlu1 %7529, %v8210_v12   ;;  %1901 = vperm.xlu0 %7554, %v8120_v39   ;;  %11525 = vst [vmem:[#allocation80_spill] sm:$0xff] %v8451_v33 }
 0x1ae   : > { %v8439_v25 = vpop.permute.xlu1 %948  ;;  %v8441_v10 = vpop.permute.xlu0 %400 }
 0x1af   : > { %11522 = vst [vmem:[#allocation77_spill] sm:$0xff] %v8439_v25  ;;  %1076 = vperm.xlu1 %7529, %v8219_v24   ;;  %2317 = vperm.xlu0 %7554, %v8081_v32   ;;  %v8461_v24 = vsub.s32 1, %v8451_v33  ;;  %v8466_v32 = vsub.s32 0, %v8451_v33  ;;  %v8503_v25 = vld [vmem:[%s7955_s24 + $0x21] sm:$0xff] }
 0x1b0   : > { %11539 = vst [vmem:[#allocation94_spill] sm:$0xff] %v8503_v25 }
 0x1b1   : > { %11529 = vst [vmem:[#allocation84_spill] sm:$0xff] %v8461_v24  ;;  %11530 = vst [vmem:[#allocation85_spill] sm:$0xff] %v8466_v32 }
 0x1b2   : > { %v8445_v36 = vpop.permute.xlu1 %1060  ;;  %v8448_v18 = vpop.permute.xlu0 %757 }
 0x1b3   : > { %11523 = vst [vmem:[#allocation78_spill] sm:$0xff] %v8445_v36  ;;  %11524 = vst [vmem:[#allocation79_spill] sm:$0xff] %v8448_v18  ;;  %1302 = vperm.xlu1 %7529, %v8073_v30   ;;  %1906 = vperm.xlu0 %7554, %v5962_v37   ;;  %v377_v30 = vld [vmem:[#allocation3] sm:$0xff]  ;;  %v551_v18 = vsub.s32 2, %v8451_v33 }
 0x1b4   : > { %v8474_v38 = vrot.slane %v377_v30, %v8461_v24  ;;  %v8480_v2 = vrot.slane %v377_v30, %v8466_v32 }
 0x1b6   : > { %v8453_v39 = vpop.permute.xlu1 %1602  ;;  %v8458_v61 = vpop.permute.xlu0 %762  ;;  %11533 = vst [vmem:[#allocation88_spill] sm:$0xff] %v8474_v38  ;;  %11534 = vst [vmem:[#allocation89_spill] sm:$0xff] %v8480_v2  ;;  %v1481_v36 = vmul.f32 %v8146_v46, %v8474_v38 }
 0x1b7   : > { %11526 = vst [vmem:[#allocation81_spill] sm:$0xff] %v8453_v39  ;;  %11528 = vst [vmem:[#allocation83_spill] sm:$0xff] %v8458_v61  ;;  %1414 = vperm.xlu1 %7529, %v7978_v9   ;;  %1385 = vperm.xlu0 %7554, %v8456_v13   ;;  %v603_v9 = vsub.s32 3, %v8451_v33 }
 0x1b9   : > { %v8492_v14 = vrot.slane %v377_v30, %v603_v9 }
 0x1ba   : > { %v8468_v37 = vpop.permute.xlu0 %993 }
 0x1bb   : > { %11531 = vst [vmem:[#allocation86_spill] sm:$0xff] %v8468_v37  ;;  %v8470_v5 = vpop.permute.xlu1 %656  ;;  %1786 = vperm.xlu1 %7529, %v8414_v63   ;;  %2219 = vperm.xlu0 %7554, %v8153_v48   ;;  %11538 = vst [vmem:[#allocation93_spill] sm:$0xff] %v8492_v14  ;;  %v1465_v48 = vmul.f32 %v8137_v42, %v8480_v2  ;;  %v432_v37 = vmul.f32 %v8480_v2, %v391_v0  ;;  %v8519_v63 = vld [vmem:[#allocation3 + $0x8] sm:$0xff] }
 0x1bc   : > { %11532 = vst [vmem:[#allocation87_spill] sm:$0xff] %v8470_v5  ;;  %v8486_v5 = vrot.slane %v377_v30, %v551_v18  ;;  %v1513_v0 = vmul.f32 %v8228_v6, %v8492_v14  ;;  %11544 = vst [vmem:[#allocation98_spill] sm:$0xff] %v8519_v63 }
 0x1bd   : > { %v1489_v22 = vadd.f32 %v1481_v36, %v1465_v48  ;;  %v11545_v36 = vsub.s32 7, %v8451_v33 }
 0x1be   : > { %v8482_v31 = vpop.permute.xlu0 %405  ;;  %11537 = vst [vmem:[#allocation92_spill] sm:$0xff] %v8486_v5 }
 0x1bf   : > { %11535 = vst [vmem:[#allocation90_spill] sm:$0xff] %v8482_v31  ;;  %v8484_v13 = vpop.permute.xlu1 %777  ;;  %1185 = vperm.xlu1 %7529, %v8094_v34   ;;  %2434 = vperm.xlu0 %7554, %v8166_v52   ;;  %v484_v31 = vmul.f32 %v8474_v38, %v8139_v43  ;;  %v723_v34 = vsub.s32 5, %v8451_v33  ;;  %v11542_v43 = vsub.s32 4, %v8451_v33  ;;  %v8527_v48 = vrot.slane %v377_v30, %v11545_v36 }
 0x1c0   : > { %11536 = vst [vmem:[#allocation91_spill] sm:$0xff] %v8484_v13  ;;  %v1497_v13 = vmul.f32 %v8155_v49, %v8486_v5  ;;  %v605_v36 = vmul.f32 %v8492_v14, %v8146_v46 }
 0x1c1   : > { %v8514_v11 = vrot.slane %v377_v30, %v11542_v43  ;;  %v8531_v43 = vrot.slane %v8519_v63, %v8461_v24 }
 0x1c2   : > { %v8508_v52 = vpop.permute.xlu0 %526  ;;  %v1505_v61 = vadd.f32 %v1497_v13, %v1489_v22 }
 0x1c3   : > { %11540 = vst [vmem:[#allocation95_spill] sm:$0xff] %v8508_v52  ;;  %v8510_v39 = vpop.permute.xlu1 %1008  ;;  %11543 = vst [vmem:[#allocation97_spill] sm:$0xff] %v8514_v11  ;;  %7530 = vset.pattern.permute.xlu1 %v11470_v17  ;;  %v1577_v56 = vmul.f32 %v8272_v3, %v8514_v11  ;;  %v492_v52 = vadd.f32 %v484_v31, %v432_v37  ;;  %2337 = vperm.xlu0 %7554, %v8176_v55   ;;  %v11547_v17 = vsub.s32 6, %v8451_v33 }
 0x1c4   : > { %11541 = vst [vmem:[#allocation96_spill] sm:$0xff] %v8510_v39  ;;  %1360 = vperm.xlu1 %7530, %v8503_v25   ;;  %v8533_v39 = vrot.slane %v377_v30, %v723_v34  ;;  %v553_v55 = vmul.f32 %v8486_v5, %v8137_v42  ;;  %v1521_v3 = vadd.f32 %v1513_v0, %v1505_v61 }
 0x1c5   : > { %v8537_v25 = vrot.slane %v377_v30, %v11547_v17  ;;  %v8545_v31 = vrot.slane %v8519_v63, %v8466_v32  ;;  %v8548_v37 = vrot.slane %v8519_v63, %v603_v9  ;;  %v8554_v17 = vmul.f32 %v8492_v14, %v8150_v47 }
 0x1c6   : > { %11546 = vst [vmem:[#allocation99_spill] sm:$0xff] %v8533_v39  ;;  %v411_v13 = vpop.permute.xlu0 %410  ;;  %v8557_v30 = vrot.slane %v8519_v63, %v723_v34  ;;  %v8560_v42 = vrot.slane %v8519_v63, %v551_v18  ;;  %v1483_v61 = vmul.f32 %v8150_v47, %v8474_v38  ;;  %v1625_v9 = vmul.f32 %v8194_v62, %v8533_v39 }
 0x1c7   : > { %v8539_v22 = vpop.permute.xlu1 %1720  ;;  %11549 = vst [vmem:[#allocation101_spill] sm:$0xff] %v8548_v37  ;;  %v1585_v0 = vadd.f32 %v1577_v56, %v1521_v3  ;;  %v561_v46 = vadd.f32 %v553_v55, %v492_v52  ;;  %2805 = vperm.xlu0 %7554, %v8056_v27   ;;  %v8572_v34 = vmul.f32 %v8531_v43, %v8159_v50  ;;  %v5972_v56 = vld [vmem:[%s7955_s24 + $0x180] sm:$0xff] }
 0x1c8   : > { %11548 = vst [vmem:[#allocation100_spill] sm:$0xff] %v8539_v22  ;;  %11550 = vst [vmem:[#allocation102_spill] sm:$0xff] %v8557_v30  ;;  %1740 = vperm.xlu1 %7530, %v8226_v1   ;;  %v673_v22 = vmul.f32 %v8514_v11, %v8155_v49  ;;  %v1657_v18 = vmul.f32 %v8159_v50, %v8527_v48  ;;  %v1467_v47 = vmul.f32 %v8216_v16, %v8480_v2 }
 0x1c9   : > { %11551 = vst [vmem:[#allocation103_spill] sm:$0xff] %v8560_v42  ;;  %11552 = vst [vmem:[#allocation104_spill] sm:$0xff] %v8572_v34  ;;  %v8583_v27 = vmul.f32 %v8159_v50, %v8492_v14  ;;  %v2555_v49 = vmul.f32 %v8159_v50, %v8474_v38  ;;  %v8589_v62 = vmul.f32 %v8527_v48, %v8168_v53  ;;  %v8615_v42 = vld [vmem:[%s7955_s24 + $0x31] sm:$0xff] }
 0x1ca   : > { %v8578_v24 = vpop.permute.xlu0 %767  ;;  %v8593_v52 = vmul.f32 %v8168_v53, %v8474_v38  ;;  %v8599_v3 = vmul.f32 %v8492_v14, %v8180_v57  ;;  %v1485_v32 = vmul.f32 %v8180_v57, %v8474_v38  ;;  %v8605_v50 = vmul.f32 %v8189_v60, %v8527_v48 }
 0x1cb   : > { %11553 = vst [vmem:[#allocation105_spill] sm:$0xff] %v8578_v24  ;;  %11554 = vst [vmem:[#allocation106_spill] sm:$0xff] %v8583_v27  ;;  %v8595_v55 = vpop.permute.xlu1 %661  ;;  %v2539_v24 = vmul.f32 %v8235_v59, %v8480_v2  ;;  %v2557_v53 = vmul.f32 %v8189_v60, %v8474_v38  ;;  %v486_v30 = vmul.f32 %v8474_v38, %v8205_v7  ;;  %2229 = vperm.xlu0 %7554, %v5972_v56  }
 0x1cc   : > { %11555 = vst [vmem:[#allocation107_spill] sm:$0xff] %v8595_v55  ;;  %11556 = vst [vmem:[#allocation108_spill] sm:$0xff] %v8605_v50  ;;  %1255 = vperm.xlu1 %7530, %v8185_v58   ;;  %v1633_v55 = vadd.f32 %v1625_v9, %v1585_v0  ;;  %v613_v34 = vadd.f32 %v605_v36, %v561_v46  ;;  %v555_v57 = vmul.f32 %v8486_v5, %v8216_v16 }
 0x1cd   : > { %v1491_v50 = vadd.f32 %v1483_v61, %v1467_v47  ;;  %v725_v27 = vmul.f32 %v8533_v39, %v8228_v6  ;;  %v1499_v58 = vmul.f32 %v8258_v20, %v8486_v5  ;;  %v8627_v7 = vmul.f32 %v8545_v31, %v8235_v59 }
 0x1ce   : > { %v8623_v60 = vpop.permute.xlu0 %1544  ;;  %v1641_v36 = vmul.f32 %v8235_v59, %v8537_v25  ;;  %v8633_v16 = vmul.f32 %v8235_v59, %v8486_v5  ;;  %v434_v6 = vmul.f32 %v8480_v2, %v8441_v10  ;;  %v490_v61 = vmul.f32 %v8474_v38, %v8237_v44 }
 0x1cf   : > { %11557 = vst [vmem:[#allocation109_spill] sm:$0xff] %v8623_v60  ;;  %v8641_v9 = vmul.f32 %v8492_v14, %v8244_v54  ;;  %v436_v0 = vmul.f32 %v8480_v2, %v411_v13  ;;  %v8647_v47 = vadd.f32 %v2555_v49, %v2539_v24  ;;  %v8651_v59 = vmul.f32 %v8250_v45, %v8548_v37  ;;  %v8658_v60 = vld [vmem:[%s7955_s24 + $0xa1] sm:$0xff] }
 0x1d0   : > { %1365 = vperm.xlu1 %7530, %v8615_v42   ;;  %v8645_v46 = vpop.permute.xlu1 %835  ;;  %v8655_v10 = vmul.f32 %v8250_v45, %v8533_v39  ;;  %v1649_v44 = vadd.f32 %v1641_v36, %v1633_v55  ;;  %v681_v56 = vadd.f32 %v673_v22, %v613_v34  ;;  %2342 = vperm.xlu0 %7554, %v8352_v15  }
 0x1d1   : > { %11558 = vst [vmem:[#allocation110_spill] sm:$0xff] %v8645_v46  ;;  %v8663_v13 = vmul.f32 %v8514_v11, %v8258_v20  ;;  %v1507_v24 = vadd.f32 %v1499_v58, %v1491_v50  ;;  %v488_v49 = vmul.f32 %v8474_v38, %v8306_v26  ;;  %v1469_v54 = vmul.f32 %v8312_v40, %v8480_v2 }
 0x1d2   : > { %11559 = vst [vmem:[#allocation111_spill] sm:$0xff] %v8655_v10  ;;  %v8669_v46 = vpop.permute.xlu0 %772  ;;  %v8673_v45 = vmul.f32 %v8527_v48, %v8265_v8  ;;  %v8677_v15 = vmul.f32 %v8265_v8, %v8474_v38  ;;  %v1515_v20 = vmul.f32 %v8321_v51, %v8492_v14  ;;  %v494_v58 = vadd.f32 %v486_v30, %v434_v6  ;;  %v11581_v10 = vld [vmem:[#allocation20_spill] sm:$0xff] }
 0x1d3   : > { %v8683_v26 = vmul.f32 %v8274_v19, %v8533_v39  ;;  %v2541_v22 = vmul.f32 %v8326_v23, %v8480_v2  ;;  %v438_v34 = vmul.f32 %v8480_v2, %v8423_v41  ;;  %v496_v55 = vadd.f32 %v488_v49, %v436_v0 }
 0x1d4   : > { %11560 = vst [vmem:[#allocation112_spill] sm:$0xff] %v8673_v45  ;;  %1891 = vperm.xlu1 %7530, %v8658_v60   ;;  %v8690_v50 = vpop.permute.xlu1 %1173  ;;  %v557_v8 = vmul.f32 %v8486_v5, %v8312_v40  ;;  %v733_v36 = vadd.f32 %v725_v27, %v681_v56  ;;  %v794_v30 = vmul.f32 %v8537_v25, %v8435_v29  ;;  %v11568_v45 = vmov 1  }
 0x1d5   : > { %v8696_v19 = vadd.f32 %v1657_v18, %v1649_v44  ;;  %2815 = vperm.xlu0 %7554, %v8210_v12   ;;  %v1493_v6 = vadd.f32 %v1485_v32, %v1469_v54  ;;  %v8701_v41 = vmul.f32 %v8533_v39, %v8321_v51  ;;  %v559_v0 = vmul.f32 %v8486_v5, %v8429_v35 }
 0x1d6   : > { %v2001_v49 = vmul.f32 %v8435_v29, %v8480_v2  ;;  %v8707_v40 = vpop.permute.xlu0 %1003  ;;  %v1523_v27 = vadd.f32 %v1515_v20, %v1507_v24  ;;  %v563_v56 = vadd.f32 %v555_v57, %v494_v58  ;;  %v8711_v18 = vmul.f32 %v8326_v23, %v8537_v25  ;;  %v11562_v29 = vld [vmem:[#allocation16_spill] sm:$0xff]  ;;  %v11563_v23 = vld [vmem:[#allocation71_spill] sm:$0xff] }
 0x1d7   : > { %v11561_v54 = vsub.s32 4, %v8451_v33  ;;  %v1501_v51 = vmul.f32 %v8363_v28, %v8486_v5  ;;  %v498_v32 = vadd.f32 %v490_v61, %v438_v34  ;;  %v565_v44 = vadd.f32 %v557_v8, %v496_v55  ;;  %v8746_v55 = vld [vmem:[%s7955_s24 + $0x221] sm:$0xff] }
 0x1d8   : > { %1139 = vperm.xlu1 %7530, %v11562_v29   ;;  %v8721_v35 = vadd.f32 %v2557_v53, %v2541_v22  ;;  %v1579_v57 = vmul.f32 %v8377_v4, %v8514_v11  ;;  %v802_v24 = vadd.f32 %v794_v30, %v733_v36  ;;  %v8727_v58 = vmul.f32 %v8334_v21, %v8531_v43  ;;  %v11567_v29 = vld [vmem:[#allocation81_spill] sm:$0xff] }
 0x1d9   : > { %v8716_v12 = vrot.slane %v8519_v63, %v11561_v54  ;;  %v1560_v20 = vpop.permute.xlu1 %1559  ;;  %v8731_v54 = vmul.f32 %v8334_v21, %v8492_v14  ;;  %2820 = vperm.xlu0 %7554, %v11563_v23   ;;  %v567_v61 = vadd.f32 %v559_v0, %v498_v32  ;;  %v2025_v34 = vadd.f32 %v8593_v52, %v2001_v49  ;;  %v11564_v23 = vld [vmem:[#allocation76_spill] sm:$0xff]  ;;  %v11566_v32 = vld [vmem:[#allocation58_spill] sm:$0xff] }
 0x1da   : > { %v8735_v53 = vpop.permute.xlu0 %1715  ;;  %v8739_v4 = vmul.f32 %v8548_v37, %v8334_v21  ;;  %v8743_v22 = vmul.f32 %v8334_v21, %v8533_v39  ;;  %v677_v8 = vmul.f32 %v8514_v11, %v8363_v28  ;;  %v1517_v36 = vmul.f32 %v11564_v23, %v8492_v14 }
 0x1db   : > { %v615_v52 = vadd.f32 %v8554_v17, %v563_v56  ;;  %v11565_v30 = vsub.s32 6, %v8451_v33  ;;  %v1509_v49 = vadd.f32 %v1501_v51, %v1493_v6  ;;  %v8760_v21 = vmul.f32 %v8527_v48, %v11566_v32 }
 0x1dc   : > { %v1627_v37 = vmul.f32 %v11567_v29, %v8533_v39  ;;  %v617_v28 = vadd.f32 %v8599_v3, %v565_v44  ;;  %7531 = vset.pattern.permute.xlu1 %v11568_v45  ;;  %v2021_v17 = vmul.f32 %v11566_v32, %v8474_v38  ;;  %v1587_v56 = vadd.f32 %v1579_v57, %v1523_v27  ;;  %v11572_v57 = vld [vmem:[#allocation77_spill] sm:$0xff] }
 0x1dd   : > { %v8756_v0 = vrot.slane %v8519_v63, %v11565_v30  ;;  %v854_v33 = vadd.f32 %v8589_v62, %v802_v24  ;;  %v11569_v30 = vld [vmem:[#allocation94_spill] sm:$0xff]  ;;  %2835 = vperm.xlu0 %7554, %v8746_v55   ;;  %v729_v6 = vmul.f32 %v8533_v39, %v11564_v23  ;;  %v2041_v51 = vadd.f32 %v8633_v16, %v2025_v34 }
 0x1de   : > { %1418 = vperm.xlu1 %7531, %v11569_v30   ;;  %v8775_v29 = vadd.f32 %v8641_v9, %v567_v61  ;;  %v1581_v3 = vmul.f32 %v1560_v20, %v8514_v11  ;;  %v8778_v44 = vpop.permute.xlu1 %710  ;;  %v894_v32 = vpop.permute.xlu0 %893  ;;  %v1525_v27 = vadd.f32 %v1517_v36, %v1509_v49  ;;  %v8782_v62 = vmul.f32 %v8531_v43, %v11572_v57  ;;  %v11573_v20 = vld [vmem:[#allocation86_spill] sm:$0xff] }
 0x1df   : > { %11571 = vst [vmem:[#allocation71_spill] sm:$0xff] %v8778_v44  ;;  %v8786_v24 = vmul.f32 %v11572_v57, %v8527_v48  ;;  %v683_v23 = vadd.f32 %v8663_v13, %v615_v52  ;;  %v8791_v16 = vmul.f32 %v11572_v57, %v8492_v14  ;;  %v1635_v9 = vadd.f32 %v1627_v37, %v1587_v56  ;;  %v11574_v13 = vld [vmem:[#allocation73_spill] sm:$0xff]  ;;  %v11575_v52 = vld [vmem:[#allocation106_spill] sm:$0xff]  ;;  %v11576_v37 = vld [vmem:[#allocation83_spill] sm:$0xff] }
 0x1e0   : > { %11570 = vst [vmem:[#allocation16_spill] sm:$0xff] %v8775_v29  ;;  %v1673_v61 = vmul.f32 %v11573_v20, %v8545_v31  ;;  %v685_v34 = vadd.f32 %v677_v8, %v617_v28  ;;  %v923_v36 = vadd.f32 %v8627_v7, %v854_v33  ;;  %v8798_v49 = vmul.f32 %v11572_v57, %v8474_v38  ;;  %v5894_v57 = vld [vmem:[%s7955_s24 + $0x100] sm:$0xff] }
 0x1e1   : > { %v2571_v30 = vmul.f32 %v11573_v20, %v8486_v5  ;;  %425 = vperm.xlu0 %7554, %v11574_v13   ;;  %v2057_v63 = vadd.f32 %v11575_v52, %v2041_v51  ;;  %v796_v56 = vmul.f32 %v8537_v25, %v11576_v37  ;;  %v798_v8 = vmul.f32 %v8537_v25, %v8669_v46  ;;  %v11578_v13 = vld [vmem:[#allocation103_spill] sm:$0xff] }
 0x1e2   : > { %1790 = vperm.xlu1 %7531, %v8226_v1   ;;  %v1589_v33 = vadd.f32 %v1581_v3, %v1525_v27  ;;  %v8809_v7 = vpop.permute.xlu1 %952  ;;  %v1115_v28 = vpop.permute.xlu0 %1114  ;;  %v735_v44 = vadd.f32 %v8701_v41, %v683_v23  ;;  %v2003_v1 = vmul.f32 %v11576_v37, %v8480_v2  ;;  %v1035_v38 = vmul.f32 %v11578_v13, %v11573_v20  ;;  %v11579_v27 = vld [vmem:[#allocation78_spill] sm:$0xff]  ;;  %v11580_v37 = vld [vmem:[#allocation104_spill] sm:$0xff] }
 0x1e3   : > { %11577 = vst [vmem:[#allocation76_spill] sm:$0xff] %v8809_v7  ;;  %v2065_v51 = vmul.f32 %v11573_v20, %v8514_v11  ;;  %v1651_v52 = vadd.f32 %v8711_v18, %v1635_v9  ;;  %v737_v45 = vadd.f32 %v729_v6, %v685_v34  ;;  %v1681_v3 = vadd.f32 %v1673_v61, %v8696_v19 }
 0x1e4   : > { %v8823_v7 = vmul.f32 %v11579_v27, %v8531_v43  ;;  %v2005_v41 = vmul.f32 %v8669_v46, %v8480_v2  ;;  %v2579_v23 = vadd.f32 %v2571_v30, %v8647_v47  ;;  %v975_v29 = vadd.f32 %v11580_v37, %v923_v36 }
 0x1e5   : > { %546 = vperm.xlu0 %7554, %v5894_v57   ;;  %v806_v20 = vadd.f32 %v798_v8, %v737_v45  ;;  %v1637_v18 = vadd.f32 %v8683_v26, %v1589_v33  ;;  %v1645_v6 = vmul.f32 %v894_v32, %v8537_v25  ;;  %v8836_v9 = vmul.f32 %v11579_v27, %v8492_v14  ;;  %v11583_v45 = vld [vmem:[#allocation108_spill] sm:$0xff] }
 0x1e6   : > { %1310 = vperm.xlu1 %7531, %v11581_v10   ;;  %v8832_v19 = vpop.permute.xlu0 %1554  ;;  %v8838_v61 = vadd.f32 %v796_v56, %v735_v44  ;;  %v8841_v46 = vadd.f32 %v8677_v15, %v2003_v1  ;;  %v1043_v47 = vadd.f32 %v1035_v38, %v975_v29  ;;  %v2073_v34 = vadd.f32 %v2065_v51, %v2057_v63  ;;  %v11584_v38 = vld [vmem:[#allocation82_spill] sm:$0xff]  ;;  %v11585_v1 = vld [vmem:[#allocation107_spill] sm:$0xff] }
 0x1e7   : > { %v8843_v10 = vpop.permute.xlu1 %1119  ;;  %v1667_v26 = vadd.f32 %v11583_v45, %v1651_v52  ;;  %v1697_v36 = vadd.f32 %v8727_v58, %v1681_v3  ;;  %v919_v30 = vmul.f32 %v8545_v31, %v894_v32  ;;  %v2037_v8 = vmul.f32 %v894_v32, %v8486_v5 }
 0x1e8   : > { %11582 = vst [vmem:[#allocation58_spill] sm:$0xff] %v8843_v10  ;;  %v2029_v33 = vadd.f32 %v2021_v17, %v2005_v41  ;;  %v1753_v44 = vmul.f32 %v8735_v53, %v11578_v13  ;;  %v2595_v15 = vadd.f32 %v8731_v54, %v2579_v23  ;;  %v858_v63 = vadd.f32 %v8760_v21, %v806_v20  ;;  %v8861_v17 = vld [vmem:[%s7955_s24 + $0x101] sm:$0xff]  ;;  %v11586_v21 = vld [vmem:[#allocation102_spill] sm:$0xff] }
 0x1e9   : > { %666 = vperm.xlu0 %7554, %v11584_v38   ;;  %v2603_v29 = vmul.f32 %v8735_v53, %v8514_v11  ;;  %v1653_v58 = vadd.f32 %v1645_v6, %v1637_v18  ;;  %v2543_v56 = vmul.f32 %v894_v32, %v8480_v2  ;;  %v679_v51 = vmul.f32 %v8514_v11, %v11585_v1 }
 0x1ea   : > { %1422 = vperm.xlu1 %7531, %v8615_v42   ;;  %v8858_v57 = vpop.permute.xlu0 %782  ;;  %v1095_v54 = vadd.f32 %v8739_v4, %v1043_v47  ;;  %v1156_v42 = vmul.f32 %v8716_v12, %v1115_v28  ;;  %v2089_v52 = vadd.f32 %v8743_v22, %v2073_v34  ;;  %v1208_v3 = vmul.f32 %v11586_v21, %v8690_v50 }
 0x1eb   : > { %v927_v53 = vadd.f32 %v919_v30, %v858_v63  ;;  %v2045_v41 = vadd.f32 %v2037_v8, %v2029_v33  ;;  %v2097_v32 = vmul.f32 %v1115_v28, %v8537_v25  ;;  %v1675_v37 = vmul.f32 %v8707_v40, %v8545_v31  ;;  %v8887_v8 = vld [vmem:[%s7955_s24 + $0x130] sm:$0xff] }
 0x1ec   : > { %v8871_v23 = vpop.permute.xlu1 %1606  ;;  %v2573_v4 = vmul.f32 %v8707_v40, %v8486_v5  ;;  %v1761_v20 = vadd.f32 %v1753_v44, %v1697_v36  ;;  %v2113_v22 = vmul.f32 %v8690_v50, %v8527_v48  ;;  %v2611_v18 = vadd.f32 %v2603_v29, %v2595_v15 }
 0x1ed   : > { %1574 = vperm.xlu0 %7554, %v8861_v17   ;;  %v2567_v28 = vadd.f32 %v8798_v49, %v2543_v56  ;;  %v1669_v47 = vadd.f32 %v8786_v24, %v1653_v58  ;;  %v1164_v34 = vadd.f32 %v1156_v42, %v1095_v54  ;;  %v979_v50 = vadd.f32 %v8782_v62, %v927_v53 }
 0x1ee   : > { %1946 = vperm.xlu1 %7531, %v8658_v60   ;;  %v1014_v6 = vpop.permute.xlu0 %1013  ;;  %v2105_v60 = vadd.f32 %v2097_v32, %v2089_v52  ;;  %v2061_v49 = vadd.f32 %v8791_v16, %v2045_v41  ;;  %v1809_v24 = vadd.f32 %v8651_v59, %v1761_v20  ;;  %v11588_v38 = vmov 0   ;;  %v11590_v52 = vld [vmem:[#allocation111_spill] sm:$0xff] }
 0x1ef   : > { %v1039_v45 = vmul.f32 %v11578_v13, %v1014_v6  ;;  %v1677_v30 = vmul.f32 %v1014_v6, %v8545_v31  ;;  %v2069_v36 = vmul.f32 %v1014_v6, %v8514_v11  ;;  %v2575_v33 = vmul.f32 %v1014_v6, %v8486_v5 }
 0x1f0   : > { %v8890_v44 = vpop.permute.xlu1 %714  ;;  %v1683_v63 = vadd.f32 %v1675_v37, %v1667_v26  ;;  %v2581_v29 = vadd.f32 %v2573_v4, %v8721_v35  ;;  %v1216_v16 = vadd.f32 %v1208_v3, %v1164_v34  ;;  %v8912_v35 = vld [vmem:[%s7955_s24 + $0xf0] sm:$0xff]  ;;  %v2627_v53 = vadd.f32 %v11590_v52, %v2611_v18  ;;  %v11591_v3 = vld [vmem:[#allocation112_spill] sm:$0xff] }
 0x1f1   : > { %v8895_v15 = vadd.f32 %v1677_v30, %v1669_v47  ;;  %v8899_v58 = vadd.f32 %v2575_v33, %v2567_v28  ;;  %v8902_v54 = vadd.f32 %v1039_v45, %v979_v50  ;;  %v8904_v62 = vadd.f32 %v2069_v36, %v2061_v49  ;;  %1750 = vperm.xlu0 %7554, %v8746_v55   ;;  %v11592_v28 = vld [vmem:[#allocation16_spill] sm:$0xff]  ;;  %v8938_v50 = vld [vmem:[%s7955_s24 + $0xb1] sm:$0xff] }
 0x1f2   : > { %7532 = vset.pattern.permute.xlu1 %v11588_v38  ;;  %v1236_v56 = vpop.permute.xlu0 %1235  ;;  %v731_v59 = vmul.f32 %v8533_v39, %v8890_v44  ;;  %v2121_v41 = vadd.f32 %v2113_v22, %v2105_v60  ;;  %v856_v20 = vadd.f32 %v11591_v3, %v8838_v61  ;;  %v687_v6 = vadd.f32 %v679_v51, %v11592_v28 }
 0x1f3   : > { %11587 = vst [vmem:[#allocation81_spill] sm:$0xff] %v8895_v15  ;;  %11589 = vst [vmem:[#allocation94_spill] sm:$0xff] %v8899_v58  ;;  %2204 = vperm.xlu1 %7532, %v8887_v8   ;;  %v1277_v42 = vmul.f32 %v8756_v0, %v1236_v56  ;;  %v1817_v26 = vmul.f32 %v1236_v56, %v8716_v12  ;;  %v2129_v32 = vmul.f32 %v1236_v56, %v8545_v31  ;;  %v11597_v49 = vmov 1   ;;  %v11623_v15 = vld [vmem:[#allocation90_spill] sm:$0xff] }
 0x1f4   : > { %v2635_v37 = vmul.f32 %v1236_v56, %v8537_v25  ;;  %v8917_v4 = vpop.permute.xlu1 %956  ;;  %v1699_v30 = vadd.f32 %v8823_v7, %v1683_v63  ;;  %v2597_v36 = vadd.f32 %v8836_v9, %v2581_v29  ;;  %v800_v61 = vmul.f32 %v8537_v25, %v8858_v57 }
 0x1f5   : > { %v8922_v47 = vadd.f32 %v1277_v42, %v1216_v16  ;;  %v8924_v34 = vadd.f32 %v1817_v26, %v1809_v24  ;;  %v8926_v45 = vadd.f32 %v2129_v32, %v2121_v41  ;;  %v739_v60 = vadd.f32 %v731_v59, %v687_v6  ;;  %7561 = vset.pattern.permute.xlu0 %v11597_v49  ;;  %v11598_v24 = vld [vmem:[#allocation47_spill] sm:$0xff]  ;;  %v11602_v16 = vld [vmem:[#allocation22_spill] sm:$0xff] }
 0x1f6   : > { %v8928_v18 = vadd.f32 %v2635_v37, %v2627_v53  ;;  %v1726_v22 = vpop.permute.xlu0 %1725  ;;  %v917_v56 = vmul.f32 %v8545_v31, %v11598_v24  ;;  %v2035_v7 = vmul.f32 %v11598_v24, %v8486_v5  ;;  %v969_v59 = vmul.f32 %v8531_v43, %v11602_v16  ;;  %v11605_v6 = vld [vmem:[#allocation110_spill] sm:$0xff] }
 0x1f7   : > { %11593 = vst [vmem:[#allocation77_spill] sm:$0xff] %v8922_v47  ;;  %11594 = vst [vmem:[#allocation86_spill] sm:$0xff] %v8924_v34  ;;  %1260 = vperm.xlu1 %7532, %v8912_v35   ;;  %v1755_v51 = vmul.f32 %v1726_v22, %v11578_v13  ;;  %v2605_v33 = vmul.f32 %v1726_v22, %v8514_v11  ;;  %v2051_v42 = vmul.f32 %v11602_v16, %v8492_v14  ;;  %v11606_v22 = vld [vmem:[#allocation88_spill] sm:$0xff] }
 0x1f8   : > { %11595 = vst [vmem:[#allocation106_spill] sm:$0xff] %v8926_v45  ;;  %11596 = vst [vmem:[#allocation83_spill] sm:$0xff] %v8928_v18  ;;  %v8945_v63 = vpop.permute.xlu1 %1068  ;;  %v925_v26 = vadd.f32 %v917_v56, %v856_v20  ;;  %v2043_v52 = vadd.f32 %v2035_v7, %v8841_v46  ;;  %v808_v41 = vadd.f32 %v800_v61, %v739_v60 }
 0x1f9   : > { %11599 = vst [vmem:[#allocation78_spill] sm:$0xff] %v8945_v63  ;;  %v8947_v9 = vadd.f32 %v1755_v51, %v1699_v30  ;;  %v8949_v29 = vadd.f32 %v2605_v33, %v2597_v36  ;;  %v1037_v32 = vmul.f32 %v11578_v13, %v8707_v40  ;;  %v2067_v37 = vmul.f32 %v8707_v40, %v8514_v11  ;;  %v11607_v40 = vld [vmem:[#allocation66_spill] sm:$0xff]  ;;  %v11608_v33 = vld [vmem:[#allocation73_spill] sm:$0xff] }
 0x1fa   : > { %v8957_v53 = vpop.permute.xlu0 %898  ;;  %v2007_v3 = vmul.f32 %v8858_v57, %v8480_v2  ;;  %v852_v20 = vmul.f32 %v8527_v48, %v11605_v6  ;;  %v2059_v46 = vadd.f32 %v2051_v42, %v2043_v52  ;;  %v2023_v30 = vmul.f32 %v11605_v6, %v11606_v22  ;;  %v11609_v52 = vld [vmem:[#allocation63_spill] sm:$0xff] }
 0x1fb   : > { %11600 = vst [vmem:[#allocation104_spill] sm:$0xff] %v8947_v9  ;;  %11601 = vst [vmem:[#allocation20_spill] sm:$0xff] %v8949_v29  ;;  %1896 = vperm.xlu1 %7532, %v8938_v50   ;;  %v977_v61 = vadd.f32 %v969_v59, %v925_v26  ;;  %v1486_v60 = vmul.f32 %v11607_v40, %v11606_v22  ;;  %v1470_v59 = vmul.f32 %v11609_v52, %v8480_v2  ;;  %v11610_v26 = vld [vmem:[#allocation87_spill] sm:$0xff] }
 0x1fc   : > { %11603 = vst [vmem:[#allocation108_spill] sm:$0xff] %v8957_v53  ;;  %v8965_v28 = vpop.permute.xlu1 %1294  ;;  %v860_v51 = vadd.f32 %v852_v20, %v808_v41  ;;  %v2031_v24 = vadd.f32 %v2023_v30, %v2007_v3  ;;  %v2075_v42 = vadd.f32 %v2067_v37, %v2059_v46  ;;  %v1502_v6 = vmul.f32 %v11610_v26, %v8486_v5  ;;  %v8990_v20 = vld [vmem:[%s7955_s24 + $0x51] sm:$0xff]  ;;  %v11611_v30 = vld [vmem:[#allocation101_spill] sm:$0xff] }
 0x1fd   : > { %11604 = vst [vmem:[#allocation82_spill] sm:$0xff] %v8965_v28  ;;  %v1045_v16 = vadd.f32 %v1037_v32, %v977_v61  ;;  %v2083_v32 = vmul.f32 %v11579_v27, %v8533_v39  ;;  %v11612_v37 = vld [vmem:[#allocation29_spill] sm:$0xff]  ;;  %v1494_v61 = vadd.f32 %v1486_v60, %v1470_v59  ;;  %v11613_v40 = vld [vmem:[#allocation75_spill] sm:$0xff]  ;;  %v1503_v60 = vmul.f32 %v11585_v1, %v8486_v5 }
 0x1fe   : > { %v8972_v36 = vpop.permute.xlu0 %903  ;;  %v1487_v46 = vmul.f32 %v11612_v37, %v11606_v22  ;;  %v1471_v26 = vmul.f32 %v11613_v40, %v8480_v2  ;;  %v11616_v40 = vld [vmem:[#allocation95_spill] sm:$0xff]  ;;  %v2055_v29 = vmul.f32 %v8917_v4, %v8492_v14  ;;  %v2561_v28 = vmul.f32 %v8917_v4, %v11606_v22 }
 0x1ff   : > { %7533 = vset.pattern.permute.xlu1 %v11597_v49  ;;  %v921_v57 = vmul.f32 %v8545_v31, %v8972_v36  ;;  %v2039_v56 = vmul.f32 %v8972_v36, %v8486_v5  ;;  %v2091_v52 = vadd.f32 %v2083_v32, %v2075_v42  ;;  %v1468_v37 = vmul.f32 %v11616_v40, %v8480_v2  ;;  %v11619_v32 = vld [vmem:[#allocation37_spill] sm:$0xff] }
 0x200   : > { %1197 = vperm.xlu1 %7533, %v11608_v33   ;;  %v8981_v7 = vpop.permute.xlu1 %1778  ;;  %v1089_v33 = vmul.f32 %v11611_v30, %v11579_v27  ;;  %v1510_v27 = vadd.f32 %v1502_v6, %v1494_v61  ;;  %v1519_v42 = vmul.f32 %v8890_v44, %v8492_v14  ;;  %v1484_v1 = vmul.f32 %v11619_v32, %v11606_v22  ;;  %v11620_v61 = vld [vmem:[#allocation38_spill] sm:$0xff] }
 0x201   : > { %v8987_v41 = vadd.f32 %v921_v57, %v860_v51  ;;  %v8992_v10 = vadd.f32 %v2039_v56, %v2031_v24  ;;  %v11614_v51 = vld [vmem:[#allocation71_spill] sm:$0xff]  ;;  %v1630_v58 = vmul.f32 %v11620_v61, %v8533_v39 }
 0x202   : > { %v1125_v3 = vpop.permute.xlu0 %1124  ;;  %v1518_v57 = vmul.f32 %v11614_v51, %v8492_v14  ;;  %v1097_v24 = vadd.f32 %v1089_v33, %v1045_v16  ;;  %v1495_v33 = vadd.f32 %v1487_v46, %v1471_v26  ;;  %v1492_v44 = vadd.f32 %v1484_v1, %v1468_v37  ;;  %v11627_v1 = vld [vmem:[#allocation35_spill] sm:$0xff] }
 0x203   : > { %v1158_v56 = vmul.f32 %v8716_v12, %v1125_v3  ;;  %v2099_v45 = vmul.f32 %v1125_v3, %v8537_v25 }
 0x204   : > { %7534 = vset.pattern.permute.xlu1 %v11588_v38  ;;  %v1526_v3 = vadd.f32 %v1518_v57, %v1510_v27 }
 0x205   : > { %1375 = vperm.xlu1 %7534, %v8990_v20   ;;  %v9010_v59 = vpop.permute.xlu1 %1018  ;;  %v9014_v51 = vadd.f32 %v1158_v56, %v1097_v24  ;;  %v9016_v18 = vadd.f32 %v2099_v45, %v2091_v52  ;;  %v1511_v24 = vadd.f32 %v1503_v60, %v1495_v33  ;;  %v1646_v45 = vmul.f32 %v8957_v53, %v8537_v25  ;;  %v11624_v33 = vld [vmem:[#allocation40_spill] sm:$0xff] }
 0x206   : > { %11615 = vst [vmem:[#allocation107_spill] sm:$0xff] %v9010_v59  ;;  %v1565_v16 = vpop.permute.xlu0 %1564  ;;  %v435_v60 = vmul.f32 %v8480_v2, %v11623_v15  ;;  %v1631_v61 = vmul.f32 %v11624_v33, %v8533_v39  ;;  %v556_v15 = vmul.f32 %v8486_v5, %v11616_v40 }
 0x207   : > { %11617 = vst [vmem:[#allocation102_spill] sm:$0xff] %v9014_v51  ;;  %11618 = vst [vmem:[#allocation111_spill] sm:$0xff] %v9016_v18  ;;  %v1582_v6 = vmul.f32 %v1565_v16, %v8514_v11  ;;  %v1527_v56 = vadd.f32 %v1519_v42, %v1511_v24  ;;  %v11622_v16 = vld [vmem:[#allocation50_spill] sm:$0xff]  ;;  %v11626_v42 = vld [vmem:[#allocation25_spill] sm:$0xff]  ;;  %v487_v24 = vmul.f32 %v11606_v22, %v11627_v1 }
 0x208   : > { %v1500_v18 = vmul.f32 %v11622_v16, %v8486_v5 }
 0x209   : > { %7535 = vset.pattern.permute.xlu1 %v11597_v49  ;;  %v1590_v52 = vadd.f32 %v1582_v6, %v1526_v3  ;;  %v9029_v26 = vpop.permute.xlu1 %1240  ;;  %v1516_v6 = vmul.f32 %v11626_v42, %v8492_v14 }
 0x20a   : > { %2259 = vperm.xlu1 %7535, %v8887_v8   ;;  %11621 = vst [vmem:[#allocation112_spill] sm:$0xff] %v9029_v26  ;;  %v1570_v46 = vpop.permute.xlu0 %1569  ;;  %v1647_v8 = vmul.f32 %v8972_v36, %v8537_v25 }
 0x20b   : > { %v1638_v57 = vadd.f32 %v1630_v58, %v1590_v52  ;;  %v1583_v27 = vmul.f32 %v1570_v46, %v8514_v11  ;;  %v1508_v52 = vadd.f32 %v1500_v18, %v1492_v44 }
 0x20d   : > { %v9040_v3 = vadd.f32 %v1646_v45, %v1638_v57  ;;  %v1591_v37 = vadd.f32 %v1583_v27, %v1527_v56  ;;  %v9043_v58 = vpop.permute.xlu1 %1730  ;;  %v1091_v45 = vmul.f32 %v11611_v30, %v8945_v63  ;;  %v495_v57 = vadd.f32 %v487_v24, %v435_v60 }
 0x20e   : > { %1314 = vperm.xlu1 %7535, %v8912_v35   ;;  %v9051_v46 = vpop.permute.xlu0 %1129  ;;  %v2085_v35 = vmul.f32 %v8945_v63, %v8533_v39  ;;  %v1580_v56 = vmul.f32 %v8832_v19, %v8514_v11  ;;  %v1524_v44 = vadd.f32 %v1516_v6, %v1508_v52  ;;  %v11640_v63 = vld [vmem:[#allocation98_spill] sm:$0xff] }
 0x20f   : > { %11625 = vst [vmem:[#allocation16_spill] sm:$0xff] %v9040_v3  ;;  %v1639_v33 = vadd.f32 %v1631_v61, %v1591_v37  ;;  %v564_v18 = vadd.f32 %v556_v15, %v495_v57  ;;  %v1628_v61 = vmul.f32 %v8871_v23, %v8533_v39  ;;  %v1099_v1 = vadd.f32 %v1091_v45, %v8902_v54 }
 0x210   : > { %v2093_v60 = vadd.f32 %v2085_v35, %v8904_v62  ;;  %v1588_v24 = vadd.f32 %v1580_v56, %v1524_v44  ;;  %v728_v57 = vmul.f32 %v8533_v39, %v11626_v42  ;;  %v11633_v56 = vld [vmem:[#allocation26_spill] sm:$0xff] }
 0x211   : > { %v9059_v27 = vadd.f32 %v1647_v8, %v1639_v33  ;;  %v9062_v40 = vpop.permute.xlu1 %1023  ;;  %v9071_v8 = vld [vmem:[%s7955_s24 + $0x140] sm:$0xff]  ;;  %v676_v33 = vmul.f32 %v8514_v11, %v11622_v16  ;;  %v2558_v16 = vmul.f32 %v11633_v56, %v11606_v22  ;;  %v9132_v53 = vmul.f32 %v8531_v43, %v11633_v56 }
 0x212   : > { %1950 = vperm.xlu1 %7535, %v8938_v50   ;;  %v1135_v37 = vpop.permute.xlu0 %1134  ;;  %v608_v50 = vmul.f32 %v8492_v14, %v11619_v32  ;;  %v1636_v52 = vadd.f32 %v1628_v61, %v1588_v24  ;;  %v11631_v32 = vld [vmem:[#allocation68_spill] sm:$0xff]  ;;  %v11636_v24 = vld [vmem:[#allocation105_spill] sm:$0xff] }
 0x213   : > { %v1160_v26 = vmul.f32 %v8716_v12, %v1135_v37  ;;  %v2101_v19 = vmul.f32 %v1135_v37, %v8537_v25  ;;  %v1644_v45 = vmul.f32 %v11631_v32, %v8537_v25  ;;  %v2542_v37 = vmul.f32 %v11631_v32, %v8480_v2 }
 0x214   : > { %v616_v62 = vadd.f32 %v608_v50, %v564_v18  ;;  %v1660_v18 = vmul.f32 %v11633_v56, %v8527_v48 }
 0x215   : > { %v9075_v15 = vadd.f32 %v1160_v26, %v1099_v1  ;;  %v9077_v6 = vadd.f32 %v2101_v19, %v2093_v60  ;;  %v9080_v23 = vpop.permute.xlu1 %1245  ;;  %v1652_v61 = vadd.f32 %v1644_v45, %v1636_v52  ;;  %v11635_v60 = vld [vmem:[#allocation96_spill] sm:$0xff] }
 0x216   : > { %7536 = vset.pattern.permute.xlu1 %v11588_v38  ;;  %11630 = vst [vmem:[#allocation110_spill] sm:$0xff] %v9080_v23  ;;  %v9083_v54 = vpop.permute.xlu0 %1250  ;;  %v684_v44 = vadd.f32 %v676_v33, %v616_v62  ;;  %v2574_v19 = vmul.f32 %v11635_v60, %v8486_v5  ;;  %v797_v62 = vmul.f32 %v8537_v25, %v11636_v24  ;;  %v7565_v33 = vld [vmem:[%s7955_s24 + $0x150] sm:$0xff] }
 0x217   : > { %11628 = vst [vmem:[#allocation47_spill] sm:$0xff] %v9075_v15  ;;  %11629 = vst [vmem:[#allocation22_spill] sm:$0xff] %v9077_v6  ;;  %2209 = vperm.xlu1 %7536, %v9071_v8   ;;  %v1668_v52 = vadd.f32 %v1660_v18, %v1652_v61  ;;  %v1676_v45 = vmul.f32 %v11635_v60, %v8545_v31  ;;  %v11637_v6 = vld [vmem:[#allocation32_spill] sm:$0xff] }
 0x218   : > { %v736_v42 = vadd.f32 %v728_v57, %v684_v44  ;;  %v2590_v3 = vmul.f32 %v11637_v6, %v8492_v14  ;;  %v11638_v15 = vld [vmem:[#allocation80_spill] sm:$0xff]  ;;  %v1692_v61 = vmul.f32 %v11637_v6, %v8531_v43 }
 0x219   : > { %v9089_v26 = vpop.permute.xlu1 %1355 }
 0x21a   : > { %11632 = vst [vmem:[#allocation73_spill] sm:$0xff] %v9089_v26  ;;  %v9092_v35 = vpop.permute.xlu0 %1745 }
 0x21b   : > { %7537 = vset.pattern.permute.xlu1 %v11597_v49 }
 0x21c   : > { %1430 = vperm.xlu1 %7537, %v8990_v20   ;;  %v2566_v20 = vadd.f32 %v2558_v16, %v2542_v37  ;;  %v805_v16 = vadd.f32 %v797_v62, %v736_v42  ;;  %v2004_v37 = vmul.f32 %v11636_v24, %v8480_v2  ;;  %v7566_v42 = vld [vmem:[%s7955_s24 + $0x61] sm:$0xff] }
 0x21d   : > { %v9103_v1 = vpop.permute.xlu1 %1735  ;;  %v11643_v24 = vld [vmem:[#allocation53_spill] sm:$0xff] }
 0x21e   : > { %11634 = vst [vmem:[#allocation29_spill] sm:$0xff] %v9103_v1  ;;  %v9107_v50 = vpop.permute.xlu0 %1144  ;;  %v11639_v1 = vsub.s32 7, %v11638_v15  ;;  %v2582_v44 = vadd.f32 %v2574_v19, %v2566_v20  ;;  %v11642_v15 = vld [vmem:[#allocation43_spill] sm:$0xff]  ;;  %v849_v62 = vmul.f32 %v8527_v48, %v11643_v24  ;;  %v1756_v20 = vmul.f32 %v9043_v58, %v11578_v13 }
 0x21f   : > { %v9144_v19 = vmul.f32 %v11642_v15, %v8527_v48 }
 0x220   : > { %7538 = vset.pattern.permute.xlu1 %v11588_v38  ;;  %v9120_v57 = vrot.slane %v11640_v63, %v11639_v1  ;;  %v9136_v63 = vmul.f32 %v11633_v56, %v8492_v14  ;;  %v9140_v1 = vmul.f32 %v11642_v15, %v11586_v21  ;;  %v918_v56 = vmul.f32 %v8545_v31, %v11631_v32 }
 0x221   : > { %2214 = vperm.xlu1 %7538, %v7565_v33   ;;  %v1684_v33 = vadd.f32 %v1676_v45, %v1668_v52  ;;  %v2020_v52 = vmul.f32 %v11643_v24, %v11606_v22  ;;  %v2036_v45 = vmul.f32 %v11631_v32, %v8486_v5  ;;  %v2598_v47 = vadd.f32 %v2590_v3, %v2582_v44 }
 0x222   : > { %v9122_v59 = vpop.permute.xlu1 %1072  ;;  %v9124_v18 = vpop.permute.xlu0 %1370  ;;  %v857_v24 = vadd.f32 %v849_v62, %v805_v16  ;;  %v1663_v32 = vmul.f32 %v8917_v4, %v8527_v48  ;;  %v2063_v44 = vadd.f32 %v2055_v29, %v8992_v10  ;;  %v9197_v62 = vld [vmem:[%s7955_s24 + $0x1d0] sm:$0xff] }
 0x223   : > { %11641 = vst [vmem:[#allocation75_spill] sm:$0xff] %v9122_v59  ;;  %v973_v59 = vmul.f32 %v8531_v43, %v8917_v4  ;;  %v2028_v26 = vadd.f32 %v2020_v52, %v2004_v37  ;;  %v1700_v9 = vadd.f32 %v1692_v61, %v1684_v33  ;;  %v1041_v61 = vmul.f32 %v11578_v13, %v9062_v40 }
 0x224   : > { %v2071_v37 = vmul.f32 %v9062_v40, %v8514_v11  ;;  %v1671_v4 = vadd.f32 %v1663_v32, %v9059_v27  ;;  %v1820_v33 = vmul.f32 %v9083_v54, %v8716_v12  ;;  %v926_v52 = vadd.f32 %v918_v56, %v857_v24 }
 0x225   : > { %1380 = vperm.xlu1 %7538, %v7566_v42   ;;  %v2606_v42 = vmul.f32 %v9043_v58, %v8514_v11  ;;  %v981_v3 = vadd.f32 %v973_v59, %v8987_v41  ;;  %v2545_v58 = vmul.f32 %v8972_v36, %v8480_v2  ;;  %v1764_v16 = vadd.f32 %v1756_v20, %v1700_v9  ;;  %v9188_v9 = vld [vmem:[#allocation3 + $0x10] sm:$0x3] }
 0x226   : > { %v9161_v51 = vpop.permute.xlu1 %1298  ;;  %v9163_v34 = vpop.permute.xlu0 %1265  ;;  %v1679_v36 = vmul.f32 %v9062_v40, %v8545_v31  ;;  %v2577_v59 = vmul.f32 %v9062_v40, %v8486_v5  ;;  %v2044_v20 = vadd.f32 %v2036_v45, %v2028_v26  ;;  %v2079_v5 = vadd.f32 %v2071_v37, %v2063_v44 }
 0x227   : > { %11644 = vst [vmem:[#allocation95_spill] sm:$0xff] %v9161_v51  ;;  %v2614_v41 = vadd.f32 %v2606_v42, %v2598_v47  ;;  %v2569_v40 = vadd.f32 %v2561_v28, %v2545_v58  ;;  %v11646_v42 = vld [vmem:[#allocation85_spill] sm:$0xff]  ;;  %v1049_v51 = vadd.f32 %v1041_v61, %v981_v3  ;;  %v2609_v56 = vmul.f32 %v9092_v35, %v8514_v11 }
 0x228   : > { %v9201_v32 = vrot.slane %v9188_v9, %v11646_v42  ;;  %v1162_v44 = vmul.f32 %v8716_v12, %v9107_v50  ;;  %v2670_v37 = vmul.f32 %v9124_v18, %v8545_v31 }
 0x229   : > { %7539 = vset.pattern.permute.xlu1 %v11597_v49  ;;  %v2585_v23 = vadd.f32 %v2577_v59, %v2569_v40  ;;  %v7567_v59 = vld [vmem:[%s7955_s24 + $0xe1] sm:$0xff]  ;;  %v978_v40 = vadd.f32 %v9132_v53, %v926_v52  ;;  %v2068_v53 = vmul.f32 %v11635_v60, %v8514_v11  ;;  %v2084_v52 = vmul.f32 %v11637_v6, %v8533_v39 }
 0x22a   : > { %2263 = vperm.xlu1 %7539, %v9071_v8   ;;  %v1783_v10 = vpop.permute.xlu1 %1782  ;;  %v9186_v29 = vpop.permute.xlu0 %1901  ;;  %v2638_v8 = vmul.f32 %v9083_v54, %v8537_v25 }
 0x22b   : > { %11645 = vst [vmem:[#allocation37_spill] sm:$0xff] %v9186_v29  ;;  %v1804_v27 = vmul.f32 %v1783_v10, %v11611_v30  ;;  %v2622_v47 = vmul.f32 %v1783_v10, %v8533_v39  ;;  %v1687_v29 = vadd.f32 %v1679_v36, %v1671_v4  ;;  %v1759_v10 = vmul.f32 %v9092_v35, %v11578_v13 }
 0x22d   : > { %v1812_v2 = vadd.f32 %v1804_v27, %v1764_v16  ;;  %v2630_v22 = vadd.f32 %v2622_v47, %v2614_v41  ;;  %v1852_v16 = vmul.f32 %v9124_v18, %v8756_v0  ;;  %v2103_v41 = vmul.f32 %v9107_v50, %v8537_v25 }
 0x22e   : > { %7540 = vset.pattern.permute.xlu1 %v11588_v38  ;;  %v1077_v28 = vpop.permute.xlu1 %1076  ;;  %v9209_v26 = vpop.permute.xlu0 %2317  ;;  %v2060_v47 = vadd.f32 %v9136_v63, %v2044_v20 }
 0x22f   : > { %2322 = vperm.xlu1 %7540, %v9197_v62   ;;  %v1828_v45 = vadd.f32 %v1820_v33, %v1812_v2  ;;  %v2646_v24 = vadd.f32 %v2638_v8, %v2630_v22  ;;  %v1093_v3 = vmul.f32 %v11611_v30, %v1077_v28  ;;  %v1695_v58 = vmul.f32 %v1077_v28, %v8531_v43 }
 0x230   : > { %v2087_v35 = vmul.f32 %v1077_v28, %v8533_v39  ;;  %v2593_v61 = vmul.f32 %v1077_v28, %v8492_v14 }
 0x231   : > { %v1844_v2 = vadd.f32 %v9140_v1, %v1828_v45  ;;  %v2662_v22 = vadd.f32 %v9144_v19, %v2646_v24  ;;  %v1703_v4 = vadd.f32 %v1695_v58, %v1687_v29  ;;  %v1101_v8 = vadd.f32 %v1093_v3, %v1049_v51  ;;  %v11648_v1 = vld [vmem:[#allocation46_spill] sm:$0xff]  ;;  %v9233_v29 = vld [vmem:[%s7955_s24 + $0x1e0] sm:$0xff] }
 0x232   : > { %v2601_v36 = vadd.f32 %v2593_v61, %v2585_v23  ;;  %v9226_v33 = vpop.permute.xlu1 %1302  ;;  %v2095_v27 = vadd.f32 %v2087_v35, %v2079_v5  ;;  %v1907_v42 = vpop.permute.xlu0 %1906  ;;  %v1868_v19 = vmul.f32 %v11648_v1, %v9120_v57  ;;  %v2686_v24 = vmul.f32 %v11648_v1, %v8531_v43  ;;  %v11650_v61 = vld [vmem:[#allocation44_spill] sm:$0xff] }
 0x233   : > { %1911 = vperm.xlu1 %7540, %v7567_v59   ;;  %11647 = vst [vmem:[#allocation38_spill] sm:$0xff] %v9226_v33  ;;  %v1767_v28 = vadd.f32 %v1759_v10, %v1703_v4  ;;  %v1860_v50 = vadd.f32 %v1852_v16, %v1844_v2  ;;  %v1932_v23 = vmul.f32 %v1907_v42, %v9201_v32 }
 0x234   : > { %v2617_v45 = vadd.f32 %v2609_v56, %v2601_v36  ;;  %v1038_v5 = vmul.f32 %v11578_v13, %v11635_v60  ;;  %v2678_v51 = vadd.f32 %v2670_v37, %v2662_v22  ;;  %v2702_v63 = vmul.f32 %v1907_v42, %v11578_v13  ;;  %v7568_v36 = vld [vmem:[%s7955_s24 + $0x131] sm:$0xff] }
 0x235   : > { %v1876_v20 = vadd.f32 %v1868_v19, %v1860_v50  ;;  %v9248_v56 = vadd.f32 %v1162_v44, %v1101_v8  ;;  %v9250_v3 = vadd.f32 %v2103_v41, %v2095_v27  ;;  %v1090_v60 = vmul.f32 %v11611_v30, %v11637_v6  ;;  %v11652_v50 = vld [vmem:[#allocation48_spill] sm:$0xff] }
 0x236   : > { %v9246_v10 = vpop.permute.xlu1 %1414  ;;  %v1046_v58 = vadd.f32 %v1038_v5, %v978_v40  ;;  %v2076_v16 = vadd.f32 %v2068_v53, %v2060_v47  ;;  %v2694_v35 = vadd.f32 %v2686_v24, %v2678_v51  ;;  %v1807_v37 = vmul.f32 %v11650_v61, %v11611_v30  ;;  %v9273_v47 = vpop.permute.xlu0 %1385 }
 0x237   : > { %2327 = vperm.xlu1 %7540, %v9233_v29   ;;  %v9254_v42 = vadd.f32 %v1932_v23, %v1876_v20  ;;  %v1159_v2 = vmul.f32 %v8716_v12, %v9051_v46  ;;  %v2100_v44 = vmul.f32 %v9051_v46, %v8537_v25  ;;  %v2625_v4 = vmul.f32 %v11650_v61, %v8533_v39 }
 0x238   : > { %v9262_v22 = vadd.f32 %v2702_v63, %v2694_v35  ;;  %v1823_v6 = vmul.f32 %v9163_v34, %v8716_v12  ;;  %v2641_v41 = vmul.f32 %v9163_v34, %v8537_v25  ;;  %v1098_v8 = vadd.f32 %v1090_v60, %v1046_v58  ;;  %v7569_v35 = vld [vmem:[%s7955_s24 + $0xd1] sm:$0xff] }
 0x239   : > { %11649 = vst [vmem:[#allocation50_spill] sm:$0xff] %v9254_v42  ;;  %v2092_v27 = vadd.f32 %v2084_v52, %v2076_v16  ;;  %v11394_v46 = vmov 0.0   ;;  %v1815_v40 = vadd.f32 %v1807_v37, %v1767_v28  ;;  %v2633_v19 = vadd.f32 %v2625_v4, %v2617_v45 }
 0x23a   : > { %11651 = vst [vmem:[#allocation90_spill] sm:$0xff] %v9262_v22  ;;  %v9271_v59 = vpop.permute.xlu1 %1786  ;;  %2942 = vst.msk [vmem:[#allocation2 + $0x10] sm:$0xff] %vm2938_vm0, %v11394_v46  ;;  %v1839_v23 = vmul.f32 %v11652_v50, %v11586_v21  ;;  %v2657_v24 = vmul.f32 %v11652_v50, %v8527_v48  ;;  %v1167_v5 = vadd.f32 %v1159_v2, %v1098_v8 }
 0x23b   : > { %2429 = vperm.xlu1 %7540, %v7568_v36   ;;  %2943 = vst.msk [vmem:[#allocation2 + $0x18] sm:$0x3] %vm2940_vm1, %v11394_v46  ;;  %2941 = vst.msk [vmem:[#allocation2 + $0x8] sm:$0x3] %vm2940_vm1, %v11394_v46  ;;  %v2108_v53 = vadd.f32 %v2100_v44, %v2092_v27  ;;  %v1855_v51 = vmul.f32 %v9273_v47, %v8756_v0  ;;  %v2673_v63 = vmul.f32 %v9273_v47, %v8545_v31 }
 0x23c   : > { %2939 = vst.msk [vmem:[#allocation2] sm:$0xff] %vm2938_vm0, %v11394_v46  ;;  %2944 = vst.msk [vmem:[#allocation2 + $0x20] sm:$0xff] %vm2938_vm0, %v11394_v46  ;;  %v1831_v28 = vadd.f32 %v1823_v6, %v1815_v40  ;;  %v2649_v20 = vadd.f32 %v2641_v41, %v2633_v19  ;;  %v1280_v45 = vmul.f32 %v8756_v0, %v9083_v54 }
 0x23d   : > { %2945 = vst.msk [vmem:[#allocation2 + $0x28] sm:$0x3] %vm2940_vm1, %v11394_v46  ;;  %2947 = vst.msk [vmem:[#allocation2 + $0x38] sm:$0x3] %vm2940_vm1, %v11394_v46  ;;  %v2132_v58 = vmul.f32 %v9083_v54, %v8545_v31  ;;  %v1332_v4 = vmul.f32 %v9120_v57, %v11642_v15  ;;  %v2148_v6 = vmul.f32 %v11642_v15, %v8531_v43 }
 0x23e   : > { %2946 = vst.msk [vmem:[#allocation2 + $0x30] sm:$0xff] %vm2938_vm0, %v11394_v46  ;;  %2948 = vst.msk [vmem:[#allocation2 + $0x40] sm:$0xff] %vm2938_vm0, %v11394_v46  ;;  %v1186_v52 = vpop.permute.xlu1 %1185  ;;  %v1847_v61 = vadd.f32 %v1839_v23, %v1831_v28  ;;  %v2665_v37 = vadd.f32 %v2657_v24, %v2649_v20  ;;  %v1400_v36 = vmul.f32 %v9201_v32, %v9124_v18  ;;  %v2220_v23 = vpop.permute.xlu0 %2219  ;;  %v5971_v28 = vld [vmem:[%s7955_s24 + $0x170] sm:$0xff]  ;;  %v6000_v20 = vld [vmem:[%s11279_s3 + $0x20] sm:$0xff] }
 0x23f   : > { %2949 = vst.msk [vmem:[#allocation2 + $0x48] sm:$0x3] %vm2940_vm1, %v11394_v46  ;;  %2951 = vst.msk [vmem:[#allocation2 + $0x58] sm:$0x3] %vm2940_vm1, %v11394_v46  ;;  %7541 = vset.pattern.permute.xlu1 %v11597_v49  ;;  %v1211_v60 = vmul.f32 %v11586_v21, %v1186_v52  ;;  %v2116_v16 = vmul.f32 %v1186_v52, %v8527_v48  ;;  %v2164_v8 = vmul.f32 %v9124_v18, %v11578_v13 }
 0x240   : > { %2950 = vst.msk [vmem:[#allocation2 + $0x50] sm:$0xff] %vm2938_vm0, %v11394_v46  ;;  %2952 = vst.msk [vmem:[#allocation2 + $0x60] sm:$0xff] %vm2938_vm0, %v11394_v46  ;;  %1958 = vperm.xlu1 %7541, %v7569_v35   ;;  %v9335_v41 = vadd.f32 %v1855_v51, %v1847_v61  ;;  %v9337_v54 = vadd.f32 %v2673_v63, %v2665_v37  ;;  %v2180_v18 = vmul.f32 %v11648_v1, %v11611_v30  ;;  %v6002_v35 = vld [vmem:[%s11279_s3 + $0x30] sm:$0xff]  ;;  %v6003_v61 = vld [vmem:[%s11279_s3 + $0x38] sm:$0xff] }
 0x241   : > { %2953 = vst.msk [vmem:[#allocation2 + $0x68] sm:$0x3] %vm2940_vm1, %v11394_v46  ;;  %2955 = vst.msk [vmem:[#allocation2 + $0x78] sm:$0x3] %vm2940_vm1, %v11394_v46  ;;  %v1219_v2 = vadd.f32 %v1211_v60, %v1167_v5  ;;  %v2124_v44 = vadd.f32 %v2116_v16, %v2108_v53  ;;  %v9347_v5 = vld [vmem:[%s7955_s24 + $0x71] sm:$0xff]  ;;  %v2245_v63 = vmul.f32 %v2220_v23, %v8716_v12 }
 0x242   : > { %2954 = vst.msk [vmem:[#allocation2 + $0x70] sm:$0xff] %vm2938_vm0, %v11394_v46  ;;  %2956 = vst.msk [vmem:[#allocation2 + $0x80] sm:$0xff] %vm2938_vm0, %v11394_v46  ;;  %v9376_v37 = vld [vmem:[%s7955_s24 + $0x190] sm:$0xff] }
 0x243   : > { %2957 = vst.msk [vmem:[#allocation2 + $0x88] sm:$0x3] %vm2940_vm1, %v11394_v46  ;;  %2959 = vst.msk [vmem:[#allocation2 + $0x98] sm:$0x3] %vm2940_vm1, %v11394_v46  ;;  %v1288_v27 = vadd.f32 %v1280_v45, %v1219_v2  ;;  %v2140_v40 = vadd.f32 %v2132_v58, %v2124_v44  ;;  %v9344_v19 = vpop.permute.xlu1 %1360  ;;  %v6001_v45 = vld [vmem:[%s11279_s3 + $0x28] sm:$0xff]  ;;  %v7035_v44 = vpack.c.bf16 %v6003_v61, %v6002_v35  ;;  %839 = vperm.xlu0 %7561, %v9376_v37   ;;  %v5934_v23 = vld [vmem:[%s7955_s24 + $0x110] sm:$0xff] }
 0x244   : > { %2958 = vst.msk [vmem:[#allocation2 + $0x90] sm:$0xff] %vm2938_vm0, %v11394_v46  ;;  %11653 = vst [vmem:[#allocation40_spill] sm:$0xff] %v9335_v41  ;;  %2376 = vperm.xlu1 %7541, %v9197_v62   ;;  %v7031_v16 = vpack.c.bf16 %v6001_v45, %v6000_v20  ;;  %v1835_v61 = vmul.f32 %v9226_v33, %v11586_v21  ;;  %v2653_v46 = vmul.f32 %v9226_v33, %v8527_v48 }
 0x245   : > { %11654 = vst [vmem:[#allocation25_spill] sm:$0xff] %v9337_v54  ;;  %11655 = vst [vmem:[#allocation35_spill] sm:$0xff] %v9344_v19  ;;  %v1340_v24 = vadd.f32 %v1332_v4, %v1288_v27  ;;  %v2156_v15 = vadd.f32 %v2148_v6, %v2140_v40  ;;  %v9384_v4 = vld [vmem:[%s7955_s24 + $0x220] sm:$0xff]  ;;  %v9398_v27 = vld [vmem:[%s7955_s24 + $0x1f0] sm:$0xff] }
 0x246   : > { %11656 = vst [vmem:[#allocation68_spill] sm:$0xff] %v9347_v5  ;;  %7032 = vmatprep.subr.bf16.mxu0 %v7031_v16  ;;  %11660 = vst [vmem:[#allocation32_spill] sm:$0xff] %v9376_v37  ;;  %v9442_v54 = vld [vmem:[%s7955_s24 + $0x151] sm:$0xff] }
 0x247   : > { %v9350_v53 = vpop.permute.xlu1 %1740  ;;  %v2172_v51 = vadd.f32 %v2164_v8, %v2156_v15  ;;  %v9355_v52 = vadd.f32 %v1400_v36, %v1340_v24  ;;  %7034 = vmatpush3.bf16.msra.mxu0 %v7031_v16  ;;  %11662 = vst [vmem:[#allocation98_spill] sm:$0xff] %v9384_v4  ;;  %v9389_v36 = vld [vmem:[%s7955_s24 + $0xf1] sm:$0xff]  ;;  %v2981_v8 = vld [vmem:[#allocation2 + $0x1] sm:$0xff]  ;;  %960 = vperm.xlu0 %7561, %v9384_v4  }
 0x248   : > { %1438 = vperm.xlu1 %7541, %v9347_v5   ;;  %11657 = vst [vmem:[#allocation26_spill] sm:$0xff] %v9350_v53  ;;  %7036 = vmatprep.subr.bf16.mxu0 %v7035_v44  ;;  %v1803_v24 = vmul.f32 %v8981_v7, %v11611_v30  ;;  %v2621_v15 = vmul.f32 %v8981_v7, %v8533_v39  ;;  %v11668_v16 = vld [vmem:[#allocation104_spill] sm:$0xff] }
 0x249   : > { %11658 = vst [vmem:[#allocation96_spill] sm:$0xff] %v9355_v52  ;;  %v2188_v62 = vadd.f32 %v2180_v18, %v2172_v51  ;;  %6520 = vmatprep.mubr.msk.f32.mxu0 %vm2938_vm0, %v2981_v8  ;;  %v11665_v51 = vld [vmem:[#allocation110_spill] sm:$0xff]  ;;  %v11669_v7 = vld [vmem:[#allocation20_spill] sm:$0xff]  ;;  %v11670_v8 = vld [vmem:[#allocation73_spill] sm:$0xff] }
 0x24a   : > { %v1819_v18 = vmul.f32 %v11665_v51, %v8716_v12  ;;  %v2637_v45 = vmul.f32 %v11665_v51, %v8537_v25  ;;  %v1811_v35 = vadd.f32 %v1803_v24, %v11668_v16  ;;  %v11672_v5 = vld [vmem:[#allocation84_spill] sm:$0xff]  ;;  %v1279_v41 = vmul.f32 %v8756_v0, %v11665_v51  ;;  %v11677_v51 = vld [vmem:[#allocation77_spill] sm:$0xff] }
 0x24b   : > { %v9364_v58 = vadd.f32 %v2245_v63, %v2188_v62  ;;  %v9367_v60 = vpop.permute.xlu1 %1255  ;;  %7038 = vmatpush3.bf16.msra.mxu0 %v7035_v44  ;;  %1798 = vperm.xlu0 %7561, %v8746_v55   ;;  %v5942_v55 = vld [vmem:[%s7955_s24 + $0x81] sm:$0xff]  ;;  %v11667_v62 = vld [vmem:[#allocation82_spill] sm:$0xff]  ;;  %v2629_v44 = vadd.f32 %v2621_v15, %v11669_v7  ;;  %v9436_v15 = vrot.slane %v9188_v9, %v11672_v5 }
 0x24c   : > { %7542 = vset.pattern.permute.xlu1 %v11588_v38  ;;  %v1833_v20 = vmul.f32 %v11667_v62, %v11586_v21  ;;  %v1827_v19 = vadd.f32 %v1819_v18, %v1811_v35  ;;  %v11673_v7 = vld [vmem:[#allocation86_spill] sm:$0xff]  ;;  %v1329_v18 = vmul.f32 %v9120_v57, %v11667_v62  ;;  %v1397_v9 = vmul.f32 %v9201_v32, %v11670_v8 }
 0x24d   : > { %11659 = vst [vmem:[#allocation105_spill] sm:$0xff] %v9364_v58  ;;  %2224 = vperm.xlu1 %7542, %v5971_v28   ;;  %v2645_v37 = vadd.f32 %v2637_v45, %v2629_v44  ;;  %v11674_v35 = vld [vmem:[#allocation102_spill] sm:$0xff] }
 0x24e   : > { %v1841_v58 = vadd.f32 %v1833_v20, %v11673_v7  ;;  %v1865_v20 = vmul.f32 %v9246_v10, %v9120_v57  ;;  %v5966_v44 = vld [vmem:[%s7955_s24 + $0x111] sm:$0xff]  ;;  %v11675_v7 = vld [vmem:[#allocation37_spill] sm:$0xff]  ;;  %v1337_v22 = vadd.f32 %v1329_v18, %v11677_v51 }
 0x24f   : > { %v9378_v2 = vpop.permute.xlu1 %1365  ;;  %1322 = vperm.xlu0 %7561, %v5934_v23   ;;  %v1849_v23 = vmul.f32 %v11670_v8, %v8756_v0  ;;  %v2661_v5 = vadd.f32 %v2653_v46, %v2645_v37  ;;  %v2701_v53 = vmul.f32 %v11675_v7, %v11578_v13 }
 0x250   : > { %11661 = vst [vmem:[#allocation80_spill] sm:$0xff] %v9378_v2  ;;  %v1851_v24 = vmul.f32 %v9378_v2, %v8756_v0 }
 0x251   : > { %7543 = vset.pattern.permute.xlu1 %v11597_v49  ;;  %v1857_v45 = vadd.f32 %v1849_v23, %v1841_v58  ;;  %v5974_v23 = vld [vmem:[%s7955_s24 + $0x1a0] sm:$0xff] }
 0x252   : > { %2380 = vperm.xlu1 %7543, %v9233_v29  }
 0x253   : > { %v9386_v6 = vpop.permute.xlu1 %1891  ;;  %1442 = vperm.xlu0 %7561, %v5942_v55  }
 0x254   : > { %v1929_v37 = vmul.f32 %v9386_v6, %v9201_v32 }
 0x256   : > { %7544 = vset.pattern.permute.xlu1 %v11588_v38 }
 0x257   : > { %1916 = vperm.xlu1 %7544, %v9389_v36   ;;  %v9395_v29 = vpop.permute.xlu1 %1139  ;;  %1974 = vperm.xlu0 %7561, %v5966_v44  }
 0x258   : > { %11663 = vst [vmem:[#allocation43_spill] sm:$0xff] %v9395_v29 }
 0x25b   : > { %2332 = vperm.xlu1 %7544, %v9398_v27   ;;  %2287 = vperm.xlu0 %7561, %v5974_v23   ;;  %v7571_v23 = vld [vmem:[%s7955_s24 + $0x190] sm:$0xff] }
 0x25d   : > { %v9402_v40 = vpop.permute.xlu1 %1418 }
 0x25e   : > { %11664 = vst [vmem:[#allocation53_spill] sm:$0xff] %v9402_v40  ;;  %v11671_v40 = vld [vmem:[#allocation36_spill] sm:$0xff] }
 0x25f   : > { %1921 = vperm.xlu1 %7544, %v8861_v17   ;;  %v1210_v55 = vmul.f32 %v11586_v21, %v11671_v40 }
 0x261   : > { %v9412_v63 = vpop.permute.xlu1 %1790  ;;  %v1218_v40 = vadd.f32 %v1210_v55, %v11674_v35  ;;  %v1331_v55 = vmul.f32 %v9120_v57, %v9226_v33 }
 0x262   : > { %11666 = vst [vmem:[#allocation44_spill] sm:$0xff] %v9412_v63  ;;  %v1843_v63 = vadd.f32 %v1835_v61, %v1827_v19 }
 0x263   : > { %7545 = vset.pattern.permute.xlu1 %v11597_v49  ;;  %v1287_v33 = vadd.f32 %v1279_v41, %v1218_v40  ;;  %v1405_v40 = vadd.f32 %v1397_v9, %v1337_v22 }
 0x264   : > { %2275 = vperm.xlu1 %7545, %v5971_v28   ;;  %v2669_v28 = vmul.f32 %v9378_v2, %v8545_v31  ;;  %v1859_v35 = vadd.f32 %v1851_v24, %v1843_v63  ;;  %v1931_v63 = vmul.f32 %v11675_v7, %v9201_v32  ;;  %v1399_v24 = vmul.f32 %v9201_v32, %v9378_v2 }
 0x265   : > { %v9432_v16 = vpop.permute.xlu1 %1310  ;;  %v1339_v52 = vadd.f32 %v1331_v55, %v1287_v33  ;;  %v11679_v33 = vld [vmem:[#allocation49_spill] sm:$0xff] }
 0x266   : > { %v2677_v46 = vadd.f32 %v2669_v28, %v2661_v5  ;;  %v1449_v28 = vmul.f32 %v9436_v15, %v9246_v10  ;;  %v1873_v5 = vadd.f32 %v1865_v20, %v1857_v45  ;;  %v5982_v45 = vld [vmem:[%s7955_s24 + $0x230] sm:$0xff]  ;;  %v1979_v7 = vmul.f32 %v11679_v33, %v9436_v15 }
 0x267   : > { %v1407_v55 = vadd.f32 %v1399_v24, %v1339_v52  ;;  %2400 = vperm.xlu0 %7561, %v5982_v45  }
 0x268   : > { %7546 = vset.pattern.permute.xlu1 %v11588_v38  ;;  %v1937_v51 = vadd.f32 %v1929_v37, %v1873_v5 }
 0x269   : > { %2439 = vperm.xlu1 %7546, %v9442_v54   ;;  %v9460_v19 = vpop.permute.xlu1 %1422 }
 0x26a   : > { %11676 = vst [vmem:[#allocation48_spill] sm:$0xff] %v9460_v19  ;;  %v1867_v58 = vmul.f32 %v9460_v19, %v9120_v57  ;;  %v2685_v61 = vmul.f32 %v9460_v19, %v8531_v43  ;;  %v1451_v1 = vmul.f32 %v9436_v15, %v9460_v19 }
 0x26c   : > { %v1875_v44 = vadd.f32 %v1867_v58, %v1859_v35  ;;  %v2693_v42 = vadd.f32 %v2685_v61, %v2677_v46  ;;  %v9489_v46 = vadd.f32 %v1449_v28, %v1405_v40  ;;  %v9493_v22 = vadd.f32 %v1451_v1, %v1407_v55  ;;  %v5998_v1 = vld [vmem:[%s7955_s24 + $0x231] sm:$0xff]  ;;  %v5986_v55 = vld [vmem:[%s7955_s24 + $0x161] sm:$0xff] }
 0x26d   : > { %7547 = vset.pattern.permute.xlu1 %v11597_v49  ;;  %v9479_v41 = vpop.permute.xlu1 %1946  ;;  %v1335_v40 = vmul.f32 %v9120_v57, %v11652_v50 }
 0x26e   : > { %v1977_v18 = vmul.f32 %v9479_v41, %v9436_v15  ;;  %1966 = vperm.xlu1 %7547, %v9389_v36   ;;  %v9484_v20 = vadd.f32 %v2701_v53, %v2693_v42  ;;  %v1939_v35 = vadd.f32 %v1931_v63, %v1875_v44  ;;  %11680 = vst [vmem:[#allocation104_spill] sm:$0xff] %v9489_v46  ;;  %11682 = vst [vmem:[#allocation73_spill] sm:$0xff] %v9493_v22  ;;  %v5990_v36 = vld [vmem:[%s7955_s24 + $0x1a1] sm:$0xff] }
 0x26f   : > { %2512 = vperm.xlu0 %7561, %v5990_v36   ;;  %v1283_v63 = vmul.f32 %v8756_v0, %v9163_v34 }
 0x270   : > { %11678 = vst [vmem:[#allocation82_spill] sm:$0xff] %v9484_v20  ;;  %v9491_v58 = vadd.f32 %v1977_v18, %v1937_v51  ;;  %v9495_v9 = vadd.f32 %v1979_v7, %v1939_v35  ;;  %v2151_v51 = vmul.f32 %v11652_v50, %v8531_v43  ;;  %v2167_v18 = vmul.f32 %v9273_v47, %v11578_v13 }
 0x272   : > { %11681 = vst [vmem:[#allocation20_spill] sm:$0xff] %v9491_v58  ;;  %11683 = vst [vmem:[#allocation84_spill] sm:$0xff] %v9495_v9  ;;  %2384 = vperm.xlu1 %7547, %v9398_v27   ;;  %v9500_v53 = vpop.permute.xlu1 %2204 }
 0x273   : > { %2888 = vperm.xlu0 %7561, %v5998_v1  }
 0x276   : > { %1970 = vperm.xlu1 %7547, %v8861_v17   ;;  %v9506_v37 = vpop.permute.xlu1 %1260  ;;  %v2135_v17 = vmul.f32 %v9163_v34, %v8545_v31  ;;  %v1403_v34 = vmul.f32 %v9201_v32, %v9273_v47  ;;  %v11688_v47 = vld [vmem:[#allocation88_spill] sm:$0xff] }
 0x277   : > { %11684 = vst [vmem:[#allocation86_spill] sm:$0xff] %v9506_v37 }
 0x27a   : > { %7548 = vset.pattern.permute.xlu1 %v11588_v38  ;;  %v9510_v61 = vpop.permute.xlu1 %1896 }
 0x27b   : > { %11685 = vst [vmem:[#allocation102_spill] sm:$0xff] %v9510_v61  ;;  %2234 = vperm.xlu1 %7548, %v7571_v23   ;;  %v11689_v23 = vld [vmem:[#allocation31_spill] sm:$0xff] }
 0x27f   : > { %7549 = vset.pattern.permute.xlu1 %v11597_v49  ;;  %v1198_v27 = vpop.permute.xlu1 %1197 }
 0x280   : > { %v1214_v24 = vmul.f32 %v11586_v21, %v1198_v27  ;;  %v2119_v28 = vmul.f32 %v1198_v27, %v8527_v48  ;;  %2492 = vperm.xlu1 %7549, %v9442_v54   ;;  %v7572_v54 = vld [vmem:[%s7955_s24 + $0x180] sm:$0xff]  ;;  %v2022_v27 = vmul.f32 %v11689_v23, %v11688_v47 }
 0x282   : > { %v1222_v5 = vadd.f32 %v1214_v24, %v9248_v56  ;;  %v2127_v44 = vadd.f32 %v2119_v28, %v9250_v3  ;;  %v7573_v28 = vld [vmem:[%s7955_s24 + $0x1d1] sm:$0xff] }
 0x284   : > { %v1291_v45 = vadd.f32 %v1283_v63, %v1222_v5  ;;  %v2143_v7 = vadd.f32 %v2135_v17, %v2127_v44  ;;  %2279 = vperm.xlu1 %7549, %v7572_v54   ;;  %v9532_v56 = vpop.permute.xlu1 %1375  ;;  %v11690_v63 = vld [vmem:[#allocation89_spill] sm:$0xff]  ;;  %v11691_v17 = vld [vmem:[#allocation91_spill] sm:$0xff]  ;;  %v11693_v44 = vld [vmem:[#allocation92_spill] sm:$0xff] }
 0x285   : > { %v2006_v24 = vmul.f32 %v11691_v17, %v11690_v63  ;;  %v11696_v54 = vld [vmem:[#allocation76_spill] sm:$0xff]  ;;  %v11710_v17 = vld [vmem:[#allocation81_spill] sm:$0xff] }
 0x286   : > { %v1343_v3 = vadd.f32 %v1335_v40, %v1291_v45  ;;  %v2159_v35 = vadd.f32 %v2151_v51, %v2143_v7  ;;  %v11694_v40 = vld [vmem:[#allocation108_spill] sm:$0xff]  ;;  %v5987_v45 = vld [vmem:[%s7955_s24 + $0x171] sm:$0xff] }
 0x287   : > { %v2038_v51 = vmul.f32 %v11694_v40, %v11693_v44 }
 0x288   : > { %7550 = vset.pattern.permute.xlu1 %v11588_v38  ;;  %v9536_v50 = vadd.f32 %v1403_v34, %v1343_v3  ;;  %v9538_v36 = vadd.f32 %v2167_v18, %v2159_v35  ;;  %v2030_v34 = vadd.f32 %v2022_v27, %v2006_v24  ;;  %v2054_v3 = vmul.f32 %v11696_v54, %v8492_v14  ;;  %v11697_v35 = vld [vmem:[#allocation107_spill] sm:$0xff] }
 0x289   : > { %2444 = vperm.xlu1 %7550, %v5986_v55   ;;  %v9540_v1 = vpop.permute.xlu1 %2259  ;;  %v2070_v52 = vmul.f32 %v11697_v35, %v8514_v11  ;;  %v11700_v27 = vld [vmem:[#allocation75_spill] sm:$0xff] }
 0x28a   : > { %11686 = vst [vmem:[#allocation37_spill] sm:$0xff] %v9536_v50  ;;  %11687 = vst [vmem:[#allocation77_spill] sm:$0xff] %v9538_v36  ;;  %v2046_v7 = vadd.f32 %v2038_v51, %v2030_v34  ;;  %v2086_v24 = vmul.f32 %v11700_v27, %v8533_v39  ;;  %v7574_v51 = vld [vmem:[%s7955_s24 + $0x210] sm:$0xff]  ;;  %v2161_v36 = vmul.f32 %v11670_v8, %v11578_v13 }
 0x28b   : > { %v2667_v50 = vmul.f32 %v11670_v8, %v8545_v31  ;;  %v2683_v8 = vmul.f32 %v9246_v10, %v8531_v43 }
 0x28c   : > { %v2062_v9 = vadd.f32 %v2054_v3, %v2046_v7  ;;  %v11702_v7 = vld [vmem:[#allocation45_spill] sm:$0xff] }
 0x28d   : > { %2810 = vperm.xlu1 %7550, %v7573_v28   ;;  %v9547_v5 = vpop.permute.xlu1 %1314  ;;  %v9559_v28 = vpop.permute.xlu0 %2434  ;;  %v2118_v3 = vmul.f32 %v11702_v7, %v8527_v48 }
 0x28e   : > { %11692 = vst [vmem:[#allocation113_spill] sm:$0xff] %v9547_v5  ;;  %11698 = vst [vmem:[#allocation76_spill] sm:$0xff] %v9559_v28  ;;  %v2078_v22 = vadd.f32 %v2070_v52, %v2062_v9  ;;  %v2134_v9 = vmul.f32 %v9506_v37, %v8545_v31  ;;  %v11712_v37 = vld [vmem:[#allocation94_spill] sm:$0xff] }
 0x290   : > { %v2094_v34 = vadd.f32 %v2086_v24, %v2078_v22  ;;  %v2150_v22 = vmul.f32 %v9547_v5, %v8531_v43 }
 0x291   : > { %2347 = vperm.xlu1 %7550, %v9384_v4   ;;  %v9552_v18 = vpop.permute.xlu1 %1950  ;;  %v9571_v20 = vpop.permute.xlu0 %2337 }
 0x292   : > { %11695 = vst [vmem:[#allocation108_spill] sm:$0xff] %v9552_v18  ;;  %v2102_v18 = vmul.f32 %v9395_v29, %v8537_v25  ;;  %11701 = vst [vmem:[#allocation115_spill] sm:$0xff] %v9571_v20 }
 0x294   : > { %v2110_v28 = vadd.f32 %v2102_v18, %v2094_v34  ;;  %v2145_v34 = vmul.f32 %v11667_v62, %v8531_v43 }
 0x295   : > { %2449 = vperm.xlu1 %7550, %v5987_v45   ;;  %v9585_v18 = vpop.permute.xlu0 %2805 }
 0x296   : > { %v9561_v42 = vpop.permute.xlu1 %2209  ;;  %v2126_v19 = vadd.f32 %v2118_v3, %v2110_v28  ;;  %v2651_v28 = vmul.f32 %v11667_v62, %v8527_v48 }
 0x297   : > { %11699 = vst [vmem:[#allocation114_spill] sm:$0xff] %v9561_v42  ;;  %v11704_v42 = vld [vmem:[#allocation78_spill] sm:$0xff] }
 0x298   : > { %v1693_v33 = vmul.f32 %v11704_v42, %v8531_v43  ;;  %v2591_v24 = vmul.f32 %v11704_v42, %v8492_v14  ;;  %v2142_v3 = vadd.f32 %v2134_v9, %v2126_v19  ;;  %v11707_v42 = vld [vmem:[#allocation42_spill] sm:$0xff] }
 0x299   : > { %7551 = vset.pattern.permute.xlu1 %v11597_v49  ;;  %v1212_v7 = vmul.f32 %v11586_v21, %v11707_v42  ;;  %v11711_v9 = vld [vmem:[#allocation54_spill] sm:$0xff] }
 0x29a   : > { %2392 = vperm.xlu1 %7551, %v7574_v51   ;;  %v1701_v5 = vadd.f32 %v1693_v33, %v11710_v17  ;;  %v2158_v19 = vadd.f32 %v2150_v22, %v2142_v3  ;;  %v2599_v58 = vadd.f32 %v2591_v24, %v11712_v37  ;;  %v11713_v33 = vld [vmem:[#allocation83_spill] sm:$0xff]  ;;  %v2623_v22 = vmul.f32 %v9271_v59, %v8533_v39  ;;  %v11714_v3 = vld [vmem:[#allocation106_spill] sm:$0xff]  ;;  %v2230_v37 = vpop.permute.xlu0 %2229 }
 0x29b   : > { %v9569_v61 = vpop.permute.xlu1 %1430  ;;  %v2659_v17 = vadd.f32 %v2651_v28, %v11713_v33  ;;  %v2639_v24 = vmul.f32 %v9367_v60, %v8537_v25 }
 0x29e   : > { %2496 = vperm.xlu1 %7551, %v5986_v55   ;;  %v11705_v55 = vld [vmem:[#allocation17_spill] sm:$0xff] }
 0x29f   : > { %v9590_v51 = vmul.f32 %v11688_v47, %v11705_v55 }
 0x2a0   : > { %v9577_v52 = vpop.permute.xlu1 %2214 }
 0x2a1   : > { %11703 = vst [vmem:[#allocation116_spill] sm:$0xff] %v9577_v52  ;;  %v11706_v52 = vld [vmem:[#allocation19_spill] sm:$0xff] }
 0x2a2   : > { %2396 = vperm.xlu1 %7551, %v9384_v4   ;;  %v9598_v2 = vmul.f32 %v11690_v63, %v11706_v52  ;;  %v11708_v4 = vld [vmem:[#allocation29_spill] sm:$0xff]  ;;  %v2182_v52 = vmul.f32 %v11711_v9, %v11611_v30 }
 0x2a3   : > { %v1757_v29 = vmul.f32 %v11708_v4, %v11578_v13  ;;  %v2607_v55 = vmul.f32 %v11708_v4, %v8514_v11  ;;  %v1805_v4 = vmul.f32 %v9271_v59, %v11611_v30  ;;  %v11715_v11 = vld [vmem:[#allocation47_spill] sm:$0xff]  ;;  %v2247_v59 = vmul.f32 %v2230_v37, %v8716_v12 }
 0x2a4   : > { %v9606_v23 = vpop.permute.xlu1 %1380  ;;  %v1220_v46 = vadd.f32 %v1212_v7, %v11715_v11 }
 0x2a5   : > { %11709 = vst [vmem:[#allocation78_spill] sm:$0xff] %v9606_v23  ;;  %v2166_v62 = vmul.f32 %v9606_v23, %v11578_v13  ;;  %v2153_v23 = vadd.f32 %v2145_v34, %v11714_v3  ;;  %v1765_v27 = vadd.f32 %v1757_v29, %v1701_v5  ;;  %v2615_v35 = vadd.f32 %v2607_v55, %v2599_v58 }
 0x2a6   : > { %2500 = vperm.xlu1 %7551, %v5987_v45   ;;  %v1821_v45 = vmul.f32 %v9367_v60, %v8716_v12  ;;  %v2675_v29 = vadd.f32 %v2667_v50, %v2659_v17  ;;  %v2177_v5 = vmul.f32 %v9246_v10, %v11611_v30  ;;  %v1837_v55 = vmul.f32 %v9432_v16, %v11586_v21 }
 0x2a7   : > { %v2174_v9 = vadd.f32 %v2166_v62, %v2158_v19  ;;  %v1813_v11 = vadd.f32 %v1805_v4, %v1765_v27  ;;  %v2169_v58 = vadd.f32 %v2161_v36, %v2153_v23  ;;  %v2631_v7 = vadd.f32 %v2623_v22, %v2615_v35  ;;  %v7575_v19 = vld [vmem:[%s7955_s24 + $0x181] sm:$0xff]  ;;  %v9651_v35 = vld [vmem:[%s7955_s24 + $0x191] sm:$0xff] }
 0x2a8   : > { %v2655_v62 = vmul.f32 %v9432_v16, %v8527_v48  ;;  %v1281_v50 = vmul.f32 %v8756_v0, %v9367_v60  ;;  %v2691_v36 = vadd.f32 %v2683_v8, %v2675_v29  ;;  %v2699_v10 = vmul.f32 %v9386_v6, %v11578_v13  ;;  %11718 = vst [vmem:[#allocation42_spill] sm:$0xff] %v9651_v35 }
 0x2a9   : > { %v9632_v28 = vpop.permute.xlu1 %2263  ;;  %v2190_v34 = vadd.f32 %v2182_v52, %v2174_v9  ;;  %v2242_v23 = vmul.f32 %v9500_v53, %v8716_v12  ;;  %v1829_v27 = vadd.f32 %v1821_v45, %v1813_v11  ;;  %v2647_v9 = vadd.f32 %v2639_v24, %v2631_v7 }
 0x2aa   : > { %11716 = vst [vmem:[#allocation17_spill] sm:$0xff] %v9632_v28  ;;  %7552 = vset.pattern.permute.xlu1 %v11588_v38  ;;  %v1853_v52 = vmul.f32 %v9532_v56, %v8756_v0  ;;  %v2671_v4 = vmul.f32 %v9532_v56, %v8545_v31  ;;  %v1333_v17 = vmul.f32 %v9120_v57, %v9432_v16 }
 0x2ab   : > { %2454 = vperm.xlu1 %7552, %v7575_v19   ;;  %v9642_v33 = vadd.f32 %v2247_v59, %v2190_v34  ;;  %v2715_v22 = vmul.f32 %v9479_v41, %v11611_v30  ;;  %v2185_v6 = vadd.f32 %v2177_v5, %v2169_v58  ;;  %v2290_v53 = vmul.f32 %v9540_v1, %v11586_v21 }
 0x2ac   : > { %v1845_v8 = vadd.f32 %v1837_v55, %v1829_v27  ;;  %v2663_v37 = vadd.f32 %v2655_v62, %v2647_v9  ;;  %v1869_v45 = vmul.f32 %v9569_v61, %v9120_v57  ;;  %v2687_v24 = vmul.f32 %v9569_v61, %v8531_v43 }
 0x2ad   : > { %11717 = vst [vmem:[#allocation19_spill] sm:$0xff] %v9642_v33  ;;  %v2355_v59 = vmul.f32 %v9209_v26, %v8756_v0  ;;  %v1289_v41 = vadd.f32 %v1281_v50, %v1220_v46  ;;  %v2707_v34 = vadd.f32 %v2699_v10, %v2691_v36  ;;  %v2250_v11 = vadd.f32 %v2242_v23, %v2185_v6  ;;  %v7576_v10 = vld [vmem:[%s7955_s24 + $0x201] sm:$0xff] }
 0x2ae   : > { %v9663_v3 = vpop.permute.xlu1 %2322  ;;  %v2731_v1 = vmul.f32 %v9209_v26, %v8716_v12  ;;  %v1401_v29 = vmul.f32 %v9201_v32, %v9532_v56  ;;  %v1861_v58 = vadd.f32 %v1853_v52, %v1845_v8  ;;  %v2679_v5 = vadd.f32 %v2671_v4, %v2663_v37  ;;  %v11720_v26 = vld [vmem:[#allocation18_spill] sm:$0xff]  ;;  %v11721_v52 = vld [vmem:[#allocation21_spill] sm:$0xff]  ;;  %v11737_v33 = vld [vmem:[#allocation16_spill] sm:$0xff] }
 0x2af   : > { %11719 = vst [vmem:[#allocation29_spill] sm:$0xff] %v9663_v3  ;;  %2459 = vperm.xlu1 %7552, %v9651_v35   ;;  %v1341_v7 = vadd.f32 %v1333_v17, %v1289_v41  ;;  %v2723_v55 = vadd.f32 %v2715_v22, %v2707_v34  ;;  %v2298_v62 = vadd.f32 %v2290_v53, %v2250_v11  ;;  %v11722_v17 = vld [vmem:[#allocation56_spill] sm:$0xff] }
 0x2b0   : > { %v1453_v19 = vmul.f32 %v9436_v15, %v9569_v61  ;;  %v1877_v9 = vadd.f32 %v1869_v45, %v1861_v58  ;;  %v2695_v50 = vadd.f32 %v2687_v24, %v2679_v5  ;;  %v9683_v23 = vmul.f32 %v11720_v26, %v8492_v14 }
 0x2b1   : > { %v554_v4 = vmul.f32 %v11693_v44, %v11721_v52  ;;  %v1981_v22 = vmul.f32 %v11722_v17, %v9436_v15  ;;  %v2719_v6 = vmul.f32 %v11722_v17, %v11611_v30  ;;  %v1409_v53 = vadd.f32 %v1401_v29, %v1341_v7 }
 0x2b2   : > { %v1912_v27 = vpop.permute.xlu1 %1911  ;;  %v493_v45 = vadd.f32 %v9590_v51, %v9598_v2  ;;  %v9695_v24 = vmul.f32 %v11721_v52, %v11690_v63  ;;  %v2739_v41 = vadd.f32 %v2731_v1, %v2723_v55  ;;  %v2735_v34 = vmul.f32 %v9571_v20, %v8716_v12  ;;  %v11726_v2 = vld [vmem:[#allocation23_spill] sm:$0xff]  ;;  %v11727_v1 = vld [vmem:[#allocation24_spill] sm:$0xff] }
 0x2b3   : > { %v1933_v46 = vmul.f32 %v1912_v27, %v9201_v32  ;;  %v2703_v36 = vmul.f32 %v1912_v27, %v11578_v13  ;;  %2825 = vperm.xlu1 %7552, %v7576_v10   ;;  %v2363_v58 = vadd.f32 %v2355_v59, %v2298_v62  ;;  %v9704_v7 = vadd.f32 %v1453_v19, %v1409_v53  ;;  %v7577_v59 = vld [vmem:[%s7955_s24 + $0x1f1] sm:$0xff] }
 0x2b4   : > { %v9706_v27 = vadd.f32 %v554_v4, %v493_v45  ;;  %v9710_v51 = vmul.f32 %v8492_v14, %v11726_v2  ;;  %v489_v55 = vmul.f32 %v11688_v47, %v11727_v1  ;;  %v9727_v52 = vmul.f32 %v11726_v2, %v11688_v47  ;;  %v11731_v4 = vld [vmem:[#allocation28_spill] sm:$0xff]  ;;  %v11733_v1 = vld [vmem:[#allocation57_spill] sm:$0xff] }
 0x2b5   : > { %v1941_v8 = vadd.f32 %v1933_v46, %v1877_v9  ;;  %v2711_v37 = vadd.f32 %v2703_v36, %v2695_v50  ;;  %11725 = vst [vmem:[#allocation83_spill] sm:$0xff] %v9704_v7  ;;  %v11728_v9 = vld [vmem:[#allocation51_spill] sm:$0xff]  ;;  %v11729_v50 = vld [vmem:[#allocation61_spill] sm:$0xff]  ;;  %v9731_v17 = vmul.f32 %v11731_v4, %v11693_v44 }
 0x2b6   : > { %v9699_v11 = vpop.permute.xlu1 %2327  ;;  %v2403_v46 = vmul.f32 %v11728_v9, %v9120_v57  ;;  %v2747_v62 = vmul.f32 %v11728_v9, %v11586_v21  ;;  %v437_v19 = vmul.f32 %v11690_v63, %v11729_v50  ;;  %v2515_v9 = vmul.f32 %v11733_v1, %v9436_v15  ;;  %v11734_v50 = vld [vmem:[#allocation63_spill] sm:$0xff] }
 0x2b7   : > { %11723 = vst [vmem:[#allocation81_spill] sm:$0xff] %v9699_v11  ;;  %v9701_v5 = vadd.f32 %v1981_v22, %v1941_v8  ;;  %v2727_v29 = vadd.f32 %v2719_v6, %v2711_v37  ;;  %7553 = vset.pattern.permute.xlu1 %v11597_v49  ;;  %v2117_v22 = vmul.f32 %v11707_v42, %v8527_v48  ;;  %v5996_v7 = vld [vmem:[%s7955_s24 + $0x211] sm:$0xff] }
 0x2b8   : > { %2872 = vperm.xlu1 %7553, %v7577_v59   ;;  %v2544_v6 = vmul.f32 %v11694_v40, %v11690_v63  ;;  %v2411_v8 = vadd.f32 %v2403_v46, %v2363_v58  ;;  %v2755_v45 = vadd.f32 %v2747_v62, %v2739_v41  ;;  %v2779_v42 = vmul.f32 %v11733_v1, %v9120_v57 }
 0x2b9   : > { %11724 = vst [vmem:[#allocation94_spill] sm:$0xff] %v9701_v5  ;;  %v9721_v36 = vadd.f32 %v2735_v34, %v2727_v29  ;;  %v11732_v29 = vld [vmem:[#allocation46_spill] sm:$0xff]  ;;  %v2560_v59 = vmul.f32 %v11696_v54, %v11688_v47  ;;  %v497_v58 = vadd.f32 %v489_v55, %v437_v19  ;;  %v1662_v41 = vmul.f32 %v11696_v54, %v8527_v48 }
 0x2ba   : > { %v2430_v53 = vpop.permute.xlu1 %2429  ;;  %v1452_v2 = vmul.f32 %v9436_v15, %v11732_v29  ;;  %v11735_v29 = vld [vmem:[#allocation64_spill] sm:$0xff]  ;;  %v2843_v55 = vmul.f32 %v9585_v18, %v9201_v32 }
 0x2bb   : > { %11730 = vst [vmem:[#allocation106_spill] sm:$0xff] %v9721_v36  ;;  %v2467_v37 = vmul.f32 %v2430_v53, %v9201_v32  ;;  %v2763_v34 = vmul.f32 %v2430_v53, %v8756_v0  ;;  %v558_v53 = vmul.f32 %v11693_v44, %v11734_v50  ;;  %v2891_v10 = vmul.f32 %v11735_v29, %v9436_v15  ;;  %v11736_v36 = vld [vmem:[#allocation66_spill] sm:$0xff]  ;;  %v11743_v29 = vld [vmem:[#allocation96_spill] sm:$0xff] }
 0x2bc   : > { %2508 = vperm.xlu1 %7553, %v9651_v35   ;;  %v610_v1 = vmul.f32 %v8492_v14, %v11736_v36  ;;  %v2568_v5 = vadd.f32 %v2560_v59, %v2544_v6  ;;  %v1670_v3 = vadd.f32 %v1662_v41, %v11737_v33  ;;  %v11739_v33 = vld [vmem:[#allocation75_spill] sm:$0xff]  ;;  %v9777_v11 = vadd.f32 %v1452_v2, %v11743_v29  ;;  %v11745_v35 = vld [vmem:[#allocation90_spill] sm:$0xff] }
 0x2bd   : > { %v2475_v46 = vadd.f32 %v2467_v37, %v2411_v8  ;;  %v2771_v62 = vadd.f32 %v2763_v34, %v2755_v45  ;;  %v11738_v37 = vld [vmem:[#allocation107_spill] sm:$0xff]  ;;  %v1694_v6 = vmul.f32 %v11739_v33, %v8531_v43  ;;  %v2592_v18 = vmul.f32 %v11739_v33, %v8492_v14  ;;  %v11746_v33 = vld [vmem:[#allocation26_spill] sm:$0xff] }
 0x2be   : > { %v1678_v45 = vmul.f32 %v11738_v37, %v8545_v31  ;;  %v2576_v34 = vmul.f32 %v11738_v37, %v11693_v44  ;;  %v566_v37 = vadd.f32 %v558_v53, %v497_v58  ;;  %v2149_v2 = vmul.f32 %v9432_v16, %v8531_v43  ;;  %v11748_v58 = vld [vmem:[#allocation87_spill] sm:$0xff]  ;;  %v11749_v53 = vld [vmem:[#allocation97_spill] sm:$0xff] }
 0x2bf   : > { %v2523_v19 = vadd.f32 %v2515_v9, %v2475_v46  ;;  %v2787_v28 = vadd.f32 %v2779_v42, %v2771_v62  ;;  %v1959_v8 = vpop.permute.xlu1 %1958  ;;  %v11740_v9 = vld [vmem:[#allocation104_spill] sm:$0xff]  ;;  %v2133_v62 = vmul.f32 %v9367_v60, %v8545_v31 }
 0x2c0   : > { %v1980_v50 = vmul.f32 %v1959_v8, %v9436_v15  ;;  %v2718_v36 = vmul.f32 %v1959_v8, %v11611_v30  ;;  %7555 = vset.pattern.permute.xlu1 %v11588_v38  ;;  %v11741_v42 = vld [vmem:[#allocation20_spill] sm:$0xff]  ;;  %v11744_v8 = vld [vmem:[#allocation50_spill] sm:$0xff]  ;;  %v1686_v14 = vadd.f32 %v1678_v45, %v1670_v3  ;;  %v2584_v60 = vadd.f32 %v2576_v34, %v2568_v5  ;;  %v11750_v5 = vld [vmem:[#allocation71_spill] sm:$0xff] }
 0x2c1   : > { %v11742_v59 = vmax.f32 %v11740_v9, %v11741_v42  ;;  %v2851_v46 = vadd.f32 %v2843_v55, %v2787_v28  ;;  %2830 = vperm.xlu1 %7555, %v5996_v7   ;;  %v1758_v9 = vmul.f32 %v11746_v33, %v11578_v13  ;;  %v11747_v55 = vld [vmem:[#allocation22_spill] sm:$0xff]  ;;  %v618_v3 = vadd.f32 %v610_v1, %v566_v37  ;;  %v11751_v1 = vld [vmem:[#allocation44_spill] sm:$0xff] }
 0x2c2   : > { %v9780_v20 = vadd.f32 %v1980_v50, %v11744_v8  ;;  %v9783_v44 = vadd.f32 %v2718_v36, %v11745_v35  ;;  %v2125_v42 = vadd.f32 %v2117_v22, %v11747_v55  ;;  %v9795_v50 = vld [vmem:[%s11278_s2] ss:$0 sm:$0xff]  ;;  %v1702_v45 = vadd.f32 %v1694_v6, %v1686_v14 }
 0x2c3   : > { %v2531_v41 = vmax.f32 %v11742_v59, %v2523_v19  ;;  %v2899_v19 = vadd.f32 %v2891_v10, %v2851_v46  ;;  %v9787_v28 = vpop.permute.xlu1 %2376  ;;  %v678_v10 = vmul.f32 %v11749_v53, %v11748_v58  ;;  %v730_v22 = vmul.f32 %v8533_v39, %v11750_v5  ;;  %v11753_v58 = vld [vmem:[#allocation40_spill] sm:$0xff] }
 0x2c4   : > { %v2600_v16 = vadd.f32 %v2592_v18, %v2584_v60  ;;  %v2608_v34 = vmul.f32 %v11746_v33, %v11749_v53  ;;  %v2141_v59 = vadd.f32 %v2133_v62, %v2125_v42  ;;  %v1766_v46 = vadd.f32 %v1758_v9, %v1702_v45  ;;  %v11752_v42 = vld [vmem:[#allocation86_spill] sm:$0xff]  ;;  %v7578_v60 = vld [vmem:[%s7955_s24 + $0x221] sm:$0xff] }
 0x2c5   : > { %v2907_v36 = vmax.f32 %v2531_v41, %v2899_v19  ;;  %7556 = vset.pattern.permute.xlu1 %v11597_v49  ;;  %v1806_v37 = vmul.f32 %v11751_v1, %v11611_v30  ;;  %v2165_v6 = vmul.f32 %v9532_v56, %v11578_v13  ;;  %v2624_v41 = vmul.f32 %v11751_v1, %v8533_v39  ;;  %v11755_v1 = vld [vmem:[#allocation25_spill] sm:$0xff] }
 0x2c6   : > { %2880 = vperm.xlu1 %7556, %v5996_v7   ;;  %v2157_v7 = vadd.f32 %v2149_v2, %v2141_v59  ;;  %v2181_v19 = vmul.f32 %v9569_v61, %v11611_v30  ;;  %v2616_v55 = vadd.f32 %v2608_v34, %v2600_v16  ;;  %v1822_v56 = vmul.f32 %v11752_v42, %v8716_v12  ;;  %v11756_v16 = vld [vmem:[#allocation77_spill] sm:$0xff] }
 0x2c7   : > { %v2922_v29 = vadd.f32 %v9795_v50, %v2907_v36  ;;  %v1439_v14 = vpop.permute.xlu1 %1438  ;;  %v11754_v36 = vld [vmem:[#allocation37_spill] sm:$0xff]  ;;  %v2640_v2 = vmul.f32 %v11752_v42, %v8537_v25 }
 0x2c8   : > { %v1455_v18 = vmul.f32 %v9436_v15, %v1439_v14  ;;  %v1871_v33 = vmul.f32 %v1439_v14, %v9120_v57  ;;  %v2183_v8 = vmul.f32 %v1439_v14, %v11611_v30  ;;  %v2689_v9 = vmul.f32 %v1439_v14, %v8531_v43 }
 0x2c9   : > { %v2930_v62 = vmax.f32 %v2922_v29, 0.0  ;;  %v2173_v59 = vadd.f32 %v2165_v6, %v2157_v7  ;;  %v1490_v29 = vadd.f32 %v9727_v52, %v9695_v24  ;;  %v686_v14 = vadd.f32 %v678_v10, %v618_v3  ;;  %v7579_v52 = vld [vmem:[%s7955_s24 + $0x70] sm:$0xff] }
 0x2ca   : > { %2884 = vperm.xlu1 %7556, %v7578_v60   ;;  %v9823_v45 = vadd.f32 %v1871_v33, %v11753_v58  ;;  %v9826_v5 = vadd.f32 %v1455_v18, %v11754_v36  ;;  %v9832_v61 = vadd.f32 %v2689_v9, %v11755_v1  ;;  %v9835_v34 = vadd.f32 %v2183_v8, %v11756_v16  ;;  %v11757_v58 = vld [vmem:[#allocation113_spill] sm:$0xff]  ;;  %v11758_v10 = vld [vmem:[#allocation78_spill] sm:$0xff] }
 0x2cb   : > { %2961 = vst.msk [vmem:[#allocation2 + $0x11] sm:$0xff] %vm2938_vm0, %v2930_v62  ;;  %v1814_v33 = vadd.f32 %v1806_v37, %v1766_v46  ;;  %v2632_v18 = vadd.f32 %v2624_v41, %v2616_v55  ;;  %v1838_v36 = vmul.f32 %v11757_v58, %v11586_v21  ;;  %v2656_v6 = vmul.f32 %v11757_v58, %v8527_v48 }
 0x2cc   : > { %v2225_v60 = vpop.permute.xlu1 %2224  ;;  %v2189_v7 = vadd.f32 %v2181_v19, %v2173_v59  ;;  %v674_v8 = vmul.f32 %v11749_v53, %v11731_v4  ;;  %v1506_v9 = vadd.f32 %v9731_v17, %v1490_v29  ;;  %v738_v1 = vadd.f32 %v730_v22, %v686_v14  ;;  %v11759_v4 = vld [vmem:[#allocation91_spill] sm:$0xff]  ;;  %v11760_v22 = vld [vmem:[#allocation109_spill] sm:$0xff] }
 0x2cd   : > { %v2246_v62 = vmul.f32 %v2225_v60, %v8716_v12  ;;  %v1830_v24 = vadd.f32 %v1822_v56, %v1814_v33  ;;  %v2648_v3 = vadd.f32 %v2640_v2, %v2632_v18  ;;  %v1854_v46 = vmul.f32 %v11758_v10, %v8756_v0  ;;  %v11761_v14 = vld [vmem:[#allocation31_spill] sm:$0xff]  ;;  %v7580_v60 = vld [vmem:[%s7955_s24 + $0x100] sm:$0xff] }
 0x2ce   : > { %477 = vperm.xlu1 %7556, %v7579_v52   ;;  %v2672_v37 = vmul.f32 %v11758_v10, %v8545_v31  ;;  %v614_v19 = vadd.f32 %v9710_v51, %v9706_v27  ;;  %v799_v17 = vmul.f32 %v8537_v25, %v11759_v4  ;;  %v1578_v55 = vmul.f32 %v11760_v22, %v11749_v53 }
 0x2cf   : > { %v9852_v41 = vadd.f32 %v2246_v62, %v2189_v7  ;;  %v1846_v2 = vadd.f32 %v1838_v36, %v1830_v24  ;;  %v2664_v59 = vadd.f32 %v2656_v6, %v2648_v3  ;;  %v726_v16 = vmul.f32 %v8533_v39, %v11720_v26  ;;  %v11762_v36 = vld [vmem:[#allocation27_spill] sm:$0xff] }
 0x2d0   : > { %v682_v29 = vadd.f32 %v674_v8, %v614_v19  ;;  %v851_v33 = vmul.f32 %v8527_v48, %v11761_v14  ;;  %v807_v18 = vadd.f32 %v799_v17, %v738_v1  ;;  %v1522_v51 = vadd.f32 %v9683_v23, %v1506_v9  ;;  %v11763_v8 = vld [vmem:[#allocation79_spill] sm:$0xff]  ;;  %v11764_v1 = vld [vmem:[#allocation54_spill] sm:$0xff]  ;;  %v11767_v14 = vld [vmem:[#allocation33_spill] sm:$0xff] }
 0x2d1   : > { %v9860_v56 = vpop.permute.xlu1 %2380  ;;  %v1862_v7 = vadd.f32 %v1854_v46, %v1846_v2  ;;  %v2680_v62 = vadd.f32 %v2672_v37, %v2664_v59  ;;  %v1626_v6 = vmul.f32 %v11762_v36, %v8533_v39  ;;  %v920_v26 = vmul.f32 %v8545_v31, %v11694_v40  ;;  %v11765_v9 = vld [vmem:[#allocation30_spill] sm:$0xff]  ;;  %v11766_v59 = vld [vmem:[#allocation32_spill] sm:$0xff] }
 0x2d2   : > { %598 = vperm.xlu1 %7556, %v7580_v60   ;;  %v2982_v27 = vld [vmem:[#allocation2 + $0x11] sm:$0xff]  ;;  %v795_v24 = vmul.f32 %v8537_v25, %v11763_v8  ;;  %v1586_v52 = vadd.f32 %v1578_v55, %v1522_v51  ;;  %v1870_v3 = vmul.f32 %v11764_v1, %v9120_v57  ;;  %v2688_v23 = vmul.f32 %v11764_v1, %v8531_v43  ;;  %v2977_v36 = vld [vmem:[%s11279_s3] sm:$0xff] }
 0x2d3   : > { %6521 = vmatmul.mubr.msk.f32.vlgmr.msra.gmra.mrb[0].mxu0 %vm2938_vm0, %v2982_v27  ;;  %v847_v46 = vmul.f32 %v8527_v48, %v11765_v9  ;;  %v2018_v37 = vmul.f32 %v11765_v9, %v11688_v47  ;;  %v734_v19 = vadd.f32 %v726_v16, %v682_v29  ;;  %v859_v4 = vadd.f32 %v851_v33, %v807_v18  ;;  %v11768_v27 = vld [vmem:[#allocation59_spill] sm:$0xff] }
 0x2d4   : > { %v1878_v17 = vadd.f32 %v1870_v3, %v1862_v7  ;;  %v2696_v55 = vadd.f32 %v2688_v23, %v2680_v62  ;;  %v9889_v60 = vmul.f32 %v11767_v14, %v11611_v30  ;;  %v2293_v51 = vmul.f32 %v11768_v27, %v11586_v21  ;;  %v2978_v3 = vld [vmem:[%s11279_s3 + $0x8] sm:$0xff]  ;;  %v11770_v9 = vld [vmem:[#allocation39_spill] sm:$0xff] }
 0x2d5   : > { %v2002_v16 = vmul.f32 %v11763_v8, %v11690_v63  ;;  %v928_v29 = vadd.f32 %v920_v26, %v859_v4  ;;  %v803_v33 = vadd.f32 %v795_v24, %v734_v19  ;;  %v1634_v18 = vadd.f32 %v1626_v6, %v1586_v52  ;;  %v11769_v6 = vld [vmem:[#allocation107_spill] sm:$0xff]  ;;  %v11771_v4 = vld [vmem:[#allocation105_spill] sm:$0xff] }
 0x2d6   : > { %7557 = vset.pattern.permute.xlu1 %v11588_v38  ;;  %v1917_v40 = vpop.permute.xlu1 %1916  ;;  %v9907_v23 = vmul.f32 %v11767_v14, %v8533_v39  ;;  %v972_v26 = vmul.f32 %v8531_v43, %v11696_v54  ;;  %v1040_v8 = vmul.f32 %v11578_v13, %v11769_v6  ;;  %v7039_v52 = vpack.c.bf16 %v2978_v3, %v2977_v36  ;;  %v11773_v14 = vld [vmem:[#allocation68_spill] sm:$0xff] }
 0x2d7   : > { %v1934_v22 = vmul.f32 %v1917_v40, %v9201_v32  ;;  %v2704_v2 = vmul.f32 %v1917_v40, %v11578_v13  ;;  %787 = vperm.xlu1 %7557, %v11766_v59   ;;  %v1642_v19 = vmul.f32 %v11770_v9, %v8537_v25  ;;  %v2301_v40 = vadd.f32 %v2293_v51, %v11771_v4  ;;  %v11772_v59 = vld [vmem:[#allocation75_spill] sm:$0xff] }
 0x2d8   : > { %v1092_v54 = vmul.f32 %v11611_v30, %v11772_v59  ;;  %7040 = vmatprep.subr.bf16.mxu0 %v7039_v52  ;;  %v855_v27 = vadd.f32 %v847_v46, %v803_v33  ;;  %v916_v6 = vmul.f32 %v8545_v31, %v11770_v9  ;;  %v11777_v46 = vld [vmem:[#allocation41_spill] sm:$0xff]  ;;  %v2980_v59 = vld [vmem:[%s11279_s3 + $0x18] sm:$0xff] }
 0x2d9   : > { %v9895_v7 = vadd.f32 %v1934_v22, %v1878_v17  ;;  %v9897_v62 = vadd.f32 %v2704_v2, %v2696_v55  ;;  %v2026_v55 = vadd.f32 %v2018_v37, %v2002_v16  ;;  %v980_v2 = vadd.f32 %v972_v26, %v928_v29  ;;  %7042 = vmatpush3.bf16.msra.mxu0 %v7039_v52  ;;  %v11776_v29 = vld [vmem:[#allocation43_spill] sm:$0xff] }
 0x2da   : > { %v2333_v24 = vpop.permute.xlu1 %2332  ;;  %v1650_v36 = vadd.f32 %v1642_v19, %v1634_v18  ;;  %v1161_v26 = vmul.f32 %v8716_v12, %v11776_v29  ;;  %v1658_v33 = vmul.f32 %v11777_v46, %v8527_v48  ;;  %v2556_v18 = vmul.f32 %v11777_v46, %v11688_v47  ;;  %v11778_v19 = vld [vmem:[#allocation34_spill] sm:$0xff]  ;;  %v11781_v47 = vld [vmem:[#allocation93_spill] sm:$0xff] }
 0x2db   : > { %v2358_v17 = vmul.f32 %v2333_v24, %v8756_v0  ;;  %v2734_v22 = vmul.f32 %v2333_v24, %v8716_v12  ;;  %7558 = vset.pattern.permute.xlu1 %v11597_v49  ;;  %v11775_v24 = vld [vmem:[#allocation92_spill] sm:$0xff]  ;;  %v1048_v16 = vadd.f32 %v1040_v8, %v980_v2  ;;  %v2540_v8 = vmul.f32 %v11770_v9, %v11690_v63  ;;  %v2979_v2 = vld [vmem:[%s11279_s3 + $0x10] sm:$0xff] }
 0x2dc   : > { %718 = vperm.xlu1 %7558, %v11773_v14   ;;  %v2034_v37 = vmul.f32 %v11770_v9, %v11775_v24  ;;  %v924_v14 = vadd.f32 %v916_v6, %v855_v27  ;;  %v1666_v29 = vadd.f32 %v1658_v33, %v1650_v36  ;;  %v11779_v9 = vld [vmem:[#allocation98_spill] sm:$0xff]  ;;  %v7043_v63 = vpack.c.bf16 %v2980_v59, %v2979_v2 }
 0x2dd   : > { %v9922_v3 = vadd.f32 %v2358_v17, %v2301_v40  ;;  %v9925_v51 = vadd.f32 %v2734_v22, %v9783_v44  ;;  %v9941_v40 = vmul.f32 %v11586_v21, %v11778_v19  ;;  %v1100_v22 = vadd.f32 %v1092_v54, %v1048_v16  ;;  %v11784_v2 = vld [vmem:[#allocation42_spill] sm:$0xff] }
 0x2de   : > { %v1922_v4 = vpop.permute.xlu1 %1921  ;;  %v2042_v17 = vadd.f32 %v2034_v37, %v2026_v55  ;;  %v11780_v55 = vld [vmem:[#allocation36_spill] sm:$0xff]  ;;  %v968_v37 = vmul.f32 %v8531_v43, %v11777_v46  ;;  %v2050_v27 = vmul.f32 %v11777_v46, %v11781_v47  ;;  %v2564_v36 = vadd.f32 %v2556_v18, %v2540_v8  ;;  %7044 = vmatprep.subr.bf16.mxu0 %v7043_v63 }
 0x2df   : > { %11774 = vst [vmem:[#allocation47_spill] sm:$0xff] %v9925_v51  ;;  %v1935_v44 = vmul.f32 %v1922_v4, %v9201_v32  ;;  %v2705_v52 = vmul.f32 %v1922_v4, %v11578_v13  ;;  %v2115_v54 = vmul.f32 %v11780_v55, %v8527_v48  ;;  %v1169_v16 = vadd.f32 %v1161_v26, %v1100_v22  ;;  %v11785_v55 = vld [vmem:[#allocation115_spill] sm:$0xff] }
 0x2e0   : > { %7559 = vset.pattern.permute.xlu1 %v11588_v38  ;;  %v1282_v26 = vmul.f32 %v8756_v0, %v11752_v42  ;;  %v2058_v46 = vadd.f32 %v2050_v27, %v2042_v17  ;;  %v976_v8 = vadd.f32 %v968_v37, %v924_v14  ;;  %7046 = vmatpush3.bf16.msra.mxu0 %v7043_v63  ;;  %v6020_v27 = vld [vmem:[%s11279_s3 + $0x40] sm:$0xff] }
 0x2e1   : > { %v9953_v4 = vadd.f32 %v1935_v44, %v9823_v45  ;;  %v9956_v35 = vadd.f32 %v2705_v52, %v9832_v61  ;;  %908 = vperm.xlu1 %7559, %v11779_v9   ;;  %v11782_v45 = vld [vmem:[#allocation55_spill] sm:$0xff]  ;;  %v11783_v44 = vld [vmem:[#allocation45_spill] sm:$0xff] }
 0x2e2   : > { %v1674_v6 = vmul.f32 %v11782_v45, %v8545_v31  ;;  %v2572_v61 = vmul.f32 %v11782_v45, %v11775_v24  ;;  %v1213_v52 = vmul.f32 %v11586_v21, %v11783_v44  ;;  %v1036_v9 = vmul.f32 %v11578_v13, %v11782_v45 }
 0x2e3   : > { %v2276_v33 = vpop.permute.xlu1 %2275  ;;  %v2359_v24 = vmul.f32 %v11785_v55, %v8756_v0  ;;  %v1334_v44 = vmul.f32 %v9120_v57, %v11757_v58  ;;  %v2066_v42 = vmul.f32 %v11782_v45, %v11749_v53  ;;  %v6021_v45 = vld [vmem:[%s11279_s3 + $0x48] sm:$0xff] }
 0x2e4   : > { %v2294_v22 = vmul.f32 %v2276_v33, %v11586_v21  ;;  %v1682_v18 = vadd.f32 %v1674_v6, %v1666_v29  ;;  %v1221_v59 = vadd.f32 %v1213_v52, %v1169_v16  ;;  %v11786_v33 = vld [vmem:[#allocation70_spill] sm:$0xff]  ;;  %v2580_v29 = vadd.f32 %v2572_v61, %v2564_v36 }
 0x2e5   : > { %1028 = vperm.xlu1 %7559, %v11784_v2   ;;  %v1088_v17 = vmul.f32 %v11611_v30, %v11786_v33  ;;  %v1690_v14 = vmul.f32 %v11786_v33, %v8531_v43  ;;  %v2588_v63 = vmul.f32 %v11786_v33, %v11781_v47  ;;  %v1402_v16 = vmul.f32 %v9201_v32, %v11758_v10  ;;  %v11787_v52 = vld [vmem:[#allocation110_spill] sm:$0xff] }
 0x2e6   : > { %v2302_v51 = vadd.f32 %v2294_v22, %v9852_v41  ;;  %v1290_v37 = vadd.f32 %v1282_v26, %v1221_v59  ;;  %v2082_v36 = vmul.f32 %v11786_v33, %v8533_v39  ;;  %v1044_v6 = vadd.f32 %v1036_v9, %v976_v8  ;;  %v11789_v55 = vld [vmem:[#allocation58_spill] sm:$0xff] }
 0x2e7   : > { %v2074_v61 = vadd.f32 %v2066_v42, %v2058_v46  ;;  %v2131_v10 = vmul.f32 %v11787_v52, %v8545_v31  ;;  %v1698_v26 = vadd.f32 %v1690_v14, %v1682_v18  ;;  %v10010_v59 = vpack.c.bf16 %v6021_v45, %v6020_v27  ;;  %v11790_v46 = vld [vmem:[#allocation111_spill] sm:$0xff]  ;;  %v11791_v42 = vld [vmem:[#allocation38_spill] sm:$0xff] }
 0x2e8   : > { %v9992_v58 = vadd.f32 %v2359_v24, %v2302_v51  ;;  %v9994_v41 = vpop.permute.xlu1 %2439  ;;  %v11788_v51 = vld [vmem:[#allocation100_spill] sm:$0xff]  ;;  %v1342_v22 = vadd.f32 %v1334_v44, %v1290_v37  ;;  %v1157_v47 = vmul.f32 %v8716_v12, %v11789_v55  ;;  %v2098_v9 = vmul.f32 %v11789_v55, %v8537_v25 }
 0x2e9   : > { %7560 = vset.pattern.permute.xlu1 %v11597_v49  ;;  %v2604_v24 = vmul.f32 %v11788_v51, %v11749_v53  ;;  %v2123_v8 = vadd.f32 %v2115_v54, %v11790_v46  ;;  %v2147_v33 = vmul.f32 %v11791_v42, %v8531_v43  ;;  %v2114_v18 = vmul.f32 %v11778_v19, %v8527_v48  ;;  %v11792_v46 = vld [vmem:[#allocation80_spill] sm:$0xff] }
 0x2ea   : > { %1080 = vperm.xlu1 %7560, %v11784_v2   ;;  %v1454_v2 = vmul.f32 %v9436_v15, %v11764_v1  ;;  %v2596_v44 = vadd.f32 %v2588_v63, %v2580_v29  ;;  %v1410_v14 = vadd.f32 %v1402_v16, %v1342_v22  ;;  %7048 = vmatprep.subr.bf16.mxu0 %v10010_v59  ;;  %v7581_v29 = vld [vmem:[%s7955_s24 + $0x101] sm:$0xff] }
 0x2eb   : > { %v1754_v37 = vmul.f32 %v11788_v51, %v11578_v13  ;;  %v1096_v27 = vadd.f32 %v1088_v17, %v1044_v6  ;;  %v2090_v45 = vadd.f32 %v2082_v36, %v2074_v61  ;;  %v2139_v54 = vadd.f32 %v2131_v10, %v2123_v8  ;;  %v11793_v17 = vld [vmem:[#allocation48_spill] sm:$0xff] }
 0x2ec   : > { %v2612_v55 = vadd.f32 %v2604_v24, %v2596_v44  ;;  %v2163_v42 = vmul.f32 %v11792_v46, %v11578_v13  ;;  %v2179_v36 = vmul.f32 %v11793_v17, %v11611_v30  ;;  %v10033_v6 = vadd.f32 %v1454_v2, %v1410_v14  ;;  %v5926_v51 = vld [vmem:[%s7955_s24 + $0x80] sm:$0xff] }
 0x2ed   : > { %v1967_v52 = vpop.permute.xlu1 %1966  ;;  %v1165_v63 = vadd.f32 %v1157_v47, %v1096_v27  ;;  %v2106_v16 = vadd.f32 %v2098_v9, %v2090_v45  ;;  %v1762_v22 = vadd.f32 %v1754_v37, %v1698_v26  ;;  %v2155_v39 = vadd.f32 %v2147_v33, %v2139_v54  ;;  %v11794_v24 = vld [vmem:[#allocation49_spill] sm:$0xff]  ;;  %v11795_v47 = vld [vmem:[#allocation52_spill] sm:$0xff] }
 0x2ee   : > { %v1982_v19 = vmul.f32 %v1967_v52, %v9436_v15  ;;  %v2720_v1 = vmul.f32 %v1967_v52, %v11611_v30  ;;  %1622 = vperm.xlu1 %7560, %v7581_v29   ;;  %v2717_v8 = vmul.f32 %v11794_v24, %v11611_v30  ;;  %v2292_v9 = vmul.f32 %v11795_v47, %v11586_v21  ;;  %v11796_v26 = vld [vmem:[#allocation112_spill] sm:$0xff]  ;;  %v11798_v52 = vld [vmem:[#allocation95_spill] sm:$0xff] }
 0x2ef   : > { %v2130_v33 = vmul.f32 %v11796_v26, %v8545_v31  ;;  %v2636_v2 = vmul.f32 %v11796_v26, %v8537_v25  ;;  %v2171_v14 = vadd.f32 %v2163_v42, %v2155_v39  ;;  %v2122_v45 = vadd.f32 %v2114_v18, %v2106_v16  ;;  %v11799_v39 = vld [vmem:[#allocation69_spill] sm:$0xff]  ;;  %v11800_v16 = vld [vmem:[#allocation35_spill] sm:$0xff] }
 0x2f0   : > { %v10036_v61 = vadd.f32 %v1982_v19, %v9895_v7  ;;  %v10039_v10 = vadd.f32 %v2720_v1, %v9897_v62  ;;  %v2628_v7 = vadd.f32 %v9907_v23, %v2612_v55  ;;  %v11797_v62 = vld [vmem:[#allocation116_spill] sm:$0xff]  ;;  %v1818_v54 = vmul.f32 %v11796_v26, %v8716_v12 }
 0x2f1   : > { %v10050_v44 = vpop.permute.xlu1 %2384  ;;  %v2244_v37 = vmul.f32 %v11797_v62, %v8716_v12  ;;  %v2146_v46 = vmul.f32 %v11798_v52, %v8531_v43  ;;  %v2652_v19 = vmul.f32 %v11798_v52, %v8527_v48  ;;  %v10066_v23 = vmul.f32 %v11799_v39, %v9436_v15 }
 0x2f2   : > { %7562 = vset.pattern.permute.xlu1 %v11588_v38  ;;  %v10069_v55 = vadd.f32 %v9941_v40, %v1165_v63  ;;  %v1810_v42 = vadd.f32 %v9889_v60, %v1762_v22  ;;  %v2187_v18 = vadd.f32 %v2179_v36, %v2171_v14  ;;  %v2138_v1 = vadd.f32 %v2130_v33, %v2122_v45  ;;  %v11801_v22 = vld [vmem:[#allocation53_spill] sm:$0xff] }
 0x2f3   : > { %1149 = vperm.xlu1 %7562, %v5926_v51   ;;  %v2644_v29 = vadd.f32 %v2636_v2, %v2628_v7  ;;  %v2162_v17 = vmul.f32 %v11800_v16, %v11578_v13  ;;  %v2668_v24 = vmul.f32 %v11800_v16, %v8545_v31  ;;  %v1278_v62 = vmul.f32 %v8756_v0, %v11796_v26  ;;  %v11802_v2 = vld [vmem:[#allocation81_spill] sm:$0xff] }
 0x2f4   : > { %v2252_v39 = vadd.f32 %v2244_v37, %v2187_v18  ;;  %v1826_v63 = vadd.f32 %v1818_v54, %v1810_v42  ;;  %v2684_v36 = vmul.f32 %v11801_v22, %v8531_v43  ;;  %v2154_v33 = vadd.f32 %v2146_v46, %v2138_v1 }
 0x2f5   : > { %v1971_v47 = vpop.permute.xlu1 %1970  ;;  %v2660_v60 = vadd.f32 %v2652_v19, %v2644_v29  ;;  %v2357_v7 = vmul.f32 %v11802_v2, %v8756_v0  ;;  %v2733_v14 = vmul.f32 %v11802_v2, %v8716_v12  ;;  %v2178_v46 = vmul.f32 %v11801_v22, %v11611_v30  ;;  %v11803_v19 = vld [vmem:[#allocation82_spill] sm:$0xff]  ;;  %v11807_v2 = vld [vmem:[#allocation17_spill] sm:$0xff] }
 0x2f6   : > { %v1983_v27 = vmul.f32 %v1971_v47, %v9436_v15  ;;  %v2721_v40 = vmul.f32 %v1971_v47, %v11611_v30  ;;  %v2170_v54 = vadd.f32 %v2162_v17, %v2154_v33  ;;  %v2300_v42 = vadd.f32 %v2292_v9, %v2252_v39  ;;  %v10104_v17 = vpop.permute.xlu0 %2342 }
 0x2f7   : > { %7563 = vset.pattern.permute.xlu1 %v11597_v49  ;;  %v2676_v45 = vadd.f32 %v2668_v24, %v2660_v60  ;;  %v2725_v49 = vadd.f32 %v2717_v8, %v11803_v19  ;;  %v2405_v18 = vmul.f32 %v9860_v56, %v9120_v57  ;;  %v2749_v1 = vmul.f32 %v9860_v56, %v11586_v21  ;;  %v11805_v8 = vld [vmem:[#allocation114_spill] sm:$0xff]  ;;  %v11806_v60 = vld [vmem:[#allocation108_spill] sm:$0xff] }
 0x2f8   : > { %v10088_v26 = vadd.f32 %v1983_v27, %v9953_v4  ;;  %v10091_v37 = vadd.f32 %v2721_v40, %v9956_v35  ;;  %1201 = vperm.xlu1 %7563, %v5926_v51   ;;  %v11804_v27 = vld [vmem:[#allocation102_spill] sm:$0xff]  ;;  %v2243_v9 = vmul.f32 %v11805_v8, %v8716_v12  ;;  %v2365_v47 = vadd.f32 %v2357_v7, %v2300_v42 }
 0x2f9   : > { %v2692_v51 = vadd.f32 %v2684_v36, %v2676_v45  ;;  %v2700_v29 = vmul.f32 %v11804_v27, %v11578_v13  ;;  %v2741_v39 = vadd.f32 %v2733_v14, %v2725_v49  ;;  %v2469_v56 = vmul.f32 %v9994_v41, %v9201_v32  ;;  %v7582_v7 = vld [vmem:[%s7955_s24 + $0x110] sm:$0xff] }
 0x2fa   : > { %v2235_v35 = vpop.permute.xlu1 %2234  ;;  %v2765_v40 = vmul.f32 %v9994_v41, %v8756_v0  ;;  %v2716_v36 = vmul.f32 %v11806_v60, %v11611_v30  ;;  %v2186_v33 = vadd.f32 %v2178_v46, %v2170_v54  ;;  %v2291_v45 = vmul.f32 %v11807_v2, %v11586_v21  ;;  %v11808_v54 = vld [vmem:[#allocation29_spill] sm:$0xff]  ;;  %v2816_v30 = vpop.permute.xlu0 %2815 }
 0x2fb   : > { %v2248_v24 = vmul.f32 %v2235_v35, %v8716_v12  ;;  %v1834_v14 = vmul.f32 %v11798_v52, %v11586_v21  ;;  %v1850_v41 = vmul.f32 %v11800_v16, %v8756_v0  ;;  %v2413_v49 = vadd.f32 %v2405_v18, %v2365_v47 }
 0x2fc   : > { %7564 = vset.pattern.permute.xlu1 %v11588_v38  ;;  %v2757_v38 = vadd.f32 %v2749_v1, %v2741_v39  ;;  %v2708_v42 = vadd.f32 %v2700_v29, %v2692_v51  ;;  %v2251_v35 = vadd.f32 %v2243_v9, %v2186_v33  ;;  %v2356_v46 = vmul.f32 %v11808_v54, %v8756_v0  ;;  %v7583_v29 = vld [vmem:[%s7955_s24 + $0x81] sm:$0xff] }
 0x2fd   : > { %v10119_v19 = vadd.f32 %v2248_v24, %v9835_v34  ;;  %1270 = vperm.xlu1 %7564, %v7582_v7   ;;  %v2732_v34 = vmul.f32 %v11808_v54, %v8716_v12  ;;  %v2477_v24 = vadd.f32 %v2469_v56, %v2413_v49  ;;  %v2404_v1 = vmul.f32 %v9787_v28, %v9120_v57 }
 0x2fe   : > { %v2773_v2 = vadd.f32 %v2765_v40, %v2757_v38  ;;  %v2724_v13 = vadd.f32 %v2716_v36, %v2708_v42  ;;  %v2299_v18 = vadd.f32 %v2291_v45, %v2251_v35  ;;  %v2748_v51 = vmul.f32 %v9787_v28, %v11586_v21  ;;  %v11809_v28 = vld [vmem:[#allocation73_spill] sm:$0xff]  ;;  %v11810_v42 = vld [vmem:[#allocation84_spill] sm:$0xff] }
 0x2ff   : > { %v2493_v8 = vpop.permute.xlu1 %2492  ;;  %v1286_v9 = vadd.f32 %v1278_v62, %v10069_v55  ;;  %v2845_v47 = vmul.f32 %v2816_v30, %v9201_v32  ;;  %v1842_v40 = vadd.f32 %v1834_v14, %v1826_v63  ;;  %v1866_v36 = vmul.f32 %v11801_v22, %v9120_v57 }
 0x300   : > { %v2517_v7 = vmul.f32 %v2493_v8, %v9436_v15  ;;  %v2781_v4 = vmul.f32 %v2493_v8, %v9120_v57  ;;  %v2364_v33 = vadd.f32 %v2356_v46, %v2299_v18  ;;  %v2740_v45 = vadd.f32 %v2732_v34, %v2724_v13  ;;  %v7584_v8 = vld [vmem:[%s7955_s24 + $0x111] sm:$0xff]  ;;  %v11812_v13 = vld [vmem:[#allocation76_spill] sm:$0xff] }
 0x301   : > { %1390 = vperm.xlu1 %7564, %v7583_v29   ;;  %v1330_v38 = vmul.f32 %v9120_v57, %v11798_v52  ;;  %v11811_v35 = vmax.f32 %v11809_v28, %v11810_v42  ;;  %v1858_v62 = vadd.f32 %v1850_v41, %v1842_v40  ;;  %v1930_v63 = vmul.f32 %v11804_v27, %v9201_v32 }
 0x302   : > { %v2525_v39 = vadd.f32 %v2517_v7, %v2477_v24  ;;  %v2789_v56 = vadd.f32 %v2781_v4, %v2773_v2  ;;  %v2412_v4 = vadd.f32 %v2404_v1, %v2364_v33  ;;  %v2756_v14 = vadd.f32 %v2748_v51, %v2740_v45  ;;  %v11813_v24 = vld [vmem:[#allocation19_spill] sm:$0xff] }
 0x303   : > { %v2280_v49 = vpop.permute.xlu1 %2279  ;;  %v2468_v46 = vmul.f32 %v11812_v13, %v9201_v32  ;;  %v2360_v52 = vmul.f32 %v10104_v17, %v8756_v0  ;;  %v1398_v41 = vmul.f32 %v9201_v32, %v11800_v16  ;;  %v2764_v27 = vmul.f32 %v11812_v13, %v8756_v0  ;;  %v7585_v16 = vld [vmem:[%s7955_s24 + $0x1a0] sm:$0xff] }
 0x304   : > { %v2533_v54 = vmax.f32 %v11811_v35, %v2525_v39  ;;  %v2853_v55 = vadd.f32 %v2845_v47, %v2789_v56  ;;  %v2295_v30 = vmul.f32 %v2280_v49, %v11586_v21  ;;  %v1874_v7 = vadd.f32 %v1866_v36, %v1858_v62  ;;  %v11814_v36 = vld [vmem:[#allocation60_spill] sm:$0xff] }
 0x305   : > { %1926 = vperm.xlu1 %7564, %v7584_v8   ;;  %v1978_v18 = vmul.f32 %v11806_v60, %v9436_v15  ;;  %v1338_v1 = vadd.f32 %v1330_v38, %v1286_v9  ;;  %v2476_v56 = vadd.f32 %v2468_v46, %v2412_v4  ;;  %v2772_v40 = vadd.f32 %v2764_v27, %v2756_v14  ;;  %v7587_v46 = vld [vmem:[%s7955_s24 + $0x1a1] sm:$0xff] }
 0x306   : > { %v2901_v34 = vadd.f32 %v10066_v23, %v2853_v55  ;;  %v2303_v2 = vadd.f32 %v2295_v30, %v11813_v24  ;;  %v1450_v23 = vmul.f32 %v9436_v15, %v11801_v22  ;;  %v1938_v39 = vadd.f32 %v1930_v63, %v1874_v7  ;;  %v7586_v55 = vld [vmem:[%s7955_s24 + $0x230] sm:$0xff] }
 0x307   : > { %v2516_v45 = vmul.f32 %v11814_v36, %v9436_v15  ;;  %v2780_v60 = vmul.f32 %v11814_v36, %v9120_v57  ;;  %v1406_v9 = vadd.f32 %v1398_v41, %v1338_v1  ;;  %v11815_v30 = vld [vmem:[#allocation67_spill] sm:$0xff]  ;;  %v2406_v27 = vmul.f32 %v10050_v44, %v9120_v57  ;;  %v11816_v36 = vld [vmem:[#allocation62_spill] sm:$0xff] }
 0x308   : > { %v2909_v51 = vmax.f32 %v2533_v54, %v2901_v34  ;;  %v2368_v29 = vadd.f32 %v2360_v52, %v2303_v2  ;;  %v10162_v47 = vpop.permute.xlu1 %2444  ;;  %v1986_v49 = vadd.f32 %v1978_v18, %v1938_v39  ;;  %v2892_v62 = vmul.f32 %v11815_v30, %v9436_v15  ;;  %v7588_v2 = vld [vmem:[%s7955_s24 + $0x231] sm:$0xff]  ;;  %s11234_s24 = scalar_lea.hbm %s11285_s9, %s6240_s18 }
 0x309   : > { %2239 = vperm.xlu1 %7564, %v7585_v16   ;;  %v1458_v22 = vadd.f32 %v1450_v23, %v1406_v9  ;;  %v2524_v42 = vadd.f32 %v2516_v45, %v2476_v56  ;;  %v2788_v35 = vadd.f32 %v2780_v60, %v2772_v40  ;;  %v2470_v18 = vmul.f32 %v10162_v47, %v9201_v32 }
 0x30a   : > { %v2924_v33 = vadd.f32 %v9795_v50, %v2909_v51  ;;  %v2414_v1 = vadd.f32 %v2406_v27, %v9922_v3  ;;  %v2407_v45 = vmul.f32 %v11816_v36, %v9120_v57  ;;  %v11817_v3 = vmax.f32 %v9777_v11, %v9780_v20 }
 0x30b   : > { %v1994_v63 = vmax.f32 %v1458_v22, %v1986_v49 }
 0x30c   : > { %v2932_v38 = vmax.f32 %v2924_v33, 0.0  ;;  %v2811_v28 = vpop.permute.xlu1 %2810  ;;  %v2478_v23 = vadd.f32 %v2470_v18, %v2414_v1  ;;  %v2415_v49 = vadd.f32 %v2407_v45, %v9992_v58  ;;  %v2751_v58 = vmul.f32 %v11816_v36, %v11586_v21  ;;  %v11823_v1 = vld [vmem:[#allocation47_spill] sm:$0xff] }
 0x30d   : > { %v2844_v54 = vmul.f32 %v2811_v28, %v9201_v32  ;;  %2352 = vperm.xlu1 %7564, %v7586_v55   ;;  %v2532_v8 = vmax.f32 %v1994_v63, %v2524_v42  ;;  %v11819_v55 = vld [vmem:[#allocation94_spill] sm:$0xff] }
 0x30e   : > { %2963 = vst.msk [vmem:[#allocation2 + $0x31] sm:$0xff] %vm2938_vm0, %v2932_v38 }
 0x30f   : > { %v2852_v4 = vadd.f32 %v2844_v54, %v2788_v35  ;;  %v11818_v54 = vld [vmem:[#allocation83_spill] sm:$0xff] }
 0x310   : > { %v10177_v14 = vpop.permute.xlu1 %2347  ;;  %v11820_v30 = vmax.f32 %v11818_v54, %v11819_v55 }
 0x311   : > { %v2900_v13 = vadd.f32 %v2892_v62, %v2852_v4  ;;  %2464 = vperm.xlu1 %7564, %v7587_v46   ;;  %v2750_v4 = vmul.f32 %v10050_v44, %v11586_v21 }
 0x313   : > { %v2908_v52 = vmax.f32 %v2532_v8, %v2900_v13  ;;  %v11821_v8 = vld [vmem:[#allocation72_spill] sm:$0xff]  ;;  %v2758_v44 = vadd.f32 %v2750_v4, %v11823_v1 }
 0x314   : > { %v2450_v34 = vpop.permute.xlu1 %2449  ;;  %v2520_v13 = vmul.f32 %v11821_v8, %v9436_v15 }
 0x315   : > { %v2923_v24 = vadd.f32 %v9795_v50, %v2908_v52  ;;  %2840 = vperm.xlu1 %7564, %v7588_v2   ;;  %v10195_v33 = vld [vmem:[#allocation2 + $0x31] sm:$0xff]  ;;  %v2471_v60 = vmul.f32 %v2450_v34, %v9201_v32  ;;  %v2767_v46 = vmul.f32 %v2450_v34, %v8756_v0 }
 0x317   : > { %v2931_v41 = vmax.f32 %v2923_v24, 0.0  ;;  %v2479_v28 = vadd.f32 %v2471_v60, %v2415_v49  ;;  %v2766_v24 = vmul.f32 %v10162_v47, %v8756_v0 }
 0x319   : > { %2962 = vst.msk [vmem:[#allocation2 + $0x21] sm:$0xff] %vm2938_vm0, %v2931_v41  ;;  %v2393_v7 = vpop.permute.xlu1 %2392  ;;  %v11822_v41 = vld [vmem:[#allocation106_spill] sm:$0xff]  ;;  %v2774_v34 = vadd.f32 %v2766_v24, %v2758_v44 }
 0x31a   : > { %v2408_v42 = vmul.f32 %v2393_v7, %v9120_v57 }
 0x31c   : > { %v2416_v20 = vadd.f32 %v2408_v42, %v2368_v29  ;;  %v2759_v29 = vadd.f32 %v2751_v58, %v11822_v41  ;;  %v2821_v42 = vpop.permute.xlu0 %2820 }
 0x31d   : > { %v2497_v51 = vpop.permute.xlu1 %2496 }
 0x31e   : > { %v2518_v39 = vmul.f32 %v2497_v51, %v9436_v15 }
 0x320   : > { %v2526_v56 = vadd.f32 %v2518_v39, %v2478_v23  ;;  %v10189_v40 = vld [vmem:[#allocation2 + $0x21] sm:$0xff]  ;;  %v2782_v23 = vmul.f32 %v2497_v51, %v9120_v57  ;;  %v2775_v39 = vadd.f32 %v2767_v46, %v2759_v29  ;;  %v11826_v51 = vld [vmem:[#allocation74_spill] sm:$0xff]  ;;  %v2836_v1 = vpop.permute.xlu0 %2835 }
 0x321   : > { %v10191_v16 = vpop.permute.xlu1 %2396  ;;  %6523 = vmatprep.mubr.msk.f32.mxu0 %vm2938_vm0, %v10189_v40 }
 0x322   : > { %v10203_v9 = vmax.f32 %v11817_v3, %v2526_v56  ;;  %6524 = vmatmul.mubr.msk.f32.gmra.mrb[2].mxu0 %vm2938_vm0, %v10195_v33  ;;  %v11824_v56 = vmax.f32 %v10033_v6, %v10036_v61  ;;  %v11825_v3 = vld [vmem:[#allocation65_spill] sm:$0xff]  ;;  %v2846_v6 = vmul.f32 %v2821_v42, %v9201_v32  ;;  %v2409_v54 = vmul.f32 %v10191_v16, %v9120_v57 }
 0x323   : > { %v2296_v49 = vmul.f32 %v11825_v3, %v11586_v21 }
 0x325   : > { %v2501_v38 = vpop.permute.xlu1 %2500  ;;  %v2304_v61 = vadd.f32 %v2296_v49, %v10119_v19  ;;  %v2737_v19 = vmul.f32 %v10177_v14, %v8716_v12  ;;  %v2784_v49 = vmul.f32 %v11821_v8, %v9120_v57 }
 0x326   : > { %v2519_v22 = vmul.f32 %v2501_v38, %v9436_v15  ;;  %v2783_v27 = vmul.f32 %v2501_v38, %v9120_v57  ;;  %v2361_v38 = vmul.f32 %v10177_v14, %v8756_v0 }
 0x328   : > { %v2527_v35 = vadd.f32 %v2519_v22, %v2479_v28  ;;  %v2791_v60 = vadd.f32 %v2783_v27, %v2775_v39  ;;  %v2790_v28 = vadd.f32 %v2782_v23, %v2774_v34  ;;  %v2895_v22 = vmul.f32 %v11826_v51, %v9436_v15 }
 0x32a   : > { %v2535_v62 = vmax.f32 %v11820_v30, %v2527_v35  ;;  %v2455_v63 = vpop.permute.xlu1 %2454  ;;  %v2854_v4 = vadd.f32 %v2846_v6, %v2790_v28 }
 0x32b   : > { %v2472_v11 = vmul.f32 %v2455_v63, %v9201_v32  ;;  %v2768_v44 = vmul.f32 %v2455_v63, %v8756_v0 }
 0x32d   : > { %v2480_v52 = vadd.f32 %v2472_v11, %v2416_v20  ;;  %v2369_v20 = vadd.f32 %v2361_v38, %v2304_v61 }
 0x32e   : > { %v2460_v2 = vpop.permute.xlu1 %2459 }
 0x32f   : > { %v2528_v18 = vadd.f32 %v2520_v13, %v2480_v52  ;;  %v2473_v11 = vmul.f32 %v2460_v2, %v9201_v32  ;;  %v2736_v13 = vmul.f32 %v10104_v17, %v8716_v12  ;;  %v2752_v52 = vmul.f32 %v2393_v7, %v11586_v21 }
 0x330   : > { %v2417_v24 = vadd.f32 %v2409_v54, %v2369_v20  ;;  %v2769_v63 = vmul.f32 %v2460_v2, %v8756_v0 }
 0x331   : > { %v10230_v36 = vmax.f32 %v11824_v56, %v2528_v18  ;;  %v2744_v29 = vadd.f32 %v2736_v13, %v10039_v10  ;;  %v2753_v56 = vmul.f32 %v10191_v16, %v11586_v21  ;;  %v2745_v10 = vadd.f32 %v2737_v19, %v10091_v37  ;;  %v426_v16 = vpop.permute.xlu0 %425 }
 0x332   : > { %v2826_v45 = vpop.permute.xlu1 %2825  ;;  %v2481_v23 = vadd.f32 %v2473_v11, %v2417_v24 }
 0x333   : > { %v2847_v47 = vmul.f32 %v2826_v45, %v9201_v32  ;;  %v2760_v7 = vadd.f32 %v2752_v52, %v2744_v29  ;;  %v2761_v38 = vadd.f32 %v2753_v56, %v2745_v10  ;;  %v6022_v56 = vld [vmem:[%s11279_s3 + $0x50] sm:$0xff] }
 0x335   : > { %v2855_v35 = vadd.f32 %v2847_v47, %v2791_v60  ;;  %v2776_v45 = vadd.f32 %v2768_v44, %v2760_v7  ;;  %v2777_v51 = vadd.f32 %v2769_v63, %v2761_v38  ;;  %v547_v6 = vpop.permute.xlu0 %546  ;;  %v6033_v38 = vld [vmem:[%s11279_s3 + $0x68] sm:$0xff] }
 0x337   : > { %v2903_v55 = vadd.f32 %v2895_v22, %v2855_v35  ;;  %v2873_v30 = vpop.permute.xlu1 %2872  ;;  %v2792_v22 = vadd.f32 %v2784_v49, %v2776_v45  ;;  %v11830_v45 = vld [vmem:[#allocation92_spill] sm:$0xff] }
 0x338   : > { %v2894_v58 = vmul.f32 %v2873_v30, %v9436_v15  ;;  %v560_v63 = vmul.f32 %v11830_v45, %v547_v6  ;;  %v10316_v49 = vld [vmem:[#allocation2 + $0x20] sm:$0xff] }
 0x339   : > { %v2911_v46 = vmax.f32 %v2535_v62, %v2903_v55 }
 0x33a   : > { %v2902_v41 = vadd.f32 %v2894_v58, %v2854_v4 }
 0x33b   : > { %v2926_v27 = vadd.f32 %v9795_v50, %v2911_v46  ;;  %v2509_v18 = vpop.permute.xlu1 %2508  ;;  %v667_v46 = vpop.permute.xlu0 %666 }
 0x33c   : > { %v2910_v39 = vmax.f32 %v10203_v9, %v2902_v41  ;;  %v2521_v17 = vmul.f32 %v2509_v18, %v9436_v15  ;;  %v11827_v9 = vmax.f32 %v9826_v5, %v10088_v26  ;;  %v2785_v37 = vmul.f32 %v2509_v18, %v9120_v57 }
 0x33d   : > { %v2934_v62 = vmax.f32 %v2926_v27, 0.0  ;;  %v2849_v26 = vmul.f32 %v2836_v1, %v9201_v32  ;;  %v11828_v1 = vld [vmem:[#allocation88_spill] sm:$0xff] }
 0x33e   : > { %v2925_v14 = vadd.f32 %v9795_v50, %v2910_v39  ;;  %v2529_v34 = vadd.f32 %v2521_v17, %v2481_v23  ;;  %v2793_v42 = vadd.f32 %v2785_v37, %v2777_v51  ;;  %v2969_v39 = vld [vmem:[#allocation2] sm:$0xff] }
 0x33f   : > { %2965 = vst.msk [vmem:[#allocation2 + $0x51] sm:$0xff] %vm2938_vm0, %v2934_v62  ;;  %v10284_v29 = vpop.permute.xlu0 %1574  ;;  %v11829_v17 = vld [vmem:[#allocation89_spill] sm:$0xff] }
 0x340   : > { %v2933_v60 = vmax.f32 %v2925_v14, 0.0  ;;  %v2537_v47 = vmax.f32 %v11827_v9, %v2529_v34  ;;  %v2831_v3 = vpop.permute.xlu1 %2830  ;;  %v2857_v30 = vadd.f32 %v2849_v26, %v2793_v42  ;;  %v6023_v14 = vld [vmem:[%s11279_s3 + $0x58] sm:$0xff] }
 0x341   : > { %v2848_v28 = vmul.f32 %v2831_v3, %v9201_v32  ;;  %v7051_v9 = vpack.c.bf16 %v6023_v14, %v6022_v56  ;;  %v6034_v56 = vld [vmem:[%s11279_s3 + $0x70] sm:$0xff]  ;;  %v6035_v14 = vld [vmem:[%s11279_s3 + $0x78] sm:$0xff] }
 0x342   : > { %2964 = vst.msk [vmem:[#allocation2 + $0x41] sm:$0xff] %vm2938_vm0, %v2933_v60  ;;  %v10309_v60 = vld [vmem:[#allocation2 + $0x10] sm:$0xff] }
 0x343   : > { %v2856_v35 = vadd.f32 %v2848_v28, %v2792_v22  ;;  %v10294_v23 = vpop.permute.xlu0 %1750  ;;  %v11831_v28 = vld [vmem:[#allocation93_spill] sm:$0xff]  ;;  %v1472_v22 = vmul.f32 %v547_v6, %v11829_v17 }
 0x345   : > { %v2881_v2 = vpop.permute.xlu1 %2880 }
 0x346   : > { %v2896_v5 = vmul.f32 %v2881_v2, %v9436_v15  ;;  %v10277_v11 = vld [vmem:[#allocation2 + $0x51] sm:$0xff] }
 0x347   : > { %v840_v10 = vpop.permute.xlu0 %839  ;;  %v10329_v2 = vld [vmem:[#allocation2 + $0x30] sm:$0xff] }
 0x348   : > { %v2904_v61 = vadd.f32 %v2896_v5, %v2856_v35 }
 0x349   : > { %v2885_v8 = vpop.permute.xlu1 %2884  ;;  %v10271_v54 = vld [vmem:[#allocation2 + $0x41] sm:$0xff] }
 0x34a   : > { %v2912_v55 = vmax.f32 %v10230_v36, %v2904_v61  ;;  %v2897_v20 = vmul.f32 %v2885_v8, %v9436_v15  ;;  %6526 = vmatprep.mubr.msk.f32.mxu0 %vm2938_vm0, %v10271_v54  ;;  %v10337_v61 = vld [vmem:[#allocation2 + $0x40] sm:$0xff] }
 0x34b   : > { %6527 = vmatmul.mubr.msk.f32.gmra.mrb[4].mxu0 %vm2938_vm0, %v10277_v11  ;;  %v10331_v5 = vpop.permute.xlu0 %960 }
 0x34c   : > { %v2927_v4 = vadd.f32 %v9795_v50, %v2912_v55  ;;  %v2905_v58 = vadd.f32 %v2897_v20, %v2857_v30  ;;  %v680_v55 = vmul.f32 %v11749_v53, %v667_v46  ;;  %v11832_v30 = vld [vmem:[#allocation99_spill] sm:$0xff] }
 0x34d   : > { %v478_v13 = vpop.permute.xlu1 %477 }
 0x34e   : > { %v2935_v52 = vmax.f32 %v2927_v4, 0.0  ;;  %v2913_v24 = vmax.f32 %v2537_v47, %v2905_v58  ;;  %v491_v44 = vmul.f32 %v11828_v1, %v478_v13  ;;  %v10345_v4 = vld [vmem:[#allocation2 + $0x50] sm:$0xff] }
 0x350   : > { %2966 = vst.msk [vmem:[#allocation2 + $0x61] sm:$0xff] %vm2938_vm0, %v2935_v52  ;;  %v2928_v36 = vadd.f32 %v9795_v50, %v2913_v24  ;;  %v439_v50 = vmul.f32 %v11829_v17, %v426_v16  ;;  %v6032_v16 = vld [vmem:[%s11279_s3 + $0x60] sm:$0xff]  ;;  %v2024_v52 = vmul.f32 %v840_v10, %v11828_v1 }
 0x351   : > { %v599_v41 = vpop.permute.xlu1 %598  ;;  %v7055_v42 = vpack.c.bf16 %v6033_v38, %v6032_v16 }
 0x352   : > { %v2936_v19 = vmax.f32 %v2928_v36, 0.0  ;;  %v499_v34 = vadd.f32 %v491_v44, %v439_v50  ;;  %v1488_v47 = vmul.f32 %v599_v41, %v11828_v1  ;;  %v612_v51 = vmul.f32 %v11831_v28, %v599_v41  ;;  %v3252_v44 = vld [vmem:[#allocation2 + $0x2] sm:$0xff] }
 0x354   : > { %2967 = vst.msk [vmem:[#allocation2 + $0x71] sm:$0xff] %vm2938_vm0, %v2936_v19  ;;  %v568_v37 = vadd.f32 %v560_v63, %v499_v34  ;;  %v1496_v35 = vadd.f32 %v1488_v47, %v1472_v22  ;;  %v1584_v34 = vmul.f32 %v10284_v29, %v11749_v53  ;;  %v2562_v63 = vmul.f32 %v10331_v5, %v11828_v1 }
 0x355   : > { %v853_v47 = vmul.f32 %v8527_v48, %v840_v10  ;;  %v7059_v22 = vpack.c.bf16 %v6035_v14, %v6034_v56  ;;  %v2056_v10 = vmul.f32 %v10331_v5, %v11831_v28 }
 0x356   : > { %v10287_v27 = vpop.permute.xlu1 %787  ;;  %v620_v8 = vadd.f32 %v612_v51, %v568_v37 }
 0x357   : > { %v10289_v18 = vld [vmem:[#allocation2 + $0x61] sm:$0xff]  ;;  %v2008_v24 = vmul.f32 %v10287_v27, %v11829_v17  ;;  %v801_v16 = vmul.f32 %v8537_v25, %v10287_v27  ;;  %v10389_v27 = vld [vmem:[#allocation2 + $0x12] sm:$0xff] }
 0x358   : > { %6529 = vmatprep.mubr.msk.f32.mxu0 %vm2938_vm0, %v10289_v18  ;;  %v10349_v13 = vld [vmem:[#allocation2 + $0x60] sm:$0xff]  ;;  %v688_v36 = vadd.f32 %v680_v55, %v620_v8 }
 0x359   : > { %v2032_v38 = vadd.f32 %v2024_v52, %v2008_v24  ;;  %v10405_v24 = vld [vmem:[#allocation2 + $0x22] sm:$0xff] }
 0x35b   : > { %v719_v62 = vpop.permute.xlu1 %718  ;;  %v10297_v7 = vld [vmem:[#allocation2 + $0x71] sm:$0xff] }
 0x35c   : > { %6530 = vmatmul.mubr.msk.f32.gmra.mrb[6].mxu0 %vm2938_vm0, %v10297_v7  ;;  %v1520_v6 = vmul.f32 %v719_v62, %v11831_v28  ;;  %v732_v20 = vmul.f32 %v11832_v30, %v719_v62  ;;  %v10362_v62 = vld [vmem:[#allocation2 + $0x70] sm:$0xff] }
 0x35d   : > { %6540 = vmatprep.mubr.msk.f32.mxu0 %vm2938_vm0, %v2969_v39 }
 0x35e   : > { %v740_v39 = vadd.f32 %v732_v20, %v688_v36 }
 0x360   : > { %v10312_v3 = vpop.permute.xlu1 %908  ;;  %6541 = vmatmul.mubr.msk.f32.vlgmr.msra.gmra.mrb[0].mxu0 %vm2938_vm0, %v10309_v60 }
 0x361   : > { %6543 = vmatprep.mubr.msk.f32.mxu0 %vm2938_vm0, %v10316_v49  ;;  %7050 = vmatpush3.bf16.msra.mxu0 %v10010_v59  ;;  %v1504_v59 = vmul.f32 %v667_v46, %v11830_v45  ;;  %v10358_v46 = vpop.permute.xlu0 %1798  ;;  %v2040_v50 = vmul.f32 %v10312_v3, %v11830_v45  ;;  %v1648_v55 = vmul.f32 %v10312_v3, %v8537_v25 }
 0x362   : > { %7052 = vmatprep.subr.bf16.mxu0 %v7051_v9 }
 0x363   : > { %v1512_v58 = vadd.f32 %v1504_v59, %v1496_v35  ;;  %v809_v35 = vadd.f32 %v801_v16, %v740_v39  ;;  %v2048_v8 = vadd.f32 %v2040_v50, %v2032_v38  ;;  %v6044_v59 = vld [vmem:[%s11279_s3 + $0x80] sm:$0xff] }
 0x364   : > { %v10333_v26 = vpop.permute.xlu1 %1028  ;;  %6544 = vmatmul.mubr.msk.f32.gmra.mrb[2].mxu0 %vm2938_vm0, %v10329_v2  ;;  %v10423_v16 = vld [vmem:[#allocation2 + $0x42] sm:$0xff] }
 0x365   : > { %6546 = vmatprep.mubr.msk.f32.mxu0 %vm2938_vm0, %v10337_v61  ;;  %7054 = vmatpush3.bf16.msra.mxu0 %v7051_v9  ;;  %v1528_v19 = vadd.f32 %v1520_v6, %v1512_v58  ;;  %v2546_v9 = vmul.f32 %v10312_v3, %v11829_v17  ;;  %v2578_v29 = vmul.f32 %v10333_v26, %v11830_v45  ;;  %v6045_v45 = vld [vmem:[%s11279_s3 + $0x88] sm:$0xff]  ;;  %v10397_v6 = vpop.permute.xlu0 %1322 }
 0x366   : > { %7056 = vmatprep.subr.bf16.mxu0 %v7055_v42  ;;  %v1664_v17 = vmul.f32 %v10331_v5, %v8527_v48  ;;  %v10411_v39 = vpack.c.bf16 %v6045_v45, %v6044_v59  ;;  %v861_v50 = vadd.f32 %v853_v47, %v809_v35  ;;  %v2072_v56 = vmul.f32 %v10333_v26, %v11749_v53  ;;  %v10440_v35 = vld [vmem:[#allocation2 + $0x52] sm:$0xff] }
 0x367   : > { %v1592_v51 = vadd.f32 %v1584_v34, %v1528_v19  ;;  %v2570_v20 = vadd.f32 %v2562_v63, %v2546_v9  ;;  %v2064_v14 = vadd.f32 %v2056_v10, %v2048_v8  ;;  %v10417_v34 = vld [vmem:[#allocation2 + $0x32] sm:$0xff]  ;;  %v2626_v59 = vmul.f32 %v10358_v46, %v11832_v30 }
 0x368   : > { %6547 = vmatmul.mubr.msk.f32.gmra.mrb[4].mxu0 %vm2938_vm0, %v10345_v4 }
 0x369   : > { %v10354_v41 = vpop.permute.xlu1 %1080  ;;  %6549 = vmatprep.mubr.msk.f32.mxu0 %vm2938_vm0, %v10349_v13  ;;  %v2586_v36 = vadd.f32 %v2578_v29, %v2570_v20  ;;  %v10431_v38 = vpop.permute.xlu0 %1442 }
 0x36a   : > { %v2594_v58 = vmul.f32 %v10354_v41, %v11831_v28  ;;  %v922_v28 = vmul.f32 %v8545_v31, %v10312_v3  ;;  %v2088_v47 = vmul.f32 %v10354_v41, %v11832_v30  ;;  %v2610_v3 = vmul.f32 %v10294_v23, %v11749_v53  ;;  %v11833_v53 = vld [vmem:[#allocation103_spill] sm:$0xff] }
 0x36b   : > { %v1760_v8 = vmul.f32 %v10294_v23, %v11833_v53 }
 0x36c   : > { %6550 = vmatmul.mubr.msk.f32.gmra.mrb[6].mxu0 %vm2938_vm0, %v10362_v62  ;;  %v2602_v63 = vadd.f32 %v2594_v58, %v2586_v36 }
 0x36d   : > { %v1623_v37 = vpop.permute.xlu1 %1622  ;;  %6560 = vmatprep.mubr.msk.f32.mxu0 %vm2938_vm0, %v3252_v44 }
 0x36e   : > { %v1632_v1 = vmul.f32 %v1623_v37, %v11832_v30  ;;  %v1696_v37 = vmul.f32 %v10354_v41, %v8531_v43  ;;  %v2618_v45 = vadd.f32 %v2610_v3, %v2602_v63  ;;  %v1042_v30 = vmul.f32 %v11833_v53, %v10333_v26 }
 0x370   : > { %v1640_v52 = vadd.f32 %v1632_v1, %v1592_v51  ;;  %6561 = vmatmul.mubr.msk.f32.vlgmr.msra.gmra.mrb[0].mxu0 %vm2938_vm0, %v10389_v27  ;;  %v974_v51 = vmul.f32 %v8531_v43, %v10331_v5  ;;  %v930_v1 = vadd.f32 %v922_v28, %v861_v50  ;;  %v10448_v5 = vld [vmem:[#allocation2 + $0x62] sm:$0xff] }
 0x371   : > { %6563 = vmatprep.mubr.msk.f32.mxu0 %vm2938_vm0, %v10405_v24  ;;  %7058 = vmatpush3.bf16.msra.mxu0 %v7055_v42  ;;  %v1680_v42 = vmul.f32 %v10333_v26, %v8545_v31  ;;  %v2634_v26 = vadd.f32 %v2626_v59, %v2618_v45  ;;  %v2152_v59 = vmul.f32 %v10397_v6, %v8531_v43 }
 0x372   : > { %v1656_v19 = vadd.f32 %v1648_v55, %v1640_v52  ;;  %v10409_v44 = vpop.permute.xlu1 %1149  ;;  %7060 = vmatprep.subr.bf16.mxu0 %v7059_v22  ;;  %v11834_v52 = vld [vmem:[#allocation101_spill] sm:$0xff]  ;;  %v982_v50 = vadd.f32 %v974_v51, %v930_v1  ;;  %v2658_v45 = vmul.f32 %v10397_v6, %v8527_v48 }
 0x373   : > { %v2104_v10 = vmul.f32 %v10409_v44, %v8537_v25  ;;  %v1808_v36 = vmul.f32 %v10358_v46, %v11834_v52  ;;  %v10466_v46 = vpop.permute.xlu0 %1974  ;;  %v1094_v63 = vmul.f32 %v11834_v52, %v10354_v41 }
 0x374   : > { %v1672_v9 = vadd.f32 %v1664_v17, %v1656_v19  ;;  %6564 = vmatmul.mubr.msk.f32.gmra.mrb[2].mxu0 %vm2938_vm0, %v10417_v34  ;;  %v2080_v17 = vadd.f32 %v2072_v56, %v2064_v14  ;;  %v7755_v19 = vmov 0.0|0.0   ;;  %v10458_v56 = vld [vmem:[#allocation2 + $0x72] sm:$0xff] }
 0x375   : > { %6566 = vmatprep.mubr.msk.f32.mxu0 %vm2938_vm0, %v10423_v16  ;;  %7062 = vmatpush3.bf16.msra.mxu0 %v7059_v22  ;;  %v6046_v14 = vld [vmem:[%s11279_s3 + $0x90] sm:$0xff] }
 0x376   : > { %v1688_v29 = vadd.f32 %v1680_v42, %v1672_v9  ;;  %7064 = vmatprep.subr.bf16.mxu0 %v10411_v39  ;;  %v2096_v20 = vadd.f32 %v2088_v47, %v2080_v17  ;;  %7139 = vmatprep.subr.bf16.mxu1 %v7755_v19  ;;  %v6047_v42 = vld [vmem:[%s11279_s3 + $0x98] sm:$0xff]  ;;  %v1050_v17 = vadd.f32 %v1042_v30, %v982_v50 }
 0x377   : > { %v1202_v22 = vpop.permute.xlu1 %1201  ;;  %v7067_v1 = vpack.c.bf16 %v6047_v42, %v6046_v14 }
 0x378   : > { %v1704_v55 = vadd.f32 %v1696_v37, %v1688_v29  ;;  %6567 = vmatmul.mubr.msk.f32.gmra.mrb[4].mxu0 %vm2938_vm0, %v10440_v35  ;;  %v2120_v58 = vmul.f32 %v1202_v22, %v8527_v48  ;;  %v2112_v28 = vadd.f32 %v2104_v10, %v2096_v20 }
 0x379   : > { %6569 = vmatprep.mubr.msk.f32.mxu0 %vm2938_vm0, %v10448_v5 }
 0x37a   : > { %v1768_v23 = vadd.f32 %v1760_v8, %v1704_v55  ;;  %v2128_v3 = vadd.f32 %v2120_v58, %v2112_v28  ;;  %v1163_v55 = vmul.f32 %v8716_v12, %v10409_v44  ;;  %v1840_v58 = vmul.f32 %v10397_v6, %v11586_v21  ;;  %v2288_v44 = vpop.permute.xlu0 %2287 }
 0x37c   : > { %v1271_v9 = vpop.permute.xlu1 %1270  ;;  %v1816_v47 = vadd.f32 %v1808_v36, %v1768_v23  ;;  %6570 = vmatmul.mubr.msk.f32.gmra.mrb[6].mxu0 %vm2938_vm0, %v10458_v56  ;;  %v1102_v36 = vadd.f32 %v1094_v63, %v1050_v17  ;;  %v1215_v23 = vmul.f32 %v11586_v21, %v1202_v22  ;;  %v2690_v63 = vmul.f32 %v10431_v38, %v8531_v43 }
 0x37d   : > { %v1824_v37 = vmul.f32 %v1271_v9, %v8716_v12  ;;  %v2136_v29 = vmul.f32 %v1271_v9, %v8545_v31  ;;  %v2642_v51 = vmul.f32 %v1271_v9, %v8537_v25  ;;  %6580 = vmatprep.mubr.msk.f32.mxu0 %vm2938_vm0, %v10309_v60  ;;  %v6056_v25 = vld [vmem:[%s11279_s3 + $0xa0] sm:$0xff]  ;;  %v6057_v60 = vld [vmem:[%s11279_s3 + $0xa8] sm:$0xff]  ;;  %v2184_v43 = vmul.f32 %v10431_v38, %v11834_v52 }
 0x37f   : > { %v1832_v10 = vadd.f32 %v1824_v37, %v1816_v47  ;;  %v2144_v41 = vadd.f32 %v2136_v29, %v2128_v3  ;;  %v2650_v8 = vadd.f32 %v2642_v51, %v2634_v26  ;;  %v10500_v47 = vpack.c.bf16 %v6057_v60, %v6056_v25 }
 0x380   : > { %v1391_v20 = vpop.permute.xlu1 %1390  ;;  %6581 = vmatmul.mubr.msk.f32.vlgmr.msra.gmra.mrb[0].mxu0 %vm2938_vm0, %v10316_v49  ;;  %v1171_v26 = vadd.f32 %v1163_v55, %v1102_v36  ;;  %v1284_v3 = vmul.f32 %v8756_v0, %v1271_v9  ;;  %v2401_v9 = vpop.permute.xlu0 %2400  ;;  %v2722_v55 = vmul.f32 %v10466_v46, %v11834_v52  ;;  %v2297_v25 = vmul.f32 %v2288_v44, %v11586_v21 }
 0x381   : > { %v2168_v48 = vmul.f32 %v1391_v20, %v11833_v53  ;;  %6583 = vmatprep.mubr.msk.f32.mxu0 %vm2938_vm0, %v10329_v2  ;;  %v2674_v30 = vmul.f32 %v1391_v20, %v8545_v31  ;;  %v2666_v50 = vadd.f32 %v2658_v45, %v2650_v8  ;;  %v2160_v28 = vadd.f32 %v2152_v59, %v2144_v41 }
 0x382   : > { %7066 = vmatpush3.bf16.msra.mxu0 %v10411_v39  ;;  %v1856_v14 = vmul.f32 %v1391_v20, %v8756_v0  ;;  %v1848_v42 = vadd.f32 %v1840_v58, %v1832_v10  ;;  %v1223_v29 = vadd.f32 %v1215_v23, %v1171_v26  ;;  %v1404_v23 = vmul.f32 %v9201_v32, %v1391_v20 }
 0x383   : > { %7068 = vmatprep.subr.bf16.mxu0 %v7067_v1  ;;  %v2682_v22 = vadd.f32 %v2674_v30, %v2666_v50  ;;  %v2176_v39 = vadd.f32 %v2168_v48, %v2160_v28  ;;  %v2754_v52 = vmul.f32 %v2401_v9, %v11586_v21 }
 0x384   : > { %v1927_v37 = vpop.permute.xlu1 %1926  ;;  %6584 = vmatmul.mubr.msk.f32.gmra.mrb[2].mxu0 %vm2938_vm0, %v10337_v61  ;;  %v1864_v17 = vadd.f32 %v1856_v14, %v1848_v42  ;;  %v1292_v10 = vadd.f32 %v1284_v3, %v1223_v29 }
 0x385   : > { %v2706_v31 = vmul.f32 %v1927_v37, %v11833_v53  ;;  %6586 = vmatprep.mubr.msk.f32.mxu0 %vm2938_vm0, %v10345_v4  ;;  %v2698_v51 = vadd.f32 %v2690_v63, %v2682_v22  ;;  %v1872_v53 = vmul.f32 %v10431_v38, %v9120_v57  ;;  %v2192_v59 = vadd.f32 %v2184_v43, %v2176_v39  ;;  %v2513_v63 = vpop.permute.xlu0 %2512 }
 0x386   : > { %7070 = vmatpush3.bf16.msra.mxu0 %v7067_v1  ;;  %v1336_v1 = vmul.f32 %v9120_v57, %v10397_v6  ;;  %v1936_v58 = vmul.f32 %v1927_v37, %v9201_v32  ;;  %v2410_v6 = vmul.f32 %v2401_v9, %v9120_v57  ;;  %v1984_v37 = vmul.f32 %v10466_v46, %v9436_v15 }
 0x387   : > { %7072 = vmatprep.subr.bf16.mxu0 %v10500_v47  ;;  %v2714_v8 = vadd.f32 %v2706_v31, %v2698_v51  ;;  %v1880_v60 = vadd.f32 %v1872_v53, %v1864_v17  ;;  %v2522_v43 = vmul.f32 %v2513_v63, %v9436_v15  ;;  %v2786_v21 = vmul.f32 %v2513_v63, %v9120_v57  ;;  %v7589_v57 = vld [vmem:[%s11278_s2] ss:$0 sm:$0xff] }
 0x388   : > { %v2240_v41 = vpop.permute.xlu1 %2239  ;;  %6587 = vmatmul.mubr.msk.f32.gmra.mrb[4].mxu0 %vm2938_vm0, %v10349_v13  ;;  %v1344_v48 = vadd.f32 %v1336_v1, %v1292_v10 }
 0x389   : > { %v2249_v45 = vmul.f32 %v2240_v41, %v8716_v12  ;;  %6589 = vmatprep.mubr.msk.f32.mxu0 %vm2938_vm0, %v10362_v62  ;;  %v2730_v14 = vadd.f32 %v2722_v55, %v2714_v8  ;;  %v1944_v44 = vadd.f32 %v1936_v58, %v1880_v60  ;;  %v2889_v41 = vpop.permute.xlu0 %2888 }
 0x38a   : > { %v1412_v22 = vadd.f32 %v1404_v23, %v1344_v48  ;;  %v2898_v1 = vmul.f32 %v2889_v41, %v9436_v15  ;;  %v7590_v23 = vld [vmem:[#allocation2 + $0x11] sm:$0xff]  ;;  %v6128_v41 = vld [vmem:[%s11281_s5 + $0x328] sm:$0xff] }
 0x38b   : > { %v2257_v36 = vadd.f32 %v2249_v45, %v2192_v59  ;;  %v1992_v17 = vadd.f32 %v1984_v37, %v1944_v44  ;;  %v6081_v44 = vld [vmem:[%s11279_s3 + $0xe8] sm:$0xff]  ;;  %v6083_v37 = vld [vmem:[%s11279_s3 + $0xf8] sm:$0xff] }
 0x38c   : > { %v2353_v30 = vpop.permute.xlu1 %2352 }
 0x38d   : > { %v2305_v50 = vadd.f32 %v2297_v25, %v2257_v36  ;;  %v2362_v28 = vmul.f32 %v2353_v30, %v8756_v0  ;;  %v2738_v42 = vmul.f32 %v2353_v30, %v8716_v12  ;;  %v1456_v12 = vmul.f32 %v9436_v15, %v10431_v38  ;;  %v6059_v15 = vld [vmem:[%s11279_s3 + $0xb8] sm:$0xff] }
 0x38f   : > { %v2370_v26 = vadd.f32 %v2362_v28, %v2305_v50  ;;  %v2746_v3 = vadd.f32 %v2738_v42, %v2730_v14  ;;  %v1464_v53 = vadd.f32 %v1456_v12, %v1412_v22  ;;  %v6068_v50 = vld [vmem:[%s11279_s3 + $0xc0] sm:$0xff]  ;;  %v6069_v28 = vld [vmem:[%s11279_s3 + $0xc8] sm:$0xff]  ;;  %v6070_v42 = vld [vmem:[%s11279_s3 + $0xd0] sm:$0xff] }
 0x390   : > { %v2465_v20 = vpop.permute.xlu1 %2464  ;;  %v7079_v14 = vpack.c.bf16 %v6069_v28, %v6068_v50 }
 0x391   : > { %v2418_v31 = vadd.f32 %v2410_v6, %v2370_v26  ;;  %v2474_v39 = vmul.f32 %v2465_v20, %v9201_v32  ;;  %v2762_v29 = vadd.f32 %v2754_v52, %v2746_v3  ;;  %v2770_v51 = vmul.f32 %v2465_v20, %v8756_v0  ;;  %v6071_v6 = vld [vmem:[%s11279_s3 + $0xd8] sm:$0xff]  ;;  %v6080_v52 = vld [vmem:[%s11279_s3 + $0xe0] sm:$0xff]  ;;  %v6082_v3 = vld [vmem:[%s11279_s3 + $0xf0] sm:$0xff] }
 0x392   : > { %v2000_v0 = vmax.f32 %v1464_v53, %v1992_v17  ;;  %v7083_v63 = vpack.c.bf16 %v6071_v6, %v6070_v42  ;;  %v7087_v26 = vpack.c.bf16 %v6081_v44, %v6080_v52  ;;  %v7091_v22 = vpack.c.bf16 %v6083_v37, %v6082_v3  ;;  %v6092_v20 = vld [vmem:[%s11279_s3 + $0x100] sm:$0xff]  ;;  %v6129_v53 = vld [vmem:[%s11281_s5 + $0x330] sm:$0xff] }
 0x393   : > { %v2482_v9 = vadd.f32 %v2474_v39, %v2418_v31  ;;  %v2778_v10 = vadd.f32 %v2770_v51, %v2762_v29  ;;  %v6093_v31 = vld [vmem:[%s11279_s3 + $0x108] sm:$0xff]  ;;  %v11835_v17 = vmov 0.0   ;;  %v6107_v44 = vld [vmem:[%s11281_s5 + $0x110] sm:$0xff] }
 0x394   : > { %v2841_v46 = vpop.permute.xlu1 %2840  ;;  %v7095_v39 = vpack.c.bf16 %v6093_v31, %v6092_v20  ;;  %v6124_v51 = vld [vmem:[%s11281_s5 + $0x308] sm:$0xff]  ;;  %6765 = vmatprep.mubr.msk.f32.mxu1 %vm7756_vm2, %v11835_v17 }
 0x395   : > { %v2530_v8 = vadd.f32 %v2522_v43, %v2482_v9  ;;  %v2794_v59 = vadd.f32 %v2786_v21, %v2778_v10  ;;  %v2850_v45 = vmul.f32 %v2841_v46, %v9201_v32  ;;  %v6058_v32 = vld [vmem:[%s11279_s3 + $0xb0] sm:$0xff]  ;;  %v6126_v21 = vld [vmem:[%s11281_s5 + $0x318] sm:$0xff]  ;;  %v6127_v10 = vld [vmem:[%s11281_s5 + $0x320] sm:$0xff] }
 0x396   : > { %v7075_v30 = vpack.c.bf16 %v6059_v15, %v6058_v32  ;;  %v6125_v43 = vld [vmem:[%s11281_s5 + $0x310] sm:$0xff]  ;;  %v7146_v46 = vpack.c.bf16 %v6128_v41, %v6127_v10  ;;  %v6105_v15 = vld [vmem:[%s11281_s5 + $0x100] sm:$0xff]  ;;  %v6117_v41 = vld [vmem:[%s11281_s5 + $0x218] sm:$0xff] }
 0x397   : > { %v2858_v55 = vadd.f32 %v2850_v45, %v2794_v59  ;;  %v2538_v25 = vmax.f32 %v2000_v0, %v2530_v8  ;;  %v7143_v9 = vpack.c.bf16 %v6126_v21, %v6125_v43  ;;  %v6130_v8 = vld [vmem:[%s11281_s5 + $0x338] sm:$0xff]  ;;  %v6116_v43 = vld [vmem:[%s11281_s5 + $0x210] sm:$0xff]  ;;  %v11836_v21 = vld [vmem:[#allocation85_spill] sm:$0xff] }
 0x398   : > { %v7149_v59 = vpack.c.bf16 %v6130_v8, %v6129_v53  ;;  %v6137_v53 = vld [vmem:[%s11281_s5 + $0x68] sm:$0xff]  ;;  %v7131_v8 = vpack.c.bf16 %v6117_v41, %v6116_v43  ;;  %v6163_v43 = vld [vmem:[%s11281_s5 + $0x360] sm:$0xff] }
 0x399   : > { %v2906_v38 = vadd.f32 %v2898_v1, %v2858_v55 }
 0x39b   : > { %v2914_v60 = vmax.f32 %v2538_v25, %v2906_v38 }
 0x39d   : > { %v2929_v58 = vadd.f32 %v7589_v57, %v2914_v60 }
 0x39f   : > { %v2937_v36 = vmax.f32 %v2929_v58, 0.0 }
 0x3a1   : > { %2968 = vst.msk [vmem:[#allocation2 + $0x81] sm:$0xff] %vm2938_vm0, %v2937_v36 }
 0x3a8   : > { %v3409_v48 = vld [vmem:[#allocation2 + $0x80] sm:$0xff] }
 0x3a9   : > { %6590 = vmatmul.mubr.msk.f32.gmra.mrb[6].mxu0 %vm2938_vm0, %v3409_v48 }
 0x3aa   : > { %6600 = vmatprep.mubr.msk.f32.mxu0 %vm2938_vm0, %v7590_v23  ;;  %v6106_v23 = vld [vmem:[%s11281_s5 + $0x108] sm:$0xff] }
 0x3ab   : > { %v7116_v6 = vpack.c.bf16 %v6106_v23, %v6105_v15  ;;  %v6141_v15 = vld [vmem:[%s11281_s5 + $0x140] sm:$0xff]  ;;  %v6142_v23 = vld [vmem:[%s11281_s5 + $0x148] sm:$0xff] }
 0x3ad   : > { %6601 = vmatmul.mubr.msk.f32.vlgmr.msra.gmra.mrb[0].mxu0 %vm2938_vm0, %v10189_v40 }
 0x3ae   : > { %7074 = vmatpush3.bf16.msra.mxu0 %v10500_v47  ;;  %6603 = vmatprep.mubr.msk.f32.mxu0 %vm2938_vm0, %v10195_v33  ;;  %v3559_v47 = vld [vmem:[#allocation2 + $0x81] sm:$0xff] }
 0x3af   : > { %7076 = vmatprep.subr.bf16.mxu0 %v7075_v30 }
 0x3b1   : > { %6604 = vmatmul.mubr.msk.f32.gmra.mrb[2].mxu0 %vm2938_vm0, %v10271_v54 }
 0x3b2   : > { %6606 = vmatprep.mubr.msk.f32.mxu0 %vm2938_vm0, %v10277_v11  ;;  %7078 = vmatpush3.bf16.msra.mxu0 %v7075_v30  ;;  %v10736_v30 = vld [vmem:[%s11280_s4] sm:$0x1] }
 0x3b3   : > { %7080 = vmatprep.subr.bf16.mxu0 %v7079_v14 }
 0x3b5   : > { %6607 = vmatmul.mubr.msk.f32.gmra.mrb[4].mxu0 %vm2938_vm0, %v10289_v18 }
 0x3b6   : > { %6609 = vmatprep.mubr.msk.f32.mxu0 %vm2938_vm0, %v10297_v7 }
 0x3b9   : > { %6610 = vmatmul.mubr.msk.f32.gmra.mrb[6].mxu0 %vm2938_vm0, %v3559_v47 }
 0x3ba   : > { %6620 = vmatprep.mubr.msk.f32.mxu0 %vm2938_vm0, %v10389_v27  ;;  %v3709_v27 = vld [vmem:[#allocation2 + $0x82] sm:$0xff] }
 0x3bd   : > { %6621 = vmatmul.mubr.msk.f32.vlgmr.msra.gmra.mrb[0].mxu0 %vm2938_vm0, %v10405_v24 }
 0x3be   : > { %7082 = vmatpush3.bf16.msra.mxu0 %v7079_v14  ;;  %6623 = vmatprep.mubr.msk.f32.mxu0 %vm2938_vm0, %v10417_v34 }
 0x3bf   : > { %7084 = vmatprep.subr.bf16.mxu0 %v7083_v63 }
 0x3c1   : > { %6624 = vmatmul.mubr.msk.f32.gmra.mrb[2].mxu0 %vm2938_vm0, %v10423_v16 }
 0x3c2   : > { %6626 = vmatprep.mubr.msk.f32.mxu0 %vm2938_vm0, %v10440_v35  ;;  %7086 = vmatpush3.bf16.msra.mxu0 %v7083_v63 }
 0x3c3   : > { %7088 = vmatprep.subr.bf16.mxu0 %v7087_v26 }
 0x3c5   : > { %6627 = vmatmul.mubr.msk.f32.gmra.mrb[4].mxu0 %vm2938_vm0, %v10448_v5 }
 0x3c6   : > { %6629 = vmatprep.mubr.msk.f32.mxu0 %vm2938_vm0, %v10458_v56 }
 0x3c9   : > { %6630 = vmatmul.mubr.msk.f32.gmra.mrb[6].mxu0 %vm2938_vm0, %v3709_v27 }
 0x3ca   : > { %6640 = vmatprep.mubr.msk.f32.mxu0 %vm2938_vm0, %v10316_v49  ;;  %v3860_v49 = vld [vmem:[#allocation2 + $0x90] sm:$0xff] }
 0x3cd   : > { %6641 = vmatmul.mubr.msk.f32.vlgmr.msra.gmra.mrb[0].mxu0 %vm2938_vm0, %v10329_v2  ;;  %v6094_v2 = vld [vmem:[%s11279_s3 + $0x110] sm:$0xff] }
 0x3ce   : > { %7090 = vmatpush3.bf16.msra.mxu0 %v7087_v26  ;;  %6643 = vmatprep.mubr.msk.f32.mxu0 %vm2938_vm0, %v10337_v61  ;;  %v6095_v61 = vld [vmem:[%s11279_s3 + $0x118] sm:$0xff] }
 0x3cf   : > { %7092 = vmatprep.subr.bf16.mxu0 %v7091_v22  ;;  %v6108_v26 = vld [vmem:[%s11281_s5 + $0x118] sm:$0xff] }
 0x3d0   : > { %v7119_v20 = vpack.c.bf16 %v6108_v26, %v6107_v44  ;;  %v6146_v44 = vld [vmem:[%s11281_s5 + $0x168] sm:$0xff] }
 0x3d1   : > { %6644 = vmatmul.mubr.msk.f32.gmra.mrb[2].mxu0 %vm2938_vm0, %v10345_v4  ;;  %v7099_v4 = vpack.c.bf16 %v6095_v61, %v6094_v2  ;;  %v6110_v2 = vld [vmem:[%s11281_s5 + $0x128] sm:$0xff] }
 0x3d2   : > { %6646 = vmatprep.mubr.msk.f32.mxu0 %vm2938_vm0, %v10349_v13  ;;  %7094 = vmatpush3.bf16.msra.mxu0 %v7091_v22  ;;  %v4345_v13 = vld [vmem:[%s11281_s5 + $0x18] sm:$0xff] }
 0x3d3   : > { %7096 = vmatprep.subr.bf16.mxu0 %v7095_v39 }
 0x3d5   : > { %6647 = vmatmul.mubr.msk.f32.gmra.mrb[4].mxu0 %vm2938_vm0, %v10362_v62 }
 0x3d6   : > { %6649 = vmatprep.mubr.msk.f32.mxu0 %vm2938_vm0, %v3409_v48 }
 0x3d9   : > { %6650 = vmatmul.mubr.msk.f32.gmra.mrb[6].mxu0 %vm2938_vm0, %v3860_v49  ;;  %v6109_v49 = vld [vmem:[%s11281_s5 + $0x120] sm:$0xff] }
 0x3da   : > { %6660 = vmatprep.mubr.msk.f32.mxu0 %vm2938_vm0, %v10189_v40  ;;  %v4010_v40 = vld [vmem:[#allocation2 + $0x91] sm:$0xff] }
 0x3dd   : > { %6661 = vmatmul.mubr.msk.f32.vlgmr.msra.gmra.mrb[0].mxu0 %vm2938_vm0, %v10195_v33  ;;  %v4342_v33 = vld [vmem:[%s11281_s5] sm:$0xff] }
 0x3de   : > { %7098 = vmatpush3.bf16.msra.mxu0 %v7095_v39  ;;  %6663 = vmatprep.mubr.msk.f32.mxu0 %vm2938_vm0, %v10271_v54  ;;  %v4343_v54 = vld [vmem:[%s11281_s5 + $0x8] sm:$0xff] }
 0x3df   : > { %7100 = vmatprep.subr.bf16.mxu0 %v7099_v4 }
 0x3e1   : > { %6664 = vmatmul.mubr.msk.f32.gmra.mrb[2].mxu0 %vm2938_vm0, %v10277_v11  ;;  %v7104_v11 = vpack.c.bf16 %v4343_v54, %v4342_v33 }
 0x3e2   : > { %6666 = vmatprep.mubr.msk.f32.mxu0 %vm2938_vm0, %v10289_v18  ;;  %7102 = vmatpush3.bf16.msra.mxu0 %v7099_v4  ;;  %v4160_v18 = vld [vmem:[#allocation2 + $0x92] sm:$0xff]  ;;  %v7122_v4 = vpack.c.bf16 %v6110_v2, %v6109_v49 }
 0x3e3   : > { %7103 = vmatprep.subr.bf16.mxu0 %v7755_v19 }
 0x3e5   : > { %6667 = vmatmul.mubr.msk.f32.gmra.mrb[4].mxu0 %vm2938_vm0, %v10297_v7  ;;  %v4344_v7 = vld [vmem:[%s11281_s5 + $0x10] sm:$0xff] }
 0x3e6   : > { %6669 = vmatprep.mubr.msk.f32.mxu0 %vm2938_vm0, %v3559_v47  ;;  %v7107_v62 = vpack.c.bf16 %v4345_v13, %v4344_v7  ;;  %v6133_v7 = vld [vmem:[%s11281_s5 + $0x48] sm:$0xff] }
 0x3e9   : > { %6670 = vmatmul.mubr.msk.f32.gmra.mrb[6].mxu0 %vm2938_vm0, %v4010_v40  ;;  %v6111_v40 = vld [vmem:[%s11281_s5 + $0x130] sm:$0xff] }
 0x3ea   : > { %6680 = vmatprep.mubr.msk.f32.mxu0 %vm2938_vm0, %v10405_v24  ;;  %v4346_v24 = vld [vmem:[%s11281_s5 + $0x20] sm:$0xff] }
 0x3ed   : > { %6681 = vmatmul.mubr.msk.f32.vlgmr.msra.gmra.mrb[0].mxu0 %vm2938_vm0, %v10417_v34  ;;  %v4347_v34 = vld [vmem:[%s11281_s5 + $0x28] sm:$0xff] }
 0x3ee   : > { %6683 = vmatprep.mubr.msk.f32.mxu0 %vm2938_vm0, %v10423_v16  ;;  %7105 = vmatpush3.bf16.msra.mxu0 %v7104_v11  ;;  %v7110_v16 = vpack.c.bf16 %v4347_v34, %v4346_v24  ;;  %v6112_v11 = vld [vmem:[%s11281_s5 + $0x138] sm:$0xff]  ;;  %v6114_v34 = vld [vmem:[%s11281_s5 + $0x200] sm:$0xff] }
 0x3ef   : > { %7106 = vmatprep.subr.bf16.mxu0 %v7755_v19 }
 0x3f1   : > { %6684 = vmatmul.mubr.msk.f32.gmra.mrb[2].mxu0 %vm2938_vm0, %v10440_v35  ;;  %v4348_v35 = vld [vmem:[%s11281_s5 + $0x30] sm:$0xff] }
 0x3f2   : > { %6686 = vmatprep.mubr.msk.f32.mxu0 %vm2938_vm0, %v10448_v5  ;;  %7108 = vmatpush3.bf16.msra.mxu0 %v7107_v62  ;;  %v4349_v5 = vld [vmem:[%s11281_s5 + $0x38] sm:$0xff]  ;;  %v7125_v62 = vpack.c.bf16 %v6112_v11, %v6111_v40  ;;  %v6155_v11 = vld [vmem:[%s11281_s5 + $0x268] sm:$0xff] }
 0x3f3   : > { %7109 = vmatprep.subr.bf16.mxu0 %v7755_v19  ;;  %v7113_v29 = vpack.c.bf16 %v4349_v5, %v4348_v35  ;;  %v6115_v5 = vld [vmem:[%s11281_s5 + $0x208] sm:$0xff] }
 0x3f5   : > { %6687 = vmatmul.mubr.msk.f32.gmra.mrb[4].mxu0 %vm2938_vm0, %v10458_v56  ;;  %v6123_v56 = vld [vmem:[%s11281_s5 + $0x300] sm:$0xff] }
 0x3f6   : > { %6689 = vmatprep.mubr.msk.f32.mxu0 %vm2938_vm0, %v3709_v27  ;;  %7111 = vmatpush3.bf16.msra.mxu0 %v7110_v16  ;;  %v7140_v12 = vpack.c.bf16 %v6124_v51, %v6123_v56  ;;  %v6134_v56 = vld [vmem:[%s11281_s5 + $0x50] sm:$0xff]  ;;  %v7128_v51 = vpack.c.bf16 %v6115_v5, %v6114_v34 }
 0x3f7   : > { %7112 = vmatprep.subr.bf16.mxu0 %v7755_v19 }
 0x3f8   : > { %7141 = vmatpush3.bf16.msra.mxu1 %v7140_v12 }
 0x3f9   : > { %6690 = vmatmul.mubr.msk.f32.gmra.mrb[6].mxu0 %vm2938_vm0, %v4160_v18  ;;  %7142 = vmatprep.subr.bf16.mxu1 %v7755_v19  ;;  %v6132_v18 = vld [vmem:[%s11281_s5 + $0x40] sm:$0xff] }
 0x3fa   : > { %7114 = vmatpush3.bf16.msra.mxu0 %v7113_v29  ;;  %6708 = vmatprep.mubr.msk.f32.mxu0 %vm7756_vm2, %v11835_v17  ;;  %v7152_v24 = vpack.c.bf16 %v6133_v7, %v6132_v18  ;;  %v6135_v29 = vld [vmem:[%s11281_s5 + $0x58] sm:$0xff] }
 0x3fb   : > { %7115 = vmatprep.subr.bf16.mxu0 %v7755_v19  ;;  %v7155_v12 = vpack.c.bf16 %v6135_v29, %v6134_v56  ;;  %v6161_v29 = vld [vmem:[%s11281_s5 + $0x350] sm:$0xff] }
 0x3fc   : > { %7144 = vmatpush3.bf16.msra.mxu1 %v7143_v9  ;;  %v10802_v9 = vrot.slane %v10736_v30, %v11836_v21  ;;  %v6164_v21 = vld [vmem:[%s11281_s5 + $0x368] sm:$0xff] }
 0x3fd   : > { %7145 = vmatprep.subr.bf16.mxu1 %v7755_v19 }
 0x400   : > { %7147 = vmatpush3.bf16.msra.mxu1 %v7146_v46  ;;  %v6136_v46 = vld [vmem:[%s11281_s5 + $0x60] sm:$0xff] }
 0x401   : > { %7148 = vmatprep.subr.bf16.mxu1 %v7755_v19 }
 0x404   : > { %7150 = vmatpush3.bf16.msra.mxu1 %v7149_v59  ;;  %v7158_v59 = vpack.c.bf16 %v6137_v53, %v6136_v46  ;;  %v6165_v46 = vld [vmem:[%s11281_s5 + $0x370] sm:$0xff]  ;;  %v6166_v53 = vld [vmem:[%s11281_s5 + $0x378] sm:$0xff] }
 0x405   : > { %7151 = vmatprep.subr.bf16.mxu1 %v7755_v19 }
 0x4c0   : > { %v6682_v45 = vpop.f32.mrb[0].mxu0 }
 0x4c1   : > { %v4305_v1 = vsel %vm4303_vm3, %v6682_v45, -inf  ;;  %v4256_v0 = vpop.f32.mrb[1].mxu0  ;;  %v6118_v45 = vld [vmem:[%s11281_s5 + $0x220] sm:$0xff] }
 0x4c2   : > { %v4304_v55 = vsel %vm4303_vm3, %v4256_v0, -inf }
 0x4c3   : > { %v4306_v25 = vmax.f32 %v4304_v55, %v4305_v1  ;;  %v6119_v55 = vld [vmem:[%s11281_s5 + $0x228] sm:$0xff] }
 0x4c4   : > { %v6685_v38 = vpop.f32.mrb[2].mxu0 }
 0x4c5   : > { %v4322_v60 = vrot.slane %v4306_v25, 1  ;;  %v4308_v57 = vsel %vm4303_vm3, %v6685_v38, -inf  ;;  %v4266_v58 = vpop.f32.mrb[3].mxu0  ;;  %v6139_v38 = vld [vmem:[%s11281_s5 + $0x78] sm:$0xff] }
 0x4c6   : > { %v4307_v36 = vsel %vm4303_vm3, %v4266_v58, -inf  ;;  %v6120_v58 = vld [vmem:[%s11281_s5 + $0x230] sm:$0xff] }
 0x4c7   : > { %v10725_v48 = vmax.f32 %v4306_v25, %v4322_v60  ;;  %v4309_v32 = vmax.f32 %v4307_v36, %v4308_v57  ;;  %v6138_v25 = vld [vmem:[%s11281_s5 + $0x70] sm:$0xff]  ;;  %v7134_v60 = vpack.c.bf16 %v6119_v55, %v6118_v45  ;;  %v6171_v55 = vld [vmem:[%s11281_s5 + $0x98] sm:$0xff] }
 0x4c8   : > { %v6688_v50 = vpop.f32.mrb[4].mxu0  ;;  %v7161_v57 = vpack.c.bf16 %v6139_v38, %v6138_v25  ;;  %v6172_v38 = vld [vmem:[%s11281_s5 + $0xa0] sm:$0xff] }
 0x4c9   : > { %v4334_v28 = vadd.f32 %v10725_v48, %v10736_v30  ;;  %v4311_v14 = vsel %vm4303_vm3, %v6688_v50, -inf  ;;  %v4276_v47 = vpop.f32.mrb[5].mxu0  ;;  %v4323_v31 = vrot.slane %v4309_v32, 1  ;;  %v4679_v1 = vadd.f32 %v10802_v9, %v10725_v48 }
 0x4ca   : > { %v4310_v42 = vsel %vm4303_vm3, %v4276_v47, -inf }
 0x4cb   : > { %v4338_v63 = vmax.f32 %v4334_v28, 0.0  ;;  %v10742_v52 = vmax.f32 %v4310_v42, %v4311_v14  ;;  %v10765_v33 = vmax.f32 %v4309_v32, %v4323_v31  ;;  %v10840_v36 = vmax.f32 %v4679_v1, 0.0  ;;  %v6121_v32 = vld [vmem:[%s11281_s5 + $0x238] sm:$0xff]  ;;  %v6143_v42 = vld [vmem:[%s11281_s5 + $0x150] sm:$0xff]  ;;  %v6150_v31 = vld [vmem:[%s11281_s5 + $0x240] sm:$0xff] }
 0x4cc   : > { %v6691_v27 = vpop.f32.mrb[6].mxu0  ;;  %v7137_v50 = vpack.c.bf16 %v6121_v32, %v6120_v58  ;;  %v7164_v28 = vpack.c.bf16 %v6142_v23, %v6141_v15  ;;  %v6174_v58 = vld [vmem:[%s11281_s5 + $0xb0] sm:$0xff]  ;;  %v6177_v15 = vld [vmem:[%s11281_s5 + $0x180] sm:$0xff]  ;;  %v6178_v23 = vld [vmem:[%s11281_s5 + $0x188] sm:$0xff] }
 0x4cd   : > { %v4286_v3 = vpop.f32.mrb[7].mxu0  ;;  %6709 = vmatmul.mubr.msk.f32.vlgmr.msra.gmra.mrb[8].mxu0 %vm4303_vm3, %v4338_v63  ;;  %v4314_v37 = vsel %vm4303_vm3, %v6691_v27, -inf  ;;  %v4335_v16 = vadd.f32 %v10765_v33, %v10736_v30  ;;  %v4324_v0 = vrot.slane %v10742_v52, 1  ;;  %v4697_v14 = vrot.slane %v10840_v36, 2 }
 0x4ce   : > { %v4313_v22 = vsel %vm4303_vm3, %v4286_v3, -inf  ;;  %7117 = vmatpush3.bf16.msra.mxu0 %v7116_v6  ;;  %6727 = vmatprep.mubr.msk.f32.mxu0 %vm7756_vm2, %v11835_v17  ;;  %v6144_v6 = vld [vmem:[%s11281_s5 + $0x158] sm:$0xff]  ;;  %v4680_v27 = vadd.f32 %v10802_v9, %v10765_v33  ;;  %v6147_v3 = vld [vmem:[%s11281_s5 + $0x170] sm:$0xff]  ;;  %v6154_v33 = vld [vmem:[%s11281_s5 + $0x260] sm:$0xff] }
 0x4cf   : > { %v4315_v39 = vmax.f32 %v4313_v22, %v4314_v37  ;;  %7118 = vmatprep.subr.bf16.mxu0 %v7755_v19  ;;  %v4339_v10 = vmax.f32 %v4335_v16, 0.0  ;;  %v4332_v48 = vmax.f32 %v10742_v52, %v4324_v0  ;;  %v7167_v63 = vpack.c.bf16 %v6144_v6, %v6143_v42  ;;  %v6148_v37 = vld [vmem:[%s11281_s5 + $0x178] sm:$0xff]  ;;  %v6159_v16 = vld [vmem:[%s11281_s5 + $0x340] sm:$0xff]  ;;  %v6170_v0 = vld [vmem:[%s11281_s5 + $0x90] sm:$0xff] }
 0x4d0   : > { %v7173_v22 = vpack.c.bf16 %v6148_v37, %v6147_v3  ;;  %v7182_v18 = vpack.c.bf16 %v6155_v11, %v6154_v33  ;;  %v7203_v25 = vpack.c.bf16 %v6171_v55, %v6170_v0  ;;  %v6181_v6 = vld [vmem:[%s11281_s5 + $0x1a0] sm:$0xff]  ;;  %v6187_v3 = vld [vmem:[%s11281_s5 + $0x288] sm:$0xff]  ;;  %v6193_v33 = vld [vmem:[%s11281_s5 + $0x2b8] sm:$0xff] }
 0x4d1   : > { %v4325_v61 = vrot.slane %v4315_v39, 1  ;;  %v4336_v47 = vadd.f32 %v4332_v48, %v10736_v30  ;;  %v4681_v7 = vadd.f32 %v10802_v9, %v4332_v48  ;;  %v6175_v48 = vld [vmem:[%s11281_s5 + $0xb8] sm:$0xff]  ;;  %v6201_v55 = vld [vmem:[%s11281_s5 + $0x3b0] sm:$0xff] }
 0x4d2   : > { %7120 = vmatpush3.bf16.msra.mxu0 %v7119_v20  ;;  %v10887_v20 = vmax.f32 %v4680_v27, 0.0  ;;  %v7209_v32 = vpack.c.bf16 %v6175_v48, %v6174_v58  ;;  %v6186_v27 = vld [vmem:[%s11281_s5 + $0x280] sm:$0xff] }
 0x4d3   : > { %v10767_v54 = vmax.f32 %v4315_v39, %v4325_v61  ;;  %7121 = vmatprep.subr.bf16.mxu0 %v7755_v19  ;;  %v4340_v52 = vmax.f32 %v4336_v47, 0.0  ;;  %v6151_v39 = vld [vmem:[%s11281_s5 + $0x248] sm:$0xff]  ;;  %v6152_v61 = vld [vmem:[%s11281_s5 + $0x250] sm:$0xff]  ;;  %v10922_v34 = vmax.f32 %v4681_v7, 0.0  ;;  %v6180_v47 = vld [vmem:[%s11281_s5 + $0x198] sm:$0xff]  ;;  %v7224_v37 = vpack.c.bf16 %v6187_v3, %v6186_v27 }
 0x4d4   : > { %v7176_v49 = vpack.c.bf16 %v6151_v39, %v6150_v31  ;;  %v4781_v2 = vrot.slane %v10887_v20, 2  ;;  %v6188_v31 = vld [vmem:[%s11281_s5 + $0x290] sm:$0xff]  ;;  %v6189_v39 = vld [vmem:[%s11281_s5 + $0x298] sm:$0xff]  ;;  %v6204_v48 = vld [vmem:[%s11281_s5 + $0xc0] sm:$0xff] }
 0x4d5   : > { %v4337_v13 = vadd.f32 %v10767_v54, %v10736_v30  ;;  %v6145_v30 = vld [vmem:[%s11281_s5 + $0x160] sm:$0xff]  ;;  %v4865_v56 = vrot.slane %v10922_v34, 2  ;;  %v4682_v41 = vadd.f32 %v10802_v9, %v10767_v54  ;;  %v6169_v9 = vld [vmem:[%s11281_s5 + $0x88] sm:$0xff]  ;;  %v6211_v27 = vld [vmem:[%s11281_s5 + $0xf8] sm:$0xff] }
 0x4d6   : > { %7123 = vmatpush3.bf16.msra.mxu0 %v7122_v4  ;;  %v7170_v26 = vpack.c.bf16 %v6146_v44, %v6145_v30  ;;  %v6153_v4 = vld [vmem:[%s11281_s5 + $0x258] sm:$0xff]  ;;  %v6168_v54 = vld [vmem:[%s11281_s5 + $0x80] sm:$0xff]  ;;  %v6183_v30 = vld [vmem:[%s11281_s5 + $0x1b0] sm:$0xff] }
 0x4d7   : > { %v4341_v35 = vmax.f32 %v4337_v13, 0.0  ;;  %7124 = vmatprep.subr.bf16.mxu0 %v7755_v19  ;;  %v7179_v40 = vpack.c.bf16 %v6153_v4, %v6152_v61  ;;  %v6156_v13 = vld [vmem:[%s11281_s5 + $0x270] sm:$0xff]  ;;  %v7200_v45 = vpack.c.bf16 %v6169_v9, %v6168_v54  ;;  %v6184_v44 = vld [vmem:[%s11281_s5 + $0x1b8] sm:$0xff]  ;;  %v6191_v61 = vld [vmem:[%s11281_s5 + $0x2a8] sm:$0xff] }
 0x4d8   : > { %v5688_v11 = vld [vmem:[#allocation8] sm:$0xff]  ;;  %v5690_v7 = vld [vmem:[#allocation8 + $0x10] sm:$0xff] }
 0x4d9   : > { %6766 = vmatmul.mubr.msk.f32.vlgmr.msra.gmra.mrb[0].mxu1 %vm4303_vm3, %v4341_v35  ;;  %v6160_v35 = vld [vmem:[%s11281_s5 + $0x348] sm:$0xff] }
 0x4da   : > { %7126 = vmatpush3.bf16.msra.mxu0 %v7125_v62  ;;  %7153 = vmatpush3.bf16.msra.mxu1 %v7152_v24  ;;  %v6157_v62 = vld [vmem:[%s11281_s5 + $0x278] sm:$0xff]  ;;  %v7188_v5 = vpack.c.bf16 %v6160_v35, %v6159_v16  ;;  %v6195_v16 = vld [vmem:[%s11281_s5 + $0x380] sm:$0xff]  ;;  %v6196_v35 = vld [vmem:[%s11281_s5 + $0x388] sm:$0xff] }
 0x4db   : > { %7127 = vmatprep.subr.bf16.mxu0 %v7755_v19  ;;  %7154 = vmatprep.subr.bf16.mxu1 %v7755_v19  ;;  %v7185_v24 = vpack.c.bf16 %v6157_v62, %v6156_v13  ;;  %v6200_v54 = vld [vmem:[%s11281_s5 + $0x3a8] sm:$0xff] }
 0x4dc   : > { %6784 = vmatprep.mubr.msk.f32.mxu1 %vm7756_vm2, %v11835_v17 }
 0x4dd   : > { %6728 = vmatmul.mubr.msk.f32.vlgmr.msra.gmra.mrb[8].mxu0 %vm4303_vm3, %v4339_v10  ;;  %v7194_v10 = vpack.c.bf16 %v6164_v21, %v6163_v43  ;;  %v6197_v43 = vld [vmem:[%s11281_s5 + $0x390] sm:$0xff]  ;;  %v6198_v21 = vld [vmem:[%s11281_s5 + $0x398] sm:$0xff] }
 0x4de   : > { %7129 = vmatpush3.bf16.msra.mxu0 %v7128_v51  ;;  %7156 = vmatpush3.bf16.msra.mxu1 %v7155_v12  ;;  %v6162_v51 = vld [vmem:[%s11281_s5 + $0x358] sm:$0xff] }
 0x4df   : > { %7130 = vmatprep.subr.bf16.mxu0 %v7755_v19  ;;  %7157 = vmatprep.subr.bf16.mxu1 %v7755_v19  ;;  %v7191_v12 = vpack.c.bf16 %v6162_v51, %v6161_v29  ;;  %v5693_v29 = vld [vmem:[#allocation8 + $0x28] sm:$0xff]  ;;  %v7236_v51 = vpack.c.bf16 %v6196_v35, %v6195_v16  ;;  %v6224_v16 = vld [vmem:[%s11281_s5 + $0x2d0] sm:$0xff]  ;;  %v6225_v35 = vld [vmem:[%s11281_s5 + $0x2d8] sm:$0xff] }
 0x4e0   : > { %6746 = vmatprep.mubr.msk.f32.mxu0 %vm7756_vm2, %v11835_v17 }
 0x4e2   : > { %7132 = vmatpush3.bf16.msra.mxu0 %v7131_v8  ;;  %7159 = vmatpush3.bf16.msra.mxu1 %v7158_v59  ;;  %v7197_v8 = vpack.c.bf16 %v6166_v53, %v6165_v46  ;;  %v10958_v59 = vmax.f32 %v4682_v41, 0.0  ;;  %v5694_v41 = vld [vmem:[#allocation8 + $0x30] sm:$0xff]  ;;  %v5695_v46 = vld [vmem:[#allocation8 + $0x38] sm:$0xff]  ;;  %v7239_v53 = vpack.c.bf16 %v6198_v21, %v6197_v43  ;;  %v6231_v21 = vld [vmem:[%s11281_s5 + $0x3c0] sm:$0xff] }
 0x4e3   : > { %7133 = vmatprep.subr.bf16.mxu0 %v7755_v19  ;;  %7160 = vmatprep.subr.bf16.mxu1 %v7755_v19  ;;  %v7305_v9 = vpack.c.bf16 %v5695_v46, %v5694_v41  ;;  %v5530_v46 = vrot.slane %v10922_v34, 6 }
 0x4e4   : > { %v4949_v1 = vrot.slane %v10958_v59, 2 }
 0x4e6   : > { %7135 = vmatpush3.bf16.msra.mxu0 %v7134_v60  ;;  %7162 = vmatpush3.bf16.msra.mxu1 %v7161_v57  ;;  %v6173_v60 = vld [vmem:[%s11281_s5 + $0xa8] sm:$0xff] }
 0x4e7   : > { %7136 = vmatprep.subr.bf16.mxu0 %v7755_v19  ;;  %7163 = vmatprep.subr.bf16.mxu1 %v7755_v19  ;;  %v7206_v57 = vpack.c.bf16 %v6173_v60, %v6172_v38  ;;  %v5698_v60 = vld [vmem:[#allocation8 + $0x50] sm:$0xff] }
 0x4e9   : > { %6785 = vmatmul.mubr.msk.f32.vlgmr.msra.gmra.mrb[0].mxu1 %vm4303_vm3, %v4697_v14  ;;  %v6179_v14 = vld [vmem:[%s11281_s5 + $0x190] sm:$0xff] }
 0x4ea   : > { %7138 = vmatpush3.bf16.msra.mxu0 %v7137_v50  ;;  %7165 = vmatpush3.bf16.msra.mxu1 %v7164_v28  ;;  %v7212_v50 = vpack.c.bf16 %v6178_v23, %v6177_v15  ;;  %v5032_v28 = vrot.slane %v10840_v36, 4  ;;  %v7215_v42 = vpack.c.bf16 %v6180_v47, %v6179_v14  ;;  %v5700_v23 = vld [vmem:[#allocation8 + $0x60] sm:$0xff]  ;;  %v5281_v14 = vrot.slane %v10958_v59, 4  ;;  %v6206_v47 = vld [vmem:[%s11281_s5 + $0xd0] sm:$0xff] }
 0x4eb   : > { %7166 = vmatprep.subr.bf16.mxu1 %v7755_v19  ;;  %6803 = vmatprep.mubr.msk.f32.mxu1 %vm7756_vm2, %v11835_v17 }
 0x4ec   : > { %7295 = vmatprep.subr.bf16.mxu0 %v7755_v19 }
 0x4ed   : > { %6747 = vmatmul.mubr.msk.f32.vlgmr.msra.gmra.mrb[8].mxu0 %vm4303_vm3, %v4340_v52 }
 0x4ee   : > { %7168 = vmatpush3.bf16.msra.mxu1 %v7167_v63  ;;  %7028 = vmatprep.mubr.msk.f32.mxu0 %vm7756_vm2, %v11835_v17  ;;  %v6182_v63 = vld [vmem:[%s11281_s5 + $0x1a8] sm:$0xff] }
 0x4ef   : > { %7169 = vmatprep.subr.bf16.mxu1 %v7755_v19  ;;  %v7218_v52 = vpack.c.bf16 %v6182_v63, %v6181_v6 }
 0x4f2   : > { %7171 = vmatpush3.bf16.msra.mxu1 %v7170_v26  ;;  %v7221_v26 = vpack.c.bf16 %v6184_v44, %v6183_v30  ;;  %v6209_v30 = vld [vmem:[%s11281_s5 + $0xe8] sm:$0xff] }
 0x4f3   : > { %7172 = vmatprep.subr.bf16.mxu1 %v7755_v19 }
 0x4f6   : > { %7174 = vmatpush3.bf16.msra.mxu1 %v7173_v22  ;;  %v5115_v22 = vrot.slane %v10887_v20, 4 }
 0x4f7   : > { %7175 = vmatprep.subr.bf16.mxu1 %v7755_v19 }
 0x4f9   : > { %6804 = vmatmul.mubr.msk.f32.vlgmr.msra.gmra.mrb[0].mxu1 %vm4303_vm3, %v4781_v2  ;;  %v6190_v2 = vld [vmem:[%s11281_s5 + $0x2a0] sm:$0xff] }
 0x4fa   : > { %7177 = vmatpush3.bf16.msra.mxu1 %v7176_v49  ;;  %6822 = vmatprep.mubr.msk.f32.mxu1 %vm7756_vm2, %v11835_v17  ;;  %v7227_v49 = vpack.c.bf16 %v6189_v39, %v6188_v31  ;;  %v7230_v4 = vpack.c.bf16 %v6191_v61, %v6190_v2  ;;  %v5364_v39 = vrot.slane %v10840_v36, 6  ;;  %v6216_v2 = vld [vmem:[%s11281_s5 + $0x1d8] sm:$0xff]  ;;  %v6217_v36 = vld [vmem:[%s11281_s5 + $0x1e0] sm:$0xff] }
 0x4fb   : > { %7178 = vmatprep.subr.bf16.mxu1 %v7755_v19 }
 0x4fe   : > { %7180 = vmatpush3.bf16.msra.mxu1 %v7179_v40  ;;  %v6192_v40 = vld [vmem:[%s11281_s5 + $0x2b0] sm:$0xff] }
 0x4ff   : > { %7181 = vmatprep.subr.bf16.mxu1 %v7755_v19  ;;  %v7233_v13 = vpack.c.bf16 %v6193_v33, %v6192_v40  ;;  %v6219_v33 = vld [vmem:[%s11281_s5 + $0x1f0] sm:$0xff] }
 0x502   : > { %7183 = vmatpush3.bf16.msra.mxu1 %v7182_v18  ;;  %v5689_v18 = vld [vmem:[#allocation8 + $0x8] sm:$0xff] }
 0x503   : > { %7184 = vmatprep.subr.bf16.mxu1 %v7755_v19  ;;  %v7296_v62 = vpack.c.bf16 %v5689_v18, %v5688_v11  ;;  %v6220_v11 = vld [vmem:[%s11281_s5 + $0x1f8] sm:$0xff] }
 0x504   : > { %v7269_v18 = vpack.c.bf16 %v6220_v11, %v6219_v33 }
 0x505   : > { %7297 = vmatpush3.bf16.msra.mxu0 %v7296_v62 }
 0x506   : > { %7186 = vmatpush3.bf16.msra.mxu1 %v7185_v24  ;;  %v5691_v24 = vld [vmem:[#allocation8 + $0x18] sm:$0xff]  ;;  %7298 = vmatprep.subr.bf16.mxu0 %v7755_v19 }
 0x507   : > { %7187 = vmatprep.subr.bf16.mxu1 %v7755_v19 }
 0x509   : > { %6823 = vmatmul.mubr.msk.f32.vlgmr.msra.gmra.mrb[0].mxu1 %vm4303_vm3, %v4865_v56  ;;  %v5692_v56 = vld [vmem:[#allocation8 + $0x20] sm:$0xff] }
 0x50a   : > { %7189 = vmatpush3.bf16.msra.mxu1 %v7188_v5  ;;  %6841 = vmatprep.mubr.msk.f32.mxu1 %vm7756_vm2, %v11835_v17  ;;  %v7299_v5 = vpack.c.bf16 %v5691_v24, %v5690_v7  ;;  %v6222_v7 = vld [vmem:[%s11281_s5 + $0x2c0] sm:$0xff]  ;;  %v5447_v24 = vrot.slane %v10887_v20, 6 }
 0x50b   : > { %7190 = vmatprep.subr.bf16.mxu1 %v7755_v19  ;;  %v6226_v20 = vld [vmem:[%s11281_s5 + $0x2e0] sm:$0xff] }
 0x50c   : > { %7300 = vmatpush3.bf16.msra.mxu0 %v7299_v5  ;;  %v7275_v5 = vpack.c.bf16 %v6225_v35, %v6224_v16 }
 0x50d   : > { %7301 = vmatprep.subr.bf16.mxu0 %v7755_v19 }
 0x50e   : > { %7192 = vmatpush3.bf16.msra.mxu1 %v7191_v12  ;;  %v5198_v12 = vrot.slane %v10922_v34, 4  ;;  %v6235_v34 = vld [vmem:[%s11281_s5 + $0x3e0] sm:$0xff] }
 0x50f   : > { %7193 = vmatprep.subr.bf16.mxu1 %v7755_v19 }
 0x512   : > { %7195 = vmatpush3.bf16.msra.mxu1 %v7194_v10  ;;  %v7302_v10 = vpack.c.bf16 %v5693_v29, %v5692_v56  ;;  %v6227_v56 = vld [vmem:[%s11281_s5 + $0x2e8] sm:$0xff] }
 0x513   : > { %7196 = vmatprep.subr.bf16.mxu1 %v7755_v19  ;;  %v7278_v29 = vpack.c.bf16 %v6227_v56, %v6226_v20 }
 0x514   : > { %7303 = vmatpush3.bf16.msra.mxu0 %v7302_v10  ;;  %v6232_v10 = vld [vmem:[%s11281_s5 + $0x3c8] sm:$0xff] }
 0x515   : > { %7304 = vmatprep.subr.bf16.mxu0 %v7755_v19  ;;  %v7284_v41 = vpack.c.bf16 %v6232_v10, %v6231_v21 }
 0x516   : > { %7198 = vmatpush3.bf16.msra.mxu1 %v7197_v8  ;;  %v6199_v8 = vld [vmem:[%s11281_s5 + $0x3a0] sm:$0xff] }
 0x517   : > { %7199 = vmatprep.subr.bf16.mxu1 %v7755_v19  ;;  %v7242_v0 = vpack.c.bf16 %v6200_v54, %v6199_v8  ;;  %v6234_v8 = vld [vmem:[%s11281_s5 + $0x3d8] sm:$0xff] }
 0x518   : > { %7306 = vmatpush3.bf16.msra.mxu0 %v7305_v9  ;;  %v6236_v9 = vld [vmem:[%s11281_s5 + $0x3e8] sm:$0xff] }
 0x519   : > { %6842 = vmatmul.mubr.msk.f32.vlgmr.msra.gmra.mrb[0].mxu1 %vm4303_vm3, %v4949_v1  ;;  %v5697_v1 = vld [vmem:[#allocation8 + $0x48] sm:$0xff]  ;;  %7307 = vmatprep.subr.bf16.mxu0 %v7755_v19 }
 0x51a   : > { %7201 = vmatpush3.bf16.msra.mxu1 %v7200_v45  ;;  %6860 = vmatprep.mubr.msk.f32.mxu1 %vm7756_vm2, %v11835_v17  ;;  %v5696_v45 = vld [vmem:[#allocation8 + $0x40] sm:$0xff] }
 0x51b   : > { %7202 = vmatprep.subr.bf16.mxu1 %v7755_v19  ;;  %v7308_v38 = vpack.c.bf16 %v5697_v1, %v5696_v45  ;;  %v7290_v45 = vpack.c.bf16 %v6236_v9, %v6235_v34  ;;  %v6237_v1 = vld [vmem:[%s11281_s5 + $0x3f0] sm:$0xff] }
 0x51d   : > { %7309 = vmatpush3.bf16.msra.mxu0 %v7308_v38 }
 0x51e   : > { %7204 = vmatpush3.bf16.msra.mxu1 %v7203_v25  ;;  %v6202_v25 = vld [vmem:[%s11281_s5 + $0x3b8] sm:$0xff]  ;;  %7310 = vmatprep.subr.bf16.mxu0 %v7755_v19 }
 0x51f   : > { %7205 = vmatprep.subr.bf16.mxu1 %v7755_v19  ;;  %v7245_v58 = vpack.c.bf16 %v6202_v25, %v6201_v55  ;;  %v5613_v55 = vrot.slane %v10958_v59, 6 }
 0x522   : > { %7207 = vmatpush3.bf16.msra.mxu1 %v7206_v57  ;;  %v5699_v57 = vld [vmem:[#allocation8 + $0x58] sm:$0xff] }
 0x523   : > { %7208 = vmatprep.subr.bf16.mxu1 %v7755_v19  ;;  %v7311_v15 = vpack.c.bf16 %v5699_v57, %v5698_v60  ;;  %v5702_v60 = vld [vmem:[#allocation8 + $0x70] sm:$0xff]  ;;  %v5703_v57 = vld [vmem:[#allocation8 + $0x78] sm:$0xff] }
 0x525   : > { %7312 = vmatpush3.bf16.msra.mxu0 %v7311_v15 }
 0x526   : > { %7210 = vmatpush3.bf16.msra.mxu1 %v7209_v32  ;;  %v6205_v32 = vld [vmem:[%s11281_s5 + $0xc8] sm:$0xff]  ;;  %7313 = vmatprep.subr.bf16.mxu0 %v7755_v19 }
 0x527   : > { %7211 = vmatprep.subr.bf16.mxu1 %v7755_v19 }
 0x529   : > { %6861 = vmatmul.mubr.msk.f32.vlgmr.msra.gmra.mrb[0].mxu1 %vm4303_vm3, %v5032_v28  ;;  %v7248_v28 = vpack.c.bf16 %v6205_v32, %v6204_v48  ;;  %v4317_v48 = vld [vmem:[#allocation6] sm:$0x1] }
 0x52a   : > { %7213 = vmatpush3.bf16.msra.mxu1 %v7212_v50  ;;  %6879 = vmatprep.mubr.msk.f32.mxu1 %vm7756_vm2, %v11835_v17  ;;  %v5701_v50 = vld [vmem:[#allocation8 + $0x68] sm:$0xff] }
 0x52b   : > { %7214 = vmatprep.subr.bf16.mxu1 %v7755_v19  ;;  %v7314_v6 = vpack.c.bf16 %v5701_v50, %v5700_v23 }
 0x52d   : > { %7315 = vmatpush3.bf16.msra.mxu0 %v7314_v6 }
 0x52e   : > { %7216 = vmatpush3.bf16.msra.mxu1 %v7215_v42  ;;  %v6207_v42 = vld [vmem:[%s11281_s5 + $0xd8] sm:$0xff]  ;;  %7316 = vmatprep.subr.bf16.mxu0 %v7755_v19 }
 0x52f   : > { %7217 = vmatprep.subr.bf16.mxu1 %v7755_v19  ;;  %v7251_v63 = vpack.c.bf16 %v6207_v42, %v6206_v47 }
 0x532   : > { %7219 = vmatpush3.bf16.msra.mxu1 %v7218_v52  ;;  %v6208_v52 = vld [vmem:[%s11281_s5 + $0xe0] sm:$0xff] }
 0x533   : > { %7220 = vmatprep.subr.bf16.mxu1 %v7755_v19  ;;  %v7254_v44 = vpack.c.bf16 %v6209_v30, %v6208_v52 }
 0x536   : > { %7222 = vmatpush3.bf16.msra.mxu1 %v7221_v26  ;;  %v6210_v26 = vld [vmem:[%s11281_s5 + $0xf0] sm:$0xff] }
 0x537   : > { %7223 = vmatprep.subr.bf16.mxu1 %v7755_v19  ;;  %v7257_v3 = vpack.c.bf16 %v6211_v27, %v6210_v26 }
 0x539   : > { %6880 = vmatmul.mubr.msk.f32.vlgmr.msra.gmra.mrb[0].mxu1 %vm4303_vm3, %v5115_v22  ;;  %v6214_v22 = vld [vmem:[%s11281_s5 + $0x1c8] sm:$0xff] }
 0x53a   : > { %7225 = vmatpush3.bf16.msra.mxu1 %v7224_v37  ;;  %6898 = vmatprep.mubr.msk.f32.mxu1 %vm7756_vm2, %v11835_v17  ;;  %v6213_v37 = vld [vmem:[%s11281_s5 + $0x1c0] sm:$0xff] }
 0x53b   : > { %7226 = vmatprep.subr.bf16.mxu1 %v7755_v19  ;;  %v7260_v31 = vpack.c.bf16 %v6214_v22, %v6213_v37 }
 0x53e   : > { %7228 = vmatpush3.bf16.msra.mxu1 %v7227_v49  ;;  %v6215_v49 = vld [vmem:[%s11281_s5 + $0x1d0] sm:$0xff] }
 0x53f   : > { %7229 = vmatprep.subr.bf16.mxu1 %v7755_v19  ;;  %v7263_v61 = vpack.c.bf16 %v6216_v2, %v6215_v49 }
 0x542   : > { %7231 = vmatpush3.bf16.msra.mxu1 %v7230_v4  ;;  %v6218_v4 = vld [vmem:[%s11281_s5 + $0x1e8] sm:$0xff] }
 0x543   : > { %7232 = vmatprep.subr.bf16.mxu1 %v7755_v19  ;;  %v7266_v40 = vpack.c.bf16 %v6218_v4, %v6217_v36 }
 0x546   : > { %7234 = vmatpush3.bf16.msra.mxu1 %v7233_v13  ;;  %v6223_v13 = vld [vmem:[%s11281_s5 + $0x2c8] sm:$0xff] }
 0x547   : > { %7235 = vmatprep.subr.bf16.mxu1 %v7755_v19  ;;  %v7272_v62 = vpack.c.bf16 %v6223_v13, %v6222_v7 }
 0x549   : > { %6899 = vmatmul.mubr.msk.f32.vlgmr.msra.gmra.mrb[0].mxu1 %vm4303_vm3, %v5198_v12  ;;  %v6229_v12 = vld [vmem:[%s11281_s5 + $0x2f8] sm:$0xff] }
 0x54a   : > { %7237 = vmatpush3.bf16.msra.mxu1 %v7236_v51  ;;  %6917 = vmatprep.mubr.msk.f32.mxu1 %vm7756_vm2, %v11835_v17  ;;  %v6228_v51 = vld [vmem:[%s11281_s5 + $0x2f0] sm:$0xff] }
 0x54b   : > { %7238 = vmatprep.subr.bf16.mxu1 %v7755_v19  ;;  %v7281_v43 = vpack.c.bf16 %v6229_v12, %v6228_v51 }
 0x54e   : > { %7240 = vmatpush3.bf16.msra.mxu1 %v7239_v53  ;;  %v6233_v53 = vld [vmem:[%s11281_s5 + $0x3d0] sm:$0xff] }
 0x54f   : > { %7241 = vmatprep.subr.bf16.mxu1 %v7755_v19  ;;  %v7287_v54 = vpack.c.bf16 %v6234_v8, %v6233_v53 }
 0x552   : > { %7243 = vmatpush3.bf16.msra.mxu1 %v7242_v0 }
 0x553   : > { %7244 = vmatprep.subr.bf16.mxu1 %v7755_v19 }
 0x556   : > { %7246 = vmatpush3.bf16.msra.mxu1 %v7245_v58  ;;  %v7317_v58 = vpack.c.bf16 %v5703_v57, %v5702_v60 }
 0x557   : > { %7247 = vmatprep.subr.bf16.mxu1 %v7755_v19 }
 0x558   : > { %7318 = vmatpush3.bf16.msra.mxu0 %v7317_v58 }
 0x559   : > { %6918 = vmatmul.mubr.msk.f32.vlgmr.msra.gmra.mrb[0].mxu1 %vm4303_vm3, %v5281_v14 }
 0x55a   : > { %7249 = vmatpush3.bf16.msra.mxu1 %v7248_v28  ;;  %6936 = vmatprep.mubr.msk.f32.mxu1 %vm7756_vm2, %v11835_v17 }
 0x55b   : > { %7250 = vmatprep.subr.bf16.mxu1 %v7755_v19 }
 0x55e   : > { %7252 = vmatpush3.bf16.msra.mxu1 %v7251_v63 }
 0x55f   : > { %7253 = vmatprep.subr.bf16.mxu1 %v7755_v19 }
 0x562   : > { %7255 = vmatpush3.bf16.msra.mxu1 %v7254_v44 }
 0x563   : > { %7256 = vmatprep.subr.bf16.mxu1 %v7755_v19 }
 0x566   : > { %7258 = vmatpush3.bf16.msra.mxu1 %v7257_v3 }
 0x567   : > { %7259 = vmatprep.subr.bf16.mxu1 %v7755_v19 }
 0x569   : > { %6937 = vmatmul.mubr.msk.f32.vlgmr.msra.gmra.mrb[0].mxu1 %vm4303_vm3, %v5364_v39 }
 0x56a   : > { %7261 = vmatpush3.bf16.msra.mxu1 %v7260_v31  ;;  %6955 = vmatprep.mubr.msk.f32.mxu1 %vm7756_vm2, %v11835_v17 }
 0x56b   : > { %7262 = vmatprep.subr.bf16.mxu1 %v7755_v19 }
 0x56e   : > { %7264 = vmatpush3.bf16.msra.mxu1 %v7263_v61 }
 0x56f   : > { %7265 = vmatprep.subr.bf16.mxu1 %v7755_v19 }
 0x572   : > { %7267 = vmatpush3.bf16.msra.mxu1 %v7266_v40 }
 0x573   : > { %7268 = vmatprep.subr.bf16.mxu1 %v7755_v19 }
 0x576   : > { %7270 = vmatpush3.bf16.msra.mxu1 %v7269_v18 }
 0x577   : > { %7271 = vmatprep.subr.bf16.mxu1 %v7755_v19 }
 0x579   : > { %6956 = vmatmul.mubr.msk.f32.vlgmr.msra.gmra.mrb[0].mxu1 %vm4303_vm3, %v5447_v24 }
 0x57a   : > { %7273 = vmatpush3.bf16.msra.mxu1 %v7272_v62  ;;  %6974 = vmatprep.mubr.msk.f32.mxu1 %vm7756_vm2, %v11835_v17 }
 0x57b   : > { %7274 = vmatprep.subr.bf16.mxu1 %v7755_v19 }
 0x57e   : > { %7276 = vmatpush3.bf16.msra.mxu1 %v7275_v5 }
 0x57f   : > { %7277 = vmatprep.subr.bf16.mxu1 %v7755_v19 }
 0x582   : > { %7279 = vmatpush3.bf16.msra.mxu1 %v7278_v29 }
 0x583   : > { %7280 = vmatprep.subr.bf16.mxu1 %v7755_v19 }
 0x586   : > { %7282 = vmatpush3.bf16.msra.mxu1 %v7281_v43 }
 0x587   : > { %7283 = vmatprep.subr.bf16.mxu1 %v7755_v19 }
 0x589   : > { %6975 = vmatmul.mubr.msk.f32.vlgmr.msra.gmra.mrb[0].mxu1 %vm4303_vm3, %v5530_v46 }
 0x58a   : > { %7285 = vmatpush3.bf16.msra.mxu1 %v7284_v41  ;;  %6993 = vmatprep.mubr.msk.f32.mxu1 %vm7756_vm2, %v11835_v17  ;;  %v6238_v17 = vld [vmem:[%s11281_s5 + $0x3f8] sm:$0xff] }
 0x58b   : > { %7286 = vmatprep.subr.bf16.mxu1 %v7755_v19  ;;  %v7293_v0 = vpack.c.bf16 %v6238_v17, %v6237_v1 }
 0x58e   : > { %7288 = vmatpush3.bf16.msra.mxu1 %v7287_v54 }
 0x58f   : > { %7289 = vmatprep.subr.bf16.mxu1 %v7755_v19 }
 0x592   : > { %7291 = vmatpush3.bf16.msra.mxu1 %v7290_v45 }
 0x593   : > { %7292 = vmatprep.subr.bf16.mxu1 %v7755_v19  ;;  %v5704_v19 = vld [vmem:[%s11284_s8] sm:$0x1] }
 0x596   : > { %7294 = vmatpush3.bf16.msra.mxu1 %v7293_v0 }
 0x599   : > { %6994 = vmatmul.mubr.msk.f32.vlgmr.msra.gmra.mrb[0].mxu1 %vm4303_vm3, %v5613_v55 }
 0x5c0   : > { %v4585_v25 = vpop.f32.mrb[8].mxu0 }
 0x5c1   : > { %v6748_v38 = vpop.f32.mrb[9].mxu0  ;;  %v7319_v32 = vadd.f32 %v4585_v25, %v4317_v48 }
 0x66c   : > { %v5682_v15 = vpop.f32.mrb[0].mxu1 }
 0x66d   : > { %v7320_v23 = vadd.f32 %v7319_v32, %v5682_v15  ;;  %v6995_v50 = vpop.f32.mrb[1].mxu1 }
 0x66f   : > { %v5687_v28 = vmax.f32 %v7320_v23, 0.0 }
 0x671   : > { %7029 = vmatmul.mubr.f32.vlgmr.msra.gmra.mrb[10].mxu0 %v5687_v28 }
 0x744   : > { %v5771_v59 = vpop.f32.mrb[10].mxu0 }
 0x745   : > { %v5772_v14 = vadd.f32 %v5771_v59, %v5704_v19  ;;  %v7030_v47 = vpop.f32.mrb[11].mxu0 }
 0x747   : > { %5775 = vst [vmem:[%s369_s16] sm:$0x1] %v5772_v14 }
 0x748   : > { %7688 = shalt.err (!%p7685_p11)
}
 0x749   : > { %s7689_s6 = scalar_lea.hbm %s11234_s24, 16  ;;  %s7693_s28 = scalar_lea.hbm %s11285_s9, 32 }
 0x74a   : > { %p7690_p13 = scmp.ne.s32.totalorder %s11234_s24, %s7689_s6  ;;  %p7694_p6 = scmp.lt.u32.totalorder %s11234_s24, %s11285_s9 }
 0x74b   : > { %p7695_p5 = scmp.lt.u32.totalorder %s7693_s28, %s7689_s6  ;;  %p7697_p9 = scmp.lt.u32.totalorder %s7689_s6, %s11234_s24 }
 0x74c   : > { %p7691_p1 = pnand %p7690_p13, %p11837_p10 }
 0x74d   : > { %p7696_p12 = por %p7695_p5, %p7694_p6 }
 0x74e   : > { %p7692_p0 = pneg %p7691_p1 }
 0x74f   : > { %p7698_p2 = por %p7697_p9, %p7696_p12 }
 0x751   : > { %p7699_p3 = pnand %p7698_p2, %p7692_p0 }
 0x753   : > { %7702 = shalt.err (!%p7699_p3)
}
 0x754   : > { %7426 = dma.vmem_to_hbm [thread:$0]  (%p11837_p10), %s11236_s27, 16, %s11234_s24, %s5777_s23  }
 0x755 PF: > { %p7448_p4 = scmp.ge.s32.totalorder %s7745_s12, 2  ;;  %s5801_s18 = sand.u32 1, %s7733_s30  }
 0x756   : > { %p11838_p7 = scmp.ne.s32.totalorder %s11449_s20, 0  ;;  %s5802_s16 = scalar_lea.sflag [#allocation5], %s5801_s18 }
 0x758   : > { %p7439_p8 = pnand %p7448_p4, %p11838_p7 }
 0x75a   : > { %7728 = dma.done.wait (!%p7439_p8), %s5802_s16, 16  }
 0x75b   : > { %7730 = vsyncadd (!%p7439_p8), %s5802_s16, 4294967280  ;;  %s11839_s12 = sld [smem:[#allocation14_spill]]  ;;  %s11840_s29 = sld [smem:[#allocation13_spill]] }
 0x75c   : > { %s11841_s11 = sld [smem:[#allocation15_spill]]  ;;  %s11842_s30 = smov %s7737_s10 }
 0x761   : > { %p21_p11 = scmp.ge.s32.totalorder %s11839_s12, 4   ;;  %s11843_s10 = smov %s11840_s29 }
 0x763   :  { %23 = sbr.rel (!%p21_p11) target bundleno = 7 (0x7), region = 136 }
 0x76a   :  { %5806 = vsyncpa [#allocation4], 1 }
 0x76b   :  { %5808 = vsyncpa [#allocation4 + $0x1], 1 }
 0x76c   :  { %5809 = vsyncpa [#allocation7], 1 }
 0x76d   :  { %5810 = vsyncpa [#allocation5], 1 }
 0x76e   :  { %5812 = vsyncpa [#allocation5 + $0x1], 1 }

</bundles_post_ra>
